<compile_context>
chip_gen: v5e
topology: v5e:2x2
jax: 0.10.0
libtpu: 0.0.40
codegen_flags: <defaults>
</compile_context>

<pallas_src>
import functools

import jax
import jax.numpy as jnp
from jax import lax
from jax.experimental import pallas as pl
from jax.experimental.pallas import tpu as pltpu

LEAKY_SLOPE = 0.01
LN_EPS = 1e-5


def _leaky(x):
    return jnp.where(x >= 0, x, LEAKY_SLOPE * x)


def _layernorm(x, g, b):
    mu = jnp.mean(x, axis=-1, keepdims=True)
    var = jnp.mean((x - mu) ** 2, axis=-1, keepdims=True)
    return (x - mu) * lax.rsqrt(var + LN_EPS) * g + b


# ---------------------------------------------------------------------------
# Fused forward kernel: one grid step == Bt batch elements, end to end.
# ---------------------------------------------------------------------------
def fused_forward_kernel(d_ref, s_ref, pe_ref, ed_ref,
                         small_w_ref, small_b_ref,
                         wproj_ref, lvec_ref, fw1_ref, fb1_ref, fw2_ref,
                         w1p_ref, mlp_b_ref, mw2_ref, mw3_ref, mw4_ref,
                         out_ref,
                         *, nhead, attn_len, bt, seq_len, small_dims):
    f32 = jnp.float32
    M = ed_ref.shape[1]                # bt * Lp (batch folded into sublanes)
    D = ed_ref.shape[-1]
    cz = pe_ref.shape[-1]
    Lp = M // bt
    dh = D // nhead
    scale = 1.0 / (dh ** 0.5)

    def small_mlp(x, idx):
        d_in, d_hid, d_out = small_dims[idx]
        w1 = small_w_ref[2 * idx][0:d_in, 0:d_hid]
        b1 = small_b_ref[2 * idx:2 * idx + 1, 0:d_hid]
        w2 = small_w_ref[2 * idx + 1][0:d_hid, 0:d_out]
        b2 = small_b_ref[2 * idx + 1:2 * idx + 2, 0:d_out]
        hh = _leaky(jnp.dot(x, w1, preferred_element_type=f32) + b1)
        return jnp.dot(hh, w2, preferred_element_type=f32) + b2

    # --- DDG enlarger & seq-emb reducer (rows = (batch, token)) ---
    ad = small_mlp(d_ref[0], 0)                      # [M, cz]
    es = small_mlp(s_ref[0], 1) + pe_ref[0]          # [M, cz]

    # key-padding mask: tokens were padded seq_len -> Lp in the wrapper
    if Lp != seq_len:
        kmask = lax.broadcasted_iota(jnp.int32, (1, Lp, Lp), 2) < seq_len
    else:
        kmask = None

    # --- transformer encoder stack on emb_diff (batch folded into rows) ---
    x = ed_ref[0]                                    # [M, D]
    for li in range(attn_len):
        wp = wproj_ref[li]                           # [D, 4D] = [Wq|Wk|Wv|Wo]
        lv = lvec_ref[li]                            # [8, 4D] packed bias/LN rows
        wqkv, wo = wp[:, 0:3 * D], wp[:, 3 * D:4 * D]
        bqkv, bo = lv[0:1, 0:3 * D], lv[0:1, 3 * D:4 * D]
        g1, be1 = lv[1:2, 0:D], lv[2:3, 0:D]
        fb2 = lv[3:4, 0:D]
        g2, be2 = lv[4:5, 0:D], lv[5:6, 0:D]

        # fused QKV projection: one lane-dense [M,D]@[D,3D] MXU push
        qkv = jnp.dot(x, wqkv, preferred_element_type=f32) + bqkv   # [M, 3D]
        qkv3 = qkv.reshape(bt, Lp, 3 * D)            # aligned split (Lp % 8 == 0)

        heads_ctx = []
        for h in range(nhead):
            q = qkv3[:, :, h * dh:(h + 1) * dh]
            k = qkv3[:, :, D + h * dh:D + (h + 1) * dh]
            v = qkv3[:, :, 2 * D + h * dh:2 * D + (h + 1) * dh]
            s = jnp.einsum('ble,bme->blm', q, k, preferred_element_type=f32) * scale
            if kmask is not None:
                s = jnp.where(kmask, s, -1e30)
            s = s - jnp.max(s, axis=-1, keepdims=True)
            p = jnp.exp(s)
            p = p * pl.reciprocal(jnp.sum(p, axis=-1, keepdims=True), approx=True)
            heads_ctx.append(
                jnp.einsum('blm,bme->ble', p, v, preferred_element_type=f32))

        # concat heads along lanes -> [M, D]; single output projection matmul
        ctx = jnp.concatenate(heads_ctx, axis=-1).reshape(M, D)
        attn = jnp.dot(ctx, wo, preferred_element_type=f32) + bo

        # residual + LN, relu-FFN (bf16-stored weights, f32 math), residual + LN
        x1 = _layernorm(x + attn, g1, be1)
        fw1 = fw1_ref[li].astype(f32)
        fw2 = fw2_ref[li].astype(f32)
        ffh = jnp.maximum(jnp.dot(x1, fw1, preferred_element_type=f32) + fb1_ref[li], 0.0)
        ffo = jnp.dot(ffh, fw2, preferred_element_type=f32) + fb2
        x = _layernorm(x1 + ffo, g2, be2)

    ed = small_mlp(x, 2)                             # [M, cz]

    # --- score MLP: flatten+concat folded into pre-permuted w1p slab ---
    hid1 = w1p_ref.shape[-1]
    hid2 = mw2_ref.shape[-1]
    hid3 = mw3_ref.shape[-1]
    n_out = mw4_ref.shape[-1]
    m = jnp.concatenate([ad, es, ed], axis=1)        # [M, 3cz]
    m3 = m.reshape(bt, Lp, 3 * cz)
    w1p = w1p_ref[...].astype(f32)                   # [Lp, 3cz, hid1], zero on pad l
    acc = jnp.einsum('blc,lch->lbh', m3, w1p, preferred_element_type=f32)
    h0 = jnp.sum(acc, axis=0) + mlp_b_ref[0:1, 0:hid1]       # [bt, hid1]
    h1 = _leaky(h0)
    h2 = _leaky(jnp.dot(h1, mw2_ref[...], preferred_element_type=f32)
                + mlp_b_ref[1:2, 0:hid2])
    h3 = _leaky(jnp.dot(h2, mw3_ref[...], preferred_element_type=f32)
                + mlp_b_ref[2:3, 0:hid3])
    res = jnp.dot(h3, mw4_ref[...], preferred_element_type=f32) + mlp_b_ref[3:4, 0:n_out]
    out_ref[0] = res.astype(out_ref.dtype)


# ---------------------------------------------------------------------------
# Wrapper: weight packing, BlockSpecs and the single pallas_call
# ---------------------------------------------------------------------------
def forward(params, pid, pos, all_deltas_in, pos_enc, emb_sector, emb_diff_in,
            *, cz, heads, batch_tile=None):
    del pid, pos                                     # unused by the PyTorch forward too
    B, L, _ = all_deltas_in.shape
    D = emb_diff_in.shape[-1]
    A = len(params["encoder_layers"])
    Lp = ((L + 7) // 8) * 8                          # pad tokens to a full sublane tile

    # batch tiling: keep >=2 "parallel" grid steps so v7x's two TCs both work
    if batch_tile is None:
        batch_tile = B // 2 if (B >= 2 and B % 2 == 0) else B
    assert B % batch_tile == 0
    bt = batch_tile
    steps = B // bt

    def prep(a):                                     # [B, L, F] -> [steps, bt*Lp, F]
        a = jnp.pad(a, ((0, 0), (0, Lp - L), (0, 0)))
        return a.reshape(steps, bt * Lp, a.shape[-1])

    deltas20 = all_deltas_in[:, :, :20]              # DDG-only (NoDDE model)

    # ---- small MLPs packed into two slabs ----
    enl = params["enlarger"]
    seq = params["seq_emb_reducer"]
    dif = params["emb_diff_reducer"]
    small_ws = [enl[0], enl[2], seq[0], seq[2], dif[0], dif[2]]
    small_bs = [enl[1], enl[3], seq[1], seq[3], dif[1], dif[3]]
    sw_r = ((max(w.shape[0] for w in small_ws) + 7) // 8) * 8
    sw_c = max(w.shape[1] for w in small_ws)
    small_w = jnp.stack([jnp.pad(w, ((0, sw_r - w.shape[0]), (0, sw_c - w.shape[1])))
                         for w in small_ws])
    sb_c = max(v.shape[0] for v in small_bs)
    small_b = jnp.stack([jnp.pad(v, (0, sb_c - v.shape[0])) for v in small_bs]
                        + [jnp.zeros((sb_c,), jnp.float32)] * 2)
    small_dims = ((enl[0].shape[0], enl[0].shape[1], enl[2].shape[1]),
                  (seq[0].shape[0], seq[0].shape[1], seq[2].shape[1]),
                  (dif[0].shape[0], dif[0].shape[1], dif[2].shape[1]))

    # ---- encoder layers: fused QKV|O weight slab, bias/LN slab, bf16 FFN ----
    wproj_l, lvec_l, fw1_l, fb1_l, fw2_l = [], [], [], [], []
    for lp in params["encoder_layers"]:
        wproj_l.append(jnp.concatenate([lp["wq"], lp["wk"], lp["wv"], lp["wo"]], axis=1))
        row0 = jnp.concatenate([lp["bq"], lp["bk"], lp["bv"], lp["bo"]])      # [4D]
        pad4 = lambda v: jnp.pad(v, (0, 4 * D - v.shape[0]))
        lvec_l.append(jnp.stack([row0, pad4(lp["ln1_g"]), pad4(lp["ln1_b"]),
                                 pad4(lp["b2"]), pad4(lp["ln2_g"]), pad4(lp["ln2_b"]),
                                 jnp.zeros((4 * D,), jnp.float32),
                                 jnp.zeros((4 * D,), jnp.float32)]))
        fw1_l.append(lp["w1"])
        fb1_l.append(lp["b1"][None, :])
        fw2_l.append(lp["w2"])
    wproj = jnp.stack(wproj_l)                        # [A, D, 4D]
    lvec = jnp.stack(lvec_l)                          # [A, 8, 4D]
    ffn_w1 = jnp.stack(fw1_l).astype(jnp.bfloat16)    # [A, D, ff]  (bf16 storage)
    ffn_b1 = jnp.stack(fb1_l)                         # [A, 1, ff]
    ffn_w2 = jnp.stack(fw2_l).astype(jnp.bfloat16)    # [A, ff, D]

    # ---- score MLP: fold flatten+concat(order: deltas|sector|diff) into w1 ----
    mp = params["mlp"]
    in_size, hid1 = mp["w1"].shape
    hid2, hid3, n_out = mp["w2"].shape[1], mp["w3"].shape[1], mp["w4"].shape[1]
    w1p = mp["w1"].reshape(3, L, cz, hid1).transpose(1, 0, 2, 3).reshape(L, 3 * cz, hid1)
    w1p = jnp.pad(w1p, ((0, Lp - L), (0, 0), (0, 0))).astype(jnp.bfloat16)
    mlp_b = jnp.stack([jnp.pad(mp[k], (0, hid1 - mp[k].shape[0]))
                       for k in ("b1", "b2", "b3", "b4")]
                      + [jnp.zeros((hid1,), jnp.float32)] * 4)   # [8, hid1]

    operands = [prep(deltas20), prep(emb_sector), prep(pos_enc), prep(emb_diff_in),
                small_w, small_b, wproj, lvec, ffn_w1, ffn_b1, ffn_w2,
                w1p, mlp_b, mp["w2"], mp["w3"], mp["w4"]]
    in_specs = []
    for idx, a in enumerate(operands):
        if idx < 4:      # per-batch activations, tiled along the folded batch axis
            in_specs.append(pl.BlockSpec((1,) + a.shape[1:], lambda i: (i, 0, 0)))
        else:            # weights: constant index map, fetched once
            in_specs.append(pl.BlockSpec(a.shape, lambda i, n=a.ndim: (0,) * n))

    # advisory cost estimate so XLA can schedule around the custom call
    ff = ffn_b1.shape[-1]
    tokens = B * L

    def mlp2_flops(dims):
        d_in, d_hid, d_out = dims
        return 2 * (d_in * d_hid + d_hid * d_out)

    flops = tokens * sum(mlp2_flops(d) for d in small_dims)
    flops += A * (tokens * 2 * (3 * D * D + D * D + 2 * D * ff)
                  + B * 2 * 2 * heads * L * L * (D // heads))
    flops += B * 2 * (in_size * hid1 + hid1 * hid2 + hid2 * hid3 + hid3 * n_out)
    transcendentals = B * A * heads * L * L
    bytes_accessed = (sum(int(a.size) * a.dtype.itemsize for a in operands)
                      + steps * bt * n_out * 4)
    ce = pl.CostEstimate(flops=int(flops), transcendentals=int(transcendentals),
                         bytes_accessed=int(bytes_accessed))

    out = pl.pallas_call(
        functools.partial(fused_forward_kernel, nhead=heads, attn_len=A,
                          bt=bt, seq_len=L, small_dims=small_dims),
        out_shape=jax.ShapeDtypeStruct((steps, bt, n_out), jnp.float32),
        grid=(steps,),
        in_specs=in_specs,
        out_specs=pl.BlockSpec((1, bt, n_out), lambda i: (i, 0, 0)),
        compiler_params=pltpu.CompilerParams(
            dimension_semantics=("parallel",),
            vmem_limit_bytes=16 * 1024 * 1024),
        cost_estimate=ce,
    )(*operands)
    # TODO(synk): attention weights (need_weights=True) are returned by the PyTorch
    # MHA but never used by this model's output path, so they are not materialized.
    return out.reshape(B, n_out)


# ---------------------------------------------------------------------------
# Parameter construction (deterministic, PyTorch-Linear-style uniform init)
# Weights are stored as [in_features, out_features] so every layer is x @ W + b.
# ---------------------------------------------------------------------------
def _init_linear(key, fan_in, fan_out):
    kw, kb = jax.random.split(key)
    bound = 1.0 / (fan_in ** 0.5)
    w = jax.random.uniform(kw, (fan_in, fan_out), jnp.float32, -bound, bound)
    b = jax.random.uniform(kb, (fan_out,), jnp.float32, -bound, bound)
    return w, b


def init_params(key, cz, seq_emb_size, heads, attn_len, in_size, ff=2048):
    keys = iter(jax.random.split(key, 64))
    red = seq_emb_size // 2
    p = {}

    # enlarger (NoDDE variant): Linear(20,42) -> LeakyReLU -> Linear(42, cz)
    w1, b1 = _init_linear(next(keys), 20, 42)
    w2, b2 = _init_linear(next(keys), 42, cz)
    p["enlarger"] = (w1, b1, w2, b2)

    # seq_emb_reducer / emb_diff_reducer: Linear(E, E/2) -> LeakyReLU -> Linear(E/2, cz)
    for name in ("seq_emb_reducer", "emb_diff_reducer"):
        w1, b1 = _init_linear(next(keys), seq_emb_size, red)
        w2, b2 = _init_linear(next(keys), red, cz)
        p[name] = (w1, b1, w2, b2)

    # transformer encoder layers
    layers = []
    D = seq_emb_size
    for _ in range(attn_len):
        lp = {}
        for nm in ("wq", "wk", "wv"):
            w, b = _init_linear(next(keys), D, D)
            lp[nm] = w
            lp["b" + nm[1]] = b
        lp["wo"], lp["bo"] = _init_linear(next(keys), D, D)
        lp["ln1_g"], lp["ln1_b"] = jnp.ones((D,), jnp.float32), jnp.zeros((D,), jnp.float32)
        lp["w1"], lp["b1"] = _init_linear(next(keys), D, ff)
        lp["w2"], lp["b2"] = _init_linear(next(keys), ff, D)
        lp["ln2_g"], lp["ln2_b"] = jnp.ones((D,), jnp.float32), jnp.zeros((D,), jnp.float32)
        layers.append(lp)
    p["encoder_layers"] = layers

    # score MLP (PrismScoreEmbDiffSimpleModel variant): in -> in/2 -> /4 -> /4 -> 2
    hid1 = in_size // 2
    hid2 = hid1 // 4
    hid3 = hid2 // 4
    mp = {}
    mp["w1"], mp["b1"] = _init_linear(next(keys), in_size, hid1)
    mp["w2"], mp["b2"] = _init_linear(next(keys), hid1, hid2)
    mp["w3"], mp["b3"] = _init_linear(next(keys), hid2, hid3)
    mp["w4"], mp["b4"] = _init_linear(next(keys), hid3, 2)
    p["mlp"] = mp
    return p


if __name__ == "__main__":
    # model config (small, consistent with the module)
    cz = 16
    diff_width = 3
    seq_emb_size = 32
    heads = 4
    attn_len = 2
    B = 8
    L = 2 * diff_width + 1                 # sector length = 7
    in_size = cz * L * 3                   # 336

    key = jax.random.PRNGKey(0)
    kp, k1, k2, k3, k4 = jax.random.split(key, 5)

    params = init_params(kp, cz, seq_emb_size, heads, attn_len, in_size)

    all_deltas_in = jax.random.normal(k1, (B, L, 40), jnp.float32)
    pos_enc = jax.random.normal(k2, (B, L, cz), jnp.float32)
    emb_sector = jax.random.normal(k3, (B, L, seq_emb_size), jnp.float32)
    emb_diff_in = jax.random.normal(k4, (B, L, seq_emb_size), jnp.float32)
    pid = jnp.zeros((B,), jnp.int32)
    pos = jnp.zeros((B,), jnp.int32)

    fwd = jax.jit(functools.partial(forward, cz=cz, heads=heads))
    out = fwd(params, pid, pos, all_deltas_in, pos_enc, emb_sector, emb_diff_in)
    out = jax.block_until_ready(out)
    assert out.shape == (B, 2) and out.dtype == jnp.float32
    assert bool(jnp.isfinite(out).all())
    print("KERNEL_OK")
</pallas_src>

<mosaic_0001>
module attributes {stable_mosaic.version = 11 : i64} {
  func.func @fused_forward_kernel(%arg0: i32, %arg1: memref<1x32x20xf32, #tpu.memory_space<vmem>>, %arg2: memref<1x32x32xf32, #tpu.memory_space<vmem>>, %arg3: memref<1x32x16xf32, #tpu.memory_space<vmem>>, %arg4: memref<1x32x32xf32, #tpu.memory_space<vmem>>, %arg5: memref<6x48x42xf32, #tpu.memory_space<vmem>>, %arg6: memref<8x42xf32, #tpu.memory_space<vmem>>, %arg7: memref<2x32x128xf32, #tpu.memory_space<vmem>>, %arg8: memref<2x8x128xf32, #tpu.memory_space<vmem>>, %arg9: memref<2x32x2048xbf16, #tpu.memory_space<vmem>>, %arg10: memref<2x1x2048xf32, #tpu.memory_space<vmem>>, %arg11: memref<2x2048x32xbf16, #tpu.memory_space<vmem>>, %arg12: memref<8x48x168xbf16, #tpu.memory_space<vmem>>, %arg13: memref<8x168xf32, #tpu.memory_space<vmem>>, %arg14: memref<168x42xf32, #tpu.memory_space<vmem>>, %arg15: memref<42x10xf32, #tpu.memory_space<vmem>>, %arg16: memref<10x2xf32, #tpu.memory_space<vmem>>, %arg17: memref<1x4x2xf32, #tpu.memory_space<vmem>>) attributes {dimension_semantics = [#tpu.dimension_semantics<parallel>], iteration_bounds = array<i64: 2>, scalar_prefetch = 0 : i64, scratch_operands = 0 : i64, tpu.core_type = #tpu.core_type<tc>, window_params = [{transform_indices = @transform_0, window_bounds = array<i64: 1, 32, 20>}, {transform_indices = @transform_1, window_bounds = array<i64: 1, 32, 32>}, {transform_indices = @transform_2, window_bounds = array<i64: 1, 32, 16>}, {transform_indices = @transform_3, window_bounds = array<i64: 1, 32, 32>}, {pipeline_mode = #tpu.pipeline_mode<synchronous>, transform_indices = @transform_4, window_bounds = array<i64: 6, 48, 42>}, {pipeline_mode = #tpu.pipeline_mode<synchronous>, transform_indices = @transform_5, window_bounds = array<i64: 8, 42>}, {pipeline_mode = #tpu.pipeline_mode<synchronous>, transform_indices = @transform_6, window_bounds = array<i64: 2, 32, 128>}, {pipeline_mode = #tpu.pipeline_mode<synchronous>, transform_indices = @transform_7, window_bounds = array<i64: 2, 8, 128>}, {pipeline_mode = #tpu.pipeline_mode<synchronous>, transform_indices = @transform_8, window_bounds = array<i64: 2, 32, 2048>}, {pipeline_mode = #tpu.pipeline_mode<synchronous>, transform_indices = @transform_9, window_bounds = array<i64: 2, 1, 2048>}, {pipeline_mode = #tpu.pipeline_mode<synchronous>, transform_indices = @transform_10, window_bounds = array<i64: 2, 2048, 32>}, {pipeline_mode = #tpu.pipeline_mode<synchronous>, transform_indices = @transform_11, window_bounds = array<i64: 8, 48, 168>}, {pipeline_mode = #tpu.pipeline_mode<synchronous>, transform_indices = @transform_12, window_bounds = array<i64: 8, 168>}, {pipeline_mode = #tpu.pipeline_mode<synchronous>, transform_indices = @transform_13, window_bounds = array<i64: 168, 42>}, {pipeline_mode = #tpu.pipeline_mode<synchronous>, transform_indices = @transform_14, window_bounds = array<i64: 42, 10>}, {pipeline_mode = #tpu.pipeline_mode<synchronous>, transform_indices = @transform_15, window_bounds = array<i64: 10, 2>}, {transform_indices = @transform_16, window_bounds = array<i64: 1, 4, 2>}]} {
    %c0 = arith.constant 0 : index
    %c0_0 = arith.constant 0 : index
    %c0_1 = arith.constant 0 : index
    %0 = vector.load %arg1[%c0, %c0_0, %c0_1] : memref<1x32x20xf32, #tpu.memory_space<vmem>>, vector<1x32x20xf32>
    %1 = vector.shape_cast %0 : vector<1x32x20xf32> to vector<32x20xf32>
    %c0_2 = arith.constant 0 : index
    %c0_3 = arith.constant 0 : index
    %c0_4 = arith.constant 0 : index
    %2 = vector.load %arg5[%c0_2, %c0_3, %c0_4] : memref<6x48x42xf32, #tpu.memory_space<vmem>>, vector<1x48x42xf32>
    %3 = vector.shape_cast %2 : vector<1x48x42xf32> to vector<48x42xf32>
    %4 = vector.extract_strided_slice %3 {offsets = [0, 0], sizes = [20, 42], strides = [1, 1]} : vector<48x42xf32> to vector<20x42xf32>
    %c0_5 = arith.constant 0 : index
    %c0_6 = arith.constant 0 : index
    %5 = vector.load %arg6[%c0_5, %c0_6] : memref<8x42xf32, #tpu.memory_space<vmem>>, vector<1x42xf32>
    %c1 = arith.constant 1 : index
    %c0_7 = arith.constant 0 : index
    %c0_8 = arith.constant 0 : index
    %6 = vector.load %arg5[%c1, %c0_7, %c0_8] : memref<6x48x42xf32, #tpu.memory_space<vmem>>, vector<1x48x42xf32>
    %7 = vector.shape_cast %6 : vector<1x48x42xf32> to vector<48x42xf32>
    %8 = vector.extract_strided_slice %7 {offsets = [0, 0], sizes = [42, 16], strides = [1, 1]} : vector<48x42xf32> to vector<42x16xf32>
    %c1_9 = arith.constant 1 : index
    %c0_10 = arith.constant 0 : index
    %9 = vector.load %arg6[%c1_9, %c0_10] : memref<8x42xf32, #tpu.memory_space<vmem>>, vector<1x16xf32>
    %cst = arith.constant dense<0.000000e+00> : vector<32x42xf32>
    %10 = tpu.matmul %1, %4, %cst {dimension_numbers = #tpu.dot_dimension_numbers<[1], [0], [0], [1], [0, 0, 1, 1], [], []>} : vector<32x20xf32>, vector<20x42xf32>, vector<32x42xf32> -> vector<32x42xf32>
    %11 = vector.broadcast %5 : vector<1x42xf32> to vector<32x42xf32>
    %12 = arith.addf %10, %11 : vector<32x42xf32>
    %cst_11 = arith.constant 0.000000e+00 : f32
    %13 = vector.broadcast %cst_11 : f32 to vector<32x42xf32>
    %14 = arith.cmpf oge, %12, %13 : vector<32x42xf32>
    %cst_12 = arith.constant 0.00999999977 : f32
    %15 = vector.broadcast %cst_12 : f32 to vector<32x42xf32>
    %16 = arith.mulf %15, %12 : vector<32x42xf32>
    %17 = arith.select %14, %12, %16 : vector<32x42xi1>, vector<32x42xf32>
    %cst_13 = arith.constant dense<0.000000e+00> : vector<32x16xf32>
    %18 = tpu.matmul %17, %8, %cst_13 {dimension_numbers = #tpu.dot_dimension_numbers<[1], [0], [0], [1], [0, 0, 1, 1], [], []>} : vector<32x42xf32>, vector<42x16xf32>, vector<32x16xf32> -> vector<32x16xf32>
    %19 = vector.broadcast %9 : vector<1x16xf32> to vector<32x16xf32>
    %20 = arith.addf %18, %19 : vector<32x16xf32>
    %c0_14 = arith.constant 0 : index
    %c0_15 = arith.constant 0 : index
    %c0_16 = arith.constant 0 : index
    %21 = vector.load %arg2[%c0_14, %c0_15, %c0_16] : memref<1x32x32xf32, #tpu.memory_space<vmem>>, vector<1x32x32xf32>
    %22 = vector.shape_cast %21 : vector<1x32x32xf32> to vector<32x32xf32>
    %c2 = arith.constant 2 : index
    %c0_17 = arith.constant 0 : index
    %c0_18 = arith.constant 0 : index
    %23 = vector.load %arg5[%c2, %c0_17, %c0_18] : memref<6x48x42xf32, #tpu.memory_space<vmem>>, vector<1x48x42xf32>
    %24 = vector.shape_cast %23 : vector<1x48x42xf32> to vector<48x42xf32>
    %25 = vector.extract_strided_slice %24 {offsets = [0, 0], sizes = [32, 16], strides = [1, 1]} : vector<48x42xf32> to vector<32x16xf32>
    %c2_19 = arith.constant 2 : index
    %c0_20 = arith.constant 0 : index
    %26 = vector.load %arg6[%c2_19, %c0_20] : memref<8x42xf32, #tpu.memory_space<vmem>>, vector<1x16xf32>
    %c3 = arith.constant 3 : index
    %c0_21 = arith.constant 0 : index
    %c0_22 = arith.constant 0 : index
    %27 = vector.load %arg5[%c3, %c0_21, %c0_22] : memref<6x48x42xf32, #tpu.memory_space<vmem>>, vector<1x48x42xf32>
    %28 = vector.shape_cast %27 : vector<1x48x42xf32> to vector<48x42xf32>
    %29 = vector.extract_strided_slice %28 {offsets = [0, 0], sizes = [16, 16], strides = [1, 1]} : vector<48x42xf32> to vector<16x16xf32>
    %c3_23 = arith.constant 3 : index
    %c0_24 = arith.constant 0 : index
    %30 = vector.load %arg6[%c3_23, %c0_24] : memref<8x42xf32, #tpu.memory_space<vmem>>, vector<1x16xf32>
    %cst_25 = arith.constant dense<0.000000e+00> : vector<32x16xf32>
    %31 = tpu.matmul %22, %25, %cst_25 {dimension_numbers = #tpu.dot_dimension_numbers<[1], [0], [0], [1], [0, 0, 1, 1], [], []>} : vector<32x32xf32>, vector<32x16xf32>, vector<32x16xf32> -> vector<32x16xf32>
    %32 = vector.broadcast %26 : vector<1x16xf32> to vector<32x16xf32>
    %33 = arith.addf %31, %32 : vector<32x16xf32>
    %cst_26 = arith.constant 0.000000e+00 : f32
    %34 = vector.broadcast %cst_26 : f32 to vector<32x16xf32>
    %35 = arith.cmpf oge, %33, %34 : vector<32x16xf32>
    %cst_27 = arith.constant 0.00999999977 : f32
    %36 = vector.broadcast %cst_27 : f32 to vector<32x16xf32>
    %37 = arith.mulf %36, %33 : vector<32x16xf32>
    %38 = arith.select %35, %33, %37 : vector<32x16xi1>, vector<32x16xf32>
    %cst_28 = arith.constant dense<0.000000e+00> : vector<32x16xf32>
    %39 = tpu.matmul %38, %29, %cst_28 {dimension_numbers = #tpu.dot_dimension_numbers<[1], [0], [0], [1], [0, 0, 1, 1], [], []>} : vector<32x16xf32>, vector<16x16xf32>, vector<32x16xf32> -> vector<32x16xf32>
    %40 = vector.broadcast %30 : vector<1x16xf32> to vector<32x16xf32>
    %41 = arith.addf %39, %40 : vector<32x16xf32>
    %c0_29 = arith.constant 0 : index
    %c0_30 = arith.constant 0 : index
    %c0_31 = arith.constant 0 : index
    %42 = vector.load %arg3[%c0_29, %c0_30, %c0_31] : memref<1x32x16xf32, #tpu.memory_space<vmem>>, vector<1x32x16xf32>
    %43 = vector.shape_cast %42 : vector<1x32x16xf32> to vector<32x16xf32>
    %44 = arith.addf %41, %43 : vector<32x16xf32>
    %45 = tpu.iota {dimensions = array<i32: 2>} : vector<1x8x8xi32>
    %c7_i32 = arith.constant 7 : i32
    %46 = vector.broadcast %c7_i32 : i32 to vector<1x8x8xi32>
    %47 = arith.cmpi slt, %45, %46 : vector<1x8x8xi32>
    %c0_32 = arith.constant 0 : index
    %c0_33 = arith.constant 0 : index
    %c0_34 = arith.constant 0 : index
    %48 = vector.load %arg4[%c0_32, %c0_33, %c0_34] : memref<1x32x32xf32, #tpu.memory_space<vmem>>, vector<1x32x32xf32>
    %49 = vector.shape_cast %48 : vector<1x32x32xf32> to vector<32x32xf32>
    %c0_35 = arith.constant 0 : index
    %c0_36 = arith.constant 0 : index
    %c0_37 = arith.constant 0 : index
    %50 = vector.load %arg7[%c0_35, %c0_36, %c0_37] : memref<2x32x128xf32, #tpu.memory_space<vmem>>, vector<1x32x128xf32>
    %51 = vector.shape_cast %50 : vector<1x32x128xf32> to vector<32x128xf32>
    %c0_38 = arith.constant 0 : index
    %c0_39 = arith.constant 0 : index
    %c0_40 = arith.constant 0 : index
    %52 = vector.load %arg8[%c0_38, %c0_39, %c0_40] : memref<2x8x128xf32, #tpu.memory_space<vmem>>, vector<1x8x128xf32>
    %53 = vector.shape_cast %52 : vector<1x8x128xf32> to vector<8x128xf32>
    %54 = vector.extract_strided_slice %51 {offsets = [0, 0], sizes = [32, 96], strides = [1, 1]} : vector<32x128xf32> to vector<32x96xf32>
    %55 = vector.extract_strided_slice %51 {offsets = [0, 96], sizes = [32, 32], strides = [1, 1]} : vector<32x128xf32> to vector<32x32xf32>
    %56 = vector.extract_strided_slice %53 {offsets = [0, 0], sizes = [1, 96], strides = [1, 1]} : vector<8x128xf32> to vector<1x96xf32>
    %57 = vector.extract_strided_slice %53 {offsets = [0, 96], sizes = [1, 32], strides = [1, 1]} : vector<8x128xf32> to vector<1x32xf32>
    %58 = vector.extract_strided_slice %53 {offsets = [1, 0], sizes = [1, 32], strides = [1, 1]} : vector<8x128xf32> to vector<1x32xf32>
    %59 = vector.extract_strided_slice %53 {offsets = [2, 0], sizes = [1, 32], strides = [1, 1]} : vector<8x128xf32> to vector<1x32xf32>
    %60 = vector.extract_strided_slice %53 {offsets = [3, 0], sizes = [1, 32], strides = [1, 1]} : vector<8x128xf32> to vector<1x32xf32>
    %61 = vector.extract_strided_slice %53 {offsets = [4, 0], sizes = [1, 32], strides = [1, 1]} : vector<8x128xf32> to vector<1x32xf32>
    %62 = vector.extract_strided_slice %53 {offsets = [5, 0], sizes = [1, 32], strides = [1, 1]} : vector<8x128xf32> to vector<1x32xf32>
    %cst_41 = arith.constant dense<0.000000e+00> : vector<32x96xf32>
    %63 = tpu.matmul %49, %54, %cst_41 {dimension_numbers = #tpu.dot_dimension_numbers<[1], [0], [0], [1], [0, 0, 1, 1], [], []>} : vector<32x32xf32>, vector<32x96xf32>, vector<32x96xf32> -> vector<32x96xf32>
    %64 = vector.broadcast %56 : vector<1x96xf32> to vector<32x96xf32>
    %65 = arith.addf %63, %64 : vector<32x96xf32>
    %66 = vector.shape_cast %65 : vector<32x96xf32> to vector<4x8x96xf32>
    %67 = vector.extract_strided_slice %66 {offsets = [0, 0, 0], sizes = [4, 8, 8], strides = [1, 1, 1]} : vector<4x8x96xf32> to vector<4x8x8xf32>
    %68 = vector.extract_strided_slice %66 {offsets = [0, 0, 32], sizes = [4, 8, 8], strides = [1, 1, 1]} : vector<4x8x96xf32> to vector<4x8x8xf32>
    %69 = vector.extract_strided_slice %66 {offsets = [0, 0, 64], sizes = [4, 8, 8], strides = [1, 1, 1]} : vector<4x8x96xf32> to vector<4x8x8xf32>
    "tpu.trace_start"() <{level = 10 : i32, message = "ble,bme->blm"}> : () -> ()
    %cst_42 = arith.constant dense<0.000000e+00> : vector<4x8x8xf32>
    %70 = tpu.matmul %67, %68, %cst_42 {dimension_numbers = #tpu.dot_dimension_numbers<[2], [2], [1], [1], [0, 0, 0, 1, 1, 1], [0], [0]>} : vector<4x8x8xf32>, vector<4x8x8xf32>, vector<4x8x8xf32> -> vector<4x8x8xf32>
    "tpu.trace_stop"() : () -> ()
    %cst_43 = arith.constant 0.353553385 : f32
    %71 = vector.broadcast %cst_43 : f32 to vector<4x8x8xf32>
    %72 = arith.mulf %70, %71 : vector<4x8x8xf32>
    %cst_44 = arith.constant -1.000000e+30 : f32
    %73 = vector.shape_cast %47 : vector<1x8x8xi1> to vector<1x8x8xi1>
    %74 = vector.broadcast %73 : vector<1x8x8xi1> to vector<4x8x8xi1>
    %75 = vector.broadcast %cst_44 : f32 to vector<4x8x8xf32>
    %76 = arith.select %74, %72, %75 : vector<4x8x8xi1>, vector<4x8x8xf32>
    %cst_45 = arith.constant dense<0xFF800000> : vector<4x8xf32>
    %77 = vector.multi_reduction <maximumf>, %76, %cst_45 [2] : vector<4x8x8xf32> to vector<4x8xf32>
    %78 = vector.shape_cast %77 : vector<4x8xf32> to vector<4x8x1xf32>
    %79 = vector.broadcast %78 : vector<4x8x1xf32> to vector<4x8x8xf32>
    %80 = arith.subf %76, %79 : vector<4x8x8xf32>
    %81 = math.exp %80 : vector<4x8x8xf32>
    %cst_46 = arith.constant dense<0.000000e+00> : vector<4x8xf32>
    %82 = vector.multi_reduction <add>, %81, %cst_46 [2] : vector<4x8x8xf32> to vector<4x8xf32>
    %83 = vector.shape_cast %82 : vector<4x8xf32> to vector<4x8x1xf32>
    %84 = tpu.reciprocal %83 {approx = true} : vector<4x8x1xf32> -> vector<4x8x1xf32>
    %85 = vector.broadcast %84 : vector<4x8x1xf32> to vector<4x8x8xf32>
    %86 = arith.mulf %81, %85 : vector<4x8x8xf32>
    "tpu.trace_start"() <{level = 10 : i32, message = "blm,bme->ble"}> : () -> ()
    %cst_47 = arith.constant dense<0.000000e+00> : vector<4x8x8xf32>
    %87 = tpu.matmul %86, %69, %cst_47 {dimension_numbers = #tpu.dot_dimension_numbers<[2], [1], [1], [2], [0, 0, 0, 1, 1, 2], [0], [0]>} : vector<4x8x8xf32>, vector<4x8x8xf32>, vector<4x8x8xf32> -> vector<4x8x8xf32>
    "tpu.trace_stop"() : () -> ()
    %88 = vector.extract_strided_slice %66 {offsets = [0, 0, 8], sizes = [4, 8, 8], strides = [1, 1, 1]} : vector<4x8x96xf32> to vector<4x8x8xf32>
    %89 = vector.extract_strided_slice %66 {offsets = [0, 0, 40], sizes = [4, 8, 8], strides = [1, 1, 1]} : vector<4x8x96xf32> to vector<4x8x8xf32>
    %90 = vector.extract_strided_slice %66 {offsets = [0, 0, 72], sizes = [4, 8, 8], strides = [1, 1, 1]} : vector<4x8x96xf32> to vector<4x8x8xf32>
    "tpu.trace_start"() <{level = 10 : i32, message = "ble,bme->blm"}> : () -> ()
    %cst_48 = arith.constant dense<0.000000e+00> : vector<4x8x8xf32>
    %91 = tpu.matmul %88, %89, %cst_48 {dimension_numbers = #tpu.dot_dimension_numbers<[2], [2], [1], [1], [0, 0, 0, 1, 1, 1], [0], [0]>} : vector<4x8x8xf32>, vector<4x8x8xf32>, vector<4x8x8xf32> -> vector<4x8x8xf32>
    "tpu.trace_stop"() : () -> ()
    %cst_49 = arith.constant 0.353553385 : f32
    %92 = vector.broadcast %cst_49 : f32 to vector<4x8x8xf32>
    %93 = arith.mulf %91, %92 : vector<4x8x8xf32>
    %cst_50 = arith.constant -1.000000e+30 : f32
    %94 = vector.shape_cast %47 : vector<1x8x8xi1> to vector<1x8x8xi1>
    %95 = vector.broadcast %94 : vector<1x8x8xi1> to vector<4x8x8xi1>
    %96 = vector.broadcast %cst_50 : f32 to vector<4x8x8xf32>
    %97 = arith.select %95, %93, %96 : vector<4x8x8xi1>, vector<4x8x8xf32>
    %cst_51 = arith.constant dense<0xFF800000> : vector<4x8xf32>
    %98 = vector.multi_reduction <maximumf>, %97, %cst_51 [2] : vector<4x8x8xf32> to vector<4x8xf32>
    %99 = vector.shape_cast %98 : vector<4x8xf32> to vector<4x8x1xf32>
    %100 = vector.broadcast %99 : vector<4x8x1xf32> to vector<4x8x8xf32>
    %101 = arith.subf %97, %100 : vector<4x8x8xf32>
    %102 = math.exp %101 : vector<4x8x8xf32>
    %cst_52 = arith.constant dense<0.000000e+00> : vector<4x8xf32>
    %103 = vector.multi_reduction <add>, %102, %cst_52 [2] : vector<4x8x8xf32> to vector<4x8xf32>
    %104 = vector.shape_cast %103 : vector<4x8xf32> to vector<4x8x1xf32>
    %105 = tpu.reciprocal %104 {approx = true} : vector<4x8x1xf32> -> vector<4x8x1xf32>
    %106 = vector.broadcast %105 : vector<4x8x1xf32> to vector<4x8x8xf32>
    %107 = arith.mulf %102, %106 : vector<4x8x8xf32>
    "tpu.trace_start"() <{level = 10 : i32, message = "blm,bme->ble"}> : () -> ()
    %cst_53 = arith.constant dense<0.000000e+00> : vector<4x8x8xf32>
    %108 = tpu.matmul %107, %90, %cst_53 {dimension_numbers = #tpu.dot_dimension_numbers<[2], [1], [1], [2], [0, 0, 0, 1, 1, 2], [0], [0]>} : vector<4x8x8xf32>, vector<4x8x8xf32>, vector<4x8x8xf32> -> vector<4x8x8xf32>
    "tpu.trace_stop"() : () -> ()
    %109 = vector.extract_strided_slice %66 {offsets = [0, 0, 16], sizes = [4, 8, 8], strides = [1, 1, 1]} : vector<4x8x96xf32> to vector<4x8x8xf32>
    %110 = vector.extract_strided_slice %66 {offsets = [0, 0, 48], sizes = [4, 8, 8], strides = [1, 1, 1]} : vector<4x8x96xf32> to vector<4x8x8xf32>
    %111 = vector.extract_strided_slice %66 {offsets = [0, 0, 80], sizes = [4, 8, 8], strides = [1, 1, 1]} : vector<4x8x96xf32> to vector<4x8x8xf32>
    "tpu.trace_start"() <{level = 10 : i32, message = "ble,bme->blm"}> : () -> ()
    %cst_54 = arith.constant dense<0.000000e+00> : vector<4x8x8xf32>
    %112 = tpu.matmul %109, %110, %cst_54 {dimension_numbers = #tpu.dot_dimension_numbers<[2], [2], [1], [1], [0, 0, 0, 1, 1, 1], [0], [0]>} : vector<4x8x8xf32>, vector<4x8x8xf32>, vector<4x8x8xf32> -> vector<4x8x8xf32>
    "tpu.trace_stop"() : () -> ()
    %cst_55 = arith.constant 0.353553385 : f32
    %113 = vector.broadcast %cst_55 : f32 to vector<4x8x8xf32>
    %114 = arith.mulf %112, %113 : vector<4x8x8xf32>
    %cst_56 = arith.constant -1.000000e+30 : f32
    %115 = vector.shape_cast %47 : vector<1x8x8xi1> to vector<1x8x8xi1>
    %116 = vector.broadcast %115 : vector<1x8x8xi1> to vector<4x8x8xi1>
    %117 = vector.broadcast %cst_56 : f32 to vector<4x8x8xf32>
    %118 = arith.select %116, %114, %117 : vector<4x8x8xi1>, vector<4x8x8xf32>
    %cst_57 = arith.constant dense<0xFF800000> : vector<4x8xf32>
    %119 = vector.multi_reduction <maximumf>, %118, %cst_57 [2] : vector<4x8x8xf32> to vector<4x8xf32>
    %120 = vector.shape_cast %119 : vector<4x8xf32> to vector<4x8x1xf32>
    %121 = vector.broadcast %120 : vector<4x8x1xf32> to vector<4x8x8xf32>
    %122 = arith.subf %118, %121 : vector<4x8x8xf32>
    %123 = math.exp %122 : vector<4x8x8xf32>
    %cst_58 = arith.constant dense<0.000000e+00> : vector<4x8xf32>
    %124 = vector.multi_reduction <add>, %123, %cst_58 [2] : vector<4x8x8xf32> to vector<4x8xf32>
    %125 = vector.shape_cast %124 : vector<4x8xf32> to vector<4x8x1xf32>
    %126 = tpu.reciprocal %125 {approx = true} : vector<4x8x1xf32> -> vector<4x8x1xf32>
    %127 = vector.broadcast %126 : vector<4x8x1xf32> to vector<4x8x8xf32>
    %128 = arith.mulf %123, %127 : vector<4x8x8xf32>
    "tpu.trace_start"() <{level = 10 : i32, message = "blm,bme->ble"}> : () -> ()
    %cst_59 = arith.constant dense<0.000000e+00> : vector<4x8x8xf32>
    %129 = tpu.matmul %128, %111, %cst_59 {dimension_numbers = #tpu.dot_dimension_numbers<[2], [1], [1], [2], [0, 0, 0, 1, 1, 2], [0], [0]>} : vector<4x8x8xf32>, vector<4x8x8xf32>, vector<4x8x8xf32> -> vector<4x8x8xf32>
    "tpu.trace_stop"() : () -> ()
    %130 = vector.extract_strided_slice %66 {offsets = [0, 0, 24], sizes = [4, 8, 8], strides = [1, 1, 1]} : vector<4x8x96xf32> to vector<4x8x8xf32>
    %131 = vector.extract_strided_slice %66 {offsets = [0, 0, 56], sizes = [4, 8, 8], strides = [1, 1, 1]} : vector<4x8x96xf32> to vector<4x8x8xf32>
    %132 = vector.extract_strided_slice %66 {offsets = [0, 0, 88], sizes = [4, 8, 8], strides = [1, 1, 1]} : vector<4x8x96xf32> to vector<4x8x8xf32>
    "tpu.trace_start"() <{level = 10 : i32, message = "ble,bme->blm"}> : () -> ()
    %cst_60 = arith.constant dense<0.000000e+00> : vector<4x8x8xf32>
    %133 = tpu.matmul %130, %131, %cst_60 {dimension_numbers = #tpu.dot_dimension_numbers<[2], [2], [1], [1], [0, 0, 0, 1, 1, 1], [0], [0]>} : vector<4x8x8xf32>, vector<4x8x8xf32>, vector<4x8x8xf32> -> vector<4x8x8xf32>
    "tpu.trace_stop"() : () -> ()
    %cst_61 = arith.constant 0.353553385 : f32
    %134 = vector.broadcast %cst_61 : f32 to vector<4x8x8xf32>
    %135 = arith.mulf %133, %134 : vector<4x8x8xf32>
    %cst_62 = arith.constant -1.000000e+30 : f32
    %136 = vector.shape_cast %47 : vector<1x8x8xi1> to vector<1x8x8xi1>
    %137 = vector.broadcast %136 : vector<1x8x8xi1> to vector<4x8x8xi1>
    %138 = vector.broadcast %cst_62 : f32 to vector<4x8x8xf32>
    %139 = arith.select %137, %135, %138 : vector<4x8x8xi1>, vector<4x8x8xf32>
    %cst_63 = arith.constant dense<0xFF800000> : vector<4x8xf32>
    %140 = vector.multi_reduction <maximumf>, %139, %cst_63 [2] : vector<4x8x8xf32> to vector<4x8xf32>
    %141 = vector.shape_cast %140 : vector<4x8xf32> to vector<4x8x1xf32>
    %142 = vector.broadcast %141 : vector<4x8x1xf32> to vector<4x8x8xf32>
    %143 = arith.subf %139, %142 : vector<4x8x8xf32>
    %144 = math.exp %143 : vector<4x8x8xf32>
    %cst_64 = arith.constant dense<0.000000e+00> : vector<4x8xf32>
    %145 = vector.multi_reduction <add>, %144, %cst_64 [2] : vector<4x8x8xf32> to vector<4x8xf32>
    %146 = vector.shape_cast %145 : vector<4x8xf32> to vector<4x8x1xf32>
    %147 = tpu.reciprocal %146 {approx = true} : vector<4x8x1xf32> -> vector<4x8x1xf32>
    %148 = vector.broadcast %147 : vector<4x8x1xf32> to vector<4x8x8xf32>
    %149 = arith.mulf %144, %148 : vector<4x8x8xf32>
    "tpu.trace_start"() <{level = 10 : i32, message = "blm,bme->ble"}> : () -> ()
    %cst_65 = arith.constant dense<0.000000e+00> : vector<4x8x8xf32>
    %150 = tpu.matmul %149, %132, %cst_65 {dimension_numbers = #tpu.dot_dimension_numbers<[2], [1], [1], [2], [0, 0, 0, 1, 1, 2], [0], [0]>} : vector<4x8x8xf32>, vector<4x8x8xf32>, vector<4x8x8xf32> -> vector<4x8x8xf32>
    "tpu.trace_stop"() : () -> ()
    %151 = tpu.concatenate %87, %108, %129, %150 in 2 : vector<4x8x8xf32>, vector<4x8x8xf32>, vector<4x8x8xf32>, vector<4x8x8xf32> -> vector<4x8x32xf32>
    %152 = vector.shape_cast %151 : vector<4x8x32xf32> to vector<32x32xf32>
    %cst_66 = arith.constant dense<0.000000e+00> : vector<32x32xf32>
    %153 = tpu.matmul %152, %55, %cst_66 {dimension_numbers = #tpu.dot_dimension_numbers<[1], [0], [0], [1], [0, 0, 1, 1], [], []>} : vector<32x32xf32>, vector<32x32xf32>, vector<32x32xf32> -> vector<32x32xf32>
    %154 = vector.broadcast %57 : vector<1x32xf32> to vector<32x32xf32>
    %155 = arith.addf %153, %154 : vector<32x32xf32>
    %156 = arith.addf %49, %155 : vector<32x32xf32>
    %cst_67 = arith.constant dense<0.000000e+00> : vector<32xf32>
    %157 = vector.multi_reduction <add>, %156, %cst_67 [1] : vector<32x32xf32> to vector<32xf32>
    %158 = vector.shape_cast %157 : vector<32xf32> to vector<32x1xf32>
    %cst_68 = arith.constant 3.200000e+01 : f32
    %159 = vector.broadcast %cst_68 : f32 to vector<32x1xf32>
    %160 = arith.divf %158, %159 : vector<32x1xf32>
    %161 = vector.broadcast %160 : vector<32x1xf32> to vector<32x32xf32>
    %162 = arith.subf %156, %161 : vector<32x32xf32>
    %163 = arith.mulf %162, %162 : vector<32x32xf32>
    %cst_69 = arith.constant dense<0.000000e+00> : vector<32xf32>
    %164 = vector.multi_reduction <add>, %163, %cst_69 [1] : vector<32x32xf32> to vector<32xf32>
    %165 = vector.shape_cast %164 : vector<32xf32> to vector<32x1xf32>
    %cst_70 = arith.constant 3.200000e+01 : f32
    %166 = vector.broadcast %cst_70 : f32 to vector<32x1xf32>
    %167 = arith.divf %165, %166 : vector<32x1xf32>
    %168 = vector.broadcast %160 : vector<32x1xf32> to vector<32x32xf32>
    %169 = arith.subf %156, %168 : vector<32x32xf32>
    %cst_71 = arith.constant 9.99999974E-6 : f32
    %170 = vector.broadcast %cst_71 : f32 to vector<32x1xf32>
    %171 = arith.addf %167, %170 : vector<32x1xf32>
    %172 = math.rsqrt %171 : vector<32x1xf32>
    %173 = vector.broadcast %172 : vector<32x1xf32> to vector<32x32xf32>
    %174 = arith.mulf %169, %173 : vector<32x32xf32>
    %175 = vector.broadcast %58 : vector<1x32xf32> to vector<32x32xf32>
    %176 = arith.mulf %174, %175 : vector<32x32xf32>
    %177 = vector.broadcast %59 : vector<1x32xf32> to vector<32x32xf32>
    %178 = arith.addf %176, %177 : vector<32x32xf32>
    %c0_72 = arith.constant 0 : index
    %c0_73 = arith.constant 0 : index
    %c0_74 = arith.constant 0 : index
    %179 = vector.load %arg9[%c0_72, %c0_73, %c0_74] : memref<2x32x2048xbf16, #tpu.memory_space<vmem>>, vector<1x32x2048xbf16>
    %180 = vector.shape_cast %179 : vector<1x32x2048xbf16> to vector<32x2048xbf16>
    %181 = arith.extf %180 : vector<32x2048xbf16> to vector<32x2048xf32>
    %c0_75 = arith.constant 0 : index
    %c0_76 = arith.constant 0 : index
    %c0_77 = arith.constant 0 : index
    %182 = vector.load %arg11[%c0_75, %c0_76, %c0_77] : memref<2x2048x32xbf16, #tpu.memory_space<vmem>>, vector<1x2048x32xbf16>
    %183 = vector.shape_cast %182 : vector<1x2048x32xbf16> to vector<2048x32xbf16>
    %184 = arith.extf %183 : vector<2048x32xbf16> to vector<2048x32xf32>
    %cst_78 = arith.constant dense<0.000000e+00> : vector<32x2048xf32>
    %185 = tpu.matmul %178, %181, %cst_78 {dimension_numbers = #tpu.dot_dimension_numbers<[1], [0], [0], [1], [0, 0, 1, 1], [], []>} : vector<32x32xf32>, vector<32x2048xf32>, vector<32x2048xf32> -> vector<32x2048xf32>
    %c0_79 = arith.constant 0 : index
    %c0_80 = arith.constant 0 : index
    %c0_81 = arith.constant 0 : index
    %186 = vector.load %arg10[%c0_79, %c0_80, %c0_81] : memref<2x1x2048xf32, #tpu.memory_space<vmem>>, vector<1x1x2048xf32>
    %187 = vector.shape_cast %186 : vector<1x1x2048xf32> to vector<1x2048xf32>
    %188 = vector.broadcast %187 : vector<1x2048xf32> to vector<32x2048xf32>
    %189 = arith.addf %185, %188 : vector<32x2048xf32>
    %cst_82 = arith.constant 0.000000e+00 : f32
    %190 = vector.broadcast %cst_82 : f32 to vector<32x2048xf32>
    %191 = arith.maximumf %189, %190 : vector<32x2048xf32>
    %cst_83 = arith.constant dense<0.000000e+00> : vector<32x32xf32>
    %192 = tpu.matmul %191, %184, %cst_83 {dimension_numbers = #tpu.dot_dimension_numbers<[1], [0], [0], [1], [0, 0, 1, 1], [], []>} : vector<32x2048xf32>, vector<2048x32xf32>, vector<32x32xf32> -> vector<32x32xf32>
    %193 = vector.broadcast %60 : vector<1x32xf32> to vector<32x32xf32>
    %194 = arith.addf %192, %193 : vector<32x32xf32>
    %195 = arith.addf %178, %194 : vector<32x32xf32>
    %cst_84 = arith.constant dense<0.000000e+00> : vector<32xf32>
    %196 = vector.multi_reduction <add>, %195, %cst_84 [1] : vector<32x32xf32> to vector<32xf32>
    %197 = vector.shape_cast %196 : vector<32xf32> to vector<32x1xf32>
    %cst_85 = arith.constant 3.200000e+01 : f32
    %198 = vector.broadcast %cst_85 : f32 to vector<32x1xf32>
    %199 = arith.divf %197, %198 : vector<32x1xf32>
    %200 = vector.broadcast %199 : vector<32x1xf32> to vector<32x32xf32>
    %201 = arith.subf %195, %200 : vector<32x32xf32>
    %202 = arith.mulf %201, %201 : vector<32x32xf32>
    %cst_86 = arith.constant dense<0.000000e+00> : vector<32xf32>
    %203 = vector.multi_reduction <add>, %202, %cst_86 [1] : vector<32x32xf32> to vector<32xf32>
    %204 = vector.shape_cast %203 : vector<32xf32> to vector<32x1xf32>
    %cst_87 = arith.constant 3.200000e+01 : f32
    %205 = vector.broadcast %cst_87 : f32 to vector<32x1xf32>
    %206 = arith.divf %204, %205 : vector<32x1xf32>
    %207 = vector.broadcast %199 : vector<32x1xf32> to vector<32x32xf32>
    %208 = arith.subf %195, %207 : vector<32x32xf32>
    %cst_88 = arith.constant 9.99999974E-6 : f32
    %209 = vector.broadcast %cst_88 : f32 to vector<32x1xf32>
    %210 = arith.addf %206, %209 : vector<32x1xf32>
    %211 = math.rsqrt %210 : vector<32x1xf32>
    %212 = vector.broadcast %211 : vector<32x1xf32> to vector<32x32xf32>
    %213 = arith.mulf %208, %212 : vector<32x32xf32>
    %214 = vector.broadcast %61 : vector<1x32xf32> to vector<32x32xf32>
    %215 = arith.mulf %213, %214 : vector<32x32xf32>
    %216 = vector.broadcast %62 : vector<1x32xf32> to vector<32x32xf32>
    %217 = arith.addf %215, %216 : vector<32x32xf32>
    %c1_89 = arith.constant 1 : index
    %c0_90 = arith.constant 0 : index
    %c0_91 = arith.constant 0 : index
    %218 = vector.load %arg7[%c1_89, %c0_90, %c0_91] : memref<2x32x128xf32, #tpu.memory_space<vmem>>, vector<1x32x128xf32>
    %219 = vector.shape_cast %218 : vector<1x32x128xf32> to vector<32x128xf32>
    %c1_92 = arith.constant 1 : index
    %c0_93 = arith.constant 0 : index
    %c0_94 = arith.constant 0 : index
    %220 = vector.load %arg8[%c1_92, %c0_93, %c0_94] : memref<2x8x128xf32, #tpu.memory_space<vmem>>, vector<1x8x128xf32>
    %221 = vector.shape_cast %220 : vector<1x8x128xf32> to vector<8x128xf32>
    %222 = vector.extract_strided_slice %219 {offsets = [0, 0], sizes = [32, 96], strides = [1, 1]} : vector<32x128xf32> to vector<32x96xf32>
    %223 = vector.extract_strided_slice %219 {offsets = [0, 96], sizes = [32, 32], strides = [1, 1]} : vector<32x128xf32> to vector<32x32xf32>
    %224 = vector.extract_strided_slice %221 {offsets = [0, 0], sizes = [1, 96], strides = [1, 1]} : vector<8x128xf32> to vector<1x96xf32>
    %225 = vector.extract_strided_slice %221 {offsets = [0, 96], sizes = [1, 32], strides = [1, 1]} : vector<8x128xf32> to vector<1x32xf32>
    %226 = vector.extract_strided_slice %221 {offsets = [1, 0], sizes = [1, 32], strides = [1, 1]} : vector<8x128xf32> to vector<1x32xf32>
    %227 = vector.extract_strided_slice %221 {offsets = [2, 0], sizes = [1, 32], strides = [1, 1]} : vector<8x128xf32> to vector<1x32xf32>
    %228 = vector.extract_strided_slice %221 {offsets = [3, 0], sizes = [1, 32], strides = [1, 1]} : vector<8x128xf32> to vector<1x32xf32>
    %229 = vector.extract_strided_slice %221 {offsets = [4, 0], sizes = [1, 32], strides = [1, 1]} : vector<8x128xf32> to vector<1x32xf32>
    %230 = vector.extract_strided_slice %221 {offsets = [5, 0], sizes = [1, 32], strides = [1, 1]} : vector<8x128xf32> to vector<1x32xf32>
    %cst_95 = arith.constant dense<0.000000e+00> : vector<32x96xf32>
    %231 = tpu.matmul %217, %222, %cst_95 {dimension_numbers = #tpu.dot_dimension_numbers<[1], [0], [0], [1], [0, 0, 1, 1], [], []>} : vector<32x32xf32>, vector<32x96xf32>, vector<32x96xf32> -> vector<32x96xf32>
    %232 = vector.broadcast %224 : vector<1x96xf32> to vector<32x96xf32>
    %233 = arith.addf %231, %232 : vector<32x96xf32>
    %234 = vector.shape_cast %233 : vector<32x96xf32> to vector<4x8x96xf32>
    %235 = vector.extract_strided_slice %234 {offsets = [0, 0, 0], sizes = [4, 8, 8], strides = [1, 1, 1]} : vector<4x8x96xf32> to vector<4x8x8xf32>
    %236 = vector.extract_strided_slice %234 {offsets = [0, 0, 32], sizes = [4, 8, 8], strides = [1, 1, 1]} : vector<4x8x96xf32> to vector<4x8x8xf32>
    %237 = vector.extract_strided_slice %234 {offsets = [0, 0, 64], sizes = [4, 8, 8], strides = [1, 1, 1]} : vector<4x8x96xf32> to vector<4x8x8xf32>
    "tpu.trace_start"() <{level = 10 : i32, message = "ble,bme->blm"}> : () -> ()
    %cst_96 = arith.constant dense<0.000000e+00> : vector<4x8x8xf32>
    %238 = tpu.matmul %235, %236, %cst_96 {dimension_numbers = #tpu.dot_dimension_numbers<[2], [2], [1], [1], [0, 0, 0, 1, 1, 1], [0], [0]>} : vector<4x8x8xf32>, vector<4x8x8xf32>, vector<4x8x8xf32> -> vector<4x8x8xf32>
    "tpu.trace_stop"() : () -> ()
    %cst_97 = arith.constant 0.353553385 : f32
    %239 = vector.broadcast %cst_97 : f32 to vector<4x8x8xf32>
    %240 = arith.mulf %238, %239 : vector<4x8x8xf32>
    %cst_98 = arith.constant -1.000000e+30 : f32
    %241 = vector.shape_cast %47 : vector<1x8x8xi1> to vector<1x8x8xi1>
    %242 = vector.broadcast %241 : vector<1x8x8xi1> to vector<4x8x8xi1>
    %243 = vector.broadcast %cst_98 : f32 to vector<4x8x8xf32>
    %244 = arith.select %242, %240, %243 : vector<4x8x8xi1>, vector<4x8x8xf32>
    %cst_99 = arith.constant dense<0xFF800000> : vector<4x8xf32>
    %245 = vector.multi_reduction <maximumf>, %244, %cst_99 [2] : vector<4x8x8xf32> to vector<4x8xf32>
    %246 = vector.shape_cast %245 : vector<4x8xf32> to vector<4x8x1xf32>
    %247 = vector.broadcast %246 : vector<4x8x1xf32> to vector<4x8x8xf32>
    %248 = arith.subf %244, %247 : vector<4x8x8xf32>
    %249 = math.exp %248 : vector<4x8x8xf32>
    %cst_100 = arith.constant dense<0.000000e+00> : vector<4x8xf32>
    %250 = vector.multi_reduction <add>, %249, %cst_100 [2] : vector<4x8x8xf32> to vector<4x8xf32>
    %251 = vector.shape_cast %250 : vector<4x8xf32> to vector<4x8x1xf32>
    %252 = tpu.reciprocal %251 {approx = true} : vector<4x8x1xf32> -> vector<4x8x1xf32>
    %253 = vector.broadcast %252 : vector<4x8x1xf32> to vector<4x8x8xf32>
    %254 = arith.mulf %249, %253 : vector<4x8x8xf32>
    "tpu.trace_start"() <{level = 10 : i32, message = "blm,bme->ble"}> : () -> ()
    %cst_101 = arith.constant dense<0.000000e+00> : vector<4x8x8xf32>
    %255 = tpu.matmul %254, %237, %cst_101 {dimension_numbers = #tpu.dot_dimension_numbers<[2], [1], [1], [2], [0, 0, 0, 1, 1, 2], [0], [0]>} : vector<4x8x8xf32>, vector<4x8x8xf32>, vector<4x8x8xf32> -> vector<4x8x8xf32>
    "tpu.trace_stop"() : () -> ()
    %256 = vector.extract_strided_slice %234 {offsets = [0, 0, 8], sizes = [4, 8, 8], strides = [1, 1, 1]} : vector<4x8x96xf32> to vector<4x8x8xf32>
    %257 = vector.extract_strided_slice %234 {offsets = [0, 0, 40], sizes = [4, 8, 8], strides = [1, 1, 1]} : vector<4x8x96xf32> to vector<4x8x8xf32>
    %258 = vector.extract_strided_slice %234 {offsets = [0, 0, 72], sizes = [4, 8, 8], strides = [1, 1, 1]} : vector<4x8x96xf32> to vector<4x8x8xf32>
    "tpu.trace_start"() <{level = 10 : i32, message = "ble,bme->blm"}> : () -> ()
    %cst_102 = arith.constant dense<0.000000e+00> : vector<4x8x8xf32>
    %259 = tpu.matmul %256, %257, %cst_102 {dimension_numbers = #tpu.dot_dimension_numbers<[2], [2], [1], [1], [0, 0, 0, 1, 1, 1], [0], [0]>} : vector<4x8x8xf32>, vector<4x8x8xf32>, vector<4x8x8xf32> -> vector<4x8x8xf32>
    "tpu.trace_stop"() : () -> ()
    %cst_103 = arith.constant 0.353553385 : f32
    %260 = vector.broadcast %cst_103 : f32 to vector<4x8x8xf32>
    %261 = arith.mulf %259, %260 : vector<4x8x8xf32>
    %cst_104 = arith.constant -1.000000e+30 : f32
    %262 = vector.shape_cast %47 : vector<1x8x8xi1> to vector<1x8x8xi1>
    %263 = vector.broadcast %262 : vector<1x8x8xi1> to vector<4x8x8xi1>
    %264 = vector.broadcast %cst_104 : f32 to vector<4x8x8xf32>
    %265 = arith.select %263, %261, %264 : vector<4x8x8xi1>, vector<4x8x8xf32>
    %cst_105 = arith.constant dense<0xFF800000> : vector<4x8xf32>
    %266 = vector.multi_reduction <maximumf>, %265, %cst_105 [2] : vector<4x8x8xf32> to vector<4x8xf32>
    %267 = vector.shape_cast %266 : vector<4x8xf32> to vector<4x8x1xf32>
    %268 = vector.broadcast %267 : vector<4x8x1xf32> to vector<4x8x8xf32>
    %269 = arith.subf %265, %268 : vector<4x8x8xf32>
    %270 = math.exp %269 : vector<4x8x8xf32>
    %cst_106 = arith.constant dense<0.000000e+00> : vector<4x8xf32>
    %271 = vector.multi_reduction <add>, %270, %cst_106 [2] : vector<4x8x8xf32> to vector<4x8xf32>
    %272 = vector.shape_cast %271 : vector<4x8xf32> to vector<4x8x1xf32>
    %273 = tpu.reciprocal %272 {approx = true} : vector<4x8x1xf32> -> vector<4x8x1xf32>
    %274 = vector.broadcast %273 : vector<4x8x1xf32> to vector<4x8x8xf32>
    %275 = arith.mulf %270, %274 : vector<4x8x8xf32>
    "tpu.trace_start"() <{level = 10 : i32, message = "blm,bme->ble"}> : () -> ()
    %cst_107 = arith.constant dense<0.000000e+00> : vector<4x8x8xf32>
    %276 = tpu.matmul %275, %258, %cst_107 {dimension_numbers = #tpu.dot_dimension_numbers<[2], [1], [1], [2], [0, 0, 0, 1, 1, 2], [0], [0]>} : vector<4x8x8xf32>, vector<4x8x8xf32>, vector<4x8x8xf32> -> vector<4x8x8xf32>
    "tpu.trace_stop"() : () -> ()
    %277 = vector.extract_strided_slice %234 {offsets = [0, 0, 16], sizes = [4, 8, 8], strides = [1, 1, 1]} : vector<4x8x96xf32> to vector<4x8x8xf32>
    %278 = vector.extract_strided_slice %234 {offsets = [0, 0, 48], sizes = [4, 8, 8], strides = [1, 1, 1]} : vector<4x8x96xf32> to vector<4x8x8xf32>
    %279 = vector.extract_strided_slice %234 {offsets = [0, 0, 80], sizes = [4, 8, 8], strides = [1, 1, 1]} : vector<4x8x96xf32> to vector<4x8x8xf32>
    "tpu.trace_start"() <{level = 10 : i32, message = "ble,bme->blm"}> : () -> ()
    %cst_108 = arith.constant dense<0.000000e+00> : vector<4x8x8xf32>
    %280 = tpu.matmul %277, %278, %cst_108 {dimension_numbers = #tpu.dot_dimension_numbers<[2], [2], [1], [1], [0, 0, 0, 1, 1, 1], [0], [0]>} : vector<4x8x8xf32>, vector<4x8x8xf32>, vector<4x8x8xf32> -> vector<4x8x8xf32>
    "tpu.trace_stop"() : () -> ()
    %cst_109 = arith.constant 0.353553385 : f32
    %281 = vector.broadcast %cst_109 : f32 to vector<4x8x8xf32>
    %282 = arith.mulf %280, %281 : vector<4x8x8xf32>
    %cst_110 = arith.constant -1.000000e+30 : f32
    %283 = vector.shape_cast %47 : vector<1x8x8xi1> to vector<1x8x8xi1>
    %284 = vector.broadcast %283 : vector<1x8x8xi1> to vector<4x8x8xi1>
    %285 = vector.broadcast %cst_110 : f32 to vector<4x8x8xf32>
    %286 = arith.select %284, %282, %285 : vector<4x8x8xi1>, vector<4x8x8xf32>
    %cst_111 = arith.constant dense<0xFF800000> : vector<4x8xf32>
    %287 = vector.multi_reduction <maximumf>, %286, %cst_111 [2] : vector<4x8x8xf32> to vector<4x8xf32>
    %288 = vector.shape_cast %287 : vector<4x8xf32> to vector<4x8x1xf32>
    %289 = vector.broadcast %288 : vector<4x8x1xf32> to vector<4x8x8xf32>
    %290 = arith.subf %286, %289 : vector<4x8x8xf32>
    %291 = math.exp %290 : vector<4x8x8xf32>
    %cst_112 = arith.constant dense<0.000000e+00> : vector<4x8xf32>
    %292 = vector.multi_reduction <add>, %291, %cst_112 [2] : vector<4x8x8xf32> to vector<4x8xf32>
    %293 = vector.shape_cast %292 : vector<4x8xf32> to vector<4x8x1xf32>
    %294 = tpu.reciprocal %293 {approx = true} : vector<4x8x1xf32> -> vector<4x8x1xf32>
    %295 = vector.broadcast %294 : vector<4x8x1xf32> to vector<4x8x8xf32>
    %296 = arith.mulf %291, %295 : vector<4x8x8xf32>
    "tpu.trace_start"() <{level = 10 : i32, message = "blm,bme->ble"}> : () -> ()
    %cst_113 = arith.constant dense<0.000000e+00> : vector<4x8x8xf32>
    %297 = tpu.matmul %296, %279, %cst_113 {dimension_numbers = #tpu.dot_dimension_numbers<[2], [1], [1], [2], [0, 0, 0, 1, 1, 2], [0], [0]>} : vector<4x8x8xf32>, vector<4x8x8xf32>, vector<4x8x8xf32> -> vector<4x8x8xf32>
    "tpu.trace_stop"() : () -> ()
    %298 = vector.extract_strided_slice %234 {offsets = [0, 0, 24], sizes = [4, 8, 8], strides = [1, 1, 1]} : vector<4x8x96xf32> to vector<4x8x8xf32>
    %299 = vector.extract_strided_slice %234 {offsets = [0, 0, 56], sizes = [4, 8, 8], strides = [1, 1, 1]} : vector<4x8x96xf32> to vector<4x8x8xf32>
    %300 = vector.extract_strided_slice %234 {offsets = [0, 0, 88], sizes = [4, 8, 8], strides = [1, 1, 1]} : vector<4x8x96xf32> to vector<4x8x8xf32>
    "tpu.trace_start"() <{level = 10 : i32, message = "ble,bme->blm"}> : () -> ()
    %cst_114 = arith.constant dense<0.000000e+00> : vector<4x8x8xf32>
    %301 = tpu.matmul %298, %299, %cst_114 {dimension_numbers = #tpu.dot_dimension_numbers<[2], [2], [1], [1], [0, 0, 0, 1, 1, 1], [0], [0]>} : vector<4x8x8xf32>, vector<4x8x8xf32>, vector<4x8x8xf32> -> vector<4x8x8xf32>
    "tpu.trace_stop"() : () -> ()
    %cst_115 = arith.constant 0.353553385 : f32
    %302 = vector.broadcast %cst_115 : f32 to vector<4x8x8xf32>
    %303 = arith.mulf %301, %302 : vector<4x8x8xf32>
    %cst_116 = arith.constant -1.000000e+30 : f32
    %304 = vector.shape_cast %47 : vector<1x8x8xi1> to vector<1x8x8xi1>
    %305 = vector.broadcast %304 : vector<1x8x8xi1> to vector<4x8x8xi1>
    %306 = vector.broadcast %cst_116 : f32 to vector<4x8x8xf32>
    %307 = arith.select %305, %303, %306 : vector<4x8x8xi1>, vector<4x8x8xf32>
    %cst_117 = arith.constant dense<0xFF800000> : vector<4x8xf32>
    %308 = vector.multi_reduction <maximumf>, %307, %cst_117 [2] : vector<4x8x8xf32> to vector<4x8xf32>
    %309 = vector.shape_cast %308 : vector<4x8xf32> to vector<4x8x1xf32>
    %310 = vector.broadcast %309 : vector<4x8x1xf32> to vector<4x8x8xf32>
    %311 = arith.subf %307, %310 : vector<4x8x8xf32>
    %312 = math.exp %311 : vector<4x8x8xf32>
    %cst_118 = arith.constant dense<0.000000e+00> : vector<4x8xf32>
    %313 = vector.multi_reduction <add>, %312, %cst_118 [2] : vector<4x8x8xf32> to vector<4x8xf32>
    %314 = vector.shape_cast %313 : vector<4x8xf32> to vector<4x8x1xf32>
    %315 = tpu.reciprocal %314 {approx = true} : vector<4x8x1xf32> -> vector<4x8x1xf32>
    %316 = vector.broadcast %315 : vector<4x8x1xf32> to vector<4x8x8xf32>
    %317 = arith.mulf %312, %316 : vector<4x8x8xf32>
    "tpu.trace_start"() <{level = 10 : i32, message = "blm,bme->ble"}> : () -> ()
    %cst_119 = arith.constant dense<0.000000e+00> : vector<4x8x8xf32>
    %318 = tpu.matmul %317, %300, %cst_119 {dimension_numbers = #tpu.dot_dimension_numbers<[2], [1], [1], [2], [0, 0, 0, 1, 1, 2], [0], [0]>} : vector<4x8x8xf32>, vector<4x8x8xf32>, vector<4x8x8xf32> -> vector<4x8x8xf32>
    "tpu.trace_stop"() : () -> ()
    %319 = tpu.concatenate %255, %276, %297, %318 in 2 : vector<4x8x8xf32>, vector<4x8x8xf32>, vector<4x8x8xf32>, vector<4x8x8xf32> -> vector<4x8x32xf32>
    %320 = vector.shape_cast %319 : vector<4x8x32xf32> to vector<32x32xf32>
    %cst_120 = arith.constant dense<0.000000e+00> : vector<32x32xf32>
    %321 = tpu.matmul %320, %223, %cst_120 {dimension_numbers = #tpu.dot_dimension_numbers<[1], [0], [0], [1], [0, 0, 1, 1], [], []>} : vector<32x32xf32>, vector<32x32xf32>, vector<32x32xf32> -> vector<32x32xf32>
    %322 = vector.broadcast %225 : vector<1x32xf32> to vector<32x32xf32>
    %323 = arith.addf %321, %322 : vector<32x32xf32>
    %324 = arith.addf %217, %323 : vector<32x32xf32>
    %cst_121 = arith.constant dense<0.000000e+00> : vector<32xf32>
    %325 = vector.multi_reduction <add>, %324, %cst_121 [1] : vector<32x32xf32> to vector<32xf32>
    %326 = vector.shape_cast %325 : vector<32xf32> to vector<32x1xf32>
    %cst_122 = arith.constant 3.200000e+01 : f32
    %327 = vector.broadcast %cst_122 : f32 to vector<32x1xf32>
    %328 = arith.divf %326, %327 : vector<32x1xf32>
    %329 = vector.broadcast %328 : vector<32x1xf32> to vector<32x32xf32>
    %330 = arith.subf %324, %329 : vector<32x32xf32>
    %331 = arith.mulf %330, %330 : vector<32x32xf32>
    %cst_123 = arith.constant dense<0.000000e+00> : vector<32xf32>
    %332 = vector.multi_reduction <add>, %331, %cst_123 [1] : vector<32x32xf32> to vector<32xf32>
    %333 = vector.shape_cast %332 : vector<32xf32> to vector<32x1xf32>
    %cst_124 = arith.constant 3.200000e+01 : f32
    %334 = vector.broadcast %cst_124 : f32 to vector<32x1xf32>
    %335 = arith.divf %333, %334 : vector<32x1xf32>
    %336 = vector.broadcast %328 : vector<32x1xf32> to vector<32x32xf32>
    %337 = arith.subf %324, %336 : vector<32x32xf32>
    %cst_125 = arith.constant 9.99999974E-6 : f32
    %338 = vector.broadcast %cst_125 : f32 to vector<32x1xf32>
    %339 = arith.addf %335, %338 : vector<32x1xf32>
    %340 = math.rsqrt %339 : vector<32x1xf32>
    %341 = vector.broadcast %340 : vector<32x1xf32> to vector<32x32xf32>
    %342 = arith.mulf %337, %341 : vector<32x32xf32>
    %343 = vector.broadcast %226 : vector<1x32xf32> to vector<32x32xf32>
    %344 = arith.mulf %342, %343 : vector<32x32xf32>
    %345 = vector.broadcast %227 : vector<1x32xf32> to vector<32x32xf32>
    %346 = arith.addf %344, %345 : vector<32x32xf32>
    %c1_126 = arith.constant 1 : index
    %c0_127 = arith.constant 0 : index
    %c0_128 = arith.constant 0 : index
    %347 = vector.load %arg9[%c1_126, %c0_127, %c0_128] : memref<2x32x2048xbf16, #tpu.memory_space<vmem>>, vector<1x32x2048xbf16>
    %348 = vector.shape_cast %347 : vector<1x32x2048xbf16> to vector<32x2048xbf16>
    %349 = arith.extf %348 : vector<32x2048xbf16> to vector<32x2048xf32>
    %c1_129 = arith.constant 1 : index
    %c0_130 = arith.constant 0 : index
    %c0_131 = arith.constant 0 : index
    %350 = vector.load %arg11[%c1_129, %c0_130, %c0_131] : memref<2x2048x32xbf16, #tpu.memory_space<vmem>>, vector<1x2048x32xbf16>
    %351 = vector.shape_cast %350 : vector<1x2048x32xbf16> to vector<2048x32xbf16>
    %352 = arith.extf %351 : vector<2048x32xbf16> to vector<2048x32xf32>
    %cst_132 = arith.constant dense<0.000000e+00> : vector<32x2048xf32>
    %353 = tpu.matmul %346, %349, %cst_132 {dimension_numbers = #tpu.dot_dimension_numbers<[1], [0], [0], [1], [0, 0, 1, 1], [], []>} : vector<32x32xf32>, vector<32x2048xf32>, vector<32x2048xf32> -> vector<32x2048xf32>
    %c1_133 = arith.constant 1 : index
    %c0_134 = arith.constant 0 : index
    %c0_135 = arith.constant 0 : index
    %354 = vector.load %arg10[%c1_133, %c0_134, %c0_135] : memref<2x1x2048xf32, #tpu.memory_space<vmem>>, vector<1x1x2048xf32>
    %355 = vector.shape_cast %354 : vector<1x1x2048xf32> to vector<1x2048xf32>
    %356 = vector.broadcast %355 : vector<1x2048xf32> to vector<32x2048xf32>
    %357 = arith.addf %353, %356 : vector<32x2048xf32>
    %cst_136 = arith.constant 0.000000e+00 : f32
    %358 = vector.broadcast %cst_136 : f32 to vector<32x2048xf32>
    %359 = arith.maximumf %357, %358 : vector<32x2048xf32>
    %cst_137 = arith.constant dense<0.000000e+00> : vector<32x32xf32>
    %360 = tpu.matmul %359, %352, %cst_137 {dimension_numbers = #tpu.dot_dimension_numbers<[1], [0], [0], [1], [0, 0, 1, 1], [], []>} : vector<32x2048xf32>, vector<2048x32xf32>, vector<32x32xf32> -> vector<32x32xf32>
    %361 = vector.broadcast %228 : vector<1x32xf32> to vector<32x32xf32>
    %362 = arith.addf %360, %361 : vector<32x32xf32>
    %363 = arith.addf %346, %362 : vector<32x32xf32>
    %cst_138 = arith.constant dense<0.000000e+00> : vector<32xf32>
    %364 = vector.multi_reduction <add>, %363, %cst_138 [1] : vector<32x32xf32> to vector<32xf32>
    %365 = vector.shape_cast %364 : vector<32xf32> to vector<32x1xf32>
    %cst_139 = arith.constant 3.200000e+01 : f32
    %366 = vector.broadcast %cst_139 : f32 to vector<32x1xf32>
    %367 = arith.divf %365, %366 : vector<32x1xf32>
    %368 = vector.broadcast %367 : vector<32x1xf32> to vector<32x32xf32>
    %369 = arith.subf %363, %368 : vector<32x32xf32>
    %370 = arith.mulf %369, %369 : vector<32x32xf32>
    %cst_140 = arith.constant dense<0.000000e+00> : vector<32xf32>
    %371 = vector.multi_reduction <add>, %370, %cst_140 [1] : vector<32x32xf32> to vector<32xf32>
    %372 = vector.shape_cast %371 : vector<32xf32> to vector<32x1xf32>
    %cst_141 = arith.constant 3.200000e+01 : f32
    %373 = vector.broadcast %cst_141 : f32 to vector<32x1xf32>
    %374 = arith.divf %372, %373 : vector<32x1xf32>
    %375 = vector.broadcast %367 : vector<32x1xf32> to vector<32x32xf32>
    %376 = arith.subf %363, %375 : vector<32x32xf32>
    %cst_142 = arith.constant 9.99999974E-6 : f32
    %377 = vector.broadcast %cst_142 : f32 to vector<32x1xf32>
    %378 = arith.addf %374, %377 : vector<32x1xf32>
    %379 = math.rsqrt %378 : vector<32x1xf32>
    %380 = vector.broadcast %379 : vector<32x1xf32> to vector<32x32xf32>
    %381 = arith.mulf %376, %380 : vector<32x32xf32>
    %382 = vector.broadcast %229 : vector<1x32xf32> to vector<32x32xf32>
    %383 = arith.mulf %381, %382 : vector<32x32xf32>
    %384 = vector.broadcast %230 : vector<1x32xf32> to vector<32x32xf32>
    %385 = arith.addf %383, %384 : vector<32x32xf32>
    %c4 = arith.constant 4 : index
    %c0_143 = arith.constant 0 : index
    %c0_144 = arith.constant 0 : index
    %386 = vector.load %arg5[%c4, %c0_143, %c0_144] : memref<6x48x42xf32, #tpu.memory_space<vmem>>, vector<1x48x42xf32>
    %387 = vector.shape_cast %386 : vector<1x48x42xf32> to vector<48x42xf32>
    %388 = vector.extract_strided_slice %387 {offsets = [0, 0], sizes = [32, 16], strides = [1, 1]} : vector<48x42xf32> to vector<32x16xf32>
    %c4_145 = arith.constant 4 : index
    %c0_146 = arith.constant 0 : index
    %389 = vector.load %arg6[%c4_145, %c0_146] : memref<8x42xf32, #tpu.memory_space<vmem>>, vector<1x16xf32>
    %c5 = arith.constant 5 : index
    %c0_147 = arith.constant 0 : index
    %c0_148 = arith.constant 0 : index
    %390 = vector.load %arg5[%c5, %c0_147, %c0_148] : memref<6x48x42xf32, #tpu.memory_space<vmem>>, vector<1x48x42xf32>
    %391 = vector.shape_cast %390 : vector<1x48x42xf32> to vector<48x42xf32>
    %392 = vector.extract_strided_slice %391 {offsets = [0, 0], sizes = [16, 16], strides = [1, 1]} : vector<48x42xf32> to vector<16x16xf32>
    %c5_149 = arith.constant 5 : index
    %c0_150 = arith.constant 0 : index
    %393 = vector.load %arg6[%c5_149, %c0_150] : memref<8x42xf32, #tpu.memory_space<vmem>>, vector<1x16xf32>
    %cst_151 = arith.constant dense<0.000000e+00> : vector<32x16xf32>
    %394 = tpu.matmul %385, %388, %cst_151 {dimension_numbers = #tpu.dot_dimension_numbers<[1], [0], [0], [1], [0, 0, 1, 1], [], []>} : vector<32x32xf32>, vector<32x16xf32>, vector<32x16xf32> -> vector<32x16xf32>
    %395 = vector.broadcast %389 : vector<1x16xf32> to vector<32x16xf32>
    %396 = arith.addf %394, %395 : vector<32x16xf32>
    %cst_152 = arith.constant 0.000000e+00 : f32
    %397 = vector.broadcast %cst_152 : f32 to vector<32x16xf32>
    %398 = arith.cmpf oge, %396, %397 : vector<32x16xf32>
    %cst_153 = arith.constant 0.00999999977 : f32
    %399 = vector.broadcast %cst_153 : f32 to vector<32x16xf32>
    %400 = arith.mulf %399, %396 : vector<32x16xf32>
    %401 = arith.select %398, %396, %400 : vector<32x16xi1>, vector<32x16xf32>
    %cst_154 = arith.constant dense<0.000000e+00> : vector<32x16xf32>
    %402 = tpu.matmul %401, %392, %cst_154 {dimension_numbers = #tpu.dot_dimension_numbers<[1], [0], [0], [1], [0, 0, 1, 1], [], []>} : vector<32x16xf32>, vector<16x16xf32>, vector<32x16xf32> -> vector<32x16xf32>
    %403 = vector.broadcast %393 : vector<1x16xf32> to vector<32x16xf32>
    %404 = arith.addf %402, %403 : vector<32x16xf32>
    %405 = tpu.concatenate %20, %44, %404 in 1 : vector<32x16xf32>, vector<32x16xf32>, vector<32x16xf32> -> vector<32x48xf32>
    %406 = vector.shape_cast %405 : vector<32x48xf32> to vector<4x8x48xf32>
    %c0_155 = arith.constant 0 : index
    %c0_156 = arith.constant 0 : index
    %c0_157 = arith.constant 0 : index
    %407 = vector.load %arg12[%c0_155, %c0_156, %c0_157] : memref<8x48x168xbf16, #tpu.memory_space<vmem>>, vector<8x48x168xbf16>
    %408 = arith.extf %407 : vector<8x48x168xbf16> to vector<8x48x168xf32>
    "tpu.trace_start"() <{level = 10 : i32, message = "blc,lch->lbh"}> : () -> ()
    %cst_158 = arith.constant dense<0.000000e+00> : vector<8x4x168xf32>
    %409 = tpu.matmul %406, %408, %cst_158 {dimension_numbers = #tpu.dot_dimension_numbers<[2], [1], [0], [2], [0, 1, 0, 0, 1, 2], [1], [0]>} : vector<4x8x48xf32>, vector<8x48x168xf32>, vector<8x4x168xf32> -> vector<8x4x168xf32>
    "tpu.trace_stop"() : () -> ()
    %cst_159 = arith.constant dense<0.000000e+00> : vector<4x168xf32>
    %410 = vector.multi_reduction <add>, %409, %cst_159 [0] : vector<8x4x168xf32> to vector<4x168xf32>
    %c0_160 = arith.constant 0 : index
    %c0_161 = arith.constant 0 : index
    %411 = vector.load %arg13[%c0_160, %c0_161] : memref<8x168xf32, #tpu.memory_space<vmem>>, vector<1x168xf32>
    %412 = vector.broadcast %411 : vector<1x168xf32> to vector<4x168xf32>
    %413 = arith.addf %410, %412 : vector<4x168xf32>
    %cst_162 = arith.constant 0.000000e+00 : f32
    %414 = vector.broadcast %cst_162 : f32 to vector<4x168xf32>
    %415 = arith.cmpf oge, %413, %414 : vector<4x168xf32>
    %cst_163 = arith.constant 0.00999999977 : f32
    %416 = vector.broadcast %cst_163 : f32 to vector<4x168xf32>
    %417 = arith.mulf %416, %413 : vector<4x168xf32>
    %418 = arith.select %415, %413, %417 : vector<4x168xi1>, vector<4x168xf32>
    %c0_164 = arith.constant 0 : index
    %c0_165 = arith.constant 0 : index
    %419 = vector.load %arg14[%c0_164, %c0_165] : memref<168x42xf32, #tpu.memory_space<vmem>>, vector<168x42xf32>
    %cst_166 = arith.constant dense<0.000000e+00> : vector<4x42xf32>
    %420 = tpu.matmul %418, %419, %cst_166 {dimension_numbers = #tpu.dot_dimension_numbers<[1], [0], [0], [1], [0, 0, 1, 1], [], []>} : vector<4x168xf32>, vector<168x42xf32>, vector<4x42xf32> -> vector<4x42xf32>
    %c1_167 = arith.constant 1 : index
    %c0_168 = arith.constant 0 : index
    %421 = vector.load %arg13[%c1_167, %c0_168] : memref<8x168xf32, #tpu.memory_space<vmem>>, vector<1x42xf32>
    %422 = vector.broadcast %421 : vector<1x42xf32> to vector<4x42xf32>
    %423 = arith.addf %420, %422 : vector<4x42xf32>
    %cst_169 = arith.constant 0.000000e+00 : f32
    %424 = vector.broadcast %cst_169 : f32 to vector<4x42xf32>
    %425 = arith.cmpf oge, %423, %424 : vector<4x42xf32>
    %cst_170 = arith.constant 0.00999999977 : f32
    %426 = vector.broadcast %cst_170 : f32 to vector<4x42xf32>
    %427 = arith.mulf %426, %423 : vector<4x42xf32>
    %428 = arith.select %425, %423, %427 : vector<4x42xi1>, vector<4x42xf32>
    %c0_171 = arith.constant 0 : index
    %c0_172 = arith.constant 0 : index
    %429 = vector.load %arg15[%c0_171, %c0_172] : memref<42x10xf32, #tpu.memory_space<vmem>>, vector<42x10xf32>
    %cst_173 = arith.constant dense<0.000000e+00> : vector<4x10xf32>
    %430 = tpu.matmul %428, %429, %cst_173 {dimension_numbers = #tpu.dot_dimension_numbers<[1], [0], [0], [1], [0, 0, 1, 1], [], []>} : vector<4x42xf32>, vector<42x10xf32>, vector<4x10xf32> -> vector<4x10xf32>
    %c2_174 = arith.constant 2 : index
    %c0_175 = arith.constant 0 : index
    %431 = vector.load %arg13[%c2_174, %c0_175] : memref<8x168xf32, #tpu.memory_space<vmem>>, vector<1x10xf32>
    %432 = vector.broadcast %431 : vector<1x10xf32> to vector<4x10xf32>
    %433 = arith.addf %430, %432 : vector<4x10xf32>
    %cst_176 = arith.constant 0.000000e+00 : f32
    %434 = vector.broadcast %cst_176 : f32 to vector<4x10xf32>
    %435 = arith.cmpf oge, %433, %434 : vector<4x10xf32>
    %cst_177 = arith.constant 0.00999999977 : f32
    %436 = vector.broadcast %cst_177 : f32 to vector<4x10xf32>
    %437 = arith.mulf %436, %433 : vector<4x10xf32>
    %438 = arith.select %435, %433, %437 : vector<4x10xi1>, vector<4x10xf32>
    %c0_178 = arith.constant 0 : index
    %c0_179 = arith.constant 0 : index
    %439 = vector.load %arg16[%c0_178, %c0_179] : memref<10x2xf32, #tpu.memory_space<vmem>>, vector<10x2xf32>
    %cst_180 = arith.constant dense<0.000000e+00> : vector<4x2xf32>
    %440 = tpu.matmul %438, %439, %cst_180 {dimension_numbers = #tpu.dot_dimension_numbers<[1], [0], [0], [1], [0, 0, 1, 1], [], []>} : vector<4x10xf32>, vector<10x2xf32>, vector<4x2xf32> -> vector<4x2xf32>
    %c3_181 = arith.constant 3 : index
    %c0_182 = arith.constant 0 : index
    %441 = vector.load %arg13[%c3_181, %c0_182] : memref<8x168xf32, #tpu.memory_space<vmem>>, vector<1x2xf32>
    %442 = vector.broadcast %441 : vector<1x2xf32> to vector<4x2xf32>
    %443 = arith.addf %440, %442 : vector<4x2xf32>
    %c0_183 = arith.constant 0 : index
    %c0_184 = arith.constant 0 : index
    %c0_185 = arith.constant 0 : index
    %444 = vector.load %arg17[%c0_183, %c0_184, %c0_185] : memref<1x4x2xf32, #tpu.memory_space<vmem>>, vector<1x4x2xf32>
    %445 = vector.shape_cast %444 : vector<1x4x2xf32> to vector<4x2xf32>
    %446 = vector.shape_cast %443 : vector<4x2xf32> to vector<1x4x2xf32>
    tpu.vector_store %arg17[%c0_183, %c0_184, %c0_185], %446 {strides = array<i32>} : memref<1x4x2xf32, #tpu.memory_space<vmem>>, vector<1x4x2xf32>,
    return
  }
  func.func @transform_0(%arg0: i32) -> (i32, i32, i32) {
    %c0_i32 = arith.constant 0 : i32
    %c0_i32_0 = arith.constant 0 : i32
    %c0_i32_1 = arith.constant 0 : i32
    return %arg0, %c0_i32, %c0_i32_0 : i32, i32, i32
  }
  func.func @transform_1(%arg0: i32) -> (i32, i32, i32) {
    %c0_i32 = arith.constant 0 : i32
    %c0_i32_0 = arith.constant 0 : i32
    %c0_i32_1 = arith.constant 0 : i32
    return %arg0, %c0_i32, %c0_i32_0 : i32, i32, i32
  }
  func.func @transform_2(%arg0: i32) -> (i32, i32, i32) {
    %c0_i32 = arith.constant 0 : i32
    %c0_i32_0 = arith.constant 0 : i32
    %c0_i32_1 = arith.constant 0 : i32
    return %arg0, %c0_i32, %c0_i32_0 : i32, i32, i32
  }
  func.func @transform_3(%arg0: i32) -> (i32, i32, i32) {
    %c0_i32 = arith.constant 0 : i32
    %c0_i32_0 = arith.constant 0 : i32
    %c0_i32_1 = arith.constant 0 : i32
    return %arg0, %c0_i32, %c0_i32_0 : i32, i32, i32
  }
  func.func @transform_4(%arg0: i32) -> (i32, i32, i32) {
    %c0_i32 = arith.constant 0 : i32
    %c0_i32_0 = arith.constant 0 : i32
    %c0_i32_1 = arith.constant 0 : i32
    %c0_i32_2 = arith.constant 0 : i32
    return %c0_i32, %c0_i32_0, %c0_i32_1 : i32, i32, i32
  }
  func.func @transform_5(%arg0: i32) -> (i32, i32) {
    %c0_i32 = arith.constant 0 : i32
    %c0_i32_0 = arith.constant 0 : i32
    %c0_i32_1 = arith.constant 0 : i32
    return %c0_i32, %c0_i32_0 : i32, i32
  }
  func.func @transform_6(%arg0: i32) -> (i32, i32, i32) {
    %c0_i32 = arith.constant 0 : i32
    %c0_i32_0 = arith.constant 0 : i32
    %c0_i32_1 = arith.constant 0 : i32
    %c0_i32_2 = arith.constant 0 : i32
    return %c0_i32, %c0_i32_0, %c0_i32_1 : i32, i32, i32
  }
  func.func @transform_7(%arg0: i32) -> (i32, i32, i32) {
    %c0_i32 = arith.constant 0 : i32
    %c0_i32_0 = arith.constant 0 : i32
    %c0_i32_1 = arith.constant 0 : i32
    %c0_i32_2 = arith.constant 0 : i32
    return %c0_i32, %c0_i32_0, %c0_i32_1 : i32, i32, i32
  }
  func.func @transform_8(%arg0: i32) -> (i32, i32, i32) {
    %c0_i32 = arith.constant 0 : i32
    %c0_i32_0 = arith.constant 0 : i32
    %c0_i32_1 = arith.constant 0 : i32
    %c0_i32_2 = arith.constant 0 : i32
    return %c0_i32, %c0_i32_0, %c0_i32_1 : i32, i32, i32
  }
  func.func @transform_9(%arg0: i32) -> (i32, i32, i32) {
    %c0_i32 = arith.constant 0 : i32
    %c0_i32_0 = arith.constant 0 : i32
    %c0_i32_1 = arith.constant 0 : i32
    %c0_i32_2 = arith.constant 0 : i32
    return %c0_i32, %c0_i32_0, %c0_i32_1 : i32, i32, i32
  }
  func.func @transform_10(%arg0: i32) -> (i32, i32, i32) {
    %c0_i32 = arith.constant 0 : i32
    %c0_i32_0 = arith.constant 0 : i32
    %c0_i32_1 = arith.constant 0 : i32
    %c0_i32_2 = arith.constant 0 : i32
    return %c0_i32, %c0_i32_0, %c0_i32_1 : i32, i32, i32
  }
  func.func @transform_11(%arg0: i32) -> (i32, i32, i32) {
    %c0_i32 = arith.constant 0 : i32
    %c0_i32_0 = arith.constant 0 : i32
    %c0_i32_1 = arith.constant 0 : i32
    %c0_i32_2 = arith.constant 0 : i32
    return %c0_i32, %c0_i32_0, %c0_i32_1 : i32, i32, i32
  }
  func.func @transform_12(%arg0: i32) -> (i32, i32) {
    %c0_i32 = arith.constant 0 : i32
    %c0_i32_0 = arith.constant 0 : i32
    %c0_i32_1 = arith.constant 0 : i32
    return %c0_i32, %c0_i32_0 : i32, i32
  }
  func.func @transform_13(%arg0: i32) -> (i32, i32) {
    %c0_i32 = arith.constant 0 : i32
    %c0_i32_0 = arith.constant 0 : i32
    %c0_i32_1 = arith.constant 0 : i32
    return %c0_i32, %c0_i32_0 : i32, i32
  }
  func.func @transform_14(%arg0: i32) -> (i32, i32) {
    %c0_i32 = arith.constant 0 : i32
    %c0_i32_0 = arith.constant 0 : i32
    %c0_i32_1 = arith.constant 0 : i32
    return %c0_i32, %c0_i32_0 : i32, i32
  }
  func.func @transform_15(%arg0: i32) -> (i32, i32) {
    %c0_i32 = arith.constant 0 : i32
    %c0_i32_0 = arith.constant 0 : i32
    %c0_i32_1 = arith.constant 0 : i32
    return %c0_i32, %c0_i32_0 : i32, i32
  }
  func.func @transform_16(%arg0: i32) -> (i32, i32, i32) {
    %c0_i32 = arith.constant 0 : i32
    %c0_i32_0 = arith.constant 0 : i32
    %c0_i32_1 = arith.constant 0 : i32
    return %arg0, %c0_i32, %c0_i32_0 : i32, i32, i32
  }
}

</mosaic_0001>

<bundles_post_ra>
// kernel: forward.1
= control target key start
LH: loop header
LB: loop body
LE: loop exit
PB: predicated region body
PF: predicated region fallthrough
CT: control target
= control target key end

     0   :  { %s10262_s21 = smov 0   ;;  %s13256_s0 = inlined_call_operand.vmem [shape: f32[2,32,20], index: 0, kind: input, shape index: {}]   ;;  %s13257_s1 = inlined_call_operand.vmem [shape: f32[2,32,32], index: 1, kind: input, shape index: {}]   ;;  %s13258_s2 = inlined_call_operand.vmem [shape: f32[2,32,16], index: 2, kind: input, shape index: {}]   ;;  %s13259_s3 = inlined_call_operand.vmem [shape: f32[2,32,32], index: 3, kind: input, shape index: {}]   ;;  %s13260_s4 = inlined_call_operand.vmem [shape: f32[6,48,42], index: 4, kind: input, shape index: {}]   ;;  %s13261_s5 = inlined_call_operand.vmem [shape: f32[8,42], index: 5, kind: input, shape index: {}]   ;;  %s13262_s6 = inlined_call_operand.vmem [shape: f32[2,32,128], index: 6, kind: input, shape index: {}]   ;;  %s13263_s7 = inlined_call_operand.vmem [shape: f32[2,8,128], index: 7, kind: input, shape index: {}]   ;;  %s13264_s8 = inlined_call_operand.vmem [shape: bf16[2,32,2048], index: 8, kind: input, shape index: {}]   ;;  %s13265_s9 = inlined_call_operand.vmem [shape: f32[2,1,2048], index: 9, kind: input, shape index: {}]   ;;  %s13266_s10 = inlined_call_operand.vmem [shape: bf16[2,2048,32], index: 10, kind: input, shape index: {}]   ;;  %s13267_s11 = inlined_call_operand.vmem [shape: bf16[8,48,168], index: 11, kind: input, shape index: {}]   ;;  %s13268_s12 = inlined_call_operand.vmem [shape: f32[8,168], index: 12, kind: input, shape index: {}]   ;;  %s13269_s13 = inlined_call_operand.vmem [shape: f32[168,42], index: 13, kind: input, shape index: {}]   ;;  %s13270_s14 = inlined_call_operand.vmem [shape: f32[42,10], index: 14, kind: input, shape index: {}]   ;;  %s13271_s15 = inlined_call_operand.vmem [shape: f32[10,2], index: 15, kind: input, shape index: {}]   ;;  %s13272_s16 = inlined_call_operand.vmem [shape: f32[2,4,2], index: 16, kind: output, shape index: {}]  }
   0x1   :  { %13303 = sst [smem:[#allocation13_spill]] %s13256_s0 }
   0x2 LB: > { %s7986_s22 = sadd.s32 4294967295, %s10157_s21   ;;  %p7990_p0 = scmp.ge.s32.totalorder %s10157_s21, 1  ;;  %s10157_s21 = sphi %s10262_s21, %s26_s21  }
   0x3   : > { %p492_p1 = scmp.lt.s32.totalorder %s10157_s21, 3 }
   0x5   : > { %p493_p2 = pnand %p7990_p0, %p492_p1 }
   0x7   : > { %496 = sbr.rel (%p493_p2) target bundleno = 7781 (0x1e65), region = 84 }
   0xc   : > { %v586_v0 = vld [vmem:[%s13260_s4 + $0x10] sm:$0xff]  ;;  %vm610_vm0 = vcmask 1043456   ;;  %v585_v1 = vld [vmem:[%s13260_s4 + $0x8] sm:$0xff]  ;;  %p556_p3 = scmp.lt.s32.totalorder %s7986_s22, 1  ;;  %v584_v2 = vld [vmem:[%s13260_s4] sm:$0xff]  ;;  %vm597_vm1 = vcmask 162816  }
   0xd   : > { %8006 = vmatpush.msk.msra.mxu0 %vm610_vm0, %v586_v0  ;;  %9885 = vmatpush.msk.msra.mxu2 %vm610_vm0, %v586_v0  ;;  %v8019_v3 = vld [vmem:[%s13260_s4 + $0x78] sm:$0xff]  ;;  %s13304_s19 = sld [smem:[#allocation13_spill]]  ;;  %v8018_v4 = vld [vmem:[%s13260_s4 + $0x70] sm:$0xff]  ;;  %v8017_v7 = vld [vmem:[%s13260_s4 + $0x68] sm:$0xff]  ;;  %vm669_vm2 = vcmask 1041408   ;;  %vm717_vm3 = vcmask 261120  }
   0xe   : > { %s13340_s22 = smov (!%p556_p3, %s7986_s22), 1  ;;  %v8005_v8 = vld [vmem:[%s13260_s4 + $0x58] sm:$0xff]  ;;  %v8016_v9 = vld [vmem:[%s13260_s4 + $0x60] sm:$0xff]  ;;  %v8004_v10 = vld [vmem:[%s13260_s4 + $0x50] sm:$0xff]  ;;  %vm656_vm5 = vcmask 343040   ;;  %vm772_vm8 = vcmask 130048  }
   0xf   : > { %628 = vmatpush.msra.mxu0 %v585_v1  ;;  %9886 = vmatpush.msra.mxu2 %v585_v1  ;;  %s10287_s0 = sshll.u32 %s13340_s22, 5  ;;  %v8003_v11 = vld [vmem:[%s13260_s4 + $0x48] sm:$0xff]  ;;  %v8002_v18 = vld [vmem:[%s13260_s4 + $0x40] sm:$0xff]  ;;  %v8001_v19 = vld [vmem:[%s13260_s4 + $0x38] sm:$0xff]  ;;  %s10159_s23 = smov 96   ;;  %vm879_vm14 = vcmask 64512  }
  0x10   : > { %8011 = vmatpush.msk.msra.mxu1 %vm669_vm2, %v8005_v8  ;;  %v8000_v20 = vld [vmem:[%s13260_s4 + $0x30] sm:$0xff]  ;;  %v8021_v21 = vld [vmem:[%s13260_s4 + $0x98] sm:$0xff]  ;;  %v9974_v23 = vld [vmem:[%s13261_s5] ss:$0 sm:$0xff]  ;;  %s10385_s27 = scalar_lea.vmem %s13259_s3, %s10287_s0  ;;  %s10399_s30 = scalar_lea.vmem %s13258_s2, %s10287_s0 }
  0x11   : > { %629 = vmatpush.msra.mxu0 %v584_v2  ;;  %9887 = vmatpush.msra.mxu2 %v584_v2  ;;  %v8020_v22 = vld [vmem:[%s13260_s4 + $0x90] sm:$0xff]  ;;  %v9975_v32 = vld [vmem:[%s13261_s5 + $0x2] ss:$0 sm:$0xff]  ;;  %v10349_v33 = vld [vmem:[%s13262_s6 + $0x18] sm:$0xff]  ;;  %s10161_s24 = smov 64   ;;  %s13295_s25 = smov 120  }
  0x12   : > { %684 = vmatpush.msra.mxu1 %v8004_v10  ;;  %799 = vmatpush.msra.mxu3 %v8021_v21  ;;  %v10354_v34 = vld [vmem:[%s13262_s6 + $0x10] sm:$0xff]  ;;  %v10362_v37 = vld [vmem:[%s13262_s6 + $0x8] sm:$0xff]  ;;  %v10367_v38 = vld [vmem:[%s13262_s6] sm:$0xff]  ;;  %s13291_s26 = smov 56   ;;  %s13293_s28 = smov 112  }
  0x13   : > { %s560_s20 = scalar_lea.vmem %s13304_s19, %s10287_s0  ;;  %742 = vmatpush.msrb.mxu2 %v8019_v3  ;;  %s565_s19 = scalar_lea.vmem %s13257_s1, %s10287_s0  ;;  %v9934_v36 = vpack.i.bf16 %v10354_v34, %v10349_v33  ;;  %v9939_v40 = vpack.i.bf16 %v10367_v38, %v10362_v37  ;;  %v825_v63 = vld [vmem:[%s10385_s27] sm:$0xff]  ;;  %v826_v0 = vld [vmem:[%s10385_s27 + $0x8] sm:$0xff]  ;;  %v827_v1 = vld [vmem:[%s10385_s27 + $0x10] sm:$0xff] }
  0x14   : > { %v580_v5 = vld [vmem:[%s560_s20] sm:$0xff]  ;;  %v583_v6 = vld [vmem:[%s560_s20 + $0x18] sm:$0xff]  ;;  %v581_v12 = vld [vmem:[%s560_s20 + $0x8] sm:$0xff]  ;;  %685 = vmatpush.msra.mxu1 %v8003_v11  ;;  %800 = vmatpush.msra.mxu3 %v8020_v22  ;;  %s13289_s29 = smov 80   ;;  %s13273_s17 = smov 72  }
  0x15   : > { %8007 = vmatmul.msk.f32.vlgmr.msra.gmra.mxu0 %vm597_vm1, %v580_v5  ;;  %8010 = vmatmul.msk.f32.vlgmr.msra.gmra.mxu2 %vm597_vm1, %v583_v6  ;;  %v702_v13 = vld [vmem:[%s565_s19] sm:$0xff]  ;;  %v582_v14 = vld [vmem:[%s560_s20 + $0x10] sm:$0xff]  ;;  %v703_v15 = vld [vmem:[%s565_s19 + $0x8] sm:$0xff]  ;;  %s13275_s20 = smov 48   ;;  %s13277_s18 = smov 104  }
  0x16   : > { %743 = vmatpush.msrb.mxu2 %v8018_v4  ;;  %v704_v16 = vld [vmem:[%s565_s19 + $0x10] sm:$0xff]  ;;  %v705_v17 = vld [vmem:[%s565_s19 + $0x18] sm:$0xff]  ;;  %686 = vmatpush.msra.mxu1 %v8002_v18  ;;  %v9977_v3 = vld [vmem:[%s13261_s5 + $0x3] ss:$0 sm:$0xff]  ;;  %s10160_s19 = smov 88   ;;  %s13287_s0 = smov 40  }
  0x17   : > { %859 = vmatpush.msrb.mxu3 %v10349_v33  ;;  %v828_v2 = vld [vmem:[%s10385_s27 + $0x18] sm:$0xff]  ;;  %v814_v5 = vld [vmem:[%s10399_s30] sm:$0xff] }
  0x18   : > { %744 = vmatpush.msrb.mxu2 %v8017_v7  ;;  %687 = vmatpush.msra.mxu1 %v8001_v19 }
  0x19   : > { %860 = vmatpush.msrb.mxu3 %v10354_v34 }
  0x1a   : > { %745 = vmatpush.msrb.mxu2 %v8016_v9  ;;  %688 = vmatpush.msra.mxu1 %v8000_v20 }
  0x1b   : > { %861 = vmatpush.msrb.mxu3 %v10362_v37 }
  0x1d   : > { %8008 = vmatmul.msk.f32.gmra.mxu0 %vm597_vm1, %v581_v12  ;;  %8022 = vmatmul.msk.f32.vlgmr.msrb.gmra.mxu2 %vm717_vm3, %v702_v13  ;;  %v833_v12 = vld [vmem:[%s13263_s7] sm:$0xff] }
  0x1e   : > { %862 = vmatpush.msrb.mxu3 %v10367_v38  ;;  %v10416_v13 = vperm.slane %v833_v12, 0 }
  0x25   : > { %8009 = vmatmul.msk.f32.gmra.mxu0 %vm597_vm1, %v582_v14  ;;  %8023 = vmatmul.msk.f32.gmra.mxu2 %vm717_vm3, %v703_v15  ;;  %vm2003_vm1 = vcmask 195584  }
  0x2d   : > { %8024 = vmatmul.msk.f32.gmra.mxu2 %vm717_vm3, %v704_v16 }
  0x35   : > { %8025 = vmatmul.msk.f32.gmra.mxu2 %vm717_vm3, %v705_v17 }
  0x92   : > { %v631_v24 = vpop.f32.mrf.mxu0 }
  0x93   : > { %v632_v25 = vadd.f32 %v9974_v23, %v631_v24 }
  0x95   : > { %vm643_vm4 = vcmp.ge.f32.partialorder %v632_v25, 0.0  ;;  %v647_v26 = vmul.f32 0.01, %v632_v25 }
  0x97   : > { %v651_v27 = vsel %vm643_vm4, %v632_v25, %v647_v26 }
  0x98   : > { %v640_v28 = vpop.f32.mrf.mxu2  ;;  %8012 = vmatmul.msk.f32.vlgmr.msra.gmra.mxu1 %vm656_vm5, %v651_v27  ;;  %v822_v27 = vlaneseq }
  0x99   : > { %v641_v47 = vadd.f32 %v9974_v23, %v640_v28 }
  0x9a   : > { %v634_v29 = vpop.f32.mrf.mxu0 }
  0x9b   : > { %v635_v30 = vadd.f32 %v9974_v23, %v634_v29  ;;  %v650_v52 = vmul.f32 0.01, %v641_v47  ;;  %vm646_vm11 = vcmp.ge.f32.partialorder %v641_v47, 0.0  ;;  %v10456_v29 = vand.u32 127, %v822_v27 }
  0x9d   : > { %vm644_vm6 = vcmp.ge.f32.partialorder %v635_v30, 0.0  ;;  %v648_v31 = vmul.f32 0.01, %v635_v30  ;;  %v654_v54 = vsel %vm646_vm11, %v641_v47, %v650_v52  ;;  %13312 = vst [vmem:[#allocation9_spill] sm:$0xff] %v10456_v29  ;;  %vm824_vm15 = vcmp.lt.s32.totalorder %v10456_v29, 7 }
  0x9f   : > { %v652_v35 = vsel %vm644_vm6, %v635_v30, %v648_v31 }
  0xa0   : > { %8013 = vmatmul.msk.f32.gmra.mxu1 %vm656_vm5, %v652_v35  ;;  %v747_v39 = vpop.f32.mrf.mxu2 }
  0xa1   : > { %v748_v41 = vadd.f32 %v9975_v32, %v747_v39 }
  0xa2   : > { %v637_v42 = vpop.f32.mrf.mxu0 }
  0xa3   : > { %v638_v43 = vadd.f32 %v9974_v23, %v637_v42  ;;  %vm759_vm7 = vcmp.ge.f32.partialorder %v748_v41, 0.0  ;;  %v763_v44 = vmul.f32 0.01, %v748_v41 }
  0xa5   : > { %v767_v45 = vsel %vm759_vm7, %v748_v41, %v763_v44  ;;  %vm645_vm9 = vcmp.ge.f32.partialorder %v638_v43, 0.0  ;;  %v649_v46 = vmul.f32 0.01, %v638_v43 }
  0xa6   : > { %8026 = vmatmul.msk.f32.vlgmr.msra.gmra.mxu3 %vm772_vm8, %v767_v45 }
  0xa7   : > { %v653_v48 = vsel %vm645_vm9, %v638_v43, %v649_v46 }
  0xa8   : > { %8014 = vmatmul.msk.f32.gmra.mxu1 %vm656_vm5, %v653_v48  ;;  %v750_v49 = vpop.f32.mrf.mxu2 }
  0xa9   : > { %v751_v50 = vadd.f32 %v9975_v32, %v750_v49 }
  0xab   : > { %vm760_vm10 = vcmp.ge.f32.partialorder %v751_v50, 0.0  ;;  %v764_v51 = vmul.f32 0.01, %v751_v50 }
  0xad   : > { %v768_v53 = vsel %vm760_vm10, %v751_v50, %v764_v51 }
  0xae   : > { %8027 = vmatmul.msk.f32.gmra.mxu3 %vm772_vm8, %v768_v53 }
  0xb0   : > { %8015 = vmatmul.msk.f32.gmra.mxu1 %vm656_vm5, %v654_v54  ;;  %v753_v55 = vpop.f32.mrf.mxu2 }
  0xb1   : > { %v754_v56 = vadd.f32 %v9975_v32, %v753_v55 }
  0xb3   : > { %vm761_vm12 = vcmp.ge.f32.partialorder %v754_v56, 0.0  ;;  %v765_v57 = vmul.f32 0.01, %v754_v56 }
  0xb5   : > { %v769_v58 = vsel %vm761_vm12, %v754_v56, %v765_v57 }
  0xb6   : > { %8028 = vmatmul.msk.f32.gmra.mxu3 %vm772_vm8, %v769_v58 }
  0xb8   : > { %v756_v59 = vpop.f32.mrf.mxu2 }
  0xb9   : > { %v757_v60 = vadd.f32 %v9975_v32, %v756_v59 }
  0xbb   : > { %vm762_vm13 = vcmp.ge.f32.partialorder %v757_v60, 0.0  ;;  %v766_v61 = vmul.f32 0.01, %v757_v60 }
  0xbd   : > { %v770_v62 = vsel %vm762_vm13, %v757_v60, %v766_v61 }
  0xbe   : > { %8029 = vmatmul.msk.f32.gmra.mxu3 %vm772_vm8, %v770_v62 }
  0xc6   : > { %8030 = vmatmul.msk.f32.vlgmr.msrb.gmra.mxu3 %vm717_vm3, %v825_v63 }
  0xce   : > { %8031 = vmatmul.msk.f32.gmra.mxu3 %vm717_vm3, %v826_v0 }
  0xd6   : > { %8032 = vmatmul.msk.f32.gmra.mxu3 %vm717_vm3, %v827_v1 }
  0xde   : > { %8033 = vmatmul.msk.f32.gmra.mxu3 %vm717_vm3, %v828_v2 }
 0x115   : > { %v10450_v25 = vpop.f32.mrf.mxu1 }
 0x116   : > { %13309 = vst [vmem:[#allocation6_spill] sm:$0xff] %v10450_v25 }
 0x11d   : > { %v10452_v26 = vpop.f32.mrf.mxu1 }
 0x11e   : > { %13310 = vst [vmem:[#allocation7_spill] sm:$0xff] %v10452_v26 }
 0x125   : > { %v10454_v28 = vpop.f32.mrf.mxu1 }
 0x126   : > { %13311 = vst [vmem:[#allocation8_spill] sm:$0xff] %v10454_v28 }
 0x129   : > { %v802_v4 = vpop.f32.mrf.mxu3 }
 0x12a   : > { %v803_v6 = vadd.f32 %v9977_v3, %v802_v4 }
 0x12c   : > { %v10405_v7 = vadd.f32 %v814_v5, %v803_v6 }
 0x12d   : > { %v10462_v42 = vpop.f32.mrf.mxu1 }
 0x12e   : > { %13305 = vst [vmem:[#allocation2_spill] sm:$0xff] %v10405_v7 }
 0x12f   : > { %13313 = vst [vmem:[#allocation10_spill] sm:$0xff] %v10462_v42 }
 0x131   : > { %v10407_v8 = vpop.f32.mrf.mxu3 }
 0x132   : > { %13306 = vst [vmem:[#allocation3_spill] sm:$0xff] %v10407_v8 }
 0x139   : > { %v10409_v9 = vpop.f32.mrf.mxu3 }
 0x13a   : > { %13307 = vst [vmem:[#allocation4_spill] sm:$0xff] %v10409_v9 }
 0x141   : > { %v10411_v10 = vpop.f32.mrf.mxu3 }
 0x142   : > { %13308 = vst [vmem:[#allocation5_spill] sm:$0xff] %v10411_v10 }
 0x149   : > { %v864_v11 = vpop.f32.mrf.mxu3 }
 0x14a   : > { %v10424_v17 = vadd.f32 %v864_v11, %v10416_v13 }
 0x151   : > { %v867_v14 = vpop.f32.mrf.mxu3 }
 0x152   : > { %v10419_v15 = vadd.f32 %v867_v14, %v10416_v13 }
 0x154   : > { %905 = vrot.lane.b32.xlu0 %v10419_v15, %s10159_s23  ;;  %v9914_v53 = vpack.i.bf16 %v10424_v17, %v10419_v15 }
 0x159   : > { %v870_v16 = vpop.f32.mrf.mxu3 }
 0x15a   : > { %v10434_v20 = vadd.f32 %v870_v16, %v10416_v13 }
 0x15c   : > { %877 = vrot.lane.b32.xlu0 %v10424_v17, %s10159_s23 }
 0x161   : > { %v873_v18 = vpop.f32.mrf.mxu3 }
 0x162   : > { %v10429_v19 = vadd.f32 %v873_v18, %v10416_v13 }
 0x164   : > { %959 = vrot.lane.b32.xlu1 %v10429_v19, %s10159_s23 }
 0x16c   : > { %932 = vrot.lane.b32.xlu1 %v10434_v20, %s10159_s23 }
 0x1c6   : > { %v906_v21 = vpop.permute.xlu0 %905 }
 0x1c7   : > { %8036 = vmatpush.xpose.msk.msra.mxu2 %vm879_vm14, %v906_v21 }
 0x1ca   : > { %8037 = vmatmul.msk.f32.vlgmr.msra.gmra.mxu2 %vm879_vm14, %v10419_v15 }
 0x1ce   : > { %v878_v22 = vpop.permute.xlu0 %877 }
 0x1cf   : > { %8034 = vmatpush.xpose.msk.msrb.mxu0 %vm879_vm14, %v878_v22 }
 0x1d2   : > { %8035 = vmatmul.msk.f32.vlgmr.msrb.gmra.mxu0 %vm879_vm14, %v10424_v17 }
 0x1d6   : > { %v960_v23 = vpop.permute.xlu1 %959 }
 0x1d7   : > { %8040 = vmatpush.xpose.msk.msra.mxu0 %vm879_vm14, %v960_v23 }
 0x1da   : > { %8041 = vmatmul.msk.f32.vlgmr.msra.gmra.mxu0 %vm879_vm14, %v10429_v19 }
 0x1de   : > { %v933_v24 = vpop.permute.xlu1 %932 }
 0x1df   : > { %8038 = vmatpush.xpose.msk.msrb.mxu1 %vm879_vm14, %v933_v24  ;;  %v10499_v24 = vpack.i.bf16 %v10434_v20, %v10424_v17 }
 0x1e2   : > { %8039 = vmatmul.msk.f32.vlgmr.msrb.gmra.mxu1 %vm879_vm14, %v10434_v20 }
 0x24d   : > { %v928_v32 = vpop.f32.mrf.mxu2 }
 0x24e   : > { %v986_v41 = vmul.f32 0.35355338, %v928_v32 }
 0x24f   : > { %v901_v30 = vpop.f32.mrf.mxu0 }
 0x250   : > { %v985_v31 = vmul.f32 0.35355338, %v901_v30  ;;  %v992_v45 = vsel %vm824_vm15, %v986_v41, -1e+30 }
 0x251   : > { %v998_v47 = vsel %vm879_vm14, %v992_v45, -inf }
 0x252   : > { %v991_v35 = vsel %vm824_vm15, %v985_v31, -1e+30 }
 0x253   : > { %v995_v39 = vsel %vm879_vm14, %v991_v35, -inf }
 0x254   : > { %996 = vmax.xlane.f32.xlu2 %v995_v39 }
 0x257   : > { %v982_v43 = vpop.f32.mrf.mxu0 }
 0x258   : > { %v988_v44 = vmul.f32 0.35355338, %v982_v43 }
 0x25a   : > { %v994_v46 = vsel %vm824_vm15, %v988_v44, -1e+30 }
 0x25b   : > { %v1004_v48 = vsel %vm879_vm14, %v994_v46, -inf }
 0x25c   : > { %999 = vmax.xlane.f32.xlu2 %v998_v47  ;;  %1005 = vmax.xlane.f32.xlu0 %v1004_v48 }
 0x25f   : > { %v955_v49 = vpop.f32.mrf.mxu1 }
 0x260   : > { %v987_v50 = vmul.f32 0.35355338, %v955_v49 }
 0x262   : > { %v993_v51 = vsel %vm824_vm15, %v987_v50, -1e+30 }
 0x263   : > { %v1001_v52 = vsel %vm879_vm14, %v993_v51, -inf }
 0x264   : > { %1002 = vmax.xlane.f32.xlu1 %v1001_v52 }
 0x270   : > { %1145 = vrot.lane.b32.xlu0 %v10424_v17, %s10160_s19 }
 0x274   : > { %9915 = vrot.lane.b32.xlu2 %v9914_v53, %s10161_s24 }
 0x278   : > { %1117 = vrot.lane.b32.xlu0 %v10429_v19, %s10161_s24 }
 0x27d   : > { %1143 = vrot.lane.b32.xlu1 %v10424_v17, %s13295_s25 }
 0x285   : > { %1201 = vrot.lane.b32.xlu1 %v10434_v20, %s10160_s19 }
 0x28d   : > { %1199 = vrot.lane.b32.xlu1 %v10434_v20, %s13295_s25 }
 0x295   : > { %1173 = vrot.lane.b32.xlu1 %v10419_v15, %s10160_s19 }
 0x29d   : > { %1171 = vrot.lane.b32.xlu1 %v10419_v15, %s13295_s25 }
 0x2a5   : > { %1229 = vrot.lane.b32.xlu1 %v10429_v19, %s10160_s19 }
 0x2c7   : > { %v997_v54 = vpop.xlane.xlu2 %996 }
 0x2c8   : > { %v1007_v55 = vsub.f32 %v991_v35, %v997_v54 }
 0x2ca   : > { %v1011_v56 = vmul.f32 1.442695, %v1007_v55 }
 0x2cc   : > { %9980 = vpow2.f32 %v1011_v56 }
 0x2cf   : > { %v1000_v57 = vpop.xlane.xlu2 %999  ;;  %v1006_v58 = vpop.xlane.xlu0 %1005 }
 0x2d0   : > { %v1008_v59 = vsub.f32 %v992_v45, %v1000_v57  ;;  %v1010_v62 = vsub.f32 %v994_v46, %v1006_v58 }
 0x2d2   : > { %v9981_v60 = vpop.eup %9980  ;;  %v1013_v61 = vmul.f32 1.442695, %v1008_v59  ;;  %v1017_v0 = vmul.f32 1.442695, %v1010_v62 }
 0x2d3   : > { %v1019_v63 = vsel %vm879_vm14, %v9981_v60, 0.0 }
 0x2d4   : > { %9982 = vpow2.f32 %v1013_v61  ;;  %1020 = vadd.xlane.f32.xlu2 %v1019_v63 }
 0x2d5   : > { %9984 = vpow2.f32 %v1017_v0 }
 0x2d7   : > { %v9916_v1 = vpop.permute.xlu2 %9915  ;;  %v1003_v2 = vpop.xlane.xlu1 %1002 }
 0x2d8   : > { %v9918_v3 = vunpack.i.h.bf16 %v9916_v1  ;;  %v9917_v4 = vunpack.i.l.bf16 %v9916_v1  ;;  %v1009_v5 = vsub.f32 %v993_v51, %v1003_v2 }
 0x2da   : > { %v9983_v6 = vpop.eup %9982  ;;  %v1015_v11 = vmul.f32 1.442695, %v1009_v5  ;;  %1060 = vmatpush.msrb.mxu2 %v9918_v3  ;;  %1086 = vmatpush.msra.mxu1 %v9917_v4 }
 0x2db   : > { %v1022_v12 = vsel %vm879_vm14, %v9983_v6, 0.0  ;;  %v9985_v14 = vpop.eup %9984 }
 0x2dc   : > { %9986 = vpow2.f32 %v1015_v11  ;;  %1023 = vadd.xlane.f32.xlu2 %v1022_v12  ;;  %v1028_v21 = vsel %vm879_vm14, %v9985_v14, 0.0 }
 0x2e2   : > { %v9987_v16 = vpop.eup %9986  ;;  %v1146_v18 = vpop.permute.xlu0 %1145 }
 0x2e3   : > { %8046 = vmatpush.xpose.msk.msrb.mxu1 %vm879_vm14, %v1146_v18  ;;  %v1025_v22 = vsel %vm879_vm14, %v9987_v16, 0.0 }
 0x2e4   : > { %1029 = vadd.xlane.f32.xlu2 %v1028_v21  ;;  %1026 = vadd.xlane.f32.xlu0 %v1025_v22 }
 0x2ea   : > { %v1118_v23 = vpop.permute.xlu0 %1117 }
 0x2eb   : > { %1138 = vmatpush.msra.mxu2 %v1118_v23 }
 0x2ef   : > { %v1144_v27 = vpop.permute.xlu1 %1143 }
 0x2f7   : > { %v1202_v30 = vpop.permute.xlu1 %1201 }
 0x2f8   : > { %9920 = vrot.lane.b32.xlu0 %v10499_v24, %s13291_s26 }
 0x2fc   : > { %1091 = vrot.lane.b32.xlu2 %v10434_v20, %s10161_s24 }
 0x2ff   : > { %v1200_v31 = vpop.permute.xlu1 %1199 }
 0x300   : > { %1411 = vrot.lane.b32.xlu0 %v10424_v17, %s13293_s28 }
 0x304   : > { %1227 = vrot.lane.b32.xlu2 %v10429_v19, %s13295_s25  ;;  %s13324_s25 = smov 48  }
 0x307   : > { %v1174_v32 = vpop.permute.xlu1 %1173 }
 0x30f   : > { %v1172_v41 = vpop.permute.xlu1 %1171 }
 0x317   : > { %v1230_v49 = vpop.permute.xlu1 %1229 }
 0x347   : > { %v1021_v35 = vpop.xlane.xlu2 %1020 }
 0x348   : > { %9988 = vrcp.f32 %v1021_v35 }
 0x34e   : > { %v9989_v39 = vpop.eup %9988 }
 0x34f   : > { %v1035_v43 = vmul.f32 %v9989_v39, %v9981_v60  ;;  %v1024_v44 = vpop.xlane.xlu2 %1023 }
 0x350   : > { %9990 = vrcp.f32 %v1024_v44 }
 0x351   : > { %8042 = vmatmul.msk.f32.vlgmr.msrb.gmra.mxu2 %vm879_vm14, %v1035_v43 }
 0x352   : > { %8050 = vmatpush.xpose.msk.msrb.mxu2 %vm879_vm14, %v1202_v30 }
 0x356   : > { %v9991_v45 = vpop.eup %9990 }
 0x357   : > { %v1036_v46 = vmul.f32 %v9991_v45, %v9983_v6  ;;  %v1030_v47 = vpop.xlane.xlu2 %1029  ;;  %v1027_v48 = vpop.xlane.xlu0 %1026 }
 0x358   : > { %9992 = vrcp.f32 %v1030_v47 }
 0x359   : > { %9994 = vrcp.f32 %v1027_v48  ;;  %8043 = vmatmul.msk.f32.vlgmr.msra.gmra.mxu1 %vm879_vm14, %v1036_v46 }
 0x35a   : > { %8052 = vmatpush.xpose.msk.msra.mxu1 %vm879_vm14, %v1230_v49 }
 0x35e   : > { %v9993_v50 = vpop.eup %9992 }
 0x35f   : > { %v9995_v51 = vpop.eup %9994  ;;  %v1038_v52 = vmul.f32 %v9993_v50, %v9985_v14  ;;  %v1092_v53 = vpop.permute.xlu2 %1091 }
 0x360   : > { %v1037_v54 = vmul.f32 %v9995_v51, %v9987_v16  ;;  %1112 = vmatpush.msrb.mxu0 %v1092_v53 }
 0x361   : > { %8045 = vmatmul.msk.f32.vlgmr.msra.gmra.mxu2 %vm879_vm14, %v1038_v52  ;;  %8047 = vmatmul.msk.f32.vlgmr.msrb.gmra.mxu1 %vm879_vm14, %v1144_v27 }
 0x362   : > { %8044 = vmatmul.msk.f32.vlgmr.msrb.gmra.mxu0 %vm879_vm14, %v1037_v54 }
 0x363   : > { %8048 = vmatpush.xpose.msk.msra.mxu0 %vm879_vm14, %v1174_v32 }
 0x367   : > { %v1228_v55 = vpop.permute.xlu2 %1227 }
 0x369   : > { %8051 = vmatmul.msk.f32.vlgmr.msrb.gmra.mxu2 %vm879_vm14, %v1200_v31  ;;  %8053 = vmatmul.msk.f32.vlgmr.msra.gmra.mxu1 %vm879_vm14, %v1228_v55 }
 0x36a   : > { %8049 = vmatmul.msk.f32.vlgmr.msra.gmra.mxu0 %vm879_vm14, %v1172_v41  ;;  %v9921_v56 = vpop.permute.xlu0 %9920 }
 0x36b   : > { %v9923_v57 = vunpack.i.h.bf16 %v9921_v56  ;;  %v9922_v58 = vunpack.i.l.bf16 %v9921_v56 }
 0x36d   : > { %1328 = vmatpush.msra.mxu3 %v9922_v58  ;;  %1380 = vmatpush.msra.mxu2 %v9923_v57 }
 0x372   : > { %v1412_v27 = vpop.permute.xlu0 %1411 }
 0x3d4   : > { %v10522_v60 = vpop.f32.mrf.mxu2 }
 0x3d6   : > { %v10520_v59 = vpop.f32.mrf.mxu1 }
 0x3de   : > { %v1168_v61 = vpop.f32.mrf.mxu1 }
 0x3df   : > { %v10524_v62 = vpop.f32.mrf.mxu0  ;;  %v1255_v63 = vmul.f32 0.35355338, %v1168_v61 }
 0x3e1   : > { %v1259_v0 = vsel %vm824_vm15, %v1255_v63, -1e+30 }
 0x3e2   : > { %v1263_v1 = vsel %vm879_vm14, %v1259_v0, -inf }
 0x3e3   : > { %1264 = vmax.xlane.f32.xlu1 %v1263_v1 }
 0x3e4   : > { %v10529_v2 = vpop.f32.mrf.mxu2 }
 0x3e6   : > { %v1252_v3 = vpop.f32.mrf.mxu1 }
 0x3e7   : > { %v1196_v4 = vpop.f32.mrf.mxu0  ;;  %v1258_v5 = vmul.f32 0.35355338, %v1252_v3 }
 0x3e8   : > { %v1256_v6 = vmul.f32 0.35355338, %v1196_v4 }
 0x3e9   : > { %v1262_v11 = vsel %vm824_vm15, %v1258_v5, -1e+30 }
 0x3ea   : > { %v1260_v12 = vsel %vm824_vm15, %v1256_v6, -1e+30  ;;  %v1272_v14 = vsel %vm879_vm14, %v1262_v11, -inf }
 0x3eb   : > { %v1266_v16 = vsel %vm879_vm14, %v1260_v12, -inf  ;;  %1273 = vmax.xlane.f32.xlu0 %v1272_v14 }
 0x3ec   : > { %1267 = vmax.xlane.f32.xlu2 %v1266_v16  ;;  %v1224_v18 = vpop.f32.mrf.mxu2 }
 0x3ed   : > { %v1257_v21 = vmul.f32 0.35355338, %v1224_v18 }
 0x3ef   : > { %v1261_v22 = vsel %vm824_vm15, %v1257_v21, -1e+30 }
 0x3f0   : > { %v1269_v23 = vsel %vm879_vm14, %v1261_v22, -inf }
 0x3f3   : > { %1270 = vmax.xlane.f32.xlu0 %v1269_v23 }
 0x3fc   : > { %1413 = vrot.lane.b32.xlu1 %v10424_v17, %s13289_s29 }
 0x404   : > { %1467 = vrot.lane.b32.xlu2 %v10434_v20, %s13293_s28  ;;  %1441 = vrot.lane.b32.xlu1 %v10419_v15, %s13289_s29 }
 0x407   : > { %1469 = vrot.lane.b32.xlu0 %v10434_v20, %s13289_s29 }
 0x40c   : > { %1439 = vrot.lane.b32.xlu1 %v10419_v15, %s13293_s28 }
 0x414   : > { %1385 = vrot.lane.b32.xlu1 %v10429_v19, %s13291_s26 }
 0x41c   : > { %1495 = vrot.lane.b32.xlu1 %v10429_v19, %s13293_s28  ;;  %s13329_s28 = smov 16  }
 0x456   : > { %v1265_v30 = vpop.xlane.xlu1 %1264 }
 0x457   : > { %v1275_v31 = vsub.f32 %v1259_v0, %v1265_v30 }
 0x459   : > { %v1279_v32 = vmul.f32 1.442695, %v1275_v31 }
 0x45b   : > { %9996 = vpow2.f32 %v1279_v32 }
 0x45e   : > { %v1274_v35 = vpop.xlane.xlu0 %1273 }
 0x45f   : > { %v1268_v39 = vpop.xlane.xlu2 %1267  ;;  %v1278_v58 = vsub.f32 %v1262_v11, %v1274_v35 }
 0x460   : > { %v1276_v41 = vsub.f32 %v1260_v12, %v1268_v39 }
 0x461   : > { %v9997_v43 = vpop.eup %9996  ;;  %v1285_v61 = vmul.f32 1.442695, %v1278_v58 }
 0x462   : > { %v1281_v44 = vmul.f32 1.442695, %v1276_v41  ;;  %v1287_v45 = vsel %vm879_vm14, %v9997_v43, 0.0 }
 0x463   : > { %1288 = vadd.xlane.f32.xlu0 %v1287_v45 }
 0x464   : > { %9998 = vpow2.f32 %v1281_v44 }
 0x466   : > { %v1271_v46 = vpop.xlane.xlu0 %1270 }
 0x467   : > { %v1277_v47 = vsub.f32 %v1261_v22, %v1271_v46  ;;  %v1468_v3 = vpop.permute.xlu2 %1467 }
 0x469   : > { %v1283_v48 = vmul.f32 1.442695, %v1277_v47 }
 0x46a   : > { %v9999_v49 = vpop.eup %9998 }
 0x46b   : > { %10000 = vpow2.f32 %v1283_v48  ;;  %v1290_v50 = vsel %vm879_vm14, %v9999_v49, 0.0 }
 0x46c   : > { %1291 = vadd.xlane.f32.xlu2 %v1290_v50  ;;  %10002 = vpow2.f32 %v1285_v61 }
 0x46e   : > { %v1414_v51 = vpop.permute.xlu1 %1413 }
 0x46f   : > { %8058 = vmatpush.xpose.msk.msrb.mxu3 %vm879_vm14, %v1414_v51 }
 0x471   : > { %v10001_v52 = vpop.eup %10000 }
 0x472   : > { %v1293_v53 = vsel %vm879_vm14, %v10001_v52, 0.0  ;;  %v10003_v63 = vpop.eup %10002 }
 0x473   : > { %v1296_v0 = vsel %vm879_vm14, %v10003_v63, 0.0 }
 0x474   : > { %1294 = vadd.xlane.f32.xlu2 %v1293_v53 }
 0x476   : > { %v1442_v54 = vpop.permute.xlu1 %1441 }
 0x477   : > { %1333 = vrot.lane.b32.xlu0 %v10419_v15, %s13291_s26  ;;  %s13328_s26 = smov 8  }
 0x479   : > { %v1470_v55 = vpop.permute.xlu0 %1469 }
 0x47a   : > { %8062 = vmatpush.xpose.msk.msrb.mxu2 %vm879_vm14, %v1470_v55 }
 0x47e   : > { %v1440_v56 = vpop.permute.xlu1 %1439 }
 0x486   : > { %v1386_v57 = vpop.permute.xlu1 %1385 }
 0x487   : > { %1406 = vmatpush.msrb.mxu1 %v1386_v57 }
 0x48c   : > { %1497 = vrot.lane.b32.xlu2 %v10429_v19, %s13289_s29  ;;  %s13330_s29 = smov 24  }
 0x48e   : > { %v1496_v31 = vpop.permute.xlu1 %1495 }
 0x4a1   : > { %1297 = vadd.xlane.f32.xlu0 %v1296_v0 }
 0x4d6   : > { %v1289_v1 = vpop.xlane.xlu0 %1288 }
 0x4d7   : > { %10004 = vrcp.f32 %v1289_v1 }
 0x4dd   : > { %v10005_v4 = vpop.eup %10004 }
 0x4de   : > { %v1303_v5 = vmul.f32 %v10005_v4, %v9997_v43 }
 0x4df   : > { %v1292_v6 = vpop.xlane.xlu2 %1291 }
 0x4e0   : > { %10006 = vrcp.f32 %v1292_v6  ;;  %8054 = vmatmul.msk.f32.vlgmr.msra.gmra.mxu3 %vm879_vm14, %v1303_v5 }
 0x4e6   : > { %v10007_v12 = vpop.eup %10006 }
 0x4e7   : > { %v1295_v14 = vpop.xlane.xlu2 %1294  ;;  %v1304_v11 = vmul.f32 %v10007_v12, %v9999_v49 }
 0x4e8   : > { %10008 = vrcp.f32 %v1295_v14  ;;  %8059 = vmatmul.msk.f32.vlgmr.msrb.gmra.mxu3 %vm879_vm14, %v1412_v27 }
 0x4e9   : > { %v1334_v16 = vpop.permute.xlu0 %1333 }
 0x4ea   : > { %1354 = vmatpush.msrb.mxu0 %v1334_v16 }
 0x4eb   : > { %8055 = vmatmul.msk.f32.vlgmr.msrb.gmra.mxu0 %vm879_vm14, %v1304_v11 }
 0x4ec   : > { %8060 = vmatpush.xpose.msk.msra.mxu0 %vm879_vm14, %v1442_v54 }
 0x4ee   : > { %v10009_v18 = vpop.eup %10008 }
 0x4ef   : > { %v1305_v21 = vmul.f32 %v10009_v18, %v10001_v52  ;;  %v1498_v22 = vpop.permute.xlu2 %1497 }
 0x4f0   : > { %8064 = vmatpush.xpose.msk.msra.mxu1 %vm879_vm14, %v1498_v22 }
 0x4f1   : > { %8056 = vmatmul.msk.f32.vlgmr.msra.gmra.mxu2 %vm879_vm14, %v1305_v21 }
 0x4f3   : > { %8061 = vmatmul.msk.f32.vlgmr.msra.gmra.mxu0 %vm879_vm14, %v1440_v56 }
 0x4f9   : > { %8063 = vmatmul.msk.f32.vlgmr.msrb.gmra.mxu2 %vm879_vm14, %v1468_v3 }
 0x514   : > { %v1298_v23 = vpop.xlane.xlu0 %1297 }
 0x515   : > { %10010 = vrcp.f32 %v1298_v23 }
 0x51b   : > { %v10011_v27 = vpop.eup %10010 }
 0x51c   : > { %v1306_v30 = vmul.f32 %v10011_v27, %v10003_v63 }
 0x51e   : > { %8057 = vmatmul.msk.f32.vlgmr.msrb.gmra.mxu1 %vm879_vm14, %v1306_v30 }
 0x526   : > { %8065 = vmatmul.msk.f32.vlgmr.msra.gmra.mxu1 %vm879_vm14, %v1496_v31 }
 0x563   : > { %v10574_v32 = vpop.f32.mrf.mxu3 }
 0x568   : > { %v10576_v35 = vpop.f32.mrf.mxu0 }
 0x56b   : > { %v1436_v39 = vpop.f32.mrf.mxu3 }
 0x56c   : > { %v1523_v41 = vmul.f32 0.35355338, %v1436_v39 }
 0x56e   : > { %v1527_v43 = vsel %vm824_vm15, %v1523_v41, -1e+30 }
 0x56f   : > { %v1531_v44 = vsel %vm879_vm14, %v1527_v43, -inf }
 0x570   : > { %1532 = vmax.xlane.f32.xlu2 %v1531_v44  ;;  %v1464_v45 = vpop.f32.mrf.mxu0 }
 0x571   : > { %v1524_v46 = vmul.f32 0.35355338, %v1464_v45 }
 0x573   : > { %v1528_v47 = vsel %vm824_vm15, %v1524_v46, -1e+30 }
 0x574   : > { %v10583_v48 = vpop.f32.mrf.mxu2  ;;  %v1534_v49 = vsel %vm879_vm14, %v1528_v47, -inf }
 0x575   : > { %1535 = vmax.xlane.f32.xlu0 %v1534_v49 }
 0x57c   : > { %v1492_v50 = vpop.f32.mrf.mxu2 }
 0x57d   : > { %v1525_v51 = vmul.f32 0.35355338, %v1492_v50 }
 0x57f   : > { %v1529_v52 = vsel %vm824_vm15, %v1525_v51, -1e+30 }
 0x580   : > { %v1537_v53 = vsel %vm879_vm14, %v1529_v52, -inf }
 0x581   : > { %1538 = vmax.xlane.f32.xlu1 %v1537_v53 }
 0x588   : > { %9925 = vrot.lane.b32.xlu2 %v10499_v24, %s13275_s20 }
 0x590   : > { %1601 = vrot.lane.b32.xlu2 %v10419_v15, %s13275_s20 }
 0x598   : > { %1737 = vrot.lane.b32.xlu2 %v10434_v20, %s13273_s17 }
 0x59a   : > { %1679 = vrot.lane.b32.xlu1 %v10424_v17, %s13277_s18 }
 0x59b   : > { %v10597_v54 = vpop.f32.mrf.mxu1 }
 0x5a0   : > { %1709 = vrot.lane.b32.xlu2 %v10419_v15, %s13273_s17 }
 0x5a3   : > { %v1520_v55 = vpop.f32.mrf.mxu1 }
 0x5a4   : > { %v1526_v56 = vmul.f32 0.35355338, %v1520_v55 }
 0x5a6   : > { %v1530_v24 = vsel %vm824_vm15, %v1526_v56, -1e+30 }
 0x5a7   : > { %v1540_v57 = vsel %vm879_vm14, %v1530_v24, -inf }
 0x5a8   : > { %1707 = vrot.lane.b32.xlu2 %v10419_v15, %s13277_s18  ;;  %1541 = vmax.xlane.f32.xlu0 %v1540_v57 }
 0x5b0   : > { %1653 = vrot.lane.b32.xlu2 %v10429_v19, %s13275_s20  ;;  %s13283_s20 = smov 8  }
 0x5b8   : > { %1765 = vrot.lane.b32.xlu2 %v10429_v19, %s13273_s17 }
 0x5e3   : > { %v1533_v58 = vpop.xlane.xlu2 %1532 }
 0x5e4   : > { %v1543_v61 = vsub.f32 %v1527_v43, %v1533_v58 }
 0x5e6   : > { %v1547_v63 = vmul.f32 1.442695, %v1543_v61 }
 0x5e8   : > { %10012 = vpow2.f32 %v1547_v63  ;;  %v1536_v30 = vpop.xlane.xlu0 %1535 }
 0x5e9   : > { %v1544_v39 = vsub.f32 %v1528_v47, %v1536_v30 }
 0x5eb   : > { %v9926_v0 = vpop.permute.xlu2 %9925  ;;  %v1549_v41 = vmul.f32 1.442695, %v1544_v39 }
 0x5ec   : > { %v9928_v1 = vunpack.i.h.bf16 %v9926_v0  ;;  %v9927_v3 = vunpack.i.l.bf16 %v9926_v0 }
 0x5ee   : > { %v10013_v4 = vpop.eup %10012  ;;  %1596 = vmatpush.msra.mxu3 %v9927_v3  ;;  %1648 = vmatpush.msra.mxu2 %v9928_v1 }
 0x5ef   : > { %v1555_v5 = vsel %vm879_vm14, %v10013_v4, 0.0 }
 0x5f0   : > { %1556 = vadd.xlane.f32.xlu0 %v1555_v5 }
 0x5f3   : > { %v1602_v6 = vpop.permute.xlu2 %1601 }
 0x5f4   : > { %v1539_v12 = vpop.xlane.xlu1 %1538  ;;  %1622 = vmatpush.msrb.mxu0 %v1602_v6 }
 0x5f5   : > { %v1545_v14 = vsub.f32 %v1529_v52, %v1539_v12 }
 0x5f7   : > { %v1551_v11 = vmul.f32 1.442695, %v1545_v14 }
 0x5f9   : > { %10014 = vpow2.f32 %v1551_v11 }
 0x5fa   : > { %10016 = vpow2.f32 %v1549_v41 }
 0x5fb   : > { %v1738_v16 = vpop.permute.xlu2 %1737 }
 0x5fc   : > { %8074 = vmatpush.xpose.msk.msrb.mxu2 %vm879_vm14, %v1738_v16 }
 0x5ff   : > { %v10015_v18 = vpop.eup %10014 }
 0x600   : > { %v1561_v21 = vsel %vm879_vm14, %v10015_v18, 0.0  ;;  %v10017_v43 = vpop.eup %10016 }
 0x601   : > { %1562 = vadd.xlane.f32.xlu1 %v1561_v21  ;;  %v1558_v44 = vsel %vm879_vm14, %v10017_v43, 0.0 }
 0x603   : > { %v1710_v22 = vpop.permute.xlu2 %1709 }
 0x604   : > { %8072 = vmatpush.xpose.msk.msra.mxu0 %vm879_vm14, %v1710_v22  ;;  %1681 = vrot.lane.b32.xlu0 %v10424_v17, %s13273_s17  ;;  %s13285_s17 = smov 32  }
 0x60b   : > { %v1708_v23 = vpop.permute.xlu2 %1707 }
 0x60c   : > { %v1680_v55 = vpop.permute.xlu1 %1679 }
 0x613   : > { %v1654_v27 = vpop.permute.xlu2 %1653 }
 0x614   : > { %1674 = vmatpush.msrb.mxu1 %v1654_v27 }
 0x61a   : > { %1735 = vrot.lane.b32.xlu1 %v10434_v20, %s13277_s18 }
 0x61b   : > { %v1766_v31 = vpop.permute.xlu2 %1765  ;;  %v1542_v45 = vpop.xlane.xlu0 %1541 }
 0x61c   : > { %8076 = vmatpush.xpose.msk.msra.mxu1 %vm879_vm14, %v1766_v31  ;;  %v1546_v46 = vsub.f32 %v1530_v24, %v1542_v45 }
 0x61e   : > { %v1553_v49 = vmul.f32 1.442695, %v1546_v46 }
 0x620   : > { %10018 = vpow2.f32 %v1553_v49 }
 0x626   : > { %v10019_v50 = vpop.eup %10018 }
 0x627   : > { %v1564_v51 = vsel %vm879_vm14, %v10019_v50, 0.0 }
 0x62e   : > { %1559 = vadd.xlane.f32.xlu0 %v1558_v44 }
 0x642   : > { %1763 = vrot.lane.b32.xlu0 %v10429_v19, %s13277_s18  ;;  %s13279_s18 = smov 16  }
 0x644   : > { %1565 = vadd.xlane.f32.xlu1 %v1564_v51 }
 0x663   : > { %v1557_v47 = vpop.xlane.xlu0 %1556 }
 0x664   : > { %10020 = vrcp.f32 %v1557_v47 }
 0x66a   : > { %v10021_v52 = vpop.eup %10020 }
 0x66b   : > { %v1571_v53 = vmul.f32 %v10021_v52, %v10013_v4 }
 0x66d   : > { %8066 = vmatmul.msk.f32.vlgmr.msra.gmra.mxu3 %vm879_vm14, %v1571_v53 }
 0x674   : > { %v1563_v56 = vpop.xlane.xlu1 %1562 }
 0x675   : > { %10022 = vrcp.f32 %v1563_v56 }
 0x676   : > { %v1682_v57 = vpop.permute.xlu0 %1681 }
 0x677   : > { %8070 = vmatpush.xpose.msk.msrb.mxu3 %vm879_vm14, %v1682_v57 }
 0x67a   : > { %8071 = vmatmul.msk.f32.vlgmr.msrb.gmra.mxu3 %vm879_vm14, %v1680_v55 }
 0x67b   : > { %v10023_v24 = vpop.eup %10022 }
 0x67c   : > { %v1573_v58 = vmul.f32 %v10023_v24, %v10015_v18 }
 0x67e   : > { %8068 = vmatmul.msk.f32.vlgmr.msra.gmra.mxu2 %vm879_vm14, %v1573_v58 }
 0x68c   : > { %v1736_v61 = vpop.permute.xlu1 %1735 }
 0x68d   : > { %8075 = vmatmul.msk.f32.vlgmr.msrb.gmra.mxu2 %vm879_vm14, %v1736_v61 }
 0x6a1   : > { %v1560_v63 = vpop.xlane.xlu0 %1559 }
 0x6a2   : > { %10024 = vrcp.f32 %v1560_v63 }
 0x6a8   : > { %v10025_v0 = vpop.eup %10024 }
 0x6a9   : > { %v1572_v1 = vmul.f32 %v10025_v0, %v10017_v43 }
 0x6ab   : > { %8067 = vmatmul.msk.f32.vlgmr.msrb.gmra.mxu0 %vm879_vm14, %v1572_v1 }
 0x6b3   : > { %8073 = vmatmul.msk.f32.vlgmr.msra.gmra.mxu0 %vm879_vm14, %v1708_v23 }
 0x6b4   : > { %v1764_v6 = vpop.permute.xlu0 %1763 }
 0x6b7   : > { %v1566_v3 = vpop.xlane.xlu1 %1565 }
 0x6b8   : > { %10026 = vrcp.f32 %v1566_v3 }
 0x6be   : > { %v10027_v4 = vpop.eup %10026 }
 0x6bf   : > { %v1574_v5 = vmul.f32 %v10027_v4, %v10019_v50 }
 0x6c1   : > { %8069 = vmatmul.msk.f32.vlgmr.msrb.gmra.mxu1 %vm879_vm14, %v1574_v5 }
 0x6c9   : > { %8077 = vmatmul.msk.f32.vlgmr.msra.gmra.mxu1 %vm879_vm14, %v1764_v6 }
 0x6f0   : > { %v1598_v12 = vpop.f32.mrf.mxu3 }
 0x6fd   : > { %v1704_v14 = vpop.f32.mrf.mxu3 }
 0x6fe   : > { %v1791_v11 = vmul.f32 0.35355338, %v1704_v14 }
 0x700   : > { %v1795_v16 = vsel %vm824_vm15, %v1791_v11, -1e+30 }
 0x701   : > { %v1799_v18 = vsel %vm879_vm14, %v1795_v16, -inf  ;;  %v1650_v39 = vpop.f32.mrf.mxu2 }
 0x702   : > { %1800 = vmax.xlane.f32.xlu2 %v1799_v18 }
 0x710   : > { %v1760_v44 = vpop.f32.mrf.mxu2 }
 0x711   : > { %v1793_v49 = vmul.f32 0.35355338, %v1760_v44 }
 0x713   : > { %v1797_v50 = vsel %vm824_vm15, %v1793_v49, -1e+30 }
 0x714   : > { %v1805_v51 = vsel %vm879_vm14, %v1797_v50, -inf }
 0x728   : > { %v10635_v21 = vpop.f32.mrf.mxu0 }
 0x730   : > { %v1732_v22 = vpop.f32.mrf.mxu0 }
 0x731   : > { %v1792_v23 = vmul.f32 0.35355338, %v1732_v22 }
 0x733   : > { %v1796_v27 = vsel %vm824_vm15, %v1792_v23, -1e+30 }
 0x734   : > { %v1802_v30 = vsel %vm879_vm14, %v1796_v27, -inf }
 0x735   : > { %1803 = vmax.xlane.f32.xlu0 %v1802_v30 }
 0x73e   : > { %v10640_v31 = vpop.f32.mrf.mxu1 }
 0x746   : > { %v1788_v41 = vpop.f32.mrf.mxu1 }
 0x747   : > { %v1794_v43 = vmul.f32 0.35355338, %v1788_v41 }
 0x749   : > { %1895 = vrot.lane.b32.xlu0 %v10434_v20, %s13287_s0  ;;  %v1798_v45 = vsel %vm824_vm15, %v1794_v43, -1e+30  ;;  %v9929_v20 = vpack.i.bf16 %v10419_v15, %v10424_v17 }
 0x74a   : > { %v1808_v46 = vsel %vm879_vm14, %v1798_v45, -inf }
 0x74b   : > { %1809 = vmax.xlane.f32.xlu1 %v1808_v46 }
 0x751   : > { %9940 = vrot.lane.b32.xlu0 %v9939_v40, %s13285_s17 }
 0x753   : > { %1806 = vmax.xlane.f32.xlu1 %v1805_v51 }
 0x76c   : > { %9930 = vrot.lane.b32.xlu1 %v9929_v20, %s13287_s0 }
 0x775   : > { %v1801_v47 = vpop.xlane.xlu2 %1800 }
 0x776   : > { %v1811_v52 = vsub.f32 %v1795_v16, %v1801_v47 }
 0x778   : > { %v1815_v53 = vmul.f32 1.442695, %v1811_v52 }
 0x77a   : > { %10028 = vpow2.f32 %v1815_v53 }
 0x780   : > { %v10029_v55 = vpop.eup %10028 }
 0x781   : > { %v1823_v56 = vsel %vm879_vm14, %v10029_v55, 0.0 }
 0x796   : > { %1824 = vadd.xlane.f32.xlu1 %v1823_v56 }
 0x7a8   : > { %v1804_v57 = vpop.xlane.xlu0 %1803 }
 0x7a9   : > { %v1812_v24 = vsub.f32 %v1796_v27, %v1804_v57 }
 0x7ab   : > { %v1817_v58 = vmul.f32 1.442695, %v1812_v24 }
 0x7ad   : > { %10030 = vpow2.f32 %v1817_v58 }
 0x7af   : > { %1921 = vrot.lane.b32.xlu1 %v10429_v19, %s13287_s0  ;;  %s13322_s0 = smov 80  }
 0x7b3   : > { %v10031_v37 = vpop.eup %10030 }
 0x7b4   : > { %v1826_v38 = vsel %vm879_vm14, %v10031_v37, 0.0 }
 0x7b5   : > { %1827 = vadd.xlane.f32.xlu2 %v1826_v38 }
 0x7b7   : > { %1951 = vrot.lane.b32.xlu1 %v10574_v32, %s13283_s20 }
 0x7bb   : > { %v1896_v40 = vpop.permute.xlu0 %1895 }
 0x7bc   : > { %1916 = vmatpush.msra.mxu2 %v1896_v40 }
 0x7be   : > { %v1810_v15 = vpop.xlane.xlu1 %1809 }
 0x7bf   : > { %1967 = vrot.lane.b32.xlu1 %v1598_v12, %s13279_s18  ;;  %v1814_v19 = vsub.f32 %v1798_v45, %v1810_v15 }
 0x7c1   : > { %v1821_v0 = vmul.f32 1.442695, %v1814_v19 }
 0x7c3   : > { %v9941_v41 = vpop.permute.xlu0 %9940 }
 0x7c4   : > { %v9943_v43 = vunpack.i.h.bf16 %v9941_v41  ;;  %v9942_v44 = vunpack.i.l.bf16 %v9941_v41 }
 0x7c6   : > { %v1807_v17 = vpop.xlane.xlu1 %1806 }
 0x7c7   : > { %v1813_v61 = vsub.f32 %v1797_v50, %v1807_v17  ;;  %1953 = vrot.lane.b32.xlu1 %v10576_v35, %s13283_s20 }
 0x7c9   : > { %v1819_v63 = vmul.f32 1.442695, %v1813_v61 }
 0x7cb   : > { %10032 = vpow2.f32 %v1819_v63 }
 0x7cc   : > { %10034 = vpow2.f32 %v1821_v0 }
 0x7cf   : > { %1955 = vrot.lane.b32.xlu1 %v10583_v48, %s13283_s20 }
 0x7d1   : > { %v10033_v1 = vpop.eup %10032 }
 0x7d2   : > { %v1829_v32 = vsel %vm879_vm14, %v10033_v1, 0.0  ;;  %v10035_v3 = vpop.eup %10034 }
 0x7d3   : > { %1830 = vadd.xlane.f32.xlu2 %v1829_v32  ;;  %v1832_v4 = vsel %vm879_vm14, %v10035_v3, 0.0 }
 0x7d7   : > { %1957 = vrot.lane.b32.xlu1 %v10597_v54, %s13283_s20  ;;  %s13323_s20 = smov 104  }
 0x7db   : > { %1833 = vadd.xlane.f32.xlu2 %v1832_v4  ;;  %v10142_v4 = vld [vmem:[%s10385_s27] sm:$0xff] }
 0x7de   : > { %v9931_v35 = vpop.permute.xlu1 %9930 }
 0x7df   : > { %v9933_v5 = vunpack.i.h.bf16 %v9931_v35  ;;  %v9932_v6 = vunpack.i.l.bf16 %v9931_v35  ;;  %2025 = vrot.lane.b32.xlu1 %v10416_v13, %s13285_s17 }
 0x7e1   : > { %1864 = vmatpush.msra.mxu3 %v9932_v6  ;;  %1890 = vmatpush.msrb.mxu0 %v9933_v5 }
 0x7f3   : > { %9935 = vrot.lane.b32.xlu2 %v9934_v36, %s13285_s17  ;;  %s13325_s17 = smov 72  }
 0x7fb   : > { %1969 = vrot.lane.b32.xlu2 %v10635_v21, %s13279_s18 }
 0x803   : > { %1971 = vrot.lane.b32.xlu2 %v1650_v39, %s13279_s18 }
 0x809   : > { %v1825_v48 = vpop.xlane.xlu1 %1824 }
 0x80a   : > { %10036 = vrcp.f32 %v1825_v48 }
 0x80b   : > { %1973 = vrot.lane.b32.xlu2 %v10640_v31, %s13279_s18  ;;  %s13281_s18 = smov 24  }
 0x810   : > { %v10037_v54 = vpop.eup %10036 }
 0x811   : > { %v1839_v12 = vmul.f32 %v10037_v54, %v10029_v55 }
 0x813   : > { %8078 = vmatmul.msk.f32.vlgmr.msra.gmra.mxu3 %vm879_vm14, %v1839_v12 }
 0x821   : > { %v1922_v13 = vpop.permute.xlu1 %1921 }
 0x822   : > { %1942 = vmatpush.msrb.mxu1 %v1922_v13 }
 0x828   : > { %v1828_v14 = vpop.xlane.xlu2 %1827 }
 0x829   : > { %10038 = vrcp.f32 %v1828_v14  ;;  %v1952_v49 = vpop.permute.xlu1 %1951 }
 0x82a   : > { %v1995_v51 = vsel %vm879_vm14, %v10522_v60, %v1952_v49 }
 0x82f   : > { %v10039_v33 = vpop.eup %10038 }
 0x830   : > { %v1840_v34 = vmul.f32 %v10039_v33, %v10031_v37  ;;  %v10144_v33 = vld [vmem:[%s10385_s27 + $0x10] sm:$0xff] }
 0x831   : > { %v1968_v50 = vpop.permute.xlu1 %1967 }
 0x832   : > { %8079 = vmatmul.msk.f32.vlgmr.msrb.gmra.mxu0 %vm879_vm14, %v1840_v34  ;;  %v1999_v20 = vsel %vm772_vm8, %v1995_v51, %v1968_v50 }
 0x839   : > { %v1954_v53 = vpop.permute.xlu1 %1953 }
 0x83a   : > { %v1996_v56 = vsel %vm879_vm14, %v10520_v59, %v1954_v53 }
 0x841   : > { %v1956_v60 = vpop.permute.xlu1 %1955 }
 0x842   : > { %v1997_v38 = vsel %vm879_vm14, %v10524_v62, %v1956_v60 }
 0x846   : > { %v1831_v36 = vpop.xlane.xlu2 %1830 }
 0x847   : > { %10040 = vrcp.f32 %v1831_v36 }
 0x849   : > { %v1958_v59 = vpop.permute.xlu1 %1957 }
 0x84a   : > { %v1998_v19 = vsel %vm879_vm14, %v10529_v2, %v1958_v59  ;;  %v10143_v2 = vld [vmem:[%s10385_s27 + $0x8] sm:$0xff] }
 0x84b   : > { %v2203_v59 = vld [vmem:[%s13264_s8 + $0xc8] sm:$0xff] }
 0x84d   : > { %v10041_v11 = vpop.eup %10040 }
 0x84e   : > { %v1841_v16 = vmul.f32 %v10041_v11, %v10033_v1  ;;  %v1834_v18 = vpop.xlane.xlu2 %1833 }
 0x84f   : > { %10042 = vrcp.f32 %v1834_v18  ;;  %v10145_v18 = vld [vmem:[%s10385_s27 + $0x18] sm:$0xff]  ;;  %s13327_s27 = smov 32  }
 0x850   : > { %8080 = vmatmul.msk.f32.vlgmr.msra.gmra.mxu2 %vm879_vm14, %v1841_v16 }
 0x851   : > { %v2026_v62 = vpop.permute.xlu1 %2025 }
 0x855   : > { %v10043_v21 = vpop.eup %10042 }
 0x856   : > { %v1842_v22 = vmul.f32 %v10043_v21, %v10035_v3  ;;  %v9936_v23 = vpop.permute.xlu2 %9935 }
 0x857   : > { %v9938_v27 = vunpack.i.h.bf16 %v9936_v23  ;;  %v9937_v30 = vunpack.i.l.bf16 %v9936_v23  ;;  %v10174_v23 = vmov 32.0  }
 0x858   : > { %8081 = vmatmul.msk.f32.vlgmr.msrb.gmra.mxu1 %vm879_vm14, %v1842_v22  ;;  %10044 = vrcp.f32 %v10174_v23 }
 0x859   : > { %2052 = vmatpush.msrb.mxu3 %v9937_v30 }
 0x85b   : > { %2053 = vmatpush.msrb.mxu3 %v9938_v27 }
 0x85d   : > { %2054 = vmatpush.msrb.mxu3 %v9942_v44 }
 0x85e   : > { %v1970_v55 = vpop.permute.xlu2 %1969  ;;  %v10045_v27 = vpop.eup %10044 }
 0x85f   : > { %2055 = vmatpush.msrb.mxu3 %v9943_v43  ;;  %v2000_v57 = vsel %vm772_vm8, %v1996_v56, %v1970_v55  ;;  %v2086_v30 = vmul.f32 32.0, %v10045_v27  ;;  %vm2090_vm4 = vweird.f32 %v10045_v27 }
 0x866   : > { %v1972_v37 = vpop.permute.xlu2 %1971 }
 0x867   : > { %v2001_v40 = vsel %vm772_vm8, %v1997_v38, %v1972_v37 }
 0x86e   : > { %v1974_v61 = vpop.permute.xlu2 %1973 }
 0x86f   : > { %v2002_v63 = vsel %vm772_vm8, %v1998_v19, %v1974_v61 }
 0x896   : > { %v1866_v31 = vpop.f32.mrf.mxu3 }
 0x897   : > { %1983 = vrot.lane.b32.xlu0 %v1866_v31, %s13281_s18  ;;  %v2087_v31 = vsub.f32 1.0, %v2086_v30 }
 0x8af   : > { %v1892_v39 = vpop.f32.mrf.mxu0 }
 0x8b0   : > { %1985 = vrot.lane.b32.xlu0 %v1892_v39, %s13281_s18  ;;  %v2088_v39 = vmul.f32 %v10045_v27, %v2087_v31 }
 0x8b2   : > { %v2089_v41 = vadd.f32 %v10045_v27, %v2088_v39 }
 0x8b4   : > { %v10719_v43 = vsel %vm2090_vm4, %v10045_v27, %v2089_v41  ;;  %v10146_v41 = vld [vmem:[%s13263_s7] sm:$0xff] }
 0x8b5   : > { %13314 = vst [vmem:[#allocation11_spill] sm:$0xff] %v10719_v43 }
 0x8d3   : > { %v1918_v45 = vpop.f32.mrf.mxu2 }
 0x8d4   : > { %1987 = vrot.lane.b32.xlu0 %v1918_v45, %s13281_s18 }
 0x8d5   : > { %v1944_v46 = vpop.f32.mrf.mxu1 }
 0x8dc   : > { %1989 = vrot.lane.b32.xlu0 %v1944_v46, %s13281_s18  ;;  %s13326_s18 = smov 40  }
 0x909   : > { %v1984_v47 = vpop.permute.xlu0 %1983 }
 0x90a   : > { %v2004_v52 = vsel %vm2003_vm1, %v1999_v20, %v1984_v47 }
 0x90b   : > { %8082 = vmatmul.msk.f32.vlgmr.msrb.gmra.mxu3 %vm717_vm3, %v2004_v52 }
 0x922   : > { %v1986_v24 = vpop.permute.xlu0 %1985 }
 0x923   : > { %v2005_v58 = vsel %vm2003_vm1, %v2000_v57, %v1986_v24 }
 0x924   : > { %8083 = vmatmul.msk.f32.gmra.mxu3 %vm717_vm3, %v2005_v58 }
 0x946   : > { %v1988_v15 = vpop.permute.xlu0 %1987 }
 0x947   : > { %v2006_v17 = vsel %vm2003_vm1, %v2001_v40, %v1988_v15 }
 0x948   : > { %8084 = vmatmul.msk.f32.gmra.mxu3 %vm717_vm3, %v2006_v17  ;;  %v2202_v17 = vld [vmem:[%s13264_s8 + $0xc0] sm:$0xff] }
 0x949   : > { %v2258_v61 = vunpack.c.l.bf16 %v2202_v17  ;;  %v2259_v19 = vunpack.c.h.bf16 %v2202_v17 }
 0x94b   : > { %2846 = vmatpush.msra.mxu0 %v2258_v61  ;;  %2875 = vmatpush.msrb.mxu2 %v2259_v19 }
 0x94e   : > { %v1990_v0 = vpop.permute.xlu0 %1989 }
 0x94f   : > { %v2007_v1 = vsel %vm2003_vm1, %v2002_v63, %v1990_v0  ;;  %v2260_v63 = vunpack.c.l.bf16 %v2203_v59  ;;  %v2261_v0 = vunpack.c.h.bf16 %v2203_v59 }
 0x950   : > { %8085 = vmatmul.msk.f32.gmra.mxu3 %vm717_vm3, %v2007_v1  ;;  %v2194_v1 = vld [vmem:[%s13264_s8 + $0x80] sm:$0xff] }
 0x951   : > { %2904 = vmatpush.msra.mxu1 %v2260_v63  ;;  %2933 = vmatpush.msra.mxu3 %v2261_v0  ;;  %v2204_v63 = vld [vmem:[%s13264_s8 + $0xd0] sm:$0xff]  ;;  %v2205_v0 = vld [vmem:[%s13264_s8 + $0xd8] sm:$0xff] }
 0x98e   : > { %v2057_v32 = vpop.f32.mrf.mxu3 }
 0x98f   : > { %v2058_v3 = vadd.f32 %v2057_v32, %v2026_v62  ;;  %v2242_v32 = vunpack.c.l.bf16 %v2194_v1 }
 0x991   : > { %v2069_v35 = vadd.f32 %v10142_v4, %v2058_v3  ;;  %v2243_v3 = vunpack.c.h.bf16 %v2194_v1  ;;  %2847 = vmatpush.msra.mxu0 %v2242_v32  ;;  %v2262_v1 = vunpack.c.l.bf16 %v2204_v63  ;;  %v2264_v32 = vunpack.c.l.bf16 %v2205_v0 }
 0x993   : > { %v2073_v5 = vsel %vm717_vm3, %v2069_v35, 0.0  ;;  %2876 = vmatpush.msrb.mxu2 %v2243_v3  ;;  %v2265_v3 = vunpack.c.h.bf16 %v2205_v0 }
 0x994   : > { %2074 = vadd.xlane.f32.xlu2 %v2073_v5  ;;  %v2186_v5 = vld [vmem:[%s13264_s8 + $0x40] sm:$0xff] }
 0x9a7   : > { %v2060_v6 = vpop.f32.mrf.mxu3 }
 0x9a8   : > { %v2061_v48 = vadd.f32 %v2060_v6, %v2026_v62  ;;  %v2187_v6 = vld [vmem:[%s13264_s8 + $0x48] sm:$0xff] }
 0x9aa   : > { %v2070_v54 = vadd.f32 %v10143_v2, %v2061_v48  ;;  %v2226_v48 = vunpack.c.l.bf16 %v2186_v5  ;;  %v2227_v2 = vunpack.c.h.bf16 %v2186_v5  ;;  %v2188_v5 = vld [vmem:[%s13264_s8 + $0x50] sm:$0xff] }
 0x9ac   : > { %v2076_v12 = vsel %vm717_vm3, %v2070_v54, 0.0  ;;  %2848 = vmatpush.msra.mxu0 %v2226_v48  ;;  %2877 = vmatpush.msrb.mxu2 %v2227_v2 }
 0x9ad   : > { %2077 = vadd.xlane.f32.xlu0 %v2076_v12  ;;  %v2229_v12 = vunpack.c.h.bf16 %v2187_v6 }
 0x9cb   : > { %v2063_v13 = vpop.f32.mrf.mxu3 }
 0x9cc   : > { %v2064_v14 = vadd.f32 %v2063_v13, %v2026_v62  ;;  %v2178_v13 = vld [vmem:[%s13264_s8] sm:$0xff] }
 0x9ce   : > { %v2071_v34 = vadd.f32 %v10144_v33, %v2064_v14  ;;  %v2179_v14 = vld [vmem:[%s13264_s8 + $0x8] sm:$0xff]  ;;  %v2210_v33 = vunpack.c.l.bf16 %v2178_v13 }
 0x9d0   : > { %v2079_v36 = vsel %vm717_vm3, %v2071_v34, 0.0  ;;  %2849 = vmatpush.msra.mxu0 %v2210_v33 }
 0x9d1   : > { %2080 = vadd.xlane.f32.xlu1 %v2079_v36  ;;  %v2212_v36 = vunpack.c.l.bf16 %v2179_v14 }
 0x9d2   : > { %2962 = vmatpush.msrb.mxu0 %v2262_v1  ;;  %v2199_v1 = vld [vmem:[%s13264_s8 + $0xa8] sm:$0xff] }
 0x9d3   : > { %v2066_v11 = vpop.f32.mrf.mxu3 }
 0x9d4   : > { %v2067_v16 = vadd.f32 %v2066_v11, %v2026_v62  ;;  %v2195_v62 = vld [vmem:[%s13264_s8 + $0x88] sm:$0xff]  ;;  %v2213_v11 = vunpack.c.h.bf16 %v2179_v14  ;;  %v2181_v14 = vld [vmem:[%s13264_s8 + $0x18] sm:$0xff] }
 0x9d5   : > { %v2244_v4 = vunpack.c.l.bf16 %v2195_v62 }
 0x9d6   : > { %v2072_v21 = vadd.f32 %v10145_v18, %v2067_v16 }
 0x9d7   : > { %2905 = vmatpush.msra.mxu1 %v2244_v4  ;;  %v2196_v4 = vld [vmem:[%s13264_s8 + $0x90] sm:$0xff] }
 0x9d8   : > { %v2082_v22 = vsel %vm717_vm3, %v2072_v21, 0.0  ;;  %v2247_v48 = vunpack.c.h.bf16 %v2196_v4 }
 0x9d9   : > { %2083 = vadd.xlane.f32.xlu2 %v2082_v22 }
 0xa07   : > { %v2075_v44 = vpop.xlane.xlu2 %2074 }
 0xa08   : > { %v2092_v45 = vmul.f32 %v10719_v43, %v2075_v44  ;;  %v10773_v44 = vperm.slane %v10146_v41, 1 }
 0xa0a   : > { %v10722_v46 = vsub.f32 %v2069_v35, %v2092_v45  ;;  %v2245_v35 = vunpack.c.h.bf16 %v2195_v62  ;;  %v2263_v62 = vunpack.c.h.bf16 %v2204_v63 }
 0xa0c   : > { %v2100_v49 = vmul.f32 %v10722_v46, %v10722_v46  ;;  %2934 = vmatpush.msra.mxu3 %v2245_v35  ;;  %v2197_v35 = vld [vmem:[%s13264_s8 + $0x98] sm:$0xff] }
 0xa0d   : > { %v2248_v2 = vunpack.c.l.bf16 %v2197_v35 }
 0xa0e   : > { %v2104_v50 = vsel %vm717_vm3, %v2100_v49, 0.0  ;;  %2935 = vmatpush.msra.mxu3 %v2229_v12  ;;  %v10775_v49 = vperm.slane %v10146_v41, 2  ;;  %v2189_v12 = vld [vmem:[%s13264_s8 + $0x58] sm:$0xff] }
 0xa0f   : > { %2105 = vadd.xlane.f32.xlu0 %v2104_v50 }
 0xa10   : > { %2936 = vmatpush.msra.mxu3 %v2213_v11  ;;  %v2232_v11 = vunpack.c.l.bf16 %v2189_v12 }
 0xa12   : > { %3049 = vmatpush.msrb.mxu3 %v2265_v3 }
 0xa20   : > { %v2078_v51 = vpop.xlane.xlu0 %2077 }
 0xa21   : > { %v2093_v20 = vmul.f32 %v10719_v43, %v2078_v51 }
 0xa23   : > { %v10728_v47 = vsub.f32 %v2070_v54, %v2093_v20  ;;  %v2228_v54 = vunpack.c.l.bf16 %v2187_v6  ;;  %v2246_v6 = vunpack.c.l.bf16 %v2196_v4  ;;  %v2252_v4 = vunpack.c.l.bf16 %v2199_v1 }
 0xa25   : > { %v2101_v52 = vmul.f32 %v10728_v47, %v10728_v47  ;;  %2906 = vmatpush.msra.mxu1 %v2228_v54  ;;  %v2249_v54 = vunpack.c.h.bf16 %v2197_v35  ;;  %2963 = vmatpush.msrb.mxu0 %v2246_v6  ;;  %v2253_v35 = vunpack.c.h.bf16 %v2199_v1 }
 0xa27   : > { %v2107_v53 = vsel %vm717_vm3, %v2101_v52, 0.0  ;;  %2907 = vmatpush.msra.mxu1 %v2212_v36  ;;  %v2231_v36 = vunpack.c.h.bf16 %v2188_v5  ;;  %3050 = vmatpush.msrb.mxu3 %v2249_v54 }
 0xa28   : > { %2108 = vadd.xlane.f32.xlu2 %v2107_v53 }
 0xa29   : > { %3020 = vmatpush.msrb.mxu1 %v2264_v32 }
 0xa2b   : > { %3021 = vmatpush.msrb.mxu1 %v2248_v2 }
 0xa2d   : > { %3022 = vmatpush.msrb.mxu1 %v2232_v11  ;;  %v2208_v11 = vld [vmem:[%s13264_s8 + $0xf0] sm:$0xff] }
 0xa44   : > { %v2081_v55 = vpop.xlane.xlu1 %2080 }
 0xa45   : > { %v2094_v56 = vmul.f32 %v10719_v43, %v2081_v55 }
 0xa47   : > { %v10734_v57 = vsub.f32 %v2071_v34, %v2094_v56  ;;  %v2211_v34 = vunpack.c.h.bf16 %v2178_v13  ;;  %v2180_v13 = vld [vmem:[%s13264_s8 + $0x10] sm:$0xff] }
 0xa49   : > { %v2102_v24 = vmul.f32 %v10734_v57, %v10734_v57  ;;  %2878 = vmatpush.msrb.mxu2 %v2211_v34  ;;  %v2230_v34 = vunpack.c.l.bf16 %v2188_v5  ;;  %v2191_v5 = vld [vmem:[%s13264_s8 + $0x68] sm:$0xff] }
 0xa4a   : > { %v2236_v2 = vunpack.c.l.bf16 %v2191_v5  ;;  %v2237_v54 = vunpack.c.h.bf16 %v2191_v5  ;;  %v9659_v5 = vld [vmem:[%s13266_s10 + $0xf0] sm:$0xff]  }
 0xa4b   : > { %v2110_v58 = vsel %vm717_vm3, %v2102_v24, 0.0  ;;  %2991 = vmatpush.msra.mxu2 %v2263_v62  ;;  %2964 = vmatpush.msrb.mxu0 %v2230_v34  ;;  %v2190_v62 = vld [vmem:[%s13264_s8 + $0x60] sm:$0xff] }
 0xa4c   : > { %2111 = vadd.xlane.f32.xlu1 %v2110_v58  ;;  %v2084_v60 = vpop.xlane.xlu2 %2083  ;;  %v2234_v6 = vunpack.c.l.bf16 %v2190_v62 }
 0xa4d   : > { %v2095_v37 = vmul.f32 %v10719_v43, %v2084_v60  ;;  %2992 = vmatpush.msra.mxu2 %v2247_v48  ;;  %v2235_v48 = vunpack.c.h.bf16 %v2190_v62 }
 0xa4f   : > { %v10740_v38 = vsub.f32 %v2072_v21, %v2095_v37  ;;  %2993 = vmatpush.msra.mxu2 %v2231_v36 }
 0xa51   : > { %v2103_v40 = vmul.f32 %v10740_v38, %v10740_v38 }
 0xa53   : > { %v2113_v15 = vsel %vm717_vm3, %v2103_v40, 0.0 }
 0xa54   : > { %2114 = vadd.xlane.f32.xlu0 %v2113_v15 }
 0xa82   : > { %v2106_v16 = vpop.xlane.xlu0 %2105 }
 0xa83   : > { %v2116_v18 = vmul.f32 %v2106_v16, %v10719_v43  ;;  %v2233_v16 = vunpack.c.h.bf16 %v2189_v12  ;;  %v2182_v12 = vld [vmem:[%s13264_s8 + $0x20] sm:$0xff] }
 0xa85   : > { %v2120_v21 = vadd.f32 1e-05, %v2116_v18  ;;  %3051 = vmatpush.msrb.mxu3 %v2233_v16  ;;  %v2209_v16 = vld [vmem:[%s13264_s8 + $0xf8] sm:$0xff] }
 0xa87   : > { %10046 = vrsqrt.f32 %v2120_v21  ;;  %vm2130_vm7 = vweird.f32 %v2120_v21 }
 0xa8d   : > { %v10047_v22 = vpop.eup %10046 }
 0xa8e   : > { %v2125_v23 = vmul.f32 %v10047_v22, %v2120_v21  ;;  %vm2131_vm6 = vweird.f32 %v10047_v22  ;;  %v2214_v21 = vunpack.c.l.bf16 %v2180_v13 }
 0xa8f   : > { %vm2132_vm9 = vmor %vm2130_vm7, %vm2131_vm6 }
 0xa90   : > { %v2126_v27 = vmul.f32 %v10047_v22, %v2125_v23  ;;  %v2216_v23 = vunpack.c.l.bf16 %v2181_v14  ;;  %2965 = vmatpush.msrb.mxu0 %v2214_v21  ;;  %v2271_v21 = vunpack.c.h.bf16 %v2208_v11 }
 0xa92   : > { %v2127_v30 = vmul.f32 0.5, %v2126_v27  ;;  %v2217_v27 = vunpack.c.h.bf16 %v2181_v14  ;;  %3023 = vmatpush.msrb.mxu1 %v2216_v23  ;;  %v2218_v14 = vunpack.c.l.bf16 %v2182_v12  ;;  %v2273_v23 = vunpack.c.h.bf16 %v2209_v16 }
 0xa94   : > { %v2128_v31 = vsub.f32 1.5, %v2127_v30  ;;  %3052 = vmatpush.msrb.mxu3 %v2217_v27  ;;  %v2200_v27 = vld [vmem:[%s13264_s8 + $0xb0] sm:$0xff] }
 0xa96   : > { %v2129_v39 = vmul.f32 %v10047_v22, %v2128_v31 }
 0xa98   : > { %v2133_v45 = vsel %vm2132_vm9, %v10047_v22, %v2129_v39  ;;  %v2215_v22 = vunpack.c.h.bf16 %v2180_v13  ;;  %v2183_v13 = vld [vmem:[%s13264_s8 + $0x28] sm:$0xff] }
 0xa99   : > { %v2164_v50 = vmul.f32 %v2133_v45, %v10722_v46  ;;  %v2220_v34 = vunpack.c.l.bf16 %v2183_v13  ;;  %v2221_v36 = vunpack.c.h.bf16 %v2183_v13  ;;  %v9642_v13 = vld [vmem:[%s13266_s10 + $0x68] sm:$0xff]  }
 0xa9a   : > { %2994 = vmatpush.msra.mxu2 %v2215_v22  ;;  %v2272_v22 = vunpack.c.l.bf16 %v2209_v16  ;;  %v8728_v16 = vunpack.c.l.bf16 %v9659_v5 }
 0xa9b   : > { %v2169_v51 = vmul.f32 %v10773_v44, %v2164_v50  ;;  %v2109_v20 = vpop.xlane.xlu2 %2108 }
 0xa9c   : > { %v2117_v52 = vmul.f32 %v2109_v20, %v10719_v43 }
 0xa9d   : > { %v10781_v53 = vadd.f32 %v10775_v49, %v2169_v51 }
 0xa9e   : > { %v2121_v55 = vadd.f32 1e-05, %v2117_v52 }
 0xa9f   : > { %8086 = vmatmul.msk.f32.vlgmr.msra.gmra.mxu0 %vm717_vm3, %v10781_v53  ;;  %8090 = vmatmul.msk.f32.vlgmr.msrb.gmra.mxu2 %vm717_vm3, %v10781_v53 }
 0xaa0   : > { %10048 = vrsqrt.f32 %v2121_v55  ;;  %8094 = vmatmul.msk.f32.vlgmr.msra.gmra.mxu1 %vm717_vm3, %v10781_v53  ;;  %8098 = vmatmul.msk.f32.vlgmr.msra.gmra.mxu3 %vm717_vm3, %v10781_v53  ;;  %vm2140_vm11 = vweird.f32 %v2121_v55 }
 0xaa6   : > { %v10049_v46 = vpop.eup %10048 }
 0xaa7   : > { %v2135_v56 = vmul.f32 %v10049_v46, %v2121_v55  ;;  %vm2141_vm10 = vweird.f32 %v10049_v46 }
 0xaa8   : > { %vm2142_vm12 = vmor %vm2140_vm11, %vm2141_vm10 }
 0xaa9   : > { %v2136_v24 = vmul.f32 %v10049_v46, %v2135_v56 }
 0xaab   : > { %v2137_v58 = vmul.f32 0.5, %v2136_v24 }
 0xaad   : > { %v2138_v60 = vsub.f32 1.5, %v2137_v58 }
 0xaaf   : > { %v2139_v37 = vmul.f32 %v10049_v46, %v2138_v60 }
 0xab1   : > { %v2143_v40 = vsel %vm2142_vm12, %v10049_v46, %v2139_v37 }
 0xab2   : > { %v2165_v15 = vmul.f32 %v2143_v40, %v10728_v47 }
 0xab4   : > { %v2170_v17 = vmul.f32 %v10773_v44, %v2165_v15 }
 0xab6   : > { %v10794_v59 = vadd.f32 %v10775_v49, %v2170_v17 }
 0xab8   : > { %8087 = vmatmul.msk.f32.gmra.mxu0 %vm717_vm3, %v10794_v59  ;;  %8091 = vmatmul.msk.f32.gmra.mxu2 %vm717_vm3, %v10794_v59 }
 0xab9   : > { %8095 = vmatmul.msk.f32.gmra.mxu1 %vm717_vm3, %v10794_v59  ;;  %8099 = vmatmul.msk.f32.gmra.mxu3 %vm717_vm3, %v10794_v59 }
 0xabf   : > { %v2112_v61 = vpop.xlane.xlu1 %2111 }
 0xac0   : > { %v2118_v47 = vmul.f32 %v2112_v61, %v10719_v43 }
 0xac2   : > { %v2122_v19 = vadd.f32 1e-05, %v2118_v47  ;;  %v2206_v47 = vld [vmem:[%s13264_s8 + $0xe0] sm:$0xff] }
 0xac3   : > { %v2267_v63 = vunpack.c.h.bf16 %v2206_v47 }
 0xac4   : > { %10050 = vrsqrt.f32 %v2122_v19  ;;  %vm2150_vm4 = vweird.f32 %v2122_v19 }
 0xac5   : > { %3107 = vmatpush.msrb.mxu2 %v2267_v63  ;;  %v9660_v63 = vld [vmem:[%s13266_s10 + $0xf8] sm:$0xff]  }
 0xac7   : > { %v2115_v33 = vpop.xlane.xlu0 %2114 }
 0xac8   : > { %v2119_v18 = vmul.f32 %v2115_v33, %v10719_v43  ;;  %v2219_v33 = vunpack.c.h.bf16 %v2182_v12  ;;  %v9634_v12 = vld [vmem:[%s13266_s10 + $0x28] sm:$0xff]  }
 0xaca   : > { %v10051_v30 = vpop.eup %10050  ;;  %v2123_v31 = vadd.f32 1e-05, %v2119_v18  ;;  %v2270_v18 = vunpack.c.l.bf16 %v2208_v11 }
 0xacb   : > { %v2145_v39 = vmul.f32 %v10051_v30, %v2122_v19  ;;  %vm2151_vm13 = vweird.f32 %v10051_v30  ;;  %v2207_v19 = vld [vmem:[%s13264_s8 + $0xe8] sm:$0xff] }
 0xacc   : > { %10052 = vrsqrt.f32 %v2123_v31  ;;  %vm2152_vm6 = vmor %vm2150_vm4, %vm2151_vm13  ;;  %vm2160_vm9 = vweird.f32 %v2123_v31  ;;  %v2269_v0 = vunpack.c.h.bf16 %v2207_v19 }
 0xacd   : > { %v2146_v41 = vmul.f32 %v10051_v30, %v2145_v39  ;;  %v2255_v39 = vunpack.c.h.bf16 %v2200_v27 }
 0xace   : > { %3165 = vmatpush.msra.mxu3 %v2269_v0  ;;  %v8733_v0 = vunpack.c.h.bf16 %v9660_v63 }
 0xacf   : > { %v2147_v45 = vmul.f32 0.5, %v2146_v41 }
 0xad0   : > { %3166 = vmatpush.msra.mxu3 %v2253_v35  ;;  %v9651_v35 = vld [vmem:[%s13266_s10 + $0xb0] sm:$0xff]  }
 0xad1   : > { %v2148_v50 = vsub.f32 1.5, %v2147_v45  ;;  %v8696_v11 = vunpack.c.l.bf16 %v9651_v35 }
 0xad2   : > { %v10053_v51 = vpop.eup %10052  ;;  %3167 = vmatpush.msra.mxu3 %v2237_v54  ;;  %v8729_v54 = vunpack.c.h.bf16 %v9659_v5 }
 0xad3   : > { %v2149_v20 = vmul.f32 %v10051_v30, %v2148_v50  ;;  %v2155_v52 = vmul.f32 %v10053_v51, %v2123_v31  ;;  %vm2161_vm7 = vweird.f32 %v10053_v51  ;;  %v2254_v31 = vunpack.c.l.bf16 %v2200_v27  ;;  %v2192_v50 = vld [vmem:[%s13264_s8 + $0x70] sm:$0xff]  ;;  %v9633_v27 = vld [vmem:[%s13266_s10 + $0x20] sm:$0xff]  }
 0xad4   : > { %vm2162_vm10 = vmor %vm2160_vm9, %vm2161_vm7  ;;  %3168 = vmatpush.msra.mxu3 %v2221_v36  ;;  %v9658_v36 = vld [vmem:[%s13266_s10 + $0xe8] sm:$0xff]  }
 0xad5   : > { %v2153_v55 = vsel %vm2152_vm6, %v10051_v30, %v2149_v20  ;;  %v2156_v46 = vmul.f32 %v10053_v51, %v2155_v52  ;;  %v2201_v30 = vld [vmem:[%s13264_s8 + $0xb8] sm:$0xff]  ;;  %v2238_v20 = vunpack.c.l.bf16 %v2192_v50  ;;  %v2239_v52 = vunpack.c.h.bf16 %v2192_v50 }
 0xad6   : > { %v2166_v56 = vmul.f32 %v2153_v55, %v10734_v57  ;;  %v2256_v41 = vunpack.c.l.bf16 %v2201_v30  ;;  %v2257_v45 = vunpack.c.h.bf16 %v2201_v30  ;;  %v9641_v30 = vld [vmem:[%s13266_s10 + $0x60] sm:$0xff]  }
 0xad7   : > { %v2157_v24 = vmul.f32 0.5, %v2156_v46 }
 0xad8   : > { %v2171_v58 = vmul.f32 %v10773_v44, %v2166_v56  ;;  %v2184_v56 = vld [vmem:[%s13264_s8 + $0x30] sm:$0xff] }
 0xad9   : > { %v2158_v60 = vsub.f32 1.5, %v2157_v24  ;;  %v2185_v24 = vld [vmem:[%s13264_s8 + $0x38] sm:$0xff] }
 0xada   : > { %v10833_v37 = vadd.f32 %v10775_v49, %v2171_v58  ;;  %v2222_v58 = vunpack.c.l.bf16 %v2184_v56 }
 0xadb   : > { %v2159_v40 = vmul.f32 %v10053_v51, %v2158_v60  ;;  %v2223_v60 = vunpack.c.h.bf16 %v2184_v56  ;;  %v8624_v56 = vunpack.c.l.bf16 %v9633_v27 }
 0xadc   : > { %8088 = vmatmul.msk.f32.gmra.mxu0 %vm717_vm3, %v10833_v37  ;;  %8092 = vmatmul.msk.f32.gmra.mxu2 %vm717_vm3, %v10833_v37 }
 0xadd   : > { %v2163_v15 = vsel %vm2162_vm10, %v10053_v51, %v2159_v40  ;;  %8096 = vmatmul.msk.f32.gmra.mxu1 %vm717_vm3, %v10833_v37  ;;  %8100 = vmatmul.msk.f32.gmra.mxu3 %vm717_vm3, %v10833_v37  ;;  %v2193_v51 = vld [vmem:[%s13264_s8 + $0x78] sm:$0xff]  ;;  %v2224_v40 = vunpack.c.l.bf16 %v2185_v24 }
 0xade   : > { %v2167_v57 = vmul.f32 %v2163_v15, %v10740_v38  ;;  %v2266_v38 = vunpack.c.l.bf16 %v2206_v47  ;;  %v2240_v55 = vunpack.c.l.bf16 %v2193_v51  ;;  %v2241_v46 = vunpack.c.h.bf16 %v2193_v51  ;;  %v9652_v47 = vld [vmem:[%s13266_s10 + $0xb8] sm:$0xff]  }
 0xadf   : > { %v2225_v15 = vunpack.c.h.bf16 %v2185_v24  ;;  %v8700_v62 = vunpack.c.l.bf16 %v9652_v47  ;;  %v8724_v51 = vunpack.c.l.bf16 %v9658_v36  ;;  %v8656_v24 = vunpack.c.l.bf16 %v9641_v30 }
 0xae0   : > { %v2172_v17 = vmul.f32 %v10773_v44, %v2167_v57  ;;  %v2268_v44 = vunpack.c.l.bf16 %v2207_v19  ;;  %3078 = vmatpush.msra.mxu0 %v2266_v38  ;;  %v9636_v57 = vld [vmem:[%s13266_s10 + $0x38] sm:$0xff]  }
 0xae1   : > { %v8637_v19 = vunpack.c.h.bf16 %v9636_v57 }
 0xae2   : > { %v10846_v61 = vadd.f32 %v10775_v49, %v2172_v17  ;;  %v2198_v49 = vld [vmem:[%s13264_s8 + $0xa0] sm:$0xff]  ;;  %3136 = vmatpush.msra.mxu1 %v2268_v44  ;;  %v9644_v17 = vld [vmem:[%s13266_s10 + $0x78] sm:$0xff]   ;;  %v8701_v44 = vunpack.c.h.bf16 %v9652_v47 }
 0xae3   : > { %v2250_v32 = vunpack.c.l.bf16 %v2198_v49  ;;  %v2251_v3 = vunpack.c.h.bf16 %v2198_v49  ;;  %v8669_v38 = vunpack.c.h.bf16 %v9644_v17  ;;  %v8636_v49 = vunpack.c.l.bf16 %v9636_v57  ;;  %v9648_v57 = vld [vmem:[%s13266_s10 + $0x98] sm:$0xff]  }
 0xae4   : > { %8089 = vmatmul.msk.f32.gmra.mxu0 %vm717_vm3, %v10846_v61  ;;  %8093 = vmatmul.msk.f32.gmra.mxu2 %vm717_vm3, %v10846_v61  ;;  %v8668_v1 = vunpack.c.l.bf16 %v9644_v17  ;;  %v9656_v17 = vld [vmem:[%s13266_s10 + $0xd8] sm:$0xff]  }
 0xae5   : > { %8097 = vmatmul.msk.f32.gmra.mxu1 %vm717_vm3, %v10846_v61  ;;  %8101 = vmatmul.msk.f32.gmra.mxu3 %vm717_vm3, %v10846_v61 }
 0xae6   : > { %3079 = vmatpush.msra.mxu0 %v2250_v32  ;;  %3108 = vmatpush.msrb.mxu2 %v2251_v3  ;;  %v8732_v32 = vunpack.c.l.bf16 %v9660_v63  ;;  %v9635_v3 = vld [vmem:[%s13266_s10 + $0x30] sm:$0xff]   ;;  %v8717_v63 = vunpack.c.h.bf16 %v9656_v17 }
 0xae7   : > { %3137 = vmatpush.msra.mxu1 %v2252_v4  ;;  %v9643_v4 = vld [vmem:[%s13266_s10 + $0x70] sm:$0xff]  }
 0xae8   : > { %3080 = vmatpush.msra.mxu0 %v2234_v6  ;;  %3109 = vmatpush.msrb.mxu2 %v2235_v48  ;;  %v8633_v6 = vunpack.c.h.bf16 %v9635_v3  ;;  %v8665_v48 = vunpack.c.h.bf16 %v9643_v4 }
 0xae9   : > { %3138 = vmatpush.msra.mxu1 %v2236_v2  ;;  %v8697_v2 = vunpack.c.h.bf16 %v9651_v35 }
 0xaea   : > { %3081 = vmatpush.msra.mxu0 %v2218_v14  ;;  %3110 = vmatpush.msrb.mxu2 %v2219_v33  ;;  %v8632_v14 = vunpack.c.l.bf16 %v9635_v3  ;;  %v8664_v33 = vunpack.c.l.bf16 %v9643_v4  ;;  %v8684_v3 = vunpack.c.l.bf16 %v9648_v57  ;;  %v8716_v4 = vunpack.c.l.bf16 %v9656_v17 }
 0xaeb   : > { %3139 = vmatpush.msra.mxu1 %v2220_v34  ;;  %v9650_v34 = vld [vmem:[%s13266_s10 + $0xa8] sm:$0xff]  }
 0xaec   : > { %8102 = vmatmul.msk.f32.vlgmr.msrb.gmra.mxu0 %vm717_vm3, %v10781_v53  ;;  %8106 = vmatmul.msk.f32.vlgmr.msra.gmra.mxu2 %vm717_vm3, %v10781_v53  ;;  %v8692_v50 = vunpack.c.l.bf16 %v9650_v34 }
 0xaed   : > { %8110 = vmatmul.msk.f32.vlgmr.msrb.gmra.mxu1 %vm717_vm3, %v10781_v53  ;;  %8114 = vmatmul.msk.f32.vlgmr.msrb.gmra.mxu3 %vm717_vm3, %v10781_v53 }
 0xaee   : > { %3194 = vmatpush.msrb.mxu0 %v2270_v18  ;;  %3223 = vmatpush.msra.mxu2 %v2271_v21  ;;  %v8629_v18 = vunpack.c.h.bf16 %v9634_v12  ;;  %v8661_v21 = vunpack.c.h.bf16 %v9642_v13 }
 0xaef   : > { %3252 = vmatpush.msrb.mxu1 %v2272_v22  ;;  %3281 = vmatpush.msrb.mxu3 %v2273_v23  ;;  %v8693_v22 = vunpack.c.h.bf16 %v9650_v34  ;;  %v8725_v23 = vunpack.c.h.bf16 %v9658_v36 }
 0xaf0   : > { %3195 = vmatpush.msrb.mxu0 %v2254_v31  ;;  %3224 = vmatpush.msra.mxu2 %v2255_v39  ;;  %v8628_v31 = vunpack.c.l.bf16 %v9634_v12  ;;  %v8660_v39 = vunpack.c.l.bf16 %v9642_v13 }
 0xaf1   : > { %3253 = vmatpush.msrb.mxu1 %v2256_v41  ;;  %3282 = vmatpush.msrb.mxu3 %v2257_v45  ;;  %v9649_v41 = vld [vmem:[%s13266_s10 + $0xa0] sm:$0xff]  }
 0xaf2   : > { %3196 = vmatpush.msrb.mxu0 %v2238_v20  ;;  %3225 = vmatpush.msra.mxu2 %v2239_v52  ;;  %v9657_v45 = vld [vmem:[%s13266_s10 + $0xe0] sm:$0xff]   ;;  %v8625_v20 = vunpack.c.h.bf16 %v9633_v27  ;;  %v8657_v52 = vunpack.c.h.bf16 %v9641_v30 }
 0xaf3   : > { %3254 = vmatpush.msrb.mxu1 %v2240_v55  ;;  %3283 = vmatpush.msrb.mxu3 %v2241_v46  ;;  %v8689_v55 = vunpack.c.h.bf16 %v9649_v41  ;;  %v8721_v46 = vunpack.c.h.bf16 %v9657_v45 }
 0xaf4   : > { %8103 = vmatmul.msk.f32.gmra.mxu0 %vm717_vm3, %v10794_v59  ;;  %8107 = vmatmul.msk.f32.gmra.mxu2 %vm717_vm3, %v10794_v59 }
 0xaf5   : > { %8111 = vmatmul.msk.f32.gmra.mxu1 %vm717_vm3, %v10794_v59  ;;  %8115 = vmatmul.msk.f32.gmra.mxu3 %vm717_vm3, %v10794_v59 }
 0xaf6   : > { %3197 = vmatpush.msrb.mxu0 %v2222_v58  ;;  %3226 = vmatpush.msra.mxu2 %v2223_v60  ;;  %v8688_v58 = vunpack.c.l.bf16 %v9649_v41  ;;  %v8720_v60 = vunpack.c.l.bf16 %v9657_v45  ;;  %v9645_v41 = vld [vmem:[%s13266_s10 + $0x80] sm:$0xff]  }
 0xaf7   : > { %3255 = vmatpush.msrb.mxu1 %v2224_v40  ;;  %3284 = vmatpush.msrb.mxu3 %v2225_v15  ;;  %v9632_v40 = vld [vmem:[%s13266_s10 + $0x18] sm:$0xff]   ;;  %v9653_v45 = vld [vmem:[%s13266_s10 + $0xc0] sm:$0xff]  }
 0xaf8   : > { %v9640_v15 = vld [vmem:[%s13266_s10 + $0x58] sm:$0xff]   ;;  %v8621_v47 = vunpack.c.h.bf16 %v9632_v40 }
 0xafc   : > { %8104 = vmatmul.msk.f32.gmra.mxu0 %vm717_vm3, %v10833_v37  ;;  %8108 = vmatmul.msk.f32.gmra.mxu2 %vm717_vm3, %v10833_v37 }
 0xafd   : > { %8112 = vmatmul.msk.f32.gmra.mxu1 %vm717_vm3, %v10833_v37  ;;  %8116 = vmatmul.msk.f32.gmra.mxu3 %vm717_vm3, %v10833_v37 }
 0xb04   : > { %8105 = vmatmul.msk.f32.gmra.mxu0 %vm717_vm3, %v10846_v61  ;;  %8109 = vmatmul.msk.f32.gmra.mxu2 %vm717_vm3, %v10846_v61 }
 0xb05   : > { %8113 = vmatmul.msk.f32.gmra.mxu1 %vm717_vm3, %v10846_v61  ;;  %8117 = vmatmul.msk.f32.gmra.mxu3 %vm717_vm3, %v10846_v61 }
 0xb0c   : > { %8118 = vmatmul.msk.f32.vlgmr.msra.gmra.mxu0 %vm717_vm3, %v10781_v53  ;;  %8122 = vmatmul.msk.f32.vlgmr.msrb.gmra.mxu2 %vm717_vm3, %v10781_v53 }
 0xb0d   : > { %8126 = vmatmul.msk.f32.vlgmr.msra.gmra.mxu1 %vm717_vm3, %v10781_v53  ;;  %8130 = vmatmul.msk.f32.vlgmr.msra.gmra.mxu3 %vm717_vm3, %v10781_v53 }
 0xb0e   : > { %3363 = vmatpush.msra.mxu0 %v8637_v19  ;;  %3392 = vmatpush.msrb.mxu2 %v8669_v38  ;;  %v8653_v19 = vunpack.c.h.bf16 %v9640_v15  ;;  %v8685_v38 = vunpack.c.h.bf16 %v9648_v57 }
 0xb0f   : > { %3421 = vmatpush.msra.mxu1 %v8701_v44  ;;  %3450 = vmatpush.msra.mxu3 %v8733_v0  ;;  %v9631_v44 = vld [vmem:[%s13266_s10 + $0x10] sm:$0xff]  }
 0xb10   : > { %3364 = vmatpush.msra.mxu0 %v8636_v49  ;;  %3393 = vmatpush.msrb.mxu2 %v8668_v1  ;;  %v9639_v0 = vld [vmem:[%s13266_s10 + $0x50] sm:$0xff]   ;;  %v8620_v49 = vunpack.c.l.bf16 %v9632_v40  ;;  %v8652_v1 = vunpack.c.l.bf16 %v9640_v15  ;;  %v8617_v35 = vunpack.c.h.bf16 %v9631_v44  ;;  %v8616_v12 = vunpack.c.l.bf16 %v9631_v44 }
 0xb11   : > { %3422 = vmatpush.msra.mxu1 %v8700_v62  ;;  %3451 = vmatpush.msra.mxu3 %v8732_v32  ;;  %v9647_v62 = vld [vmem:[%s13266_s10 + $0x90] sm:$0xff]   ;;  %v8649_v5 = vunpack.c.h.bf16 %v9639_v0  ;;  %v8648_v13 = vunpack.c.l.bf16 %v9639_v0  ;;  %v8672_v40 = vunpack.c.l.bf16 %v9645_v41  ;;  %v8704_v15 = vunpack.c.l.bf16 %v9653_v45 }
 0xb12   : > { %3365 = vmatpush.msra.mxu0 %v8633_v6  ;;  %3394 = vmatpush.msrb.mxu2 %v8665_v48  ;;  %v9655_v32 = vld [vmem:[%s13266_s10 + $0xd0] sm:$0xff]   ;;  %v8681_v6 = vunpack.c.h.bf16 %v9647_v62  ;;  %v8680_v34 = vunpack.c.l.bf16 %v9647_v62 }
 0xb13   : > { %3423 = vmatpush.msra.mxu1 %v8697_v2  ;;  %3452 = vmatpush.msra.mxu3 %v8729_v54  ;;  %v8713_v48 = vunpack.c.h.bf16 %v9655_v32  ;;  %v9630_v2 = vld [vmem:[%s13266_s10 + $0x8] sm:$0xff]   ;;  %v8712_v36 = vunpack.c.l.bf16 %v9655_v32 }
 0xb14   : > { %8119 = vmatmul.msk.f32.gmra.mxu0 %vm717_vm3, %v10794_v59  ;;  %8123 = vmatmul.msk.f32.gmra.mxu2 %vm717_vm3, %v10794_v59  ;;  %v9638_v54 = vld [vmem:[%s13266_s10 + $0x48] sm:$0xff]  }
 0xb15   : > { %8127 = vmatmul.msk.f32.gmra.mxu1 %vm717_vm3, %v10794_v59  ;;  %8131 = vmatmul.msk.f32.gmra.mxu3 %vm717_vm3, %v10794_v59 }
 0xb16   : > { %3366 = vmatpush.msra.mxu0 %v8632_v14  ;;  %3395 = vmatpush.msrb.mxu2 %v8664_v33  ;;  %v9646_v14 = vld [vmem:[%s13266_s10 + $0x88] sm:$0xff]  }
 0xb17   : > { %3424 = vmatpush.msra.mxu1 %v8696_v11  ;;  %3453 = vmatpush.msra.mxu3 %v8728_v16  ;;  %v9654_v33 = vld [vmem:[%s13266_s10 + $0xc8] sm:$0xff]   ;;  %v8613_v11 = vunpack.c.h.bf16 %v9630_v2  ;;  %v8645_v16 = vunpack.c.h.bf16 %v9638_v54  ;;  %v8676_v27 = vunpack.c.l.bf16 %v9646_v14 }
 0xb18   : > { %3367 = vmatpush.msra.mxu0 %v8629_v18  ;;  %3396 = vmatpush.msrb.mxu2 %v8661_v21  ;;  %v8677_v18 = vunpack.c.h.bf16 %v9646_v14  ;;  %v8709_v21 = vunpack.c.h.bf16 %v9654_v33  ;;  %v8708_v30 = vunpack.c.l.bf16 %v9654_v33  ;;  %v9674_v33 = vld [vmem:[%s13266_s10 + $0x168] sm:$0xff]  }
 0xb19   : > { %3425 = vmatpush.msra.mxu1 %v8693_v22  ;;  %3454 = vmatpush.msra.mxu3 %v8725_v23  ;;  %v8612_v22 = vunpack.c.l.bf16 %v9630_v2  ;;  %v8644_v23 = vunpack.c.l.bf16 %v9638_v54  ;;  %v11115_v2 = vld [vmem:[%s13265_s9] sm:$0xff]  ;;  %v9666_v54 = vld [vmem:[%s13266_s10 + $0x128] sm:$0xff]  }
 0xb1a   : > { %3368 = vmatpush.msra.mxu0 %v8628_v31  ;;  %3397 = vmatpush.msrb.mxu2 %v8660_v39  ;;  %v8607_v31 = vld [vmem:[%s13266_s10] sm:$0xff]  }
 0xb1b   : > { %3426 = vmatpush.msra.mxu1 %v8692_v50  ;;  %3455 = vmatpush.msra.mxu3 %v8724_v51  ;;  %v9637_v39 = vld [vmem:[%s13266_s10 + $0x40] sm:$0xff]   ;;  %v8609_v50 = vunpack.c.h.bf16 %v8607_v31 }
 0xb1c   : > { %8120 = vmatmul.msk.f32.gmra.mxu0 %vm717_vm3, %v10833_v37  ;;  %8124 = vmatmul.msk.f32.gmra.mxu2 %vm717_vm3, %v10833_v37  ;;  %v8641_v51 = vunpack.c.h.bf16 %v9637_v39 }
 0xb1d   : > { %8128 = vmatmul.msk.f32.gmra.mxu1 %vm717_vm3, %v10833_v37  ;;  %8132 = vmatmul.msk.f32.gmra.mxu3 %vm717_vm3, %v10833_v37 }
 0xb1e   : > { %3369 = vmatpush.msra.mxu0 %v8625_v20  ;;  %3398 = vmatpush.msrb.mxu2 %v8657_v52  ;;  %v8673_v20 = vunpack.c.h.bf16 %v9645_v41  ;;  %v8705_v52 = vunpack.c.h.bf16 %v9653_v45  ;;  %v2909_v45 = vpop.f32.mrf.mxu1 }
 0xb1f   : > { %3427 = vmatpush.msra.mxu1 %v8689_v55  ;;  %3456 = vmatpush.msra.mxu3 %v8721_v46  ;;  %v9668_v55 = vld [vmem:[%s13266_s10 + $0x138] sm:$0xff]  }
 0xb20   : > { %3370 = vmatpush.msra.mxu0 %v8624_v56  ;;  %3399 = vmatpush.msrb.mxu2 %v8656_v24  ;;  %v9684_v46 = vld [vmem:[%s13266_s10 + $0x1b8] sm:$0xff]   ;;  %v8608_v56 = vunpack.c.l.bf16 %v8607_v31  ;;  %v8640_v24 = vunpack.c.l.bf16 %v9637_v39  ;;  %v8765_v57 = vunpack.c.h.bf16 %v9668_v55  ;;  %v8764_v44 = vunpack.c.l.bf16 %v9668_v55  ;;  %v11149_v31 = vld [vmem:[%s13266_s10 + $0x1a0] sm:$0xff]  }
 0xb21   : > { %3428 = vmatpush.msra.mxu1 %v8688_v58  ;;  %3457 = vmatpush.msra.mxu3 %v8720_v60  ;;  %v9676_v58 = vld [vmem:[%s13266_s10 + $0x178] sm:$0xff]   ;;  %v8829_v17 = vunpack.c.h.bf16 %v9684_v46  ;;  %v8828_v0 = vunpack.c.l.bf16 %v9684_v46  ;;  %v8789_v39 = vunpack.c.h.bf16 %v9674_v33  ;;  %v9689_v55 = vld [vmem:[%s13266_s10 + $0x1e0] sm:$0xff]   ;;  %v8788_v46 = vunpack.c.l.bf16 %v9674_v33 }
 0xb22   : > { %3371 = vmatpush.msra.mxu0 %v8621_v47  ;;  %3400 = vmatpush.msrb.mxu2 %v8653_v19  ;;  %v9692_v60 = vld [vmem:[%s13266_s10 + $0x1f8] sm:$0xff]   ;;  %v8797_v47 = vunpack.c.h.bf16 %v9676_v58  ;;  %v8796_v62 = vunpack.c.l.bf16 %v9676_v58 }
 0xb23   : > { %3429 = vmatpush.msra.mxu1 %v8685_v38  ;;  %3458 = vmatpush.msra.mxu3 %v8717_v63  ;;  %v8861_v19 = vunpack.c.h.bf16 %v9692_v60  ;;  %v9667_v38 = vld [vmem:[%s13266_s10 + $0x130] sm:$0xff]   ;;  %v8860_v32 = vunpack.c.l.bf16 %v9692_v60 }
 0xb24   : > { %8121 = vmatmul.msk.f32.gmra.mxu0 %vm717_vm3, %v10846_v61  ;;  %8125 = vmatmul.msk.f32.gmra.mxu2 %vm717_vm3, %v10846_v61  ;;  %v9683_v63 = vld [vmem:[%s13266_s10 + $0x1b0] sm:$0xff]  }
 0xb25   : > { %8129 = vmatmul.msk.f32.gmra.mxu1 %vm717_vm3, %v10846_v61  ;;  %8133 = vmatmul.msk.f32.gmra.mxu3 %vm717_vm3, %v10846_v61 }
 0xb26   : > { %3372 = vmatpush.msra.mxu0 %v8620_v49  ;;  %3401 = vmatpush.msrb.mxu2 %v8652_v1  ;;  %v9675_v49 = vld [vmem:[%s13266_s10 + $0x170] sm:$0xff]  }
 0xb27   : > { %3430 = vmatpush.msra.mxu1 %v8684_v3  ;;  %3459 = vmatpush.msra.mxu3 %v8716_v4  ;;  %v9691_v1 = vld [vmem:[%s13266_s10 + $0x1f0] sm:$0xff]   ;;  %v8761_v3 = vunpack.c.h.bf16 %v9667_v38  ;;  %v8825_v4 = vunpack.c.h.bf16 %v9683_v63 }
 0xb28   : > { %3373 = vmatpush.msra.mxu0 %v8617_v35  ;;  %3402 = vmatpush.msrb.mxu2 %v8649_v5  ;;  %v8793_v35 = vunpack.c.h.bf16 %v9675_v49  ;;  %v8857_v5 = vunpack.c.h.bf16 %v9691_v1  ;;  %v8856_v14 = vunpack.c.l.bf16 %v9691_v1  ;;  %v9672_v1 = vld [vmem:[%s13266_s10 + $0x158] sm:$0xff]  }
 0xb29   : > { %3431 = vmatpush.msra.mxu1 %v8681_v6  ;;  %3460 = vmatpush.msra.mxu3 %v8713_v48  ;;  %v8760_v6 = vunpack.c.l.bf16 %v9667_v38  ;;  %v8824_v48 = vunpack.c.l.bf16 %v9683_v63  ;;  %v9680_v38 = vld [vmem:[%s13266_s10 + $0x198] sm:$0xff]  }
 0xb2a   : > { %3374 = vmatpush.msra.mxu0 %v8616_v12  ;;  %3403 = vmatpush.msrb.mxu2 %v8648_v13  ;;  %v9682_v12 = vld [vmem:[%s13266_s10 + $0x1a8] sm:$0xff]   ;;  %v8792_v13 = vunpack.c.l.bf16 %v9675_v49  ;;  %v8816_v49 = vunpack.c.l.bf16 %v11149_v31 }
 0xb2b   : > { %3432 = vmatpush.msra.mxu1 %v8680_v34  ;;  %3461 = vmatpush.msra.mxu3 %v8712_v36  ;;  %v9690_v34 = vld [vmem:[%s13266_s10 + $0x1e8] sm:$0xff]   ;;  %v11130_v36 = vperm.slane %v11115_v2, 0 }
 0xb2c   : > { %8134 = vmatmul.msk.f32.vlgmr.msrb.gmra.mxu0 %vm717_vm3, %v10781_v53  ;;  %8138 = vmatmul.msk.f32.vlgmr.msra.gmra.mxu2 %vm717_vm3, %v10781_v53  ;;  %v8853_v41 = vunpack.c.h.bf16 %v9690_v34 }
 0xb2d   : > { %8142 = vmatmul.msk.f32.vlgmr.msrb.gmra.mxu1 %vm717_vm3, %v10781_v53  ;;  %8146 = vmatmul.msk.f32.vlgmr.msrb.gmra.mxu3 %vm717_vm3, %v10781_v53 }
 0xb2e   : > { %3375 = vmatpush.msra.mxu0 %v8613_v11  ;;  %3404 = vmatpush.msrb.mxu2 %v8645_v16  ;;  %v11133_v11 = vperm.slane %v11115_v2, 1  ;;  %v8757_v16 = vunpack.c.h.bf16 %v9666_v54 }
 0xb2f   : > { %3433 = vmatpush.msra.mxu1 %v8677_v18  ;;  %3462 = vmatpush.msra.mxu3 %v8709_v21  ;;  %v8821_v18 = vunpack.c.h.bf16 %v9682_v12  ;;  %v2851_v21 = vpop.f32.mrf.mxu0 }
 0xb30   : > { %3376 = vmatpush.msra.mxu0 %v8612_v22  ;;  %3405 = vmatpush.msrb.mxu2 %v8644_v23  ;;  %v11136_v22 = vperm.slane %v11115_v2, 2  ;;  %v2880_v23 = vpop.f32.mrf.mxu2 }
 0xb31   : > { %3434 = vmatpush.msra.mxu1 %v8676_v27  ;;  %3463 = vmatpush.msra.mxu3 %v8708_v30  ;;  %v11139_v27 = vperm.slane %v11115_v2, 3  ;;  %v11144_v30 = vld [vmem:[%s13266_s10 + $0x120] sm:$0xff]   ;;  %v2881_v58 = vadd.f32 %v2880_v23, %v11133_v11 }
 0xb32   : > { %3377 = vmatpush.msra.mxu0 %v8609_v50  ;;  %3406 = vmatpush.msrb.mxu2 %v8641_v51  ;;  %v2938_v50 = vpop.f32.mrf.mxu3  ;;  %v8756_v51 = vunpack.c.l.bf16 %v9666_v54  ;;  %v8753_v60 = vunpack.c.h.bf16 %v11144_v30 }
 0xb33   : > { %3435 = vmatpush.msra.mxu1 %v8673_v20  ;;  %3464 = vmatpush.msra.mxu3 %v8705_v52  ;;  %v8820_v20 = vunpack.c.l.bf16 %v9682_v12  ;;  %v9673_v52 = vld [vmem:[%s13266_s10 + $0x160] sm:$0xff]  }
 0xb34   : > { %8135 = vmatmul.msk.f32.gmra.mxu0 %vm717_vm3, %v10794_v59  ;;  %8139 = vmatmul.msk.f32.gmra.mxu2 %vm717_vm3, %v10794_v59 }
 0xb35   : > { %8143 = vmatmul.msk.f32.gmra.mxu1 %vm717_vm3, %v10794_v59  ;;  %8147 = vmatmul.msk.f32.gmra.mxu3 %vm717_vm3, %v10794_v59 }
 0xb36   : > { %3378 = vmatpush.msra.mxu0 %v8608_v56  ;;  %3407 = vmatpush.msrb.mxu2 %v8640_v24  ;;  %v8852_v56 = vunpack.c.l.bf16 %v9690_v34  ;;  %v2852_v24 = vadd.f32 %v2851_v21, %v11130_v36  ;;  %v8812_v21 = vunpack.c.l.bf16 %v9680_v38 }
 0xb37   : > { %3436 = vmatpush.msra.mxu1 %v8672_v40  ;;  %3465 = vmatpush.msra.mxu3 %v8704_v15  ;;  %v8817_v40 = vunpack.c.h.bf16 %v11149_v31  ;;  %v2910_v15 = vadd.f32 %v2909_v45, %v11136_v22  ;;  %v9663_v31 = vld [vmem:[%s13266_s10 + $0x110] sm:$0xff]  }
 0xb38   : > { %3479 = vmatpush.msrb.mxu0 %v8765_v57  ;;  %3508 = vmatpush.msra.mxu2 %v8797_v47  ;;  %v2939_v57 = vadd.f32 %v2938_v50, %v11139_v27  ;;  %v8849_v47 = vunpack.c.h.bf16 %v9689_v55  ;;  %v3298_v63 = vmax.f32 %v2852_v24, 0.0  ;;  %v9671_v50 = vld [vmem:[%s13266_s10 + $0x150] sm:$0xff]  }
 0xb39   : > { %3537 = vmatpush.msrb.mxu1 %v8829_v17  ;;  %3566 = vmatpush.msrb.mxu3 %v8861_v19  ;;  %v8785_v17 = vunpack.c.h.bf16 %v9673_v52  ;;  %v9664_v19 = vld [vmem:[%s13266_s10 + $0x118] sm:$0xff]  }
 0xb3a   : > { %3480 = vmatpush.msrb.mxu0 %v8764_v44  ;;  %3509 = vmatpush.msra.mxu2 %v8796_v62  ;;  %v3299_v44 = vmax.f32 %v2881_v58, 0.0  ;;  %v9688_v62 = vld [vmem:[%s13266_s10 + $0x1d8] sm:$0xff]   ;;  %v8749_v12 = vunpack.c.h.bf16 %v9664_v19  ;;  %v9662_v58 = vld [vmem:[%s13266_s10 + $0x108] sm:$0xff]  }
 0xb3b   : > { %3538 = vmatpush.msrb.mxu1 %v8828_v0  ;;  %3567 = vmatpush.msrb.mxu3 %v8860_v32  ;;  %v8752_v0 = vunpack.c.l.bf16 %v11144_v30  ;;  %v3300_v32 = vmax.f32 %v2910_v15, 0.0  ;;  %v8845_v33 = vunpack.c.h.bf16 %v9688_v62  ;;  %v8844_v45 = vunpack.c.l.bf16 %v9688_v62 }
 0xb3c   : > { %8136 = vmatmul.msk.f32.gmra.mxu0 %vm717_vm3, %v10833_v37  ;;  %8140 = vmatmul.msk.f32.gmra.mxu2 %vm717_vm3, %v10833_v37  ;;  %v2941_v54 = vpop.f32.mrf.mxu3 }
 0xb3d   : > { %8144 = vmatmul.msk.f32.gmra.mxu1 %vm717_vm3, %v10833_v37  ;;  %8148 = vmatmul.msk.f32.gmra.mxu3 %vm717_vm3, %v10833_v37  ;;  %v2942_v30 = vadd.f32 %v2941_v54, %v11139_v27 }
 0xb3e   : > { %3481 = vmatpush.msrb.mxu0 %v8761_v3  ;;  %3539 = vmatpush.msrb.mxu1 %v8825_v4  ;;  %v3301_v3 = vmax.f32 %v2939_v57, 0.0  ;;  %v2854_v4 = vpop.f32.mrf.mxu0  ;;  %v8744_v57 = vunpack.c.l.bf16 %v9663_v31 }
 0xb3f   : > { %3510 = vmatpush.msra.mxu2 %v8793_v35  ;;  %3568 = vmatpush.msrb.mxu3 %v8857_v5  ;;  %v2883_v35 = vpop.f32.mrf.mxu2  ;;  %v8784_v5 = vunpack.c.l.bf16 %v9673_v52  ;;  %v2855_v34 = vadd.f32 %v2854_v4, %v11130_v36  ;;  %v3317_v24 = vmax.f32 %v2942_v30, 0.0  ;;  %v9661_v4 = vld [vmem:[%s13266_s10 + $0x100] sm:$0xff]  }
 0xb40   : > { %3482 = vmatpush.msrb.mxu0 %v8760_v6  ;;  %3540 = vmatpush.msrb.mxu1 %v8824_v48  ;;  %v8848_v6 = vunpack.c.l.bf16 %v9689_v55  ;;  %v2912_v48 = vpop.f32.mrf.mxu1  ;;  %v8745_v55 = vunpack.c.h.bf16 %v9663_v31 }
 0xb41   : > { %3511 = vmatpush.msra.mxu2 %v8792_v13  ;;  %3569 = vmatpush.msrb.mxu3 %v8856_v14  ;;  %v8813_v13 = vunpack.c.h.bf16 %v9680_v38  ;;  %v8781_v14 = vunpack.c.h.bf16 %v9672_v1  ;;  %v2913_v23 = vadd.f32 %v2912_v48, %v11136_v22  ;;  %v8776_v38 = vunpack.c.l.bf16 %v9671_v50  ;;  %v9669_v48 = vld [vmem:[%s13266_s10 + $0x140] sm:$0xff]  }
 0xb42   : > { %3483 = vmatpush.msrb.mxu0 %v8757_v16  ;;  %3541 = vmatpush.msrb.mxu1 %v8821_v18  ;;  %v2884_v16 = vadd.f32 %v2883_v35, %v11133_v11  ;;  %v8748_v18 = vunpack.c.l.bf16 %v9664_v19  ;;  %v9686_v19 = vld [vmem:[%s13266_s10 + $0x1c8] sm:$0xff]   ;;  %v8769_v30 = vunpack.c.h.bf16 %v9669_v48 }
 0xb43   : > { %3512 = vmatpush.msra.mxu2 %v8789_v39  ;;  %3570 = vmatpush.msrb.mxu3 %v8853_v41  ;;  %v9679_v39 = vld [vmem:[%s13266_s10 + $0x190] sm:$0xff]   ;;  %v8780_v41 = vunpack.c.l.bf16 %v9672_v1  ;;  %v8837_v62 = vunpack.c.h.bf16 %v9686_v19 }
 0xb44   : > { %8137 = vmatmul.msk.f32.gmra.mxu0 %vm717_vm3, %v10846_v61  ;;  %8141 = vmatmul.msk.f32.gmra.mxu2 %vm717_vm3, %v10846_v61  ;;  %v3315_v52 = vmax.f32 %v2884_v16, 0.0  ;;  %v9700_v16 = vld [vmem:[%s13266_s10 + $0x238] sm:$0xff]  }
 0xb45   : > { %8145 = vmatmul.msk.f32.gmra.mxu1 %vm717_vm3, %v10846_v61  ;;  %8149 = vmatmul.msk.f32.gmra.mxu3 %vm717_vm3, %v10846_v61 }
 0xb46   : > { %3484 = vmatpush.msrb.mxu0 %v8756_v51  ;;  %3542 = vmatpush.msrb.mxu1 %v8820_v20  ;;  %v9687_v51 = vld [vmem:[%s13266_s10 + $0x1d0] sm:$0xff]   ;;  %v3314_v20 = vmax.f32 %v2855_v34, 0.0  ;;  %v8737_v34 = vunpack.c.h.bf16 %v9661_v4 }
 0xb47   : > { %3513 = vmatpush.msra.mxu2 %v8788_v46  ;;  %3571 = vmatpush.msrb.mxu3 %v8852_v56  ;;  %v8809_v46 = vunpack.c.h.bf16 %v9679_v39  ;;  %v3316_v56 = vmax.f32 %v2913_v23, 0.0  ;;  %v8841_v15 = vunpack.c.h.bf16 %v9687_v51 }
 0xb48   : > { %3485 = vmatpush.msrb.mxu0 %v8753_v60  ;;  %3543 = vmatpush.msrb.mxu1 %v8817_v40  ;;  %v9678_v60 = vld [vmem:[%s13266_s10 + $0x188] sm:$0xff]   ;;  %v8777_v40 = vunpack.c.h.bf16 %v9671_v50 }
 0xb49   : > { %3514 = vmatpush.msra.mxu2 %v8785_v17  ;;  %3572 = vmatpush.msrb.mxu3 %v8849_v47  ;;  %v8808_v17 = vunpack.c.l.bf16 %v9679_v39  ;;  %v9670_v47 = vld [vmem:[%s13266_s10 + $0x148] sm:$0xff]   ;;  %v8736_v39 = vunpack.c.l.bf16 %v9661_v4 }
 0xb4a   : > { %3486 = vmatpush.msrb.mxu0 %v8752_v0  ;;  %3544 = vmatpush.msrb.mxu1 %v8816_v49  ;;  %v8805_v0 = vunpack.c.h.bf16 %v9678_v60  ;;  %v9677_v49 = vld [vmem:[%s13266_s10 + $0x180] sm:$0xff]   ;;  %v8773_v1 = vunpack.c.h.bf16 %v9670_v47 }
 0xb4b   : > { %3515 = vmatpush.msra.mxu2 %v8784_v5  ;;  %3573 = vmatpush.msrb.mxu3 %v8848_v6  ;;  %v8772_v5 = vunpack.c.l.bf16 %v9670_v47  ;;  %v8836_v6 = vunpack.c.l.bf16 %v9686_v19  ;;  %v8800_v23 = vunpack.c.l.bf16 %v9677_v49 }
 0xb4c   : > { %3379 = vmatmul.f32.vlgmr.msra.gmra.mxu0 %v3298_v63  ;;  %3408 = vmatmul.f32.vlgmr.msrb.gmra.mxu2 %v3299_v44  ;;  %v8840_v63 = vunpack.c.l.bf16 %v9687_v51  ;;  %v8741_v44 = vunpack.c.h.bf16 %v9662_v58  ;;  %v9715_v51 = vld [vmem:[%s13266_s10 + $0x2b0] sm:$0xff]  }
 0xb4d   : > { %3437 = vmatmul.f32.vlgmr.msra.gmra.mxu1 %v3300_v32  ;;  %3466 = vmatmul.f32.vlgmr.msra.gmra.mxu3 %v3301_v3  ;;  %v8740_v32 = vunpack.c.l.bf16 %v9662_v58  ;;  %v8804_v3 = vunpack.c.l.bf16 %v9678_v60  ;;  %v9699_v58 = vld [vmem:[%s13266_s10 + $0x230] sm:$0xff]  }
 0xb4e   : > { %3487 = vmatpush.msrb.mxu0 %v8749_v12  ;;  %3545 = vmatpush.msrb.mxu1 %v8813_v13  ;;  %v8801_v13 = vunpack.c.h.bf16 %v9677_v49  ;;  %v8889_v49 = vunpack.c.h.bf16 %v9699_v58 }
 0xb4f   : > { %3516 = vmatpush.msra.mxu2 %v8781_v14  ;;  %3574 = vmatpush.msrb.mxu3 %v8845_v33  ;;  %v9716_v14 = vld [vmem:[%s13266_s10 + $0x2b8] sm:$0xff]  }
 0xb50   : > { %3488 = vmatpush.msrb.mxu0 %v8748_v18  ;;  %3546 = vmatpush.msrb.mxu1 %v8812_v21  ;;  %v9685_v18 = vld [vmem:[%s13266_s10 + $0x1c0] sm:$0xff]  }
 0xb51   : > { %3517 = vmatpush.msra.mxu2 %v8780_v41  ;;  %3575 = vmatpush.msrb.mxu3 %v8844_v45  ;;  %v8957_v41 = vunpack.c.h.bf16 %v9716_v14  ;;  %v8893_v45 = vunpack.c.h.bf16 %v9700_v16  ;;  %v8833_v50 = vunpack.c.h.bf16 %v9685_v18 }
 0xb52   : > { %3489 = vmatpush.msrb.mxu0 %v8745_v55  ;;  %3547 = vmatpush.msrb.mxu1 %v8809_v46  ;;  %v8768_v55 = vunpack.c.l.bf16 %v9669_v48 }
 0xb53   : > { %3518 = vmatpush.msra.mxu2 %v8777_v40  ;;  %3576 = vmatpush.msrb.mxu3 %v8841_v15  ;;  %v8953_v15 = vunpack.c.h.bf16 %v9715_v51 }
 0xb54   : > { %3382 = vmatmul.f32.gmra.mxu0 %v3314_v20  ;;  %3411 = vmatmul.f32.gmra.mxu2 %v3315_v52  ;;  %v8956_v52 = vunpack.c.l.bf16 %v9716_v14 }
 0xb55   : > { %3440 = vmatmul.f32.gmra.mxu1 %v3316_v56  ;;  %3469 = vmatmul.f32.gmra.mxu3 %v3317_v24  ;;  %v8892_v24 = vunpack.c.l.bf16 %v9700_v16 }
 0xb56   : > { %3490 = vmatpush.msrb.mxu0 %v8744_v57  ;;  %3548 = vmatpush.msrb.mxu1 %v8808_v17  ;;  %v9708_v57 = vld [vmem:[%s13266_s10 + $0x278] sm:$0xff]  }
 0xb57   : > { %3519 = vmatpush.msra.mxu2 %v8776_v38  ;;  %3577 = vmatpush.msrb.mxu3 %v8840_v63  ;;  %v8832_v38 = vunpack.c.l.bf16 %v9685_v18  ;;  %v9724_v63 = vld [vmem:[%s13266_s10 + $0x2f8] sm:$0xff]  }
 0xb58   : > { %3491 = vmatpush.msrb.mxu0 %v8741_v44  ;;  %3549 = vmatpush.msrb.mxu1 %v8805_v0  ;;  %v8988_v14 = vunpack.c.l.bf16 %v9724_v63 }
 0xb59   : > { %v2857_v35 = vpop.f32.mrf.mxu0  ;;  %3520 = vmatpush.msra.mxu2 %v8773_v1  ;;  %3578 = vmatpush.msrb.mxu3 %v8837_v62  ;;  %v9714_v1 = vld [vmem:[%s13266_s10 + $0x2a8] sm:$0xff]  }
 0xb5a   : > { %v2858_v54 = vadd.f32 %v2857_v35, %v11130_v36  ;;  %v2915_v12 = vpop.f32.mrf.mxu1  ;;  %3492 = vmatpush.msrb.mxu0 %v8740_v32  ;;  %3550 = vmatpush.msrb.mxu1 %v8804_v3  ;;  %v8952_v32 = vunpack.c.l.bf16 %v9715_v51  ;;  %v9698_v3 = vld [vmem:[%s13266_s10 + $0x228] sm:$0xff]   ;;  %v8989_v35 = vunpack.c.h.bf16 %v9724_v63  ;;  %v8949_v48 = vunpack.c.h.bf16 %v9714_v1  ;;  %v9713_v51 = vld [vmem:[%s13266_s10 + $0x2a0] sm:$0xff]  }
 0xb5b   : > { %v2916_v33 = vadd.f32 %v2915_v12, %v11136_v22  ;;  %3521 = vmatpush.msra.mxu2 %v8772_v5  ;;  %3579 = vmatpush.msrb.mxu3 %v8836_v6  ;;  %v11256_v5 = vperm.slane %v11115_v2, 4  ;;  %v8924_v6 = vunpack.c.l.bf16 %v9708_v57  ;;  %v11259_v12 = vperm.slane %v11115_v2, 6 }
 0xb5c   : > { %v3330_v21 = vmax.f32 %v2858_v54, 0.0  ;;  %3551 = vmatpush.msrb.mxu1 %v8801_v13  ;;  %3493 = vmatpush.msrb.mxu0 %v8737_v34  ;;  %v8885_v13 = vunpack.c.h.bf16 %v9698_v3  ;;  %v8948_v18 = vunpack.c.l.bf16 %v9714_v1 }
 0xb5d   : > { %v3332_v31 = vmax.f32 %v2916_v33, 0.0  ;;  %3522 = vmatpush.msra.mxu2 %v8769_v30  ;;  %3580 = vmatpush.msrb.mxu3 %v8833_v50  ;;  %v9707_v33 = vld [vmem:[%s13266_s10 + $0x270] sm:$0xff]  }
 0xb5e   : > { %3385 = vmatmul.f32.gmra.mxu0 %v3330_v21  ;;  %3552 = vmatpush.msrb.mxu1 %v8800_v23  ;;  %v9723_v21 = vld [vmem:[%s13266_s10 + $0x2f0] sm:$0xff]   ;;  %v8921_v50 = vunpack.c.h.bf16 %v9707_v33 }
 0xb5f   : > { %3443 = vmatmul.f32.gmra.mxu1 %v3332_v31  ;;  %v2886_v20 = vpop.f32.mrf.mxu2  ;;  %3494 = vmatpush.msrb.mxu0 %v8736_v39  ;;  %v8884_v31 = vunpack.c.l.bf16 %v9698_v3  ;;  %v9697_v39 = vld [vmem:[%s13266_s10 + $0x220] sm:$0xff]  }
 0xb60   : > { %v2887_v46 = vadd.f32 %v2886_v20, %v11133_v11  ;;  %v2944_v56 = vpop.f32.mrf.mxu3  ;;  %3653 = vmatpush.msra.mxu1 %v8957_v41  ;;  %3523 = vmatpush.msra.mxu2 %v8768_v55  ;;  %v9706_v55 = vld [vmem:[%s13266_s10 + $0x268] sm:$0xff]  }
 0xb61   : > { %v2945_v60 = vadd.f32 %v2944_v56, %v11139_v27  ;;  %v2860_v40 = vpop.f32.mrf.mxu0  ;;  %3595 = vmatpush.msra.mxu0 %v8893_v45  ;;  %3581 = vmatpush.msrb.mxu3 %v8832_v38  ;;  %v11281_v56 = vperm.slane %v11115_v2, 5  ;;  %v8917_v38 = vunpack.c.h.bf16 %v9706_v55  ;;  %v8916_v3 = vunpack.c.l.bf16 %v9706_v55 }
 0xb62   : > { %v3331_v17 = vmax.f32 %v2887_v46, 0.0  ;;  %v2861_v47 = vadd.f32 %v2860_v40, %v11130_v36  ;;  %v2918_v19 = vpop.f32.mrf.mxu1  ;;  %3654 = vmatpush.msra.mxu1 %v8956_v52  ;;  %v8925_v36 = vunpack.c.h.bf16 %v9708_v57  ;;  %v8985_v52 = vunpack.c.h.bf16 %v9723_v21 }
 0xb63   : > { %v3333_v44 = vmax.f32 %v2945_v60, 0.0  ;;  %v2919_v0 = vadd.f32 %v2918_v19, %v11136_v22  ;;  %3596 = vmatpush.msra.mxu0 %v8892_v24  ;;  %v8888_v22 = vunpack.c.l.bf16 %v9699_v58  ;;  %3682 = vmatpush.msra.mxu3 %v8989_v35  ;;  %v8881_v24 = vunpack.c.h.bf16 %v9697_v39  ;;  %v9722_v60 = vld [vmem:[%s13266_s10 + $0x2e8] sm:$0xff]  }
 0xb64   : > { %v3346_v62 = vmax.f32 %v2861_v47, 0.0  ;;  %3414 = vmatmul.f32.gmra.mxu2 %v3331_v17  ;;  %3655 = vmatpush.msra.mxu1 %v8953_v15  ;;  %v8920_v58 = vunpack.c.l.bf16 %v9707_v33  ;;  %v11287_v15 = vperm.slane %v11115_v2, 7  ;;  %v8945_v57 = vunpack.c.h.bf16 %v9713_v51  ;;  %v9696_v47 = vld [vmem:[%s13266_s10 + $0x218] sm:$0xff]  }
 0xb65   : > { %v3348_v4 = vmax.f32 %v2919_v0, 0.0  ;;  %3472 = vmatmul.f32.gmra.mxu3 %v3333_v44  ;;  %3597 = vmatpush.msra.mxu0 %v8889_v49  ;;  %v8984_v17 = vunpack.c.l.bf16 %v9723_v21  ;;  %v8880_v19 = vunpack.c.l.bf16 %v9697_v39  ;;  %v8944_v44 = vunpack.c.l.bf16 %v9713_v51  ;;  %v9712_v2 = vld [vmem:[%s13266_s10 + $0x298] sm:$0xff]  }
 0xb66   : > { %3388 = vmatmul.f32.gmra.mxu0 %v3346_v62  ;;  %3624 = vmatpush.msrb.mxu2 %v8925_v36  ;;  %v8981_v0 = vunpack.c.h.bf16 %v9722_v60  ;;  %v8877_v62 = vunpack.c.h.bf16 %v9696_v47  ;;  %v8980_v33 = vunpack.c.l.bf16 %v9722_v60 }
 0xb67   : > { %3446 = vmatmul.f32.gmra.mxu1 %v3348_v4  ;;  %v2889_v54 = vpop.f32.mrf.mxu2  ;;  %3598 = vmatpush.msra.mxu0 %v8888_v22  ;;  %v9705_v4 = vld [vmem:[%s13266_s10 + $0x260] sm:$0xff]  }
 0xb68   : > { %v2890_v34 = vadd.f32 %v2889_v54, %v11133_v11  ;;  %v2947_v16 = vpop.f32.mrf.mxu3  ;;  %3656 = vmatpush.msra.mxu1 %v8952_v32  ;;  %3625 = vmatpush.msrb.mxu2 %v8924_v6  ;;  %v9721_v54 = vld [vmem:[%s13266_s10 + $0x2e0] sm:$0xff]   ;;  %v8913_v21 = vunpack.c.h.bf16 %v9705_v4 }
 0xb69   : > { %v2948_v23 = vadd.f32 %v2947_v16, %v11139_v27  ;;  %v2967_v30 = vpop.f32.mrf.mxu0  ;;  %3599 = vmatpush.msra.mxu0 %v8885_v13  ;;  %3683 = vmatpush.msra.mxu3 %v8988_v14  ;;  %v8977_v39 = vunpack.c.h.bf16 %v9721_v54 }
 0xb6a   : > { %v3347_v41 = vmax.f32 %v2890_v34, 0.0  ;;  %v2968_v11 = vadd.f32 %v2967_v30, %v11256_v5  ;;  %v3025_v45 = vpop.f32.mrf.mxu1  ;;  %3657 = vmatpush.msra.mxu1 %v8949_v48  ;;  %3626 = vmatpush.msrb.mxu2 %v8921_v50  ;;  %v8941_v48 = vunpack.c.h.bf16 %v9712_v2  ;;  %v9695_v34 = vld [vmem:[%s13266_s10 + $0x210] sm:$0xff]  }
 0xb6b   : > { %v3349_v27 = vmax.f32 %v2948_v23, 0.0  ;;  %v3026_v20 = vadd.f32 %v3025_v45, %v11259_v12  ;;  %3600 = vmatpush.msra.mxu0 %v8884_v31  ;;  %3684 = vmatpush.msra.mxu3 %v8985_v52  ;;  %v9711_v23 = vld [vmem:[%s13266_s10 + $0x290] sm:$0xff]   ;;  %v8940_v31 = vunpack.c.l.bf16 %v9712_v2  ;;  %v9704_v45 = vld [vmem:[%s13266_s10 + $0x258] sm:$0xff]   ;;  %v8872_v55 = vunpack.c.l.bf16 %v9695_v34 }
 0xb6c   : > { %v3302_v46 = vmax.f32 %v2968_v11, 0.0  ;;  %3417 = vmatmul.f32.gmra.mxu2 %v3347_v41  ;;  %3658 = vmatpush.msra.mxu1 %v8948_v18  ;;  %v8876_v18 = vunpack.c.l.bf16 %v9696_v47  ;;  %v8873_v41 = vunpack.c.h.bf16 %v9695_v34  ;;  %v8912_v11 = vunpack.c.l.bf16 %v9705_v4  ;;  %v9703_v2 = vld [vmem:[%s13266_s10 + $0x250] sm:$0xff]  }
 0xb6d   : > { %v3304_v40 = vmax.f32 %v3026_v20, 0.0  ;;  %3475 = vmatmul.f32.gmra.mxu3 %v3349_v27  ;;  %3601 = vmatpush.msra.mxu0 %v8881_v24  ;;  %v8937_v51 = vunpack.c.h.bf16 %v9711_v23  ;;  %v8976_v27 = vunpack.c.l.bf16 %v9721_v54  ;;  %v8909_v60 = vunpack.c.h.bf16 %v9704_v45 }
 0xb6e   : > { %3495 = vmatmul.f32.vlgmr.msrb.gmra.mxu0 %v3302_v46  ;;  %3627 = vmatpush.msrb.mxu2 %v8920_v58  ;;  %v9720_v46 = vld [vmem:[%s13266_s10 + $0x2d8] sm:$0xff]  }
 0xb6f   : > { %3553 = vmatmul.f32.vlgmr.msrb.gmra.mxu1 %v3304_v40  ;;  %v2996_v63 = vpop.f32.mrf.mxu2  ;;  %3685 = vmatpush.msra.mxu3 %v8984_v17  ;;  %v9694_v40 = vld [vmem:[%s13266_s10 + $0x208] sm:$0xff]   ;;  %v8972_v4 = vunpack.c.l.bf16 %v9720_v46 }
 0xb70   : > { %v2997_v49 = vadd.f32 %v2996_v63, %v11281_v56  ;;  %v3054_v1 = vpop.f32.mrf.mxu3  ;;  %3659 = vmatpush.msra.mxu1 %v8945_v57  ;;  %3602 = vmatpush.msra.mxu0 %v8880_v19  ;;  %v8936_v19 = vunpack.c.l.bf16 %v9711_v23  ;;  %v8904_v23 = vunpack.c.l.bf16 %v9703_v2 }
 0xb71   : > { %v3055_v36 = vadd.f32 %v3054_v1, %v11287_v15  ;;  %v2970_v32 = vpop.f32.mrf.mxu0  ;;  %3628 = vmatpush.msrb.mxu2 %v8917_v38  ;;  %3686 = vmatpush.msra.mxu3 %v8981_v0  ;;  %v9710_v38 = vld [vmem:[%s13266_s10 + $0x288] sm:$0xff]   ;;  %v8973_v0 = vunpack.c.h.bf16 %v9720_v46  ;;  %v8869_v1 = vunpack.c.h.bf16 %v9694_v40 }
 0xb72   : > { %v3303_v22 = vmax.f32 %v2997_v49, 0.0  ;;  %v2971_v35 = vadd.f32 %v2970_v32, %v11256_v5  ;;  %v3028_v6 = vpop.f32.mrf.mxu1  ;;  %3660 = vmatpush.msra.mxu1 %v8944_v44  ;;  %3603 = vmatpush.msra.mxu0 %v8877_v62  ;;  %v8908_v62 = vunpack.c.l.bf16 %v9704_v45  ;;  %v8932_v54 = vunpack.c.l.bf16 %v9710_v38  ;;  %v9718_v45 = vld [vmem:[%s13266_s10 + $0x2c8] sm:$0xff]  }
 0xb73   : > { %v3305_v13 = vmax.f32 %v3055_v36, 0.0  ;;  %v3029_v14 = vadd.f32 %v3028_v6, %v11259_v12  ;;  %3629 = vmatpush.msrb.mxu2 %v8916_v3  ;;  %3687 = vmatpush.msra.mxu3 %v8980_v33  ;;  %v9719_v36 = vld [vmem:[%s13266_s10 + $0x2d0] sm:$0xff]   ;;  %v8933_v3 = vunpack.c.h.bf16 %v9710_v38  ;;  %v8905_v6 = vunpack.c.h.bf16 %v9703_v2 }
 0xb74   : > { %v3318_v16 = vmax.f32 %v2971_v35, 0.0  ;;  %3524 = vmatmul.f32.vlgmr.msra.gmra.mxu2 %v3303_v22  ;;  %3661 = vmatpush.msra.mxu1 %v8941_v48  ;;  %v9693_v22 = vld [vmem:[%s13266_s10 + $0x200] sm:$0xff]   ;;  %v8868_v35 = vunpack.c.l.bf16 %v9694_v40 }
 0xb75   : > { %v3320_v30 = vmax.f32 %v3029_v14, 0.0  ;;  %3582 = vmatmul.f32.vlgmr.msrb.gmra.mxu3 %v3305_v13  ;;  %3604 = vmatpush.msra.mxu0 %v8876_v18  ;;  %v8969_v13 = vunpack.c.h.bf16 %v9719_v36  ;;  %v9709_v14 = vld [vmem:[%s13266_s10 + $0x280] sm:$0xff]  }
 0xb76   : > { %3498 = vmatmul.f32.gmra.mxu0 %v3318_v16  ;;  %3630 = vmatpush.msrb.mxu2 %v8913_v21  ;;  %v8865_v16 = vunpack.c.h.bf16 %v9693_v22 }
 0xb77   : > { %3556 = vmatmul.f32.gmra.mxu1 %v3320_v30  ;;  %v2999_v50 = vpop.f32.mrf.mxu2  ;;  %3688 = vmatpush.msra.mxu3 %v8977_v39  ;;  %v9702_v30 = vld [vmem:[%s13266_s10 + $0x248] sm:$0xff]  }
 0xb78   : > { %v3000_v20 = vadd.f32 %v2999_v50, %v11281_v56  ;;  %v3057_v52 = vpop.f32.mrf.mxu3  ;;  %3662 = vmatpush.msra.mxu1 %v8940_v31  ;;  %3605 = vmatpush.msra.mxu0 %v8873_v41  ;;  %v8901_v46 = vunpack.c.h.bf16 %v9702_v30 }
 0xb79   : > { %v3058_v24 = vadd.f32 %v3057_v52, %v11287_v15  ;;  %v2973_v58 = vpop.f32.mrf.mxu0  ;;  %3631 = vmatpush.msrb.mxu2 %v8912_v11  ;;  %3689 = vmatpush.msra.mxu3 %v8976_v27  ;;  %v8929_v11 = vunpack.c.h.bf16 %v9709_v14  ;;  %v11352_v27 = vld [vmem:[%s13265_s9 + $0x8] sm:$0xff] }
 0xb7a   : > { %v3319_v57 = vmax.f32 %v3000_v20, 0.0  ;;  %v2974_v17 = vadd.f32 %v2973_v58, %v11256_v5  ;;  %v3031_v47 = vpop.f32.mrf.mxu1  ;;  %3663 = vmatpush.msra.mxu1 %v8937_v51  ;;  %3606 = vmatpush.msra.mxu0 %v8872_v55  ;;  %v8968_v20 = vunpack.c.l.bf16 %v9719_v36  ;;  %v8864_v55 = vunpack.c.l.bf16 %v9693_v22 }
 0xb7b   : > { %v3321_v63 = vmax.f32 %v3058_v24, 0.0  ;;  %v3032_v44 = vadd.f32 %v3031_v47, %v11259_v12  ;;  %3632 = vmatpush.msrb.mxu2 %v8909_v60  ;;  %3690 = vmatpush.msra.mxu3 %v8973_v0  ;;  %v8928_v58 = vunpack.c.l.bf16 %v9709_v14  ;;  %v8965_v60 = vunpack.c.h.bf16 %v9718_v45  ;;  %v9701_v47 = vld [vmem:[%s13266_s10 + $0x240] sm:$0xff]   ;;  %v11391_v14 = vld [vmem:[%s13266_s10 + $0x3f8] sm:$0xff]  }
 0xb7c   : > { %v3334_v49 = vmax.f32 %v2974_v17, 0.0  ;;  %3527 = vmatmul.f32.gmra.mxu2 %v3319_v57  ;;  %3664 = vmatpush.msra.mxu1 %v8936_v19  ;;  %v11363_v40 = vperm.slane %v11352_v27, 0  ;;  %v8900_v57 = vunpack.c.l.bf16 %v9702_v30  ;;  %v11369_v38 = vperm.slane %v11352_v27, 2  ;;  %v9717_v0 = vld [vmem:[%s13266_s10 + $0x2c0] sm:$0xff]  }
 0xb7d   : > { %v3336_v32 = vmax.f32 %v3032_v44, 0.0  ;;  %3585 = vmatmul.f32.gmra.mxu3 %v3321_v63  ;;  %3607 = vmatpush.msra.mxu0 %v8869_v1  ;;  %v8964_v63 = vunpack.c.l.bf16 %v9718_v45 }
 0xb7e   : > { %3501 = vmatmul.f32.gmra.mxu0 %v3334_v49  ;;  %3633 = vmatpush.msrb.mxu2 %v8908_v62 }
 0xb7f   : > { %3559 = vmatmul.f32.gmra.mxu1 %v3336_v32  ;;  %v3002_v48 = vpop.f32.mrf.mxu2  ;;  %3691 = vmatpush.msra.mxu3 %v8972_v4  ;;  %v8897_v32 = vunpack.c.h.bf16 %v9701_v47 }
 0xb80   : > { %v3003_v33 = vadd.f32 %v3002_v48, %v11281_v56  ;;  %v3060_v34 = vpop.f32.mrf.mxu3  ;;  %3665 = vmatpush.msra.mxu1 %v8933_v3  ;;  %3608 = vmatpush.msra.mxu0 %v8868_v35  ;;  %v8961_v35 = vunpack.c.h.bf16 %v9717_v0 }
 0xb81   : > { %v3061_v18 = vadd.f32 %v3060_v34, %v11287_v15  ;;  %v2976_v21 = vpop.f32.mrf.mxu0  ;;  %3634 = vmatpush.msrb.mxu2 %v8905_v6  ;;  %3692 = vmatpush.msra.mxu3 %v8969_v13  ;;  %v9740_v6 = vld [vmem:[%s13266_s10 + $0x378] sm:$0xff]   ;;  %v9747_v13 = vld [vmem:[%s13266_s10 + $0x3b0] sm:$0xff]   ;;  %v11394_v34 = vperm.slane %v11352_v27, 1 }
 0xb82   : > { %v3335_v31 = vmax.f32 %v3003_v33, 0.0  ;;  %v2977_v39 = vadd.f32 %v2976_v21, %v11256_v5  ;;  %v3034_v41 = vpop.f32.mrf.mxu1  ;;  %3666 = vmatpush.msra.mxu1 %v8932_v54  ;;  %v9732_v5 = vld [vmem:[%s13266_s10 + $0x338] sm:$0xff]   ;;  %3609 = vmatpush.msra.mxu0 %v8865_v16  ;;  %v8896_v54 = vunpack.c.l.bf16 %v9701_v47 }
 0xb83   : > { %v3337_v50 = vmax.f32 %v3061_v18, 0.0  ;;  %v3035_v51 = vadd.f32 %v3034_v41, %v11259_v12  ;;  %v11360_v12 = vld [vmem:[%s13266_s10 + $0x3b8] sm:$0xff]   ;;  %3635 = vmatpush.msrb.mxu2 %v8904_v23  ;;  %v9021_v17 = vunpack.c.h.bf16 %v9732_v5  ;;  %3693 = vmatpush.msra.mxu3 %v8968_v20  ;;  %v9020_v1 = vunpack.c.l.bf16 %v9732_v5  ;;  %v9746_v20 = vld [vmem:[%s13266_s10 + $0x3a8] sm:$0xff]  }
 0xb84   : > { %v3350_v52 = vmax.f32 %v2977_v39, 0.0  ;;  %3530 = vmatmul.f32.gmra.mxu2 %v3335_v31  ;;  %3667 = vmatpush.msra.mxu1 %v8929_v11  ;;  %v9085_v44 = vunpack.c.h.bf16 %v11360_v12  ;;  %v9084_v16 = vunpack.c.l.bf16 %v11360_v12  ;;  %v8960_v18 = vunpack.c.l.bf16 %v9717_v0  ;;  %v9730_v11 = vld [vmem:[%s13266_s10 + $0x328] sm:$0xff]  }
 0xb85   : > { %v3352_v24 = vmax.f32 %v3035_v51, 0.0  ;;  %3588 = vmatmul.f32.gmra.mxu3 %v3337_v50  ;;  %3610 = vmatpush.msra.mxu0 %v8864_v55  ;;  %v11398_v23 = vperm.slane %v11352_v27, 3  ;;  %v9053_v31 = vunpack.c.h.bf16 %v9740_v6  ;;  %v9081_v39 = vunpack.c.h.bf16 %v9747_v13 }
 0xb86   : > { %3504 = vmatmul.f32.gmra.mxu0 %v3350_v52  ;;  %3636 = vmatpush.msrb.mxu2 %v8901_v46  ;;  %v9117_v41 = vunpack.c.h.bf16 %v11391_v14  ;;  %v9052_v51 = vunpack.c.l.bf16 %v9740_v6  ;;  %v9080_v55 = vunpack.c.l.bf16 %v9747_v13  ;;  %v9077_v47 = vunpack.c.h.bf16 %v9746_v20 }
 0xb87   : > { %3562 = vmatmul.f32.gmra.mxu1 %v3352_v24  ;;  %v3005_v19 = vpop.f32.mrf.mxu2  ;;  %3694 = vmatpush.msra.mxu3 %v8965_v60  ;;  %v9013_v24 = vunpack.c.h.bf16 %v9730_v11  ;;  %v9116_v0 = vunpack.c.l.bf16 %v11391_v14 }
 0xb88   : > { %v3006_v2 = vadd.f32 %v3005_v19, %v11281_v56  ;;  %v3063_v49 = vpop.f32.mrf.mxu3  ;;  %3668 = vmatpush.msra.mxu1 %v8928_v58  ;;  %3637 = vmatpush.msrb.mxu2 %v8900_v57  ;;  %v9731_v56 = vld [vmem:[%s13266_s10 + $0x330] sm:$0xff]  }
 0xb89   : > { %v3064_v62 = vadd.f32 %v3063_v49, %v11287_v15  ;;  %v3083_v36 = vpop.f32.mrf.mxu0  ;;  %3711 = vmatpush.msrb.mxu0 %v9021_v17  ;;  %3695 = vmatpush.msra.mxu3 %v8964_v63  ;;  %v9017_v30 = vunpack.c.h.bf16 %v9731_v56  ;;  %v9016_v50 = vunpack.c.l.bf16 %v9731_v56  ;;  %v9739_v58 = vld [vmem:[%s13266_s10 + $0x370] sm:$0xff]   ;;  %v9738_v56 = vld [vmem:[%s13266_s10 + $0x368] sm:$0xff]  }
 0xb8a   : > { %v3351_v3 = vmax.f32 %v3006_v2, 0.0  ;;  %v3084_v4 = vadd.f32 %v3083_v36, %v11363_v40  ;;  %v3141_v22 = vpop.f32.mrf.mxu1  ;;  %3769 = vmatpush.msrb.mxu1 %v9085_v44  ;;  %3638 = vmatpush.msrb.mxu2 %v8897_v32  ;;  %v9755_v19 = vld [vmem:[%s13266_s10 + $0x3f0] sm:$0xff]   ;;  %v9729_v2 = vld [vmem:[%s13266_s10 + $0x320] sm:$0xff]  }
 0xb8b   : > { %v3353_v15 = vmax.f32 %v3064_v62, 0.0  ;;  %v3142_v48 = vadd.f32 %v3141_v22, %v11369_v38  ;;  %3712 = vmatpush.msrb.mxu0 %v9020_v1  ;;  %3696 = vmatpush.msra.mxu3 %v8961_v35  ;;  %v9012_v1 = vunpack.c.l.bf16 %v9730_v11  ;;  %v9049_v62 = vunpack.c.h.bf16 %v9739_v58  ;;  %v9745_v36 = vld [vmem:[%s13266_s10 + $0x3a0] sm:$0xff]  }
 0xb8c   : > { %v3306_v33 = vmax.f32 %v3084_v4, 0.0  ;;  %3533 = vmatmul.f32.gmra.mxu2 %v3351_v3  ;;  %3770 = vmatpush.msrb.mxu1 %v9084_v16  ;;  %v9076_v3 = vunpack.c.l.bf16 %v9746_v20  ;;  %v9113_v4 = vunpack.c.h.bf16 %v9755_v19  ;;  %v9009_v22 = vunpack.c.h.bf16 %v9729_v2 }
 0xb8d   : > { %v3308_v21 = vmax.f32 %v3142_v48, 0.0  ;;  %3591 = vmatmul.f32.gmra.mxu3 %v3353_v15  ;;  %3639 = vmatpush.msrb.mxu2 %v8896_v54  ;;  %v9048_v35 = vunpack.c.l.bf16 %v9739_v58  ;;  %v9073_v15 = vunpack.c.h.bf16 %v9745_v36  ;;  %v9112_v48 = vunpack.c.l.bf16 %v9755_v19  ;;  %v9754_v54 = vld [vmem:[%s13266_s10 + $0x3e8] sm:$0xff]   ;;  %v9743_v19 = vld [vmem:[%s13266_s10 + $0x390] sm:$0xff]  }
 0xb8e   : > { %3611 = vmatmul.f32.vlgmr.msra.gmra.mxu0 %v3306_v33  ;;  %3697 = vmatpush.msra.mxu3 %v8960_v18  ;;  %v9008_v33 = vunpack.c.l.bf16 %v9729_v2  ;;  %v9072_v11 = vunpack.c.l.bf16 %v9745_v36  ;;  %v9736_v36 = vld [vmem:[%s13266_s10 + $0x358] sm:$0xff]  }
 0xb8f   : > { %3669 = vmatmul.f32.vlgmr.msra.gmra.mxu1 %v3308_v21  ;;  %v3112_v45 = vpop.f32.mrf.mxu2  ;;  %3713 = vmatpush.msrb.mxu0 %v9017_v30  ;;  %v9045_v21 = vunpack.c.h.bf16 %v9738_v56  ;;  %v9728_v30 = vld [vmem:[%s13266_s10 + $0x318] sm:$0xff]  }
 0xb90   : > { %v3113_v5 = vadd.f32 %v3112_v45, %v11394_v34  ;;  %v3170_v52 = vpop.f32.mrf.mxu3  ;;  %3740 = vmatpush.msra.mxu2 %v9053_v31  ;;  %3771 = vmatpush.msrb.mxu1 %v9081_v39  ;;  %v9109_v45 = vunpack.c.h.bf16 %v9754_v54 }
 0xb91   : > { %v3171_v46 = vadd.f32 %v3170_v52, %v11398_v23  ;;  %v3086_v12 = vpop.f32.mrf.mxu0  ;;  %3798 = vmatpush.msrb.mxu3 %v9117_v41  ;;  %3714 = vmatpush.msrb.mxu0 %v9016_v50  ;;  %v9744_v50 = vld [vmem:[%s13266_s10 + $0x398] sm:$0xff]  }
 0xb92   : > { %v3307_v60 = vmax.f32 %v3113_v5, 0.0  ;;  %v3087_v57 = vadd.f32 %v3086_v12, %v11363_v40  ;;  %v3144_v17 = vpop.f32.mrf.mxu1  ;;  %3741 = vmatpush.msra.mxu2 %v9052_v51  ;;  %3772 = vmatpush.msrb.mxu1 %v9080_v55  ;;  %v9737_v5 = vld [vmem:[%s13266_s10 + $0x360] sm:$0xff]   ;;  %v9005_v55 = vunpack.c.h.bf16 %v9728_v30  ;;  %v9069_v58 = vunpack.c.h.bf16 %v9744_v50 }
 0xb93   : > { %v3309_v63 = vmax.f32 %v3171_v46, 0.0  ;;  %v3145_v44 = vadd.f32 %v3144_v17, %v11369_v38  ;;  %3715 = vmatpush.msrb.mxu0 %v9013_v24  ;;  %3799 = vmatpush.msrb.mxu3 %v9116_v0  ;;  %v9044_v46 = vunpack.c.l.bf16 %v9738_v56  ;;  %v9753_v12 = vld [vmem:[%s13266_s10 + $0x3e0] sm:$0xff]   ;;  %v9004_v17 = vunpack.c.l.bf16 %v9728_v30 }
 0xb94   : > { %v3322_v49 = vmax.f32 %v3087_v57, 0.0  ;;  %3640 = vmatmul.f32.vlgmr.msrb.gmra.mxu2 %v3307_v60  ;;  %3773 = vmatpush.msrb.mxu1 %v9077_v47  ;;  %v9108_v60 = vunpack.c.l.bf16 %v9754_v54  ;;  %v9727_v57 = vld [vmem:[%s13266_s10 + $0x310] sm:$0xff]   ;;  %v9041_v47 = vunpack.c.h.bf16 %v9737_v5  ;;  %v9105_v0 = vunpack.c.h.bf16 %v9753_v12 }
 0xb95   : > { %v3324_v32 = vmax.f32 %v3145_v44, 0.0  ;;  %3698 = vmatmul.f32.vlgmr.msra.gmra.mxu3 %v3309_v63  ;;  %3716 = vmatpush.msrb.mxu0 %v9012_v1  ;;  %v9068_v44 = vunpack.c.l.bf16 %v9744_v50  ;;  %v9001_v1 = vunpack.c.h.bf16 %v9727_v57 }
 0xb96   : > { %3614 = vmatmul.f32.gmra.mxu0 %v3322_v49  ;;  %3742 = vmatpush.msra.mxu2 %v9049_v62  ;;  %v9040_v62 = vunpack.c.l.bf16 %v9737_v5  ;;  %v9725_v5 = vld [vmem:[%s13266_s10 + $0x300] sm:$0xff]  }
 0xb97   : > { %3672 = vmatmul.f32.gmra.mxu1 %v3324_v32  ;;  %v3115_v6 = vpop.f32.mrf.mxu2  ;;  %3800 = vmatpush.msrb.mxu3 %v9113_v4  ;;  %v9065_v4 = vunpack.c.h.bf16 %v9743_v19 }
 0xb98   : > { %v3116_v13 = vadd.f32 %v3115_v6, %v11394_v34  ;;  %v3173_v14 = vpop.f32.mrf.mxu3  ;;  %3774 = vmatpush.msrb.mxu1 %v9076_v3  ;;  %3717 = vmatpush.msrb.mxu0 %v9009_v22  ;;  %v9104_v22 = vunpack.c.l.bf16 %v9753_v12 }
 0xb99   : > { %v3174_v16 = vadd.f32 %v3173_v14, %v11398_v23  ;;  %v3089_v18 = vpop.f32.mrf.mxu0  ;;  %3743 = vmatpush.msra.mxu2 %v9048_v35  ;;  %3801 = vmatpush.msrb.mxu3 %v9112_v48  ;;  %v9752_v35 = vld [vmem:[%s13266_s10 + $0x3d8] sm:$0xff]   ;;  %v9037_v14 = vunpack.c.h.bf16 %v9736_v36 }
 0xb9a   : > { %v3323_v31 = vmax.f32 %v3116_v13, 0.0  ;;  %v3090_v39 = vadd.f32 %v3089_v18, %v11363_v40  ;;  %v3147_v41 = vpop.f32.mrf.mxu1  ;;  %3775 = vmatpush.msrb.mxu1 %v9073_v15  ;;  %3718 = vmatpush.msrb.mxu0 %v9008_v33  ;;  %v9000_v13 = vunpack.c.l.bf16 %v9727_v57  ;;  %v9726_v33 = vld [vmem:[%s13266_s10 + $0x308] sm:$0xff]   ;;  %v9101_v18 = vunpack.c.h.bf16 %v9752_v35 }
 0xb9b   : > { %v3325_v51 = vmax.f32 %v3174_v16, 0.0  ;;  %v3148_v20 = vadd.f32 %v3147_v41, %v11369_v38  ;;  %3744 = vmatpush.msra.mxu2 %v9045_v21  ;;  %3802 = vmatpush.msrb.mxu3 %v9109_v45  ;;  %v9064_v16 = vunpack.c.l.bf16 %v9743_v19  ;;  %v9751_v41 = vld [vmem:[%s13266_s10 + $0x3d0] sm:$0xff]   ;;  %v9100_v50 = vunpack.c.l.bf16 %v9752_v35 }
 0xb9c   : > { %v3338_v52 = vmax.f32 %v3090_v39, 0.0  ;;  %3643 = vmatmul.f32.gmra.mxu2 %v3323_v31  ;;  %3776 = vmatpush.msrb.mxu1 %v9072_v11  ;;  %v8997_v31 = vunpack.c.h.bf16 %v9726_v33  ;;  %v9036_v39 = vunpack.c.l.bf16 %v9736_v36  ;;  %v8993_v19 = vunpack.c.h.bf16 %v9725_v5 }
 0xb9d   : > { %v3340_v24 = vmax.f32 %v3148_v20, 0.0  ;;  %3701 = vmatmul.f32.gmra.mxu3 %v3325_v51  ;;  %3719 = vmatpush.msrb.mxu0 %v9005_v55  ;;  %v11475_v51 = vperm.slane %v11352_v27, 4  ;;  %v11478_v20 = vperm.slane %v11352_v27, 6  ;;  %v8992_v36 = vunpack.c.l.bf16 %v9725_v5 }
 0xb9e   : > { %3617 = vmatmul.f32.gmra.mxu0 %v3338_v52  ;;  %3745 = vmatpush.msra.mxu2 %v9044_v46  ;;  %v8996_v46 = vunpack.c.l.bf16 %v9726_v33 }
 0xb9f   : > { %3675 = vmatmul.f32.gmra.mxu1 %v3340_v24  ;;  %v3118_v63 = vpop.f32.mrf.mxu2  ;;  %3803 = vmatpush.msrb.mxu3 %v9108_v60  ;;  %v9741_v24 = vld [vmem:[%s13266_s10 + $0x380] sm:$0xff]  }
 0xba0   : > { %v3119_v2 = vadd.f32 %v3118_v63, %v11394_v34  ;;  %v3176_v49 = vpop.f32.mrf.mxu3  ;;  %3777 = vmatpush.msrb.mxu1 %v9069_v58  ;;  %3720 = vmatpush.msrb.mxu0 %v9004_v17  ;;  %v9097_v17 = vunpack.c.h.bf16 %v9751_v41 }
 0xba1   : > { %v3177_v32 = vadd.f32 %v3176_v49, %v11398_v23  ;;  %v3092_v3 = vpop.f32.mrf.mxu0  ;;  %3746 = vmatpush.msra.mxu2 %v9041_v47  ;;  %3804 = vmatpush.msrb.mxu3 %v9105_v0  ;;  %v9750_v49 = vld [vmem:[%s13266_s10 + $0x3c8] sm:$0xff]  }
 0xba2   : > { %v3339_v56 = vmax.f32 %v3119_v2, 0.0  ;;  %v3093_v6 = vadd.f32 %v3092_v3, %v11363_v40  ;;  %v3150_v15 = vpop.f32.mrf.mxu1  ;;  %3778 = vmatpush.msrb.mxu1 %v9068_v44  ;;  %3721 = vmatpush.msrb.mxu0 %v9001_v1  ;;  %v9742_v40 = vld [vmem:[%s13266_s10 + $0x388] sm:$0xff]   ;;  %v9057_v2 = vunpack.c.h.bf16 %v9741_v24  ;;  %v11497_v3 = vperm.slane %v11352_v27, 5 }
 0xba3   : > { %v3341_v48 = vmax.f32 %v3177_v32, 0.0  ;;  %v3151_v54 = vadd.f32 %v3150_v15, %v11369_v38  ;;  %3747 = vmatpush.msra.mxu2 %v9040_v62  ;;  %3805 = vmatpush.msrb.mxu3 %v9104_v22  ;;  %v9735_v38 = vld [vmem:[%s13266_s10 + $0x350] sm:$0xff]   ;;  %v9061_v45 = vunpack.c.h.bf16 %v9742_v40  ;;  %v9060_v57 = vunpack.c.l.bf16 %v9742_v40 }
 0xba4   : > { %v3354_v21 = vmax.f32 %v3093_v6, 0.0  ;;  %3779 = vmatpush.msrb.mxu1 %v9065_v4  ;;  %3646 = vmatmul.f32.gmra.mxu2 %v3339_v56  ;;  %v9033_v12 = vunpack.c.h.bf16 %v9735_v38  ;;  %v9032_v63 = vunpack.c.l.bf16 %v9735_v38  ;;  %v11500_v4 = vperm.slane %v11352_v27, 7 }
 0xba5   : > { %v3356_v30 = vmax.f32 %v3151_v54, 0.0  ;;  %3704 = vmatmul.f32.gmra.mxu3 %v3341_v48  ;;  %3722 = vmatpush.msrb.mxu0 %v9000_v13  ;;  %v9056_v22 = vunpack.c.l.bf16 %v9741_v24  ;;  %v9093_v35 = vunpack.c.h.bf16 %v9750_v49  ;;  %v9733_v48 = vld [vmem:[%s13266_s10 + $0x340] sm:$0xff]  }
 0xba6   : > { %3748 = vmatpush.msra.mxu2 %v9037_v14  ;;  %3780 = vmatpush.msrb.mxu1 %v9064_v16  ;;  %v9749_v54 = vld [vmem:[%s13266_s10 + $0x3c0] sm:$0xff]   ;;  %v9092_v14 = vunpack.c.l.bf16 %v9750_v49 }
 0xba7   : > { %v3121_v11 = vpop.f32.mrf.mxu2  ;;  %3806 = vmatpush.msrb.mxu3 %v9101_v18  ;;  %3620 = vmatmul.f32.gmra.mxu0 %v3354_v21  ;;  %v9025_v21 = vunpack.c.h.bf16 %v9733_v48 }
 0xba8   : > { %v3122_v52 = vadd.f32 %v3121_v11, %v11394_v34  ;;  %v3179_v55 = vpop.f32.mrf.mxu3  ;;  %3678 = vmatmul.f32.gmra.mxu1 %v3356_v30  ;;  %3723 = vmatpush.msrb.mxu0 %v8997_v31  ;;  %v9734_v34 = vld [vmem:[%s13266_s10 + $0x348] sm:$0xff]   ;;  %v9089_v30 = vunpack.c.h.bf16 %v9749_v54 }
 0xba9   : > { %v3180_v58 = vadd.f32 %v3179_v55, %v11398_v23  ;;  %v3199_v60 = vpop.f32.mrf.mxu0  ;;  %3749 = vmatpush.msra.mxu2 %v9036_v39  ;;  %3781 = vmatpush.msrb.mxu1 %v9061_v45  ;;  %v9096_v23 = vunpack.c.l.bf16 %v9751_v41  ;;  %v9029_v32 = vunpack.c.h.bf16 %v9734_v34  ;;  %v9028_v13 = vunpack.c.l.bf16 %v9734_v34 }
 0xbaa   : > { %v3257_v47 = vpop.f32.mrf.mxu1  ;;  %3807 = vmatpush.msrb.mxu3 %v9100_v50  ;;  %v3200_v44 = vadd.f32 %v3199_v60, %v11475_v51  ;;  %v3355_v1 = vmax.f32 %v3122_v52, 0.0  ;;  %3724 = vmatpush.msrb.mxu0 %v8996_v46  ;;  %v9024_v39 = vunpack.c.l.bf16 %v9733_v48  ;;  %v9088_v41 = vunpack.c.l.bf16 %v9749_v54 }
 0xbab   : > { %v3258_v0 = vadd.f32 %v3257_v47, %v11478_v20  ;;  %v3357_v62 = vmax.f32 %v3180_v58, 0.0  ;;  %3750 = vmatpush.msra.mxu2 %v9033_v12  ;;  %3782 = vmatpush.msrb.mxu1 %v9060_v57 }
 0xbac   : > { %3808 = vmatpush.msrb.mxu3 %v9097_v17  ;;  %3725 = vmatpush.msrb.mxu0 %v8993_v19  ;;  %v3310_v56 = vmax.f32 %v3200_v44, 0.0 }
 0xbad   : > { %3751 = vmatpush.msra.mxu2 %v9032_v63  ;;  %v3312_v6 = vmax.f32 %v3258_v0, 0.0  ;;  %3783 = vmatpush.msrb.mxu1 %v9057_v2 }
 0xbae   : > { %3809 = vmatpush.msrb.mxu3 %v9096_v23  ;;  %3649 = vmatmul.f32.gmra.mxu2 %v3355_v1 }
 0xbaf   : > { %v3228_v15 = vpop.f32.mrf.mxu2  ;;  %3707 = vmatmul.f32.gmra.mxu3 %v3357_v62  ;;  %3726 = vmatpush.msrb.mxu0 %v8992_v36 }
 0xbb0   : > { %v3286_v27 = vpop.f32.mrf.mxu3  ;;  %3752 = vmatpush.msra.mxu2 %v9029_v32  ;;  %v3229_v33 = vadd.f32 %v3228_v15, %v11497_v3  ;;  %3784 = vmatpush.msrb.mxu1 %v9056_v22 }
 0xbb1   : > { %v3287_v16 = vadd.f32 %v3286_v27, %v11500_v4  ;;  %v3202_v18 = vpop.f32.mrf.mxu0  ;;  %3810 = vmatpush.msrb.mxu3 %v9093_v35  ;;  %3727 = vmatmul.f32.vlgmr.msrb.gmra.mxu0 %v3310_v56 }
 0xbb2   : > { %v3260_v40 = vpop.f32.mrf.mxu1  ;;  %3785 = vmatmul.f32.vlgmr.msrb.gmra.mxu1 %v3312_v6  ;;  %v3203_v38 = vadd.f32 %v3202_v18, %v11475_v51  ;;  %3753 = vmatpush.msra.mxu2 %v9028_v13  ;;  %v3311_v11 = vmax.f32 %v3229_v33, 0.0 }
 0xbb3   : > { %v3261_v31 = vadd.f32 %v3260_v40, %v11478_v20  ;;  %3811 = vmatpush.msrb.mxu3 %v9092_v14  ;;  %v3313_v45 = vmax.f32 %v3287_v16, 0.0 }
 0xbb4   : > { %3754 = vmatpush.msra.mxu2 %v9025_v21  ;;  %v3326_v50 = vmax.f32 %v3203_v38, 0.0 }
 0xbb5   : > { %3812 = vmatpush.msrb.mxu3 %v9089_v30  ;;  %v3328_v5 = vmax.f32 %v3261_v31, 0.0 }
 0xbb6   : > { %3755 = vmatpush.msra.mxu2 %v9024_v39 }
 0xbb7   : > { %v3231_v52 = vpop.f32.mrf.mxu2  ;;  %3813 = vmatpush.msrb.mxu3 %v9088_v41  ;;  %3756 = vmatmul.f32.vlgmr.msra.gmra.mxu2 %v3311_v11 }
 0xbb8   : > { %v3289_v55 = vpop.f32.mrf.mxu3  ;;  %3814 = vmatmul.f32.vlgmr.msrb.gmra.mxu3 %v3313_v45  ;;  %v3232_v46 = vadd.f32 %v3231_v52, %v11497_v3 }
 0xbb9   : > { %v3290_v12 = vadd.f32 %v3289_v55, %v11500_v4  ;;  %v3205_v24 = vpop.f32.mrf.mxu0  ;;  %3730 = vmatmul.f32.gmra.mxu0 %v3326_v50 }
 0xbba   : > { %v3263_v58 = vpop.f32.mrf.mxu1  ;;  %3788 = vmatmul.f32.gmra.mxu1 %v3328_v5  ;;  %v3206_v60 = vadd.f32 %v3205_v24, %v11475_v51  ;;  %v3327_v17 = vmax.f32 %v3232_v46, 0.0 }
 0xbbb   : > { %v3264_v57 = vadd.f32 %v3263_v58, %v11478_v20  ;;  %v3329_v47 = vmax.f32 %v3290_v12, 0.0 }
 0xbbc   : > { %v3342_v19 = vmax.f32 %v3206_v60, 0.0 }
 0xbbd   : > { %v3344_v63 = vmax.f32 %v3264_v57, 0.0 }
 0xbbf   : > { %v3234_v34 = vpop.f32.mrf.mxu2  ;;  %3759 = vmatmul.f32.gmra.mxu2 %v3327_v17 }
 0xbc0   : > { %v3292_v44 = vpop.f32.mrf.mxu3  ;;  %3817 = vmatmul.f32.gmra.mxu3 %v3329_v47  ;;  %v3235_v0 = vadd.f32 %v3234_v34, %v11497_v3 }
 0xbc1   : > { %v3293_v2 = vadd.f32 %v3292_v44, %v11500_v4  ;;  %v3208_v23 = vpop.f32.mrf.mxu0  ;;  %3733 = vmatmul.f32.gmra.mxu0 %v3342_v19 }
 0xbc2   : > { %v3266_v49 = vpop.f32.mrf.mxu1  ;;  %3791 = vmatmul.f32.gmra.mxu1 %v3344_v63  ;;  %v3209_v1 = vadd.f32 %v3208_v23, %v11475_v51  ;;  %v3343_v36 = vmax.f32 %v3235_v0, 0.0  ;;  %v11533_v0 = vld [vmem:[%s13263_s7] sm:$0xff] }
 0xbc3   : > { %v3267_v62 = vadd.f32 %v3266_v49, %v11478_v20  ;;  %v3345_v32 = vmax.f32 %v3293_v2, 0.0  ;;  %13315 = vst [vmem:[#allocation12_spill] sm:$0xff] %v11533_v0  ;;  %v3362_v2 = vperm.slane %v11533_v0, 3 }
 0xbc4   : > { %v3358_v22 = vmax.f32 %v3209_v1, 0.0 }
 0xbc5   : > { %v3360_v35 = vmax.f32 %v3267_v62, 0.0 }
 0xbc7   : > { %v3237_v56 = vpop.f32.mrf.mxu2  ;;  %3762 = vmatmul.f32.gmra.mxu2 %v3343_v36 }
 0xbc8   : > { %v3295_v6 = vpop.f32.mrf.mxu3  ;;  %3820 = vmatmul.f32.gmra.mxu3 %v3345_v32  ;;  %v3238_v15 = vadd.f32 %v3237_v56, %v11497_v3 }
 0xbc9   : > { %v3296_v48 = vadd.f32 %v3295_v6, %v11500_v4  ;;  %v3380_v54 = vpop.f32.mrf.mxu0  ;;  %3736 = vmatmul.f32.gmra.mxu0 %v3358_v22 }
 0xbca   : > { %v3438_v27 = vpop.f32.mrf.mxu1  ;;  %3794 = vmatmul.f32.gmra.mxu1 %v3360_v35  ;;  %v3359_v13 = vmax.f32 %v3238_v15, 0.0  ;;  %v3381_v49 = vadd.f32 %v3380_v54, %v3362_v2 }
 0xbcb   : > { %v3361_v51 = vmax.f32 %v3296_v48, 0.0 }
 0xbcf   : > { %3765 = vmatmul.f32.gmra.mxu2 %v3359_v13  ;;  %v3409_v33 = vpop.f32.mrf.mxu2 }
 0xbd0   : > { %3823 = vmatmul.f32.gmra.mxu3 %v3361_v51  ;;  %v3467_v16 = vpop.f32.mrf.mxu3  ;;  %v3410_v36 = vadd.f32 %v3409_v33, %v3381_v49 }
 0xbd1   : > { %v3383_v20 = vpop.f32.mrf.mxu0 }
 0xbd2   : > { %v3441_v14 = vpop.f32.mrf.mxu1  ;;  %v3439_v22 = vadd.f32 %v3438_v27, %v3410_v36  ;;  %v3384_v56 = vadd.f32 %v3383_v20, %v3362_v2 }
 0xbd4   : > { %v3468_v48 = vadd.f32 %v3467_v16, %v3439_v22 }
 0xbd7   : > { %v3412_v21 = vpop.f32.mrf.mxu2 }
 0xbd8   : > { %v3470_v30 = vpop.f32.mrf.mxu3  ;;  %v3413_v13 = vadd.f32 %v3412_v21, %v3384_v56 }
 0xbda   : > { %v3442_v28 = vadd.f32 %v3441_v14, %v3413_v13 }
 0xbdb   : > { %v3386_v18 = vpop.f32.mrf.mxu0 }
 0xbdc   : > { %v3444_v40 = vpop.f32.mrf.mxu1  ;;  %v3387_v42 = vadd.f32 %v3386_v18, %v3362_v2  ;;  %v3471_v8 = vadd.f32 %v3470_v30, %v3442_v28 }
 0xbe3   : > { %v3389_v38 = vpop.f32.mrf.mxu0 }
 0xbe4   : > { %v11522_v3 = vpop.f32.mrf.mxu1  ;;  %v3390_v0 = vadd.f32 %v3389_v38, %v3362_v2 }
 0xbe7   : > { %v3415_v4 = vpop.f32.mrf.mxu2 }
 0xbe8   : > { %v3473_v31 = vpop.f32.mrf.mxu3  ;;  %v3416_v9 = vadd.f32 %v3415_v4, %v3387_v42 }
 0xbea   : > { %v3445_v49 = vadd.f32 %v3444_v40, %v3416_v9 }
 0xbeb   : > { %v3496_v39 = vpop.f32.mrf.mxu0 }
 0xbec   : > { %v3554_v41 = vpop.f32.mrf.mxu1  ;;  %v3497_v51 = vadd.f32 %v3496_v39, %v3468_v48  ;;  %v3474_v16 = vadd.f32 %v3473_v31, %v3445_v49 }
 0xbef   : > { %v3418_v11 = vpop.f32.mrf.mxu2 }
 0xbf0   : > { %v11524_v45 = vpop.f32.mrf.mxu3  ;;  %v3419_v21 = vadd.f32 %v3418_v11, %v3390_v0 }
 0xbf2   : > { %v3448_v28 = vadd.f32 %v11522_v3, %v3419_v21 }
 0xbf3   : > { %v3499_v50 = vpop.f32.mrf.mxu0 }
 0xbf4   : > { %v3557_v5 = vpop.f32.mrf.mxu1  ;;  %v3500_v33 = vadd.f32 %v3499_v50, %v3471_v8  ;;  %v3477_v40 = vadd.f32 %v11524_v45, %v3448_v28 }
 0xbf7   : > { %v3525_v52 = vpop.f32.mrf.mxu2 }
 0xbf8   : > { %v3583_v55 = vpop.f32.mrf.mxu3  ;;  %v3526_v26 = vadd.f32 %v3525_v52, %v3497_v51 }
 0xbfa   : > { %v3555_v54 = vadd.f32 %v3554_v41, %v3526_v26 }
 0xbfb   : > { %v3502_v46 = vpop.f32.mrf.mxu0 }
 0xbfc   : > { %v3560_v12 = vpop.f32.mrf.mxu1  ;;  %v3584_v27 = vadd.f32 %v3583_v55, %v3555_v54  ;;  %v3503_v52 = vadd.f32 %v3502_v46, %v3474_v16 }
 0xbff   : > { %v3528_v24 = vpop.f32.mrf.mxu2 }
 0xc00   : > { %v3586_v58 = vpop.f32.mrf.mxu3  ;;  %v3529_v36 = vadd.f32 %v3528_v24, %v3500_v33 }
 0xc02   : > { %v3558_v39 = vadd.f32 %v3557_v5, %v3529_v36 }
 0xc03   : > { %v3505_v60 = vpop.f32.mrf.mxu0 }
 0xc04   : > { %v11526_v57 = vpop.f32.mrf.mxu1  ;;  %v3587_v26 = vadd.f32 %v3586_v58, %v3558_v39  ;;  %v3506_v31 = vadd.f32 %v3505_v60, %v3477_v40 }
 0xc07   : > { %v3531_v17 = vpop.f32.mrf.mxu2 }
 0xc08   : > { %v3589_v47 = vpop.f32.mrf.mxu3  ;;  %v3532_v42 = vadd.f32 %v3531_v17, %v3503_v52 }
 0xc0a   : > { %v3561_v4 = vadd.f32 %v3560_v12, %v3532_v42 }
 0xc0b   : > { %v3612_v19 = vpop.f32.mrf.mxu0 }
 0xc0c   : > { %v3670_v34 = vpop.f32.mrf.mxu1  ;;  %v3613_v43 = vadd.f32 %v3612_v19, %v3584_v27  ;;  %v3590_v55 = vadd.f32 %v3589_v47, %v3561_v4 }
 0xc0f   : > { %v3534_v63 = vpop.f32.mrf.mxu2 }
 0xc10   : > { %v11528_v44 = vpop.f32.mrf.mxu3  ;;  %v3535_v46 = vadd.f32 %v3534_v63, %v3506_v31 }
 0xc12   : > { %v3564_v17 = vadd.f32 %v11526_v57, %v3535_v46 }
 0xc13   : > { %v3615_v23 = vpop.f32.mrf.mxu0 }
 0xc14   : > { %v3673_v32 = vpop.f32.mrf.mxu1  ;;  %v3616_v8 = vadd.f32 %v3615_v23, %v3587_v26 }
 0xc17   : > { %v3641_v1 = vpop.f32.mrf.mxu2 }
 0xc18   : > { %v3699_v62 = vpop.f32.mrf.mxu3  ;;  %v3642_v22 = vadd.f32 %v3641_v1, %v3613_v43 }
 0xc1a   : > { %v3671_v30 = vadd.f32 %v3670_v34, %v3642_v22 }
 0xc1b   : > { %v3618_v35 = vpop.f32.mrf.mxu0 }
 0xc1c   : > { %v3676_v25 = vpop.f32.mrf.mxu1  ;;  %v3700_v38 = vadd.f32 %v3699_v62, %v3671_v30  ;;  %v3619_v3 = vadd.f32 %v3618_v35, %v3590_v55  ;;  %v3593_v62 = vadd.f32 %v11528_v44, %v3564_v17  ;;  %v11577_v17 = vld [vmem:[%s13262_s6 + $0x30] sm:$0xff] }
 0xc1f   : > { %v3644_v6 = vpop.f32.mrf.mxu2 }
 0xc20   : > { %v3702_v15 = vpop.f32.mrf.mxu3  ;;  %v3645_v41 = vadd.f32 %v3644_v6, %v3616_v8 }
 0xc22   : > { %v3674_v24 = vadd.f32 %v3673_v32, %v3645_v41 }
 0xc24   : > { %v3621_v7 = vpop.f32.mrf.mxu0  ;;  %v3703_v34 = vadd.f32 %v3702_v15, %v3674_v24 }
 0xc25   : > { %v3679_v20 = vpop.f32.mrf.mxu1  ;;  %v3622_v35 = vadd.f32 %v3621_v7, %v3593_v62 }
 0xc27   : > { %v3647_v10 = vpop.f32.mrf.mxu2 }
 0xc28   : > { %v3705_v29 = vpop.f32.mrf.mxu3  ;;  %v3648_v0 = vadd.f32 %v3647_v10, %v3619_v3 }
 0xc2a   : > { %v3677_v6 = vadd.f32 %v3676_v25, %v3648_v0  ;;  %v11589_v0 = vld [vmem:[%s13262_s6 + $0x20] sm:$0xff] }
 0xc2c   : > { %v3706_v57 = vadd.f32 %v3705_v29, %v3677_v6 }
 0xc2e   : > { %v3728_v14 = vpop.f32.mrf.mxu0 }
 0xc2f   : > { %v3786_v9 = vpop.f32.mrf.mxu1  ;;  %v3729_v11 = vadd.f32 %v3728_v14, %v3700_v38 }
 0xc31   : > { %v3650_v18 = vpop.f32.mrf.mxu2 }
 0xc32   : > { %v3708_v56 = vpop.f32.mrf.mxu3  ;;  %v3651_v15 = vadd.f32 %v3650_v18, %v3622_v35 }
 0xc34   : > { %v3680_v33 = vadd.f32 %v3679_v20, %v3651_v15 }
 0xc36   : > { %v3731_v50 = vpop.f32.mrf.mxu0  ;;  %v3709_v16 = vadd.f32 %v3708_v56, %v3680_v33  ;;  %v13316_v56 = vld [vmem:[#allocation11_spill] sm:$0xff] }
 0xc37   : > { %v3789_v45 = vpop.f32.mrf.mxu1  ;;  %v3732_v12 = vadd.f32 %v3731_v50, %v3703_v34  ;;  %v11583_v34 = vld [vmem:[%s13262_s6 + $0x28] sm:$0xff] }
 0xc3a   : > { %v3757_v43 = vpop.f32.mrf.mxu2 }
 0xc3b   : > { %v3815_v5 = vpop.f32.mrf.mxu3  ;;  %v3758_v19 = vadd.f32 %v3757_v43, %v3729_v11 }
 0xc3d   : > { %v3787_v58 = vadd.f32 %v3786_v9, %v3758_v19 }
 0xc3e   : > { %v3734_v32 = vpop.f32.mrf.mxu0 }
 0xc3f   : > { %v3816_v2 = vadd.f32 %v3815_v5, %v3787_v58  ;;  %v3735_v13 = vadd.f32 %v3734_v32, %v3706_v57  ;;  %v3792_v54 = vpop.f32.mrf.mxu1  ;;  %v11571_v58 = vld [vmem:[%s13262_s6 + $0x38] sm:$0xff]  ;;  %v9969_v32 = vpack.i.bf16 %v11589_v0, %v11583_v34 }
 0xc40   : > { %3961 = vmatpush.msra.mxu0 %v11571_v58 }
 0xc41   : > { %v3827_v23 = vadd.f32 %v3816_v2, %v10781_v53 }
 0xc42   : > { %v3760_v60 = vpop.f32.mrf.mxu2  ;;  %3962 = vmatpush.msra.mxu0 %v11577_v17 }
 0xc43   : > { %v3818_v1 = vpop.f32.mrf.mxu3  ;;  %v3761_v47 = vadd.f32 %v3760_v60, %v3732_v12  ;;  %v3831_v63 = vsel %vm717_vm3, %v3827_v23, 0.0 }
 0xc44   : > { %3832 = vadd.xlane.f32.xlu2 %v3831_v63  ;;  %3963 = vmatpush.msra.mxu0 %v11583_v34 }
 0xc45   : > { %v3790_v48 = vadd.f32 %v3789_v45, %v3761_v47 }
 0xc46   : > { %v3737_v36 = vpop.f32.mrf.mxu0  ;;  %3964 = vmatpush.msra.mxu0 %v11589_v0 }
 0xc47   : > { %v3819_v10 = vadd.f32 %v3818_v1, %v3790_v48  ;;  %v3738_v7 = vadd.f32 %v3737_v36, %v3709_v16 }
 0xc49   : > { %v3828_v51 = vadd.f32 %v3819_v10, %v10794_v59  ;;  %v3795_v59 = vpop.f32.mrf.mxu1 }
 0xc4a   : > { %v3763_v53 = vpop.f32.mrf.mxu2 }
 0xc4b   : > { %v3764_v49 = vadd.f32 %v3763_v53, %v3735_v13  ;;  %v3834_v44 = vsel %vm717_vm3, %v3828_v51, 0.0  ;;  %v3821_v25 = vpop.f32.mrf.mxu3  ;;  %v13317_v53 = vld [vmem:[#allocation12_spill] sm:$0xff] }
 0xc4c   : > { %3835 = vadd.xlane.f32.xlu1 %v3834_v44  ;;  %v3919_v33 = vperm.slane %v13317_v53, 4 }
 0xc4d   : > { %v3793_v27 = vadd.f32 %v3792_v54, %v3764_v49 }
 0xc4f   : > { %v3822_v21 = vadd.f32 %v3821_v25, %v3793_v27  ;;  %v3924_v25 = vperm.slane %v13317_v53, 5 }
 0xc51   : > { %v3829_v29 = vadd.f32 %v3822_v21, %v10833_v37 }
 0xc52   : > { %v3766_v39 = vpop.f32.mrf.mxu2 }
 0xc53   : > { %v3767_v22 = vadd.f32 %v3766_v39, %v3738_v7  ;;  %v3837_v14 = vsel %vm717_vm3, %v3829_v29, 0.0  ;;  %v3824_v20 = vpop.f32.mrf.mxu3 }
 0xc54   : > { %3838 = vadd.xlane.f32.xlu0 %v3837_v14 }
 0xc55   : > { %v3796_v52 = vadd.f32 %v3795_v59, %v3767_v22 }
 0xc57   : > { %v3825_v18 = vadd.f32 %v3824_v20, %v3796_v52 }
 0xc59   : > { %v3830_v28 = vadd.f32 %v3825_v18, %v10846_v61 }
 0xc5b   : > { %v3840_v26 = vsel %vm717_vm3, %v3830_v28, 0.0 }
 0xc5c   : > { %3841 = vadd.xlane.f32.xlu1 %v3840_v26 }
 0xcb7   : > { %v3833_v42 = vpop.xlane.xlu2 %3832 }
 0xcb8   : > { %v3843_v30 = vmul.f32 %v3833_v42, %v13316_v56 }
 0xcba   : > { %v3847_v8 = vsub.f32 %v3827_v23, %v3843_v30  ;;  %v9964_v23 = vpack.i.bf16 %v11577_v17, %v11571_v58 }
 0xcbc   : > { %v3851_v9 = vmul.f32 %v3847_v8, %v3847_v8 }
 0xcbe   : > { %v3855_v37 = vsel %vm717_vm3, %v3851_v9, 0.0 }
 0xcbf   : > { %v3836_v40 = vpop.xlane.xlu1 %3835  ;;  %3856 = vadd.xlane.f32.xlu2 %v3855_v37 }
 0xcc0   : > { %v3844_v4 = vmul.f32 %v3836_v40, %v13316_v56 }
 0xcc2   : > { %v11551_v38 = vsub.f32 %v3828_v51, %v3844_v4 }
 0xcc4   : > { %v3852_v41 = vmul.f32 %v11551_v38, %v11551_v38 }
 0xcc6   : > { %v3858_v61 = vsel %vm717_vm3, %v3852_v41, 0.0 }
 0xcc7   : > { %v3839_v31 = vpop.xlane.xlu0 %3838  ;;  %3859 = vadd.xlane.f32.xlu0 %v3858_v61 }
 0xcc8   : > { %v3845_v11 = vmul.f32 %v3839_v31, %v13316_v56 }
 0xcca   : > { %v11557_v50 = vsub.f32 %v3829_v29, %v3845_v11 }
 0xccc   : > { %v3853_v43 = vmul.f32 %v11557_v50, %v11557_v50 }
 0xcce   : > { %v3861_v5 = vsel %vm717_vm3, %v3853_v43, 0.0 }
 0xccf   : > { %3862 = vadd.xlane.f32.xlu2 %v3861_v5  ;;  %v3842_v55 = vpop.xlane.xlu1 %3841 }
 0xcd0   : > { %v3846_v46 = vmul.f32 %v3842_v55, %v13316_v56 }
 0xcd2   : > { %v11563_v24 = vsub.f32 %v3830_v28, %v3846_v46 }
 0xcd4   : > { %v3854_v19 = vmul.f32 %v11563_v24, %v11563_v24 }
 0xcd6   : > { %v3864_v3 = vsel %vm717_vm3, %v3854_v19, 0.0 }
 0xcd7   : > { %3865 = vadd.xlane.f32.xlu1 %v3864_v3 }
 0xd32   : > { %v3857_v2 = vpop.xlane.xlu2 %3856 }
 0xd33   : > { %v3867_v45 = vmul.f32 %v3857_v2, %v13316_v56 }
 0xd35   : > { %v3871_v12 = vadd.f32 1e-05, %v3867_v45 }
 0xd37   : > { %10054 = vrsqrt.f32 %v3871_v12  ;;  %vm3881_vm12 = vweird.f32 %v3871_v12 }
 0xd3a   : > { %v3860_v60 = vpop.xlane.xlu0 %3859 }
 0xd3b   : > { %v3868_v1 = vmul.f32 %v3860_v60, %v13316_v56 }
 0xd3d   : > { %v10055_v62 = vpop.eup %10054  ;;  %v3872_v6 = vadd.f32 1e-05, %v3868_v1 }
 0xd3e   : > { %v3876_v47 = vmul.f32 %v10055_v62, %v3871_v12  ;;  %vm3882_vm11 = vweird.f32 %v10055_v62 }
 0xd3f   : > { %10056 = vrsqrt.f32 %v3872_v6  ;;  %vm3883_vm13 = vmor %vm3881_vm12, %vm3882_vm11  ;;  %vm3891_vm6 = vweird.f32 %v3872_v6 }
 0xd40   : > { %v3877_v63 = vmul.f32 %v10055_v62, %v3876_v47 }
 0xd42   : > { %v3878_v35 = vmul.f32 0.5, %v3877_v63  ;;  %v3863_v48 = vpop.xlane.xlu2 %3862 }
 0xd43   : > { %v3869_v57 = vmul.f32 %v3863_v48, %v13316_v56 }
 0xd44   : > { %v3879_v15 = vsub.f32 1.5, %v3878_v35 }
 0xd45   : > { %v10057_v10 = vpop.eup %10056  ;;  %v3873_v13 = vadd.f32 1e-05, %v3869_v57 }
 0xd46   : > { %v3880_v51 = vmul.f32 %v10055_v62, %v3879_v15  ;;  %v3886_v54 = vmul.f32 %v10057_v10, %v3872_v6  ;;  %vm3892_vm4 = vweird.f32 %v10057_v10 }
 0xd47   : > { %10058 = vrsqrt.f32 %v3873_v13  ;;  %vm3893_vm7 = vmor %vm3891_vm6, %vm3892_vm4  ;;  %vm3901_vm10 = vweird.f32 %v3873_v13 }
 0xd48   : > { %v3884_v49 = vsel %vm3883_vm13, %v10055_v62, %v3880_v51  ;;  %v3887_v44 = vmul.f32 %v10057_v10, %v3886_v54 }
 0xd49   : > { %v3915_v27 = vmul.f32 %v3884_v49, %v3847_v8 }
 0xd4a   : > { %v3888_v36 = vmul.f32 0.5, %v3887_v44  ;;  %v3866_v16 = vpop.xlane.xlu1 %3865 }
 0xd4b   : > { %v3920_v21 = vmul.f32 %v3919_v33, %v3915_v27  ;;  %v3870_v7 = vmul.f32 %v3866_v16, %v13316_v56 }
 0xd4c   : > { %v3889_v29 = vsub.f32 1.5, %v3888_v36 }
 0xd4d   : > { %v10059_v39 = vpop.eup %10058  ;;  %v11602_v22 = vadd.f32 %v3924_v25, %v3920_v21  ;;  %v3874_v14 = vadd.f32 1e-05, %v3870_v7 }
 0xd4e   : > { %v3890_v59 = vmul.f32 %v10057_v10, %v3889_v29  ;;  %v3896_v52 = vmul.f32 %v10059_v39, %v3873_v13  ;;  %vm3902_vm9 = vweird.f32 %v10059_v39 }
 0xd4f   : > { %10060 = vrsqrt.f32 %v3874_v14  ;;  %8155 = vmatmul.msk.f32.vlgmr.msra.gmra.mxu0 %vm717_vm3, %v11602_v22  ;;  %vm3903_vm11 = vmor %vm3901_vm10, %vm3902_vm9  ;;  %vm3911_vm13 = vweird.f32 %v3874_v14 }
 0xd50   : > { %v3894_v20 = vsel %vm3893_vm7, %v10057_v10, %v3890_v59  ;;  %v3897_v18 = vmul.f32 %v10059_v39, %v3896_v52 }
 0xd51   : > { %v3916_v28 = vmul.f32 %v3894_v20, %v11551_v38 }
 0xd52   : > { %v3898_v26 = vmul.f32 0.5, %v3897_v18 }
 0xd53   : > { %v3921_v42 = vmul.f32 %v3919_v33, %v3916_v28 }
 0xd54   : > { %v3899_v30 = vsub.f32 1.5, %v3898_v26 }
 0xd55   : > { %v10061_v8 = vpop.eup %10060  ;;  %v11607_v9 = vadd.f32 %v3924_v25, %v3921_v42 }
 0xd56   : > { %v3900_v37 = vmul.f32 %v10059_v39, %v3899_v30  ;;  %v3906_v40 = vmul.f32 %v10061_v8, %v3874_v14  ;;  %vm3912_vm12 = vweird.f32 %v10061_v8 }
 0xd57   : > { %8156 = vmatmul.msk.f32.gmra.mxu0 %vm717_vm3, %v11607_v9  ;;  %vm3913_vm4 = vmor %vm3911_vm13, %vm3912_vm12 }
 0xd58   : > { %v3904_v4 = vsel %vm3903_vm11, %v10059_v39, %v3900_v37  ;;  %v3907_v41 = vmul.f32 %v10061_v8, %v3906_v40 }
 0xd59   : > { %v3917_v61 = vmul.f32 %v3904_v4, %v11557_v50  ;;  %v8154_v50 = vld [vmem:[%s13263_s7 + $0x8] sm:$0xff] }
 0xd5a   : > { %v3908_v31 = vmul.f32 0.5, %v3907_v41  ;;  %v11624_v2 = vperm.slane %v8154_v50, 0 }
 0xd5b   : > { %v3922_v38 = vmul.f32 %v3919_v33, %v3917_v61 }
 0xd5c   : > { %v3909_v11 = vsub.f32 1.5, %v3908_v31 }
 0xd5d   : > { %v11612_v43 = vadd.f32 %v3924_v25, %v3922_v38 }
 0xd5e   : > { %v3910_v5 = vmul.f32 %v10061_v8, %v3909_v11 }
 0xd5f   : > { %8157 = vmatmul.msk.f32.gmra.mxu0 %vm717_vm3, %v11612_v43 }
 0xd60   : > { %v3914_v55 = vsel %vm3913_vm4, %v10061_v8, %v3910_v5 }
 0xd61   : > { %v3918_v46 = vmul.f32 %v3914_v55, %v11563_v24 }
 0xd63   : > { %v3923_v19 = vmul.f32 %v3919_v33, %v3918_v46 }
 0xd65   : > { %v11617_v3 = vadd.f32 %v3924_v25, %v3923_v19 }
 0xd67   : > { %8158 = vmatmul.msk.f32.gmra.mxu0 %vm717_vm3, %v11617_v3 }
 0xdcc   : > { %v3966_v45 = vpop.f32.mrf.mxu0 }
 0xdcd   : > { %v11627_v12 = vadd.f32 %v3966_v45, %v11624_v2 }
 0xdcf   : > { %3979 = vrot.lane.b32.xlu0 %v11627_v12, %s10159_s23 }
 0xdd4   : > { %v3969_v24 = vpop.f32.mrf.mxu0 }
 0xdd5   : > { %v11632_v60 = vadd.f32 %v3969_v24, %v11624_v2 }
 0xdd7   : > { %4006 = vrot.lane.b32.xlu1 %v11632_v60, %s10159_s23 }
 0xddc   : > { %v3972_v1 = vpop.f32.mrf.mxu0 }
 0xddd   : > { %v11637_v62 = vadd.f32 %v3972_v1, %v11624_v2 }
 0xddf   : > { %4033 = vrot.lane.b32.xlu2 %v11637_v62, %s10159_s23  ;;  %4244 = vrot.lane.b32.xlu1 %v11627_v12, %s10160_s19  ;;  %v11677_v59 = vpack.i.bf16 %v11637_v62, %v11627_v12 }
 0xde4   : > { %v3975_v6 = vpop.f32.mrf.mxu0 }
 0xde5   : > { %v11644_v47 = vadd.f32 %v3975_v6, %v11624_v2 }
 0xde7   : > { %4060 = vrot.lane.b32.xlu0 %v11644_v47, %s10159_s23  ;;  %s13319_s23 = smov 120  }
 0xe39   : > { %v4034_v35 = vpop.permute.xlu2 %4033 }
 0xe41   : > { %v3980_v63 = vpop.permute.xlu0 %3979 }
 0xe42   : > { %8159 = vmatpush.xpose.msk.msrb.mxu2 %vm879_vm14, %v3980_v63 }
 0xe45   : > { %8160 = vmatmul.msk.f32.vlgmr.msrb.gmra.mxu2 %vm879_vm14, %v11627_v12 }
 0xe46   : > { %8163 = vmatpush.xpose.msk.msra.mxu2 %vm879_vm14, %v4034_v35 }
 0xe49   : > { %v4007_v48 = vpop.permute.xlu1 %4006 }
 0xe4a   : > { %8161 = vmatpush.xpose.msk.msra.mxu1 %vm879_vm14, %v4007_v48 }
 0xe4d   : > { %8162 = vmatmul.msk.f32.vlgmr.msra.gmra.mxu1 %vm879_vm14, %v11632_v60  ;;  %8164 = vmatmul.msk.f32.vlgmr.msra.gmra.mxu2 %vm879_vm14, %v11637_v62 }
 0xe51   : > { %v4245_v57 = vpop.permute.xlu1 %4244 }
 0xe52   : > { %8171 = vmatpush.xpose.msk.msra.mxu3 %vm879_vm14, %v4245_v57 }
 0xe59   : > { %v4061_v15 = vpop.permute.xlu0 %4060 }
 0xe5a   : > { %8165 = vmatpush.xpose.msk.msrb.mxu1 %vm879_vm14, %v4061_v15 }
 0xe5d   : > { %8166 = vmatmul.msk.f32.vlgmr.msrb.gmra.mxu1 %vm879_vm14, %v11644_v47 }
 0xec8   : > { %v4002_v10 = vpop.f32.mrf.mxu2 }
 0xec9   : > { %v4086_v13 = vmul.f32 0.35355338, %v4002_v10 }
 0xeca   : > { %v4029_v51 = vpop.f32.mrf.mxu1 }
 0xecb   : > { %v4087_v54 = vmul.f32 0.35355338, %v4029_v51  ;;  %v4090_v33 = vsel %vm824_vm15, %v4086_v13, -1e+30 }
 0xecc   : > { %v4094_v49 = vsel %vm879_vm14, %v4090_v33, -inf }
 0xecd   : > { %4095 = vmax.xlane.f32.xlu0 %v4094_v49  ;;  %v4091_v44 = vsel %vm824_vm15, %v4087_v54, -1e+30 }
 0xece   : > { %v4097_v25 = vsel %vm879_vm14, %v4091_v44, -inf }
 0xecf   : > { %4098 = vmax.xlane.f32.xlu1 %v4097_v25 }
 0xed0   : > { %v4056_v27 = vpop.f32.mrf.mxu2 }
 0xed1   : > { %v4088_v36 = vmul.f32 0.35355338, %v4056_v27 }
 0xed3   : > { %v4092_v16 = vsel %vm824_vm15, %v4088_v36, -1e+30 }
 0xed4   : > { %v4100_v21 = vsel %vm879_vm14, %v4092_v16, -inf }
 0xed5   : > { %4101 = vmax.xlane.f32.xlu2 %v4100_v21 }
 0xeda   : > { %v4083_v7 = vpop.f32.mrf.mxu1 }
 0xedb   : > { %v4089_v29 = vmul.f32 0.35355338, %v4083_v7 }
 0xedd   : > { %v4093_v39 = vsel %vm824_vm15, %v4089_v29, -1e+30 }
 0xede   : > { %v4103_v14 = vsel %vm879_vm14, %v4093_v39, -inf }
 0xedf   : > { %4104 = vmax.xlane.f32.xlu0 %v4103_v14 }
 0xee8   : > { %4300 = vrot.lane.b32.xlu1 %v11637_v62, %s10160_s19 }
 0xeed   : > { %9945 = vrot.lane.b32.xlu2 %v11677_v59, %s10161_s24 }
 0xef0   : > { %4272 = vrot.lane.b32.xlu1 %v11632_v60, %s10160_s19 }
 0xef8   : > { %4164 = vrot.lane.b32.xlu1 %v11632_v60, %s10161_s24 }
 0xf00   : > { %4270 = vrot.lane.b32.xlu1 %v11632_v60, %s13319_s23 }
 0xf08   : > { %4216 = vrot.lane.b32.xlu1 %v11644_v47, %s10161_s24  ;;  %s13321_s24 = smov 56  }
 0xf10   : > { %4328 = vrot.lane.b32.xlu1 %v11644_v47, %s10160_s19  ;;  %s13320_s19 = smov 112  }
 0xf18   : > { %4326 = vrot.lane.b32.xlu1 %v11644_v47, %s13319_s23 }
 0xf40   : > { %v4096_v52 = vpop.xlane.xlu0 %4095 }
 0xf41   : > { %v4106_v20 = vsub.f32 %v4090_v33, %v4096_v52 }
 0xf42   : > { %v4099_v41 = vpop.xlane.xlu1 %4098 }
 0xf43   : > { %v4110_v18 = vmul.f32 1.442695, %v4106_v20  ;;  %v4107_v24 = vsub.f32 %v4091_v44, %v4099_v41 }
 0xf45   : > { %10062 = vpow2.f32 %v4110_v18  ;;  %v4112_v1 = vmul.f32 1.442695, %v4107_v24 }
 0xf48   : > { %v4102_v28 = vpop.xlane.xlu2 %4101 }
 0xf49   : > { %v4108_v26 = vsub.f32 %v4092_v16, %v4102_v28 }
 0xf4b   : > { %v10063_v42 = vpop.eup %10062  ;;  %v4114_v30 = vmul.f32 1.442695, %v4108_v26 }
 0xf4c   : > { %v4118_v8 = vsel %vm879_vm14, %v10063_v42, 0.0 }
 0xf4d   : > { %10064 = vpow2.f32 %v4114_v30  ;;  %4119 = vadd.xlane.f32.xlu2 %v4118_v8 }
 0xf50   : > { %v9946_v37 = vpop.permute.xlu2 %9945 }
 0xf51   : > { %v9948_v40 = vunpack.i.h.bf16 %v9946_v37  ;;  %v9947_v4 = vunpack.i.l.bf16 %v9946_v37 }
 0xf52   : > { %v4105_v46 = vpop.xlane.xlu0 %4104 }
 0xf53   : > { %v10065_v61 = vpop.eup %10064  ;;  %4159 = vmatpush.msrb.mxu2 %v9947_v4  ;;  %v4109_v50 = vsub.f32 %v4093_v39, %v4105_v46 }
 0xf54   : > { %v4124_v31 = vsel %vm879_vm14, %v10065_v61, 0.0 }
 0xf55   : > { %4211 = vmatpush.msra.mxu2 %v9948_v40  ;;  %4125 = vadd.xlane.f32.xlu0 %v4124_v31  ;;  %v4116_v45 = vmul.f32 1.442695, %v4109_v50 }
 0xf57   : > { %10066 = vpow2.f32 %v4116_v45 }
 0xf58   : > { %10068 = vpow2.f32 %v4112_v1 }
 0xf5a   : > { %v4301_v38 = vpop.permute.xlu1 %4300 }
 0xf5d   : > { %v10067_v6 = vpop.eup %10066 }
 0xf5e   : > { %v4127_v63 = vsel %vm879_vm14, %v10067_v6, 0.0  ;;  %v10069_v35 = vpop.eup %10068 }
 0xf5f   : > { %v4121_v48 = vsel %vm879_vm14, %v10069_v35, 0.0 }
 0xf62   : > { %v4273_v11 = vpop.permute.xlu1 %4272 }
 0xf63   : > { %8173 = vmatpush.xpose.msk.msrb.mxu0 %vm879_vm14, %v4273_v11 }
 0xf65   : > { %4298 = vrot.lane.b32.xlu2 %v11637_v62, %s13319_s23 }
 0xf69   : > { %4242 = vrot.lane.b32.xlu0 %v11627_v12, %s13319_s23  ;;  %s7999_s23 = sshll.u32 %s13340_s22, 2 }
 0xf6a   : > { %v4165_v5 = vpop.permute.xlu1 %4164 }
 0xf6b   : > { %4185 = vmatpush.msra.mxu1 %v4165_v5 }
 0xf72   : > { %v4271_v55 = vpop.permute.xlu1 %4270 }
 0xf73   : > { %8174 = vmatmul.msk.f32.vlgmr.msrb.gmra.mxu0 %vm879_vm14, %v4271_v55 }
 0xf7a   : > { %v4217_v19 = vpop.permute.xlu1 %4216 }
 0xf7b   : > { %4237 = vmatpush.msrb.mxu1 %v4217_v19 }
 0xf82   : > { %v4329_v39 = vpop.permute.xlu1 %4328 }
 0xf8a   : > { %v4327_v20 = vpop.permute.xlu1 %4326 }
 0xf8e   : > { %4128 = vadd.xlane.f32.xlu2 %v4127_v63 }
 0xf93   : > { %4122 = vadd.xlane.f32.xlu0 %v4121_v48 }
 0xfc0   : > { %v4120_v57 = vpop.xlane.xlu2 %4119 }
 0xfc1   : > { %10070 = vrcp.f32 %v4120_v57 }
 0xfc7   : > { %v10071_v15 = vpop.eup %10070 }
 0xfc8   : > { %v4134_v10 = vmul.f32 %v10071_v15, %v10063_v42  ;;  %v4126_v13 = vpop.xlane.xlu0 %4125  ;;  %v4299_v33 = vpop.permute.xlu2 %4298 }
 0xfc9   : > { %10072 = vrcp.f32 %v4126_v13 }
 0xfca   : > { %8167 = vmatmul.msk.f32.vlgmr.msrb.gmra.mxu2 %vm879_vm14, %v4134_v10 }
 0xfcb   : > { %8175 = vmatpush.xpose.msk.msrb.mxu2 %vm879_vm14, %v4301_v38 }
 0xfcf   : > { %v10073_v51 = vpop.eup %10072 }
 0xfd0   : > { %v4136_v54 = vmul.f32 %v10073_v51, %v10065_v61 }
 0xfd2   : > { %8169 = vmatmul.msk.f32.vlgmr.msra.gmra.mxu2 %vm879_vm14, %v4136_v54 }
 0xfda   : > { %8176 = vmatmul.msk.f32.vlgmr.msrb.gmra.mxu2 %vm879_vm14, %v4299_v33 }
 0xfdb   : > { %v4243_v49 = vpop.permute.xlu0 %4242 }
 0xfdc   : > { %8172 = vmatmul.msk.f32.vlgmr.msra.gmra.mxu3 %vm879_vm14, %v4243_v49 }
 0xff0   : > { %v4295_v44 = vpop.f32.mrf.mxu0 }
 0xff1   : > { %v4355_v25 = vmul.f32 0.35355338, %v4295_v44 }
 0xff3   : > { %v4359_v27 = vsel %vm824_vm15, %v4355_v25, -1e+30 }
 0xff4   : > { %v4365_v36 = vsel %vm879_vm14, %v4359_v27, -inf }
 0xff5   : > { %4366 = vmax.xlane.f32.xlu1 %v4365_v36 }
0x1001   : > { %v4129_v21 = vpop.xlane.xlu2 %4128 }
0x1006   : > { %v4123_v16 = vpop.xlane.xlu0 %4122 }
0x1007   : > { %10074 = vrcp.f32 %v4123_v16 }
0x1008   : > { %10076 = vrcp.f32 %v4129_v21 }
0x100d   : > { %v10075_v7 = vpop.eup %10074 }
0x100e   : > { %v4135_v29 = vmul.f32 %v10075_v7, %v10069_v35  ;;  %v10077_v14 = vpop.eup %10076 }
0x100f   : > { %v4137_v52 = vmul.f32 %v10077_v14, %v10067_v6 }
0x1010   : > { %8168 = vmatmul.msk.f32.vlgmr.msra.gmra.mxu1 %vm879_vm14, %v4135_v29 }
0x1011   : > { %8177 = vmatpush.xpose.msk.msra.mxu1 %vm879_vm14, %v4329_v39 }
0x1018   : > { %8170 = vmatmul.msk.f32.vlgmr.msrb.gmra.mxu1 %vm879_vm14, %v4137_v52 }
0x1020   : > { %8178 = vmatmul.msk.f32.vlgmr.msra.gmra.mxu1 %vm879_vm14, %v4327_v20 }
0x104d   : > { %v11748_v63 = vpop.f32.mrf.mxu2 }
0x1055   : > { %v11751_v48 = vpop.f32.mrf.mxu2 }
0x105d   : > { %v4323_v15 = vpop.f32.mrf.mxu2 }
0x105e   : > { %v4356_v10 = vmul.f32 0.35355338, %v4323_v15 }
0x105f   : > { %v4267_v18 = vpop.f32.mrf.mxu3 }
0x1060   : > { %v4354_v28 = vmul.f32 0.35355338, %v4267_v18  ;;  %v4360_v33 = vsel %vm824_vm15, %v4356_v10, -1e+30 }
0x1061   : > { %v4368_v49 = vsel %vm879_vm14, %v4360_v33, -inf }
0x1062   : > { %v4358_v26 = vsel %vm824_vm15, %v4354_v28, -1e+30 }
0x1063   : > { %v4362_v42 = vsel %vm879_vm14, %v4358_v26, -inf }
0x1064   : > { %4363 = vmax.xlane.f32.xlu0 %v4362_v42 }
0x1068   : > { %v4367_v30 = vpop.xlane.xlu1 %4366 }
0x1069   : > { %v4375_v8 = vsub.f32 %v4359_v27, %v4367_v30 }
0x106b   : > { %v4380_v37 = vmul.f32 1.442695, %v4375_v8 }
0x106d   : > { %10078 = vpow2.f32 %v4380_v37 }
0x1073   : > { %v11718_v40 = vpop.eup %10078 }
0x1074   : > { %v4389_v4 = vsel %vm879_vm14, %v11718_v40, 0.0 }
0x1075   : > { %4390 = vadd.xlane.f32.xlu1 %v4389_v4 }
0x108d   : > { %v11722_v41 = vpop.f32.mrf.mxu1 }
0x108e   : > { %4566 = vrot.lane.b32.xlu1 %v11637_v62, %s13320_s19 }
0x1095   : > { %v11726_v61 = vpop.f32.mrf.mxu1 }
0x1096   : > { %4484 = vrot.lane.b32.xlu1 %v11644_v47, %s13321_s24 }
0x109d   : > { %v4351_v31 = vpop.f32.mrf.mxu1 }
0x109e   : > { %v4357_v38 = vmul.f32 0.35355338, %v4351_v31  ;;  %4596 = vrot.lane.b32.xlu1 %v11644_v47, %s13322_s0 }
0x10a0   : > { %v4361_v11 = vsel %vm824_vm15, %v4357_v38, -1e+30 }
0x10a1   : > { %v4371_v5 = vsel %vm879_vm14, %v4361_v11, -inf }
0x10a2   : > { %4372 = vmax.xlane.f32.xlu0 %v4371_v5 }
0x10a6   : > { %4594 = vrot.lane.b32.xlu1 %v11644_v47, %s13320_s19 }
0x10ae   : > { %4778 = vrot.lane.b32.xlu1 %v11627_v12, %s13323_s20 }
0x10b6   : > { %9950 = vrot.lane.b32.xlu0 %v11677_v59, %s13321_s24 }
0x10d7   : > { %v4364_v55 = vpop.xlane.xlu0 %4363 }
0x10d8   : > { %v4374_v46 = vsub.f32 %v4358_v26, %v4364_v55 }
0x10da   : > { %v4378_v19 = vmul.f32 1.442695, %v4374_v46 }
0x10dc   : > { %10080 = vpow2.f32 %v4378_v19 }
0x10e2   : > { %v10081_v50 = vpop.eup %10080 }
0x10e3   : > { %v4386_v45 = vsel %vm879_vm14, %v10081_v50, 0.0 }
0x10e4   : > { %4387 = vadd.xlane.f32.xlu2 %v4386_v45 }
0x10e8   : > { %v4391_v24 = vpop.xlane.xlu1 %4390 }
0x10fc   : > { %4512 = vrot.lane.b32.xlu2 %v11627_v12, %s13322_s0 }
0x1100   : > { %v11744_v1 = vpop.permute.xlu1 %4566 }
0x1104   : > { %4510 = vrot.lane.b32.xlu2 %v11627_v12, %s13320_s19 }
0x1108   : > { %v4485_v6 = vpop.permute.xlu1 %4484 }
0x1109   : > { %4505 = vmatpush.msrb.mxu1 %v4485_v6 }
0x1110   : > { %v4597_v35 = vpop.permute.xlu1 %4596 }
0x1111   : > { %8189 = vmatpush.xpose.msk.msra.mxu1 %vm879_vm14, %v4597_v35 }
0x1115   : > { %v4373_v57 = vpop.xlane.xlu0 %4372 }
0x1116   : > { %v4377_v21 = vsub.f32 %v4361_v11, %v4373_v57 }
0x1118   : > { %v4384_v7 = vmul.f32 1.442695, %v4377_v21  ;;  %v4595_v19 = vpop.permute.xlu1 %4594 }
0x1128   : > { %v9951_v13 = vpop.permute.xlu0 %9950 }
0x1129   : > { %v9953_v51 = vunpack.i.h.bf16 %v9951_v13  ;;  %v9952_v54 = vunpack.i.l.bf16 %v9951_v13 }
0x112b   : > { %4427 = vmatpush.msrb.mxu3 %v9952_v54  ;;  %4479 = vmatpush.msra.mxu2 %v9953_v51 }
0x112d   : > { %4369 = vmax.xlane.f32.xlu2 %v4368_v49 }
0x1145   : > { %4568 = vrot.lane.b32.xlu2 %v11637_v62, %s13322_s0 }
0x114d   : > { %4432 = vrot.lane.b32.xlu2 %v11632_v60, %s13321_s24 }
0x1155   : > { %4540 = vrot.lane.b32.xlu2 %v11632_v60, %s13322_s0  ;;  %s579_s0 = scalar_lea.vmem %s13272_s16, %s7999_s23 }
0x1157   : > { %v4388_v44 = vpop.xlane.xlu2 %4387 }
0x1158   : > { %10082 = vrcp.f32 %v4388_v44 }
0x1159   : > { %10084 = vpow2.f32 %v4384_v7 }
0x115e   : > { %v10083_v25 = vpop.eup %10082 }
0x115f   : > { %v4402_v27 = vmul.f32 %v10083_v25, %v10081_v50  ;;  %v4513_v36 = vpop.permute.xlu2 %4512  ;;  %v10085_v29 = vpop.eup %10084 }
0x1160   : > { %8183 = vmatpush.xpose.msk.msra.mxu3 %vm879_vm14, %v4513_v36  ;;  %v4395_v39 = vsel %vm879_vm14, %v10085_v29, 0.0 }
0x1161   : > { %8179 = vmatmul.msk.f32.vlgmr.msrb.gmra.mxu3 %vm879_vm14, %v4402_v27 }
0x1167   : > { %v4511_v16 = vpop.permute.xlu2 %4510 }
0x1169   : > { %8184 = vmatmul.msk.f32.vlgmr.msra.gmra.mxu3 %vm879_vm14, %v4511_v16 }
0x117e   : > { %4396 = vadd.xlane.f32.xlu2 %v4395_v39 }
0x11a0   : > { %v4370_v14 = vpop.xlane.xlu2 %4369 }
0x11a1   : > { %v4376_v52 = vsub.f32 %v4360_v33, %v4370_v14 }
0x11a3   : > { %v4382_v20 = vmul.f32 1.442695, %v4376_v52 }
0x11a5   : > { %10086 = vpow2.f32 %v4382_v20 }
0x11a6   : > { %10088 = vrcp.f32 %v4391_v24 }
0x11a8   : > { %v4569_v18 = vpop.permute.xlu2 %4568 }
0x11a9   : > { %8187 = vmatpush.xpose.msk.msrb.mxu2 %vm879_vm14, %v4569_v18  ;;  %v4779_v18 = vpop.permute.xlu1 %4778 }
0x11ab   : > { %v10087_v28 = vpop.eup %10086 }
0x11ac   : > { %v4392_v26 = vsel %vm879_vm14, %v10087_v28, 0.0  ;;  %v10089_v42 = vpop.eup %10088 }
0x11ad   : > { %4393 = vadd.xlane.f32.xlu0 %v4392_v26  ;;  %v4403_v30 = vmul.f32 %v10089_v42, %v11718_v40 }
0x11b0   : > { %v4433_v8 = vpop.permute.xlu2 %4432 }
0x11b1   : > { %4453 = vmatpush.msra.mxu0 %v4433_v8 }
0x11b2   : > { %8180 = vmatmul.msk.f32.vlgmr.msra.gmra.mxu0 %vm879_vm14, %v4403_v30 }
0x11b8   : > { %v4541_v37 = vpop.permute.xlu2 %4540 }
0x11b9   : > { %8185 = vmatpush.xpose.msk.msrb.mxu0 %vm879_vm14, %v4541_v37 }
0x11c1   : > { %4538 = vrot.lane.b32.xlu0 %v11632_v60, %s13320_s19 }
0x11e4   : > { %v11773_v4 = vpop.f32.mrf.mxu3 }
0x11ec   : > { %v4535_v31 = vpop.f32.mrf.mxu3 }
0x11ed   : > { %v4622_v38 = vmul.f32 0.35355338, %v4535_v31 }
0x11ef   : > { %v4626_v11 = vsel %vm824_vm15, %v4622_v38, -1e+30 }
0x11f0   : > { %v4630_v5 = vsel %vm879_vm14, %v4626_v11, -inf }
0x11f1   : > { %v4397_v40 = vpop.xlane.xlu2 %4396  ;;  %4631 = vmax.xlane.f32.xlu0 %v4630_v5 }
0x11f2   : > { %10090 = vrcp.f32 %v4397_v40 }
0x11f8   : > { %v10091_v55 = vpop.eup %10090 }
0x11f9   : > { %v4405_v46 = vmul.f32 %v10091_v55, %v10085_v29 }
0x11fb   : > { %8182 = vmatmul.msk.f32.vlgmr.msrb.gmra.mxu1 %vm879_vm14, %v4405_v46 }
0x1203   : > { %8190 = vmatmul.msk.f32.vlgmr.msra.gmra.mxu1 %vm879_vm14, %v4595_v19 }
0x1205   : > { %9955 = vrot.lane.b32.xlu0 %v11677_v59, %s13324_s25 }
0x1220   : > { %v4394_v50 = vpop.xlane.xlu0 %4393 }
0x1221   : > { %10092 = vrcp.f32 %v4394_v50 }
0x1227   : > { %v10093_v45 = vpop.eup %10092 }
0x1228   : > { %v4404_v24 = vmul.f32 %v10093_v45, %v10087_v28 }
0x122a   : > { %8181 = vmatmul.msk.f32.vlgmr.msra.gmra.mxu2 %vm879_vm14, %v4404_v24 }
0x122f   : > { %v11786_v13 = vpop.f32.mrf.mxu0 }
0x1232   : > { %8188 = vmatmul.msk.f32.vlgmr.msrb.gmra.mxu2 %vm879_vm14, %v11744_v1 }
0x1233   : > { %v4539_v6 = vpop.permute.xlu0 %4538 }
0x1234   : > { %8186 = vmatmul.msk.f32.vlgmr.msrb.gmra.mxu0 %vm879_vm14, %v4539_v6 }
0x1264   : > { %v4632_v35 = vpop.xlane.xlu0 %4631 }
0x1265   : > { %v4642_v59 = vsub.f32 %v4626_v11, %v4632_v35 }
0x1267   : > { %v4646_v54 = vmul.f32 1.442695, %v4642_v59 }
0x1269   : > { %10094 = vpow2.f32 %v4646_v54 }
0x126f   : > { %v10095_v21 = vpop.eup %10094 }
0x1270   : > { %v4654_v7 = vsel %vm879_vm14, %v10095_v21, 0.0 }
0x1277   : > { %v9956_v57 = vpop.permute.xlu0 %9955 }
0x1278   : > { %v9958_v15 = vunpack.i.h.bf16 %v9956_v57  ;;  %v9957_v10 = vunpack.i.l.bf16 %v9956_v57  ;;  %v11801_v29 = vpop.f32.mrf.mxu1 }
0x127a   : > { %4695 = vmatpush.msrb.mxu3 %v9957_v10  ;;  %4747 = vmatpush.msra.mxu2 %v9958_v15 }
0x1280   : > { %v4619_v39 = vpop.f32.mrf.mxu1 }
0x1281   : > { %v4625_v14 = vmul.f32 0.35355338, %v4619_v39 }
0x1283   : > { %v4629_v52 = vsel %vm824_vm15, %v4625_v14, -1e+30 }
0x1284   : > { %v4639_v20 = vsel %vm879_vm14, %v4629_v52, -inf }
0x12ad   : > { %v11788_v51 = vpop.f32.mrf.mxu2 }
0x12b1   : > { %v4563_v33 = vpop.f32.mrf.mxu0 }
0x12b2   : > { %v4623_v49 = vmul.f32 0.35355338, %v4563_v33 }
0x12b4   : > { %v4627_v1 = vsel %vm824_vm15, %v4623_v49, -1e+30 }
0x12b5   : > { %v4591_v44 = vpop.f32.mrf.mxu2  ;;  %v4633_v25 = vsel %vm879_vm14, %v4627_v1, -inf }
0x12b6   : > { %v4624_v27 = vmul.f32 0.35355338, %v4591_v44  ;;  %4634 = vmax.xlane.f32.xlu2 %v4633_v25 }
0x12b8   : > { %v4628_v36 = vsel %vm824_vm15, %v4624_v27, -1e+30 }
0x12b9   : > { %v4636_v16 = vsel %vm879_vm14, %v4628_v36, -inf }
0x12ba   : > { %4637 = vmax.xlane.f32.xlu1 %v4636_v16 }
0x12be   : > { %4655 = vadd.xlane.f32.xlu2 %v4654_v7 }
0x12d6   : > { %4780 = vrot.lane.b32.xlu2 %v11627_v12, %s13325_s17 }
0x12de   : > { %4700 = vrot.lane.b32.xlu2 %v11632_v60, %s13324_s25 }
0x1307   : > { %4640 = vmax.xlane.f32.xlu2 %v4639_v20  ;;  %v9959_v20 = vpack.i.bf16 %v11632_v60, %v11627_v12 }
0x131f   : > { %4836 = vrot.lane.b32.xlu2 %v11637_v62, %s13325_s17 }
0x1327   : > { %4808 = vrot.lane.b32.xlu2 %v11632_v60, %s13325_s17 }
0x1329   : > { %v4635_v28 = vpop.xlane.xlu2 %4634 }
0x132a   : > { %v4643_v26 = vsub.f32 %v4627_v1, %v4635_v28 }
0x132c   : > { %v4648_v42 = vmul.f32 1.442695, %v4643_v26 }
0x132d   : > { %v4638_v30 = vpop.xlane.xlu1 %4637 }
0x132e   : > { %10096 = vpow2.f32 %v4648_v42  ;;  %v4644_v8 = vsub.f32 %v4628_v36, %v4638_v30 }
0x132f   : > { %4806 = vrot.lane.b32.xlu2 %v11632_v60, %s13323_s20 }
0x1330   : > { %v4650_v37 = vmul.f32 1.442695, %v4644_v8 }
0x1331   : > { %v4656_v31 = vpop.xlane.xlu2 %4655 }
0x1332   : > { %10098 = vpow2.f32 %v4650_v37 }
0x1333   : > { %10100 = vrcp.f32 %v4656_v31 }
0x1334   : > { %v10097_v38 = vpop.eup %10096 }
0x1335   : > { %v4657_v11 = vsel %vm879_vm14, %v10097_v38, 0.0 }
0x1336   : > { %4658 = vadd.xlane.f32.xlu0 %v4657_v11 }
0x1337   : > { %4752 = vrot.lane.b32.xlu2 %v11644_v47, %s13324_s25 }
0x1338   : > { %v10099_v5 = vpop.eup %10098 }
0x1339   : > { %v10101_v40 = vpop.eup %10100  ;;  %v4781_v55 = vpop.permute.xlu2 %4780  ;;  %v4660_v46 = vsel %vm879_vm14, %v10099_v5, 0.0 }
0x133a   : > { %v4670_v19 = vmul.f32 %v10101_v40, %v10095_v21  ;;  %8195 = vmatpush.xpose.msk.msra.mxu3 %vm879_vm14, %v4781_v55  ;;  %4661 = vadd.xlane.f32.xlu1 %v4660_v46 }
0x133c   : > { %8191 = vmatmul.msk.f32.vlgmr.msrb.gmra.mxu3 %vm879_vm14, %v4670_v19 }
0x133f   : > { %4862 = vrot.lane.b32.xlu2 %v11644_v47, %s13323_s20 }
0x1341   : > { %v4701_v50 = vpop.permute.xlu2 %4700 }
0x1342   : > { %4721 = vmatpush.msra.mxu0 %v4701_v50 }
0x1344   : > { %8196 = vmatmul.msk.f32.vlgmr.msra.gmra.mxu3 %vm879_vm14, %v4779_v18 }
0x134a   : > { %4864 = vrot.lane.b32.xlu0 %v11644_v47, %s13325_s17 }
0x1353   : > { %4834 = vrot.lane.b32.xlu1 %v11637_v62, %s13323_s20 }
0x137a   : > { %v4641_v45 = vpop.xlane.xlu2 %4640 }
0x137b   : > { %v4645_v24 = vsub.f32 %v4629_v52, %v4641_v45 }
0x137d   : > { %v4652_v6 = vmul.f32 1.442695, %v4645_v24 }
0x137f   : > { %10102 = vpow2.f32 %v4652_v6 }
0x1382   : > { %v4837_v35 = vpop.permute.xlu2 %4836 }
0x1383   : > { %8199 = vmatpush.xpose.msk.msrb.mxu2 %vm879_vm14, %v4837_v35 }
0x1385   : > { %v10103_v57 = vpop.eup %10102 }
0x1386   : > { %v4663_v15 = vsel %vm879_vm14, %v10103_v57, 0.0 }
0x1387   : > { %4664 = vadd.xlane.f32.xlu1 %v4663_v15 }
0x138a   : > { %v4809_v10 = vpop.permute.xlu2 %4808 }
0x138b   : > { %8197 = vmatpush.xpose.msk.msrb.mxu0 %vm879_vm14, %v4809_v10 }
0x1392   : > { %v4807_v59 = vpop.permute.xlu2 %4806 }
0x139a   : > { %v4753_v54 = vpop.permute.xlu2 %4752 }
0x139b   : > { %4773 = vmatpush.msrb.mxu1 %v4753_v54 }
0x13a2   : > { %v4863_v42 = vpop.permute.xlu2 %4862 }
0x13a9   : > { %v4659_v33 = vpop.xlane.xlu0 %4658 }
0x13aa   : > { %10104 = vrcp.f32 %v4659_v33 }
0x13ad   : > { %v4662_v49 = vpop.xlane.xlu1 %4661 }
0x13ae   : > { %10106 = vrcp.f32 %v4662_v49 }
0x13b0   : > { %v10105_v1 = vpop.eup %10104 }
0x13b1   : > { %v4671_v44 = vmul.f32 %v10105_v1, %v10097_v38 }
0x13b3   : > { %8192 = vmatmul.msk.f32.vlgmr.msra.gmra.mxu0 %vm879_vm14, %v4671_v44 }
0x13b4   : > { %v10107_v25 = vpop.eup %10106 }
0x13b5   : > { %v4672_v27 = vmul.f32 %v10107_v25, %v10099_v5 }
0x13b7   : > { %8193 = vmatmul.msk.f32.vlgmr.msra.gmra.mxu2 %vm879_vm14, %v4672_v27 }
0x13bb   : > { %8198 = vmatmul.msk.f32.vlgmr.msrb.gmra.mxu0 %vm879_vm14, %v4807_v59 }
0x13bc   : > { %v4865_v36 = vpop.permute.xlu0 %4864 }
0x13bd   : > { %8201 = vmatpush.xpose.msk.msra.mxu1 %vm879_vm14, %v4865_v36 }
0x13bf   : > { %v4697_v16 = vpop.f32.mrf.mxu3 }
0x13c5   : > { %v4835_v21 = vpop.permute.xlu1 %4834 }
0x13c6   : > { %8200 = vmatmul.msk.f32.vlgmr.msrb.gmra.mxu2 %vm879_vm14, %v4835_v21 }
0x13c7   : > { %v4803_v7 = vpop.f32.mrf.mxu3 }
0x13c8   : > { %v4890_v39 = vmul.f32 0.35355338, %v4803_v7 }
0x13ca   : > { %v4894_v14 = vsel %vm824_vm15, %v4890_v39, -1e+30 }
0x13cb   : > { %v4898_v52 = vsel %vm879_vm14, %v4894_v14, -inf }
0x13cc   : > { %4899 = vmax.xlane.f32.xlu2 %v4898_v52 }
0x13e4   : > { %9960 = vrot.lane.b32.xlu2 %v9959_v20, %s13326_s18 }
0x13ec   : > { %5020 = vrot.lane.b32.xlu2 %v11644_v47, %s13326_s18 }
0x13f4   : > { %9970 = vrot.lane.b32.xlu2 %v9969_v32, %s13327_s27 }
0x13fa   : > { %v4665_v18 = vpop.xlane.xlu1 %4664 }
0x13fb   : > { %10108 = vrcp.f32 %v4665_v18 }
0x1401   : > { %v10109_v28 = vpop.eup %10108 }
0x1402   : > { %v4673_v26 = vmul.f32 %v10109_v28, %v10103_v57 }
0x1404   : > { %8194 = vmatmul.msk.f32.vlgmr.msrb.gmra.mxu1 %vm879_vm14, %v4673_v26 }
0x140c   : > { %8202 = vmatmul.msk.f32.vlgmr.msra.gmra.mxu1 %vm879_vm14, %v4863_v42 }
0x1430   : > { %v11847_v12 = vpop.f32.mrf.mxu0 }
0x1438   : > { %v4831_v60 = vpop.f32.mrf.mxu0 }
0x1439   : > { %v4891_v30 = vmul.f32 0.35355338, %v4831_v60 }
0x143a   : > { %v11852_v0 = vpop.f32.mrf.mxu2 }
0x143b   : > { %v4895_v47 = vsel %vm824_vm15, %v4891_v30, -1e+30 }
0x143c   : > { %v4901_v8 = vsel %vm879_vm14, %v4895_v47, -inf }
0x143d   : > { %4902 = vmax.xlane.f32.xlu0 %v4901_v8 }
0x143f   : > { %v4900_v34 = vpop.xlane.xlu2 %4899 }
0x1440   : > { %v4910_v19 = vsub.f32 %v4894_v14, %v4900_v34 }
0x1447   : > { %v9961_v32 = vpop.permute.xlu2 %9960 }
0x1448   : > { %v9963_v37 = vunpack.i.h.bf16 %v9961_v32  ;;  %v9962_v31 = vunpack.i.l.bf16 %v9961_v32 }
0x1449   : > { %v4859_v38 = vpop.f32.mrf.mxu2 }
0x144a   : > { %v4892_v11 = vmul.f32 0.35355338, %v4859_v38  ;;  %4963 = vmatpush.msrb.mxu3 %v9962_v31  ;;  %4989 = vmatpush.msra.mxu0 %v9963_v37 }
0x144c   : > { %v4896_v5 = vsel %vm824_vm15, %v4892_v11, -1e+30 }
0x144d   : > { %v4904_v40 = vsel %vm879_vm14, %v4896_v5, -inf }
0x144e   : > { %4905 = vmax.xlane.f32.xlu1 %v4904_v40 }
0x144f   : > { %v5021_v55 = vpop.permute.xlu2 %5020 }
0x1450   : > { %5041 = vmatpush.msrb.mxu1 %v5021_v55 }
0x1451   : > { %4994 = vrot.lane.b32.xlu0 %v11637_v62, %s13326_s18  ;;  %v4914_v62 = vmul.f32 1.442695, %v4910_v19 }
0x1453   : > { %10110 = vpow2.f32 %v4914_v62 }
0x1457   : > { %v9971_v30 = vpop.permute.xlu2 %9970 }
0x1458   : > { %v9973_v8 = vunpack.i.h.bf16 %v9971_v30 }
0x1459   : > { %5050 = vrot.lane.b32.xlu0 %v11773_v4, %s13328_s26  ;;  %v10111_v24 = vpop.eup %10110 }
0x1461   : > { %5066 = vrot.lane.b32.xlu0 %v4697_v16, %s13329_s28 }
0x1469   : > { %5052 = vrot.lane.b32.xlu0 %v11786_v13, %s13328_s26 }
0x1471   : > { %5054 = vrot.lane.b32.xlu0 %v11788_v51, %s13328_s26  ;;  %v4922_v51 = vsel %vm879_vm14, %v10111_v24, 0.0 }
0x1479   : > { %5056 = vrot.lane.b32.xlu0 %v11801_v29, %s13328_s26 }
0x1481   : > { %v4775_v46 = vpop.f32.mrf.mxu1  ;;  %5123 = vrot.lane.b32.xlu0 %v11624_v2, %s13327_s27 }
0x1489   : > { %v4887_v50 = vpop.f32.mrf.mxu1 }
0x148a   : > { %v4893_v45 = vmul.f32 0.35355338, %v4887_v50 }
0x148c   : > { %v4897_v4 = vsel %vm824_vm15, %v4893_v45, -1e+30 }
0x148d   : > { %v4907_v13 = vsel %vm879_vm14, %v4897_v4, -inf }
0x148e   : > { %4908 = vmax.xlane.f32.xlu1 %v4907_v13 }
0x1496   : > { %4923 = vadd.xlane.f32.xlu1 %v4922_v51 }
0x14b0   : > { %v4903_v29 = vpop.xlane.xlu0 %4902 }
0x14b1   : > { %v4911_v6 = vsub.f32 %v4895_v47, %v4903_v29  ;;  %v9972_v47 = vunpack.i.l.bf16 %v9971_v30  ;;  %v8236_v30 = vld [vmem:[%s13264_s8 + $0x1c8] sm:$0xff] }
0x14b3   : > { %v4916_v35 = vmul.f32 1.442695, %v4911_v6 }
0x14b5   : > { %10112 = vpow2.f32 %v4916_v35 }
0x14bb   : > { %v10113_v2 = vpop.eup %10112 }
0x14bc   : > { %v4925_v57 = vsel %vm879_vm14, %v10113_v2, 0.0 }
0x14bd   : > { %4926 = vadd.xlane.f32.xlu1 %v4925_v57 }
0x14c1   : > { %v4906_v15 = vpop.xlane.xlu1 %4905 }
0x14c2   : > { %v4912_v10 = vsub.f32 %v4896_v5, %v4906_v15 }
0x14c3   : > { %v4995_v59 = vpop.permute.xlu0 %4994 }
0x14c4   : > { %v4918_v53 = vmul.f32 1.442695, %v4912_v10  ;;  %5015 = vmatpush.msra.mxu2 %v4995_v59 }
0x14c6   : > { %10114 = vpow2.f32 %v4918_v53 }
0x14cc   : > { %v10115_v54 = vpop.eup %10114 }
0x14cd   : > { %v4928_v33 = vsel %vm879_vm14, %v10115_v54, 0.0 }
0x14ce   : > { %4929 = vadd.xlane.f32.xlu1 %v4928_v33 }
0x1501   : > { %v4909_v49 = vpop.xlane.xlu1 %4908 }
0x1502   : > { %v4913_v1 = vsub.f32 %v4897_v4, %v4909_v49 }
0x1504   : > { %v4920_v44 = vmul.f32 1.442695, %v4913_v1 }
0x1506   : > { %10116 = vpow2.f32 %v4920_v44 }
0x1509   : > { %v4924_v25 = vpop.xlane.xlu1 %4923 }
0x150a   : > { %10118 = vrcp.f32 %v4924_v25 }
0x150c   : > { %v10117_v27 = vpop.eup %10116 }
0x150d   : > { %v4931_v36 = vsel %vm879_vm14, %v10117_v27, 0.0 }
0x150e   : > { %4932 = vadd.xlane.f32.xlu1 %v4931_v36 }
0x1510   : > { %v10119_v16 = vpop.eup %10118 }
0x1511   : > { %v4938_v21 = vmul.f32 %v10119_v16, %v10111_v24 }
0x1513   : > { %8203 = vmatmul.msk.f32.vlgmr.msrb.gmra.mxu3 %vm879_vm14, %v4938_v21 }
0x1527   : > { %9965 = vrot.lane.b32.xlu1 %v9964_v23, %s13327_s27 }
0x1530   : > { %v4927_v7 = vpop.xlane.xlu1 %4926 }
0x1531   : > { %10120 = vrcp.f32 %v4927_v7 }
0x1537   : > { %v10121_v39 = vpop.eup %10120 }
0x1538   : > { %v4939_v14 = vmul.f32 %v10121_v39, %v10113_v2 }
0x153a   : > { %8204 = vmatmul.msk.f32.vlgmr.msra.gmra.mxu0 %vm879_vm14, %v4939_v14 }
0x1541   : > { %v4930_v52 = vpop.xlane.xlu1 %4929 }
0x1542   : > { %10122 = vrcp.f32 %v4930_v52 }
0x1548   : > { %v10123_v20 = vpop.eup %10122 }
0x1549   : > { %v4940_v18 = vmul.f32 %v10123_v20, %v10115_v54 }
0x154b   : > { %8205 = vmatmul.msk.f32.vlgmr.msra.gmra.mxu2 %vm879_vm14, %v4940_v18 }
0x1581   : > { %v4933_v28 = vpop.xlane.xlu1 %4932 }
0x1582   : > { %10124 = vrcp.f32 %v4933_v28 }
0x1588   : > { %v10125_v26 = vpop.eup %10124 }
0x1589   : > { %v4941_v42 = vmul.f32 %v10125_v26, %v10117_v27 }
0x158b   : > { %8206 = vmatmul.msk.f32.vlgmr.msrb.gmra.mxu1 %vm879_vm14, %v4941_v42 }
0x1596   : > { %v4965_v58 = vpop.f32.mrf.mxu3 }
0x1597   : > { %5082 = vrot.lane.b32.xlu2 %v4965_v58, %s13330_s29 }
0x1599   : > { %v9966_v17 = vpop.permute.xlu1 %9965 }
0x159a   : > { %v9968_v23 = vunpack.i.h.bf16 %v9966_v17  ;;  %v9967_v60 = vunpack.i.l.bf16 %v9966_v17 }
0x159c   : > { %5150 = vmatpush.msra.mxu3 %v9967_v60  ;;  %v8235_v60 = vld [vmem:[%s13264_s8 + $0x1c0] sm:$0xff] }
0x159e   : > { %5151 = vmatpush.msra.mxu3 %v9968_v23 }
0x159f   : > { %5068 = vrot.lane.b32.xlu2 %v11847_v12, %s13329_s28  ;;  %v5051_v12 = vpop.permute.xlu0 %5050 }
0x15a0   : > { %5152 = vmatpush.msra.mxu3 %v9972_v47  ;;  %v5094_v37 = vsel %vm879_vm14, %v11748_v63, %v5051_v12  ;;  %v5350_v47 = vunpack.c.l.bf16 %v8235_v60  ;;  %v8227_v12 = vld [vmem:[%s13264_s8 + $0x180] sm:$0xff] }
0x15a2   : > { %5153 = vmatpush.msra.mxu3 %v9973_v8  ;;  %v5351_v8 = vunpack.c.h.bf16 %v8235_v60  ;;  %5940 = vmatpush.msrb.mxu0 %v5350_v47 }
0x15a4   : > { %5969 = vmatpush.msrb.mxu2 %v5351_v8 }
0x15a7   : > { %5070 = vrot.lane.b32.xlu2 %v11852_v0, %s13329_s28  ;;  %v5067_v0 = vpop.permute.xlu0 %5066 }
0x15a8   : > { %v5098_v31 = vsel %vm772_vm8, %v5094_v37, %v5067_v0  ;;  %v8228_v0 = vld [vmem:[%s13264_s8 + $0x188] sm:$0xff]  ;;  %v5334_v37 = vunpack.c.l.bf16 %v8227_v12 }
0x15aa   : > { %5941 = vmatpush.msrb.mxu0 %v5334_v37 }
0x15af   : > { %5072 = vrot.lane.b32.xlu2 %v4775_v46, %s13329_s28  ;;  %v5053_v40 = vpop.permute.xlu0 %5052 }
0x15b0   : > { %v5095_v46 = vsel %vm879_vm14, %v11722_v41, %v5053_v40  ;;  %v8220_v40 = vld [vmem:[%s13264_s8 + $0x148] sm:$0xff] }
0x15b7   : > { %v4991_v34 = vpop.f32.mrf.mxu0  ;;  %v5055_v50 = vpop.permute.xlu0 %5054 }
0x15b8   : > { %5084 = vrot.lane.b32.xlu1 %v4991_v34, %s13330_s29  ;;  %v5096_v4 = vsel %vm879_vm14, %v11751_v48, %v5055_v50  ;;  %v5352_v34 = vunpack.c.l.bf16 %v8236_v30  ;;  %v8212_v50 = vld [vmem:[%s13264_s8 + $0x108] sm:$0xff] }
0x15ba   : > { %5998 = vmatpush.msra.mxu1 %v5352_v34 }
0x15bf   : > { %v5057_v41 = vpop.permute.xlu0 %5056 }
0x15c0   : > { %v5097_v15 = vsel %vm879_vm14, %v11726_v61, %v5057_v41 }
0x15c7   : > { %v5124_v29 = vpop.permute.xlu0 %5123 }
0x15ce   : > { %v5017_v32 = vpop.f32.mrf.mxu2 }
0x15cf   : > { %5086 = vrot.lane.b32.xlu1 %v5017_v32, %s13330_s29  ;;  %v5353_v32 = vunpack.c.h.bf16 %v8236_v30 }
0x15d1   : > { %6027 = vmatpush.msrb.mxu3 %v5353_v32 }
0x15f1   : > { %v5083_v38 = vpop.permute.xlu2 %5082 }
0x15f2   : > { %v5102_v11 = vsel %vm2003_vm1, %v5098_v31, %v5083_v38  ;;  %v5335_v31 = vunpack.c.h.bf16 %v8227_v12  ;;  %v5336_v38 = vunpack.c.l.bf16 %v8228_v0 }
0x15f3   : > { %8207 = vmatmul.msk.f32.vlgmr.msra.gmra.mxu3 %vm717_vm3, %v5102_v11  ;;  %v5337_v11 = vunpack.c.h.bf16 %v8228_v0 }
0x15f4   : > { %5970 = vmatpush.msrb.mxu2 %v5335_v31  ;;  %5999 = vmatpush.msra.mxu1 %v5336_v38  ;;  %v8238_v31 = vld [vmem:[%s13264_s8 + $0x1d8] sm:$0xff] }
0x15f5   : > { %6028 = vmatpush.msrb.mxu3 %v5337_v11 }
0x15f9   : > { %v5069_v55 = vpop.permute.xlu2 %5068 }
0x15fa   : > { %v5099_v19 = vsel %vm772_vm8, %v5095_v46, %v5069_v55 }
0x1601   : > { %v5071_v45 = vpop.permute.xlu2 %5070 }
0x1602   : > { %v5100_v13 = vsel %vm772_vm8, %v5096_v4, %v5071_v45 }
0x1608   : > { %v5043_v5 = vpop.f32.mrf.mxu1 }
0x1609   : > { %5088 = vrot.lane.b32.xlu1 %v5043_v5, %s13330_s29  ;;  %v5073_v2 = vpop.permute.xlu2 %5072  ;;  %v8219_v5 = vld [vmem:[%s13264_s8 + $0x140] sm:$0xff] }
0x160a   : > { %v5101_v10 = vsel %vm772_vm8, %v5097_v15, %v5073_v2  ;;  %v5318_v55 = vunpack.c.l.bf16 %v8219_v5  ;;  %v5319_v46 = vunpack.c.h.bf16 %v8219_v5  ;;  %v5356_v5 = vunpack.c.l.bf16 %v8238_v31 }
0x160c   : > { %5942 = vmatpush.msrb.mxu0 %v5318_v55  ;;  %5971 = vmatpush.msrb.mxu2 %v5319_v46  ;;  %v8229_v55 = vld [vmem:[%s13264_s8 + $0x190] sm:$0xff]  ;;  %v8230_v46 = vld [vmem:[%s13264_s8 + $0x198] sm:$0xff] }
0x162a   : > { %v5085_v62 = vpop.permute.xlu1 %5084 }
0x162b   : > { %v5103_v63 = vsel %vm2003_vm1, %v5099_v19, %v5085_v62  ;;  %v5320_v19 = vunpack.c.l.bf16 %v8220_v40  ;;  %v5321_v62 = vunpack.c.h.bf16 %v8220_v40  ;;  %v5357_v40 = vunpack.c.h.bf16 %v8238_v31  ;;  %v8241_v31 = vld [vmem:[%s13264_s8 + $0x1f0] sm:$0xff] }
0x162c   : > { %8208 = vmatmul.msk.f32.gmra.mxu3 %vm717_vm3, %v5103_v63  ;;  %v8211_v63 = vld [vmem:[%s13264_s8 + $0x100] sm:$0xff] }
0x162d   : > { %v5302_v45 = vunpack.c.l.bf16 %v8211_v63  ;;  %v5303_v4 = vunpack.c.h.bf16 %v8211_v63  ;;  %6000 = vmatpush.msra.mxu1 %v5320_v19  ;;  %6029 = vmatpush.msrb.mxu3 %v5321_v62  ;;  %v8221_v19 = vld [vmem:[%s13264_s8 + $0x150] sm:$0xff]  ;;  %v5338_v62 = vunpack.c.l.bf16 %v8229_v55  ;;  %v5339_v63 = vunpack.c.h.bf16 %v8229_v55 }
0x162f   : > { %5943 = vmatpush.msrb.mxu0 %v5302_v45  ;;  %5972 = vmatpush.msrb.mxu2 %v5303_v4  ;;  %v5341_v45 = vunpack.c.h.bf16 %v8230_v46  ;;  %v8222_v4 = vld [vmem:[%s13264_s8 + $0x158] sm:$0xff] }
0x1641   : > { %v5087_v24 = vpop.permute.xlu1 %5086 }
0x1642   : > { %v5104_v51 = vsel %vm2003_vm1, %v5100_v13, %v5087_v24  ;;  %v5304_v13 = vunpack.c.l.bf16 %v8212_v50  ;;  %v5305_v24 = vunpack.c.h.bf16 %v8212_v50  ;;  %v5340_v50 = vunpack.c.l.bf16 %v8230_v46  ;;  %v8233_v46 = vld [vmem:[%s13264_s8 + $0x1b0] sm:$0xff] }
0x1643   : > { %8209 = vmatmul.msk.f32.gmra.mxu3 %vm717_vm3, %v5104_v51 }
0x1644   : > { %6001 = vmatpush.msra.mxu1 %v5304_v13  ;;  %6030 = vmatpush.msrb.mxu3 %v5305_v24  ;;  %v8213_v13 = vld [vmem:[%s13264_s8 + $0x110] sm:$0xff]  ;;  %v8214_v24 = vld [vmem:[%s13264_s8 + $0x118] sm:$0xff] }
0x1646   : > { %6114 = vmatpush.msrb.mxu1 %v5356_v5  ;;  %6143 = vmatpush.msra.mxu3 %v5357_v40  ;;  %v5363_v5 = vunpack.c.h.bf16 %v8241_v31 }
0x1648   : > { %6115 = vmatpush.msrb.mxu1 %v5340_v50  ;;  %6144 = vmatpush.msra.mxu3 %v5341_v45 }
0x1676   : > { %v5155_v6 = vpop.f32.mrf.mxu3 }
0x1677   : > { %v5156_v35 = vadd.f32 %v5155_v6, %v5124_v29 }
0x1679   : > { %v5167_v57 = vadd.f32 %v5156_v35, %v11602_v22 }
0x167b   : > { %v5089_v48 = vpop.permute.xlu1 %5088  ;;  %v5171_v59 = vsel %vm717_vm3, %v5167_v57, 0.0 }
0x167c   : > { %v5105_v53 = vsel %vm2003_vm1, %v5101_v10, %v5089_v48  ;;  %5172 = vadd.xlane.f32.xlu2 %v5171_v59 }
0x167d   : > { %8210 = vmatmul.msk.f32.gmra.mxu3 %vm717_vm3, %v5105_v53 }
0x16af   : > { %v5158_v54 = vpop.f32.mrf.mxu3 }
0x16b0   : > { %v5159_v33 = vadd.f32 %v5158_v54, %v5124_v29 }
0x16b2   : > { %v5168_v49 = vadd.f32 %v5159_v33, %v11607_v9  ;;  %v10148_v33 = vld [vmem:[%s13263_s7 + $0x8] sm:$0xff] }
0x16b4   : > { %v5174_v1 = vsel %vm717_vm3, %v5168_v49, 0.0 }
0x16b5   : > { %5175 = vadd.xlane.f32.xlu1 %v5174_v1 }
0x16c6   : > { %v5161_v22 = vpop.f32.mrf.mxu3 }
0x16c7   : > { %v5162_v44 = vadd.f32 %v5161_v22, %v5124_v29 }
0x16c9   : > { %v5169_v61 = vadd.f32 %v5162_v44, %v11612_v43  ;;  %v11980_v44 = vperm.slane %v10148_v33, 2 }
0x16cb   : > { %v5177_v25 = vsel %vm717_vm3, %v5169_v61, 0.0 }
0x16cc   : > { %5178 = vadd.xlane.f32.xlu0 %v5177_v25 }
0x16ef   : > { %v5173_v27 = vpop.xlane.xlu2 %5172 }
0x16f0   : > { %v5183_v36 = vmul.f32 %v5173_v27, %v13316_v56 }
0x16f2   : > { %v11921_v16 = vsub.f32 %v5167_v57, %v5183_v36 }
0x16f4   : > { %v5191_v21 = vmul.f32 %v11921_v16, %v11921_v16 }
0x16f6   : > { %v5195_v9 = vsel %vm717_vm3, %v5191_v21, 0.0 }
0x16f7   : > { %5196 = vadd.xlane.f32.xlu1 %v5195_v9 }
0x1700   : > { %v5164_v7 = vpop.f32.mrf.mxu3 }
0x1701   : > { %v5165_v39 = vadd.f32 %v5164_v7, %v5124_v29 }
0x1703   : > { %v11927_v14 = vadd.f32 %v5165_v39, %v11617_v3 }
0x1705   : > { %v5180_v43 = vsel %vm717_vm3, %v11927_v14, 0.0 }
0x1706   : > { %5181 = vadd.xlane.f32.xlu2 %v5180_v43 }
0x1728   : > { %v5176_v52 = vpop.xlane.xlu1 %5175 }
0x1729   : > { %v5184_v20 = vmul.f32 %v5176_v52, %v13316_v56 }
0x172b   : > { %v11932_v18 = vsub.f32 %v5168_v49, %v5184_v20  ;;  %v11977_v49 = vperm.slane %v10148_v33, 1 }
0x172d   : > { %v5192_v28 = vmul.f32 %v11932_v18, %v11932_v18 }
0x172f   : > { %v5198_v26 = vsel %vm717_vm3, %v5192_v28, 0.0 }
0x1730   : > { %5199 = vadd.xlane.f32.xlu0 %v5198_v26 }
0x173f   : > { %v5179_v42 = vpop.xlane.xlu0 %5178 }
0x1740   : > { %v5185_v58 = vmul.f32 %v5179_v42, %v13316_v56 }
0x1742   : > { %v11938_v3 = vsub.f32 %v5169_v61, %v5185_v58 }
0x1744   : > { %v5193_v17 = vmul.f32 %v11938_v3, %v11938_v3 }
0x1746   : > { %v5201_v23 = vsel %vm717_vm3, %v5193_v17, 0.0 }
0x1747   : > { %5202 = vadd.xlane.f32.xlu2 %v5201_v23 }
0x176a   : > { %v5197_v51 = vpop.xlane.xlu1 %5196 }
0x176b   : > { %v5207_v41 = vmul.f32 %v5197_v51, %v13316_v56 }
0x176d   : > { %v5211_v29 = vadd.f32 1e-05, %v5207_v41  ;;  %v5322_v41 = vunpack.c.l.bf16 %v8221_v19 }
0x176f   : > { %10126 = vrsqrt.f32 %v5211_v29  ;;  %vm5221_vm15 = vweird.f32 %v5211_v29 }
0x1775   : > { %v10127_v6 = vpop.eup %10126 }
0x1776   : > { %v5216_v35 = vmul.f32 %v10127_v6, %v5211_v29  ;;  %vm5222_vm14 = vweird.f32 %v10127_v6  ;;  %v5323_v29 = vunpack.c.h.bf16 %v8221_v19  ;;  %v8234_v19 = vld [vmem:[%s13264_s8 + $0x1b8] sm:$0xff] }
0x1777   : > { %vm5223_vm1 = vmor %vm5221_vm15, %vm5222_vm14  ;;  %v5348_v50 = vunpack.c.l.bf16 %v8234_v19  ;;  %v5349_v45 = vunpack.c.h.bf16 %v8234_v19 }
0x1778   : > { %v5217_v2 = vmul.f32 %v10127_v6, %v5216_v35  ;;  %v5325_v35 = vunpack.c.h.bf16 %v8222_v4 }
0x1779   : > { %v5182_v57 = vpop.xlane.xlu2 %5181 }
0x177a   : > { %v5218_v15 = vmul.f32 0.5, %v5217_v2  ;;  %v5186_v10 = vmul.f32 %v5182_v57, %v13316_v56  ;;  %v5306_v57 = vunpack.c.l.bf16 %v8213_v13  ;;  %6145 = vmatpush.msra.mxu3 %v5325_v35  ;;  %v8218_v35 = vld [vmem:[%s13264_s8 + $0x138] sm:$0xff] }
0x177c   : > { %v5219_v48 = vsub.f32 1.5, %v5218_v15  ;;  %v11970_v59 = vsub.f32 %v11927_v14, %v5186_v10  ;;  %v5307_v15 = vunpack.c.h.bf16 %v8213_v13  ;;  %v5308_v10 = vunpack.c.l.bf16 %v8214_v24  ;;  %v8226_v13 = vld [vmem:[%s13264_s8 + $0x178] sm:$0xff] }
0x177e   : > { %v5220_v53 = vmul.f32 %v10127_v6, %v5219_v48  ;;  %v5194_v54 = vmul.f32 %v11970_v59, %v11970_v59  ;;  %v5309_v48 = vunpack.c.h.bf16 %v8214_v24 }
0x1780   : > { %v5224_v1 = vsel %vm5223_vm1, %v10127_v6, %v5220_v53  ;;  %v5204_v22 = vsel %vm717_vm3, %v5194_v54, 0.0  ;;  %v5324_v6 = vunpack.c.l.bf16 %v8222_v4  ;;  %6146 = vmatpush.msra.mxu3 %v5309_v48  ;;  %v8225_v4 = vld [vmem:[%s13264_s8 + $0x170] sm:$0xff]  ;;  %v9764_v48 = vld [vmem:[%s13266_s10 + $0x438] sm:$0xff]  }
0x1781   : > { %v5255_v61 = vmul.f32 %v5224_v1, %v11921_v16  ;;  %5205 = vadd.xlane.f32.xlu1 %v5204_v22  ;;  %v5330_v24 = vunpack.c.l.bf16 %v8225_v4 }
0x1782   : > { %6116 = vmatpush.msrb.mxu1 %v5324_v6  ;;  %v8217_v6 = vld [vmem:[%s13264_s8 + $0x130] sm:$0xff] }
0x1783   : > { %v5260_v25 = vmul.f32 %v11977_v49, %v5255_v61 }
0x1784   : > { %6117 = vmatpush.msrb.mxu1 %v5308_v10  ;;  %v5317_v10 = vunpack.c.h.bf16 %v8218_v35 }
0x1785   : > { %v11985_v27 = vadd.f32 %v11980_v44, %v5260_v25 }
0x1787   : > { %8501 = vmatmul.msk.f32.vlgmr.msrb.gmra.mxu0 %vm717_vm3, %v11985_v27  ;;  %8505 = vmatmul.msk.f32.vlgmr.msrb.gmra.mxu2 %vm717_vm3, %v11985_v27 }
0x1788   : > { %8509 = vmatmul.msk.f32.vlgmr.msra.gmra.mxu1 %vm717_vm3, %v11985_v27  ;;  %8513 = vmatmul.msk.f32.vlgmr.msrb.gmra.mxu3 %vm717_vm3, %v11985_v27 }
0x17a3   : > { %v5200_v36 = vpop.xlane.xlu0 %5199 }
0x17a4   : > { %v5208_v16 = vmul.f32 %v5200_v36, %v13316_v56 }
0x17a6   : > { %v5212_v21 = vadd.f32 1e-05, %v5208_v16 }
0x17a8   : > { %10128 = vrsqrt.f32 %v5212_v21  ;;  %vm5231_vm7 = vweird.f32 %v5212_v21 }
0x17ae   : > { %v10129_v9 = vpop.eup %10128 }
0x17af   : > { %v5226_v7 = vmul.f32 %v10129_v9, %v5212_v21  ;;  %vm5232_vm6 = vweird.f32 %v10129_v9 }
0x17b0   : > { %vm5233_vm9 = vmor %vm5231_vm7, %vm5232_vm6 }
0x17b1   : > { %v5227_v39 = vmul.f32 %v10129_v9, %v5226_v7  ;;  %v8239_v7 = vld [vmem:[%s13264_s8 + $0x1e0] sm:$0xff] }
0x17b3   : > { %v5228_v14 = vmul.f32 0.5, %v5227_v39  ;;  %v8240_v39 = vld [vmem:[%s13264_s8 + $0x1e8] sm:$0xff] }
0x17b5   : > { %v5229_v43 = vsub.f32 1.5, %v5228_v14  ;;  %v5359_v14 = vunpack.c.h.bf16 %v8239_v7 }
0x17b7   : > { %v5230_v52 = vmul.f32 %v10129_v9, %v5229_v43  ;;  %v5361_v43 = vunpack.c.h.bf16 %v8240_v39 }
0x17b9   : > { %v5234_v20 = vsel %vm5233_vm9, %v10129_v9, %v5230_v52  ;;  %v8232_v52 = vld [vmem:[%s13264_s8 + $0x1a8] sm:$0xff]  ;;  %6259 = vmatpush.msrb.mxu3 %v5361_v43 }
0x17ba   : > { %v5256_v28 = vmul.f32 %v5234_v20, %v11932_v18  ;;  %v5203_v26 = vpop.xlane.xlu2 %5202  ;;  %v8223_v20 = vld [vmem:[%s13264_s8 + $0x160] sm:$0xff] }
0x17bb   : > { %v5209_v42 = vmul.f32 %v5203_v26, %v13316_v56 }
0x17bc   : > { %v5261_v58 = vmul.f32 %v11977_v49, %v5256_v28 }
0x17bd   : > { %v5213_v17 = vadd.f32 1e-05, %v5209_v42  ;;  %v5344_v42 = vunpack.c.l.bf16 %v8232_v52 }
0x17be   : > { %v12000_v23 = vadd.f32 %v11980_v44, %v5261_v58  ;;  %v5345_v58 = vunpack.c.h.bf16 %v8232_v52 }
0x17bf   : > { %10130 = vrsqrt.f32 %v5213_v17  ;;  %vm5241_vm11 = vweird.f32 %v5213_v17 }
0x17c0   : > { %8502 = vmatmul.msk.f32.gmra.mxu0 %vm717_vm3, %v12000_v23  ;;  %8506 = vmatmul.msk.f32.gmra.mxu2 %vm717_vm3, %v12000_v23 }
0x17c1   : > { %8510 = vmatmul.msk.f32.gmra.mxu1 %vm717_vm3, %v12000_v23  ;;  %8514 = vmatmul.msk.f32.gmra.mxu3 %vm717_vm3, %v12000_v23 }
0x17c2   : > { %6260 = vmatpush.msrb.mxu3 %v5345_v58 }
0x17c5   : > { %v10131_v18 = vpop.eup %10130 }
0x17c6   : > { %v5236_v60 = vmul.f32 %v10131_v18, %v5213_v17  ;;  %vm5242_vm10 = vweird.f32 %v10131_v18  ;;  %v8224_v17 = vld [vmem:[%s13264_s8 + $0x168] sm:$0xff] }
0x17c7   : > { %vm5243_vm12 = vmor %vm5241_vm11, %vm5242_vm10 }
0x17c8   : > { %v5237_v30 = vmul.f32 %v10131_v18, %v5236_v60  ;;  %v5327_v60 = vunpack.c.h.bf16 %v8223_v20 }
0x17ca   : > { %v5238_v47 = vmul.f32 0.5, %v5237_v30  ;;  %v5328_v30 = vunpack.c.l.bf16 %v8224_v17 }
0x17cc   : > { %v5239_v8 = vsub.f32 1.5, %v5238_v47  ;;  %v5329_v47 = vunpack.c.h.bf16 %v8224_v17  ;;  %v9778_v17 = vld [vmem:[%s13266_s10 + $0x4a8] sm:$0xff]  }
0x17ce   : > { %v5240_v34 = vmul.f32 %v10131_v18, %v5239_v8  ;;  %v8215_v8 = vld [vmem:[%s13264_s8 + $0x120] sm:$0xff]  ;;  %6261 = vmatpush.msrb.mxu3 %v5329_v47 }
0x17d0   : > { %v5244_v32 = vsel %vm5243_vm12, %v10131_v18, %v5240_v34  ;;  %v5326_v18 = vunpack.c.l.bf16 %v8223_v20  ;;  %v8216_v34 = vld [vmem:[%s13264_s8 + $0x128] sm:$0xff] }
0x17d1   : > { %v5257_v12 = vmul.f32 %v5244_v32, %v11938_v3  ;;  %v8237_v3 = vld [vmem:[%s13264_s8 + $0x1d0] sm:$0xff]  ;;  %v5310_v32 = vunpack.c.l.bf16 %v8215_v8 }
0x17d2   : > { %v5354_v38 = vunpack.c.l.bf16 %v8237_v3  ;;  %v5355_v11 = vunpack.c.h.bf16 %v8237_v3  ;;  %v5313_v3 = vunpack.c.h.bf16 %v8216_v34 }
0x17d3   : > { %v5262_v0 = vmul.f32 %v11977_v49, %v5257_v12  ;;  %v5311_v12 = vunpack.c.h.bf16 %v8215_v8 }
0x17d4   : > { %6056 = vmatpush.msra.mxu0 %v5354_v38  ;;  %6085 = vmatpush.msra.mxu2 %v5355_v11  ;;  %v8242_v38 = vld [vmem:[%s13264_s8 + $0x1f8] sm:$0xff]  ;;  %v5362_v11 = vunpack.c.l.bf16 %v8241_v31 }
0x17d5   : > { %v12013_v37 = vadd.f32 %v11980_v44, %v5262_v0  ;;  %v5312_v0 = vunpack.c.l.bf16 %v8216_v34  ;;  %6262 = vmatpush.msrb.mxu3 %v5313_v3  ;;  %v5364_v40 = vunpack.c.l.bf16 %v8242_v38  ;;  %v5365_v55 = vunpack.c.h.bf16 %v8242_v38  ;;  %v9777_v38 = vld [vmem:[%s13266_s10 + $0x4a0] sm:$0xff]  }
0x17d6   : > { %6057 = vmatpush.msra.mxu0 %v5338_v62  ;;  %6086 = vmatpush.msra.mxu2 %v5339_v63  ;;  %v5346_v62 = vunpack.c.l.bf16 %v8233_v46  ;;  %v5347_v63 = vunpack.c.h.bf16 %v8233_v46  ;;  %v9205_v34 = vunpack.c.h.bf16 %v9778_v17  ;;  %v9201_v19 = vunpack.c.h.bf16 %v9777_v38 }
0x17d7   : > { %8503 = vmatmul.msk.f32.gmra.mxu0 %vm717_vm3, %v12013_v37  ;;  %8507 = vmatmul.msk.f32.gmra.mxu2 %vm717_vm3, %v12013_v37 }
0x17d8   : > { %8511 = vmatmul.msk.f32.gmra.mxu1 %vm717_vm3, %v12013_v37  ;;  %8515 = vmatmul.msk.f32.gmra.mxu3 %vm717_vm3, %v12013_v37 }
0x17d9   : > { %6058 = vmatpush.msra.mxu0 %v5322_v41  ;;  %6087 = vmatpush.msra.mxu2 %v5323_v29  ;;  %v5332_v41 = vunpack.c.l.bf16 %v8226_v13  ;;  %v5333_v29 = vunpack.c.h.bf16 %v8226_v13  ;;  %v9760_v13 = vld [vmem:[%s13266_s10 + $0x418] sm:$0xff]  }
0x17db   : > { %6059 = vmatpush.msra.mxu0 %v5306_v57  ;;  %6088 = vmatpush.msra.mxu2 %v5307_v15  ;;  %v5315_v57 = vunpack.c.h.bf16 %v8217_v6  ;;  %v5316_v15 = vunpack.c.l.bf16 %v8218_v35 }
0x17dd   : > { %6201 = vmatpush.msrb.mxu2 %v5359_v14  ;;  %v9779_v14 = vld [vmem:[%s13266_s10 + $0x4b0] sm:$0xff]  }
0x17de   : > { %v9209_v52 = vunpack.c.h.bf16 %v9779_v14 }
0x17f4   : > { %v5206_v51 = vpop.xlane.xlu1 %5205 }
0x17f5   : > { %v5210_v2 = vmul.f32 %v5206_v51, %v13316_v56  ;;  %v5331_v51 = vunpack.c.h.bf16 %v8225_v4 }
0x17f7   : > { %v5214_v53 = vadd.f32 1e-05, %v5210_v2  ;;  %v5314_v2 = vunpack.c.l.bf16 %v8217_v6 }
0x17f9   : > { %10132 = vrsqrt.f32 %v5214_v53  ;;  %vm5251_vm4 = vweird.f32 %v5214_v53 }
0x17ff   : > { %v10133_v54 = vpop.eup %10132 }
0x1800   : > { %v5246_v33 = vmul.f32 %v10133_v54, %v5214_v53  ;;  %vm5252_vm13 = vweird.f32 %v10133_v54  ;;  %v9772_v53 = vld [vmem:[%s13266_s10 + $0x478] sm:$0xff]  }
0x1801   : > { %vm5253_vm14 = vmor %vm5251_vm4, %vm5252_vm13 }
0x1802   : > { %v5247_v1 = vmul.f32 %v10133_v54, %v5246_v33  ;;  %v9149_v33 = vunpack.c.h.bf16 %v9764_v48 }
0x1804   : > { %v5248_v22 = vmul.f32 0.5, %v5247_v1  ;;  %v9181_v1 = vunpack.c.h.bf16 %v9772_v53 }
0x1806   : > { %v5249_v61 = vsub.f32 1.5, %v5248_v22  ;;  %v9788_v22 = vld [vmem:[%s13266_s10 + $0x4f8] sm:$0xff]  }
0x1808   : > { %v5250_v25 = vmul.f32 %v10133_v54, %v5249_v61 }
0x180a   : > { %v5254_v36 = vsel %vm5253_vm14, %v10133_v54, %v5250_v25  ;;  %v9780_v54 = vld [vmem:[%s13266_s10 + $0x4b8] sm:$0xff]   ;;  %v9245_v25 = vunpack.c.h.bf16 %v9788_v22 }
0x180b   : > { %v5258_v16 = vmul.f32 %v5254_v36, %v11970_v59  ;;  %v5358_v59 = vunpack.c.l.bf16 %v8239_v7  ;;  %v9213_v61 = vunpack.c.h.bf16 %v9780_v54  ;;  %v9148_v36 = vunpack.c.l.bf16 %v9764_v48 }
0x180c   : > { %v9244_v7 = vunpack.c.l.bf16 %v9788_v22 }
0x180d   : > { %v5263_v21 = vmul.f32 %v11977_v49, %v5258_v16  ;;  %v5360_v49 = vunpack.c.l.bf16 %v8240_v39  ;;  %6172 = vmatpush.msrb.mxu0 %v5358_v59  ;;  %v9180_v16 = vunpack.c.l.bf16 %v9772_v53  ;;  %v9763_v39 = vld [vmem:[%s13266_s10 + $0x430] sm:$0xff]  }
0x180e   : > { %v9771_v59 = vld [vmem:[%s13266_s10 + $0x470] sm:$0xff]   ;;  %v9145_v43 = vunpack.c.h.bf16 %v9763_v39 }
0x180f   : > { %v12051_v9 = vadd.f32 %v11980_v44, %v5263_v21  ;;  %v8231_v44 = vld [vmem:[%s13264_s8 + $0x1a0] sm:$0xff]  ;;  %6230 = vmatpush.msra.mxu1 %v5360_v49  ;;  %v9212_v21 = vunpack.c.l.bf16 %v9780_v54  ;;  %v9787_v49 = vld [vmem:[%s13266_s10 + $0x4f0] sm:$0xff]   ;;  %v9176_v58 = vunpack.c.l.bf16 %v9771_v59 }
0x1810   : > { %v5342_v28 = vunpack.c.l.bf16 %v8231_v44  ;;  %v5343_v26 = vunpack.c.h.bf16 %v8231_v44  ;;  %v9177_v44 = vunpack.c.h.bf16 %v9771_v59  ;;  %v9241_v20 = vunpack.c.h.bf16 %v9787_v49  ;;  %v9775_v53 = vld [vmem:[%s13266_s10 + $0x490] sm:$0xff]   ;;  %v9774_v59 = vld [vmem:[%s13266_s10 + $0x488] sm:$0xff]  }
0x1811   : > { %8504 = vmatmul.msk.f32.gmra.mxu0 %vm717_vm3, %v12051_v9  ;;  %8508 = vmatmul.msk.f32.gmra.mxu2 %vm717_vm3, %v12051_v9  ;;  %v9783_v54 = vld [vmem:[%s13266_s10 + $0x4d0] sm:$0xff]  }
0x1812   : > { %8512 = vmatmul.msk.f32.gmra.mxu1 %vm717_vm3, %v12051_v9  ;;  %8516 = vmatmul.msk.f32.gmra.mxu3 %vm717_vm3, %v12051_v9 }
0x1813   : > { %6173 = vmatpush.msrb.mxu0 %v5342_v28  ;;  %6202 = vmatpush.msrb.mxu2 %v5343_v26  ;;  %v9762_v28 = vld [vmem:[%s13266_s10 + $0x428] sm:$0xff]  }
0x1814   : > { %6231 = vmatpush.msra.mxu1 %v5344_v42  ;;  %v9770_v26 = vld [vmem:[%s13266_s10 + $0x468] sm:$0xff]   ;;  %v9144_v42 = vunpack.c.l.bf16 %v9763_v39  ;;  %v9141_v47 = vunpack.c.h.bf16 %v9762_v28  ;;  %v9140_v3 = vunpack.c.l.bf16 %v9762_v28 }
0x1815   : > { %6174 = vmatpush.msrb.mxu0 %v5326_v18  ;;  %6203 = vmatpush.msrb.mxu2 %v5327_v60  ;;  %v9786_v18 = vld [vmem:[%s13266_s10 + $0x4e8] sm:$0xff]   ;;  %v9208_v60 = vunpack.c.l.bf16 %v9779_v14  ;;  %v9173_v8 = vunpack.c.h.bf16 %v9770_v26  ;;  %v9172_v31 = vunpack.c.l.bf16 %v9770_v26 }
0x1816   : > { %6232 = vmatpush.msra.mxu1 %v5328_v30  ;;  %v9240_v30 = vunpack.c.l.bf16 %v9787_v49  ;;  %v9782_v14 = vld [vmem:[%s13266_s10 + $0x4c8] sm:$0xff]   ;;  %v9192_v49 = vunpack.c.l.bf16 %v9775_v53 }
0x1817   : > { %6175 = vmatpush.msrb.mxu0 %v5310_v32  ;;  %6204 = vmatpush.msrb.mxu2 %v5311_v12  ;;  %v9237_v32 = vunpack.c.h.bf16 %v9786_v18  ;;  %v9761_v12 = vld [vmem:[%s13266_s10 + $0x420] sm:$0xff]   ;;  %v9221_v28 = vunpack.c.h.bf16 %v9782_v14 }
0x1818   : > { %6233 = vmatpush.msra.mxu1 %v5312_v0  ;;  %v9769_v0 = vld [vmem:[%s13266_s10 + $0x460] sm:$0xff]  }
0x1819   : > { %8517 = vmatmul.msk.f32.vlgmr.msra.gmra.mxu0 %vm717_vm3, %v11985_v27  ;;  %8521 = vmatmul.msk.f32.vlgmr.msra.gmra.mxu2 %vm717_vm3, %v11985_v27  ;;  %v9169_v46 = vunpack.c.h.bf16 %v9769_v0 }
0x181a   : > { %8525 = vmatmul.msk.f32.vlgmr.msrb.gmra.mxu1 %vm717_vm3, %v11985_v27  ;;  %8529 = vmatmul.msk.f32.vlgmr.msra.gmra.mxu3 %vm717_vm3, %v11985_v27 }
0x181b   : > { %6288 = vmatpush.msra.mxu0 %v5362_v11  ;;  %6317 = vmatpush.msra.mxu2 %v5363_v5  ;;  %v9785_v11 = vld [vmem:[%s13266_s10 + $0x4e0] sm:$0xff]   ;;  %v9204_v5 = vunpack.c.l.bf16 %v9778_v17  ;;  %v9220_v17 = vunpack.c.l.bf16 %v9782_v14 }
0x181c   : > { %6346 = vmatpush.msrb.mxu1 %v5364_v40  ;;  %6375 = vmatpush.msra.mxu3 %v5365_v55  ;;  %v9236_v40 = vunpack.c.l.bf16 %v9786_v18  ;;  %v9137_v55 = vunpack.c.h.bf16 %v9761_v12  ;;  %v9232_v4 = vunpack.c.l.bf16 %v9785_v11  ;;  %v9757_v18 = vld [vmem:[%s13266_s10 + $0x400] sm:$0xff]  }
0x181d   : > { %6289 = vmatpush.msra.mxu0 %v5346_v62  ;;  %6318 = vmatpush.msra.mxu2 %v5347_v63  ;;  %v9233_v62 = vunpack.c.h.bf16 %v9785_v11  ;;  %v9136_v63 = vunpack.c.l.bf16 %v9761_v12  ;;  %v9804_v11 = vld [vmem:[%s13266_s10 + $0x578] sm:$0xff]  }
0x181e   : > { %6347 = vmatpush.msrb.mxu1 %v5348_v50  ;;  %6376 = vmatpush.msra.mxu3 %v5349_v45  ;;  %v9168_v50 = vunpack.c.l.bf16 %v9769_v0  ;;  %v9200_v45 = vunpack.c.l.bf16 %v9777_v38  ;;  %v9796_v0 = vld [vmem:[%s13266_s10 + $0x538] sm:$0xff]  }
0x181f   : > { %6290 = vmatpush.msra.mxu0 %v5330_v24  ;;  %6319 = vmatpush.msra.mxu2 %v5331_v51  ;;  %v9768_v24 = vld [vmem:[%s13266_s10 + $0x458] sm:$0xff]  }
0x1820   : > { %6348 = vmatpush.msrb.mxu1 %v5332_v41  ;;  %6377 = vmatpush.msra.mxu3 %v5333_v29  ;;  %v9776_v51 = vld [vmem:[%s13266_s10 + $0x498] sm:$0xff]   ;;  %v9133_v29 = vunpack.c.h.bf16 %v9760_v13  ;;  %v9165_v6 = vunpack.c.h.bf16 %v9768_v24  ;;  %v9164_v48 = vunpack.c.l.bf16 %v9768_v24  ;;  %v9803_v24 = vld [vmem:[%s13266_s10 + $0x570] sm:$0xff]  }
0x1821   : > { %8518 = vmatmul.msk.f32.gmra.mxu0 %vm717_vm3, %v12000_v23  ;;  %8522 = vmatmul.msk.f32.gmra.mxu2 %vm717_vm3, %v12000_v23  ;;  %v9784_v41 = vld [vmem:[%s13266_s10 + $0x4d8] sm:$0xff]   ;;  %v9197_v35 = vunpack.c.h.bf16 %v9776_v51 }
0x1822   : > { %8526 = vmatmul.msk.f32.gmra.mxu1 %vm717_vm3, %v12000_v23  ;;  %8530 = vmatmul.msk.f32.gmra.mxu3 %vm717_vm3, %v12000_v23 }
0x1823   : > { %6291 = vmatpush.msra.mxu0 %v5314_v2  ;;  %6320 = vmatpush.msra.mxu2 %v5315_v57  ;;  %v9229_v2 = vunpack.c.h.bf16 %v9784_v41  ;;  %v9759_v57 = vld [vmem:[%s13266_s10 + $0x410] sm:$0xff]  }
0x1824   : > { %6349 = vmatpush.msrb.mxu1 %v5316_v15  ;;  %6378 = vmatpush.msra.mxu3 %v5317_v10  ;;  %v9767_v15 = vld [vmem:[%s13266_s10 + $0x450] sm:$0xff]   ;;  %v9132_v10 = vunpack.c.l.bf16 %v9760_v13  ;;  %v9129_v22 = vunpack.c.h.bf16 %v9759_v57 }
0x1825   : > { %v9160_v39 = vunpack.c.l.bf16 %v9767_v15 }
0x1829   : > { %8519 = vmatmul.msk.f32.gmra.mxu0 %vm717_vm3, %v12013_v37  ;;  %8523 = vmatmul.msk.f32.gmra.mxu2 %vm717_vm3, %v12013_v37 }
0x182a   : > { %8527 = vmatmul.msk.f32.gmra.mxu1 %vm717_vm3, %v12013_v37  ;;  %8531 = vmatmul.msk.f32.gmra.mxu3 %vm717_vm3, %v12013_v37 }
0x1831   : > { %8520 = vmatmul.msk.f32.gmra.mxu0 %vm717_vm3, %v12051_v9  ;;  %8524 = vmatmul.msk.f32.gmra.mxu2 %vm717_vm3, %v12051_v9 }
0x1832   : > { %8528 = vmatmul.msk.f32.gmra.mxu1 %vm717_vm3, %v12051_v9  ;;  %8532 = vmatmul.msk.f32.gmra.mxu3 %vm717_vm3, %v12051_v9 }
0x1839   : > { %8533 = vmatmul.msk.f32.vlgmr.msrb.gmra.mxu0 %vm717_vm3, %v11985_v27  ;;  %8537 = vmatmul.msk.f32.vlgmr.msrb.gmra.mxu2 %vm717_vm3, %v11985_v27 }
0x183a   : > { %8541 = vmatmul.msk.f32.vlgmr.msra.gmra.mxu1 %vm717_vm3, %v11985_v27  ;;  %8545 = vmatmul.msk.f32.vlgmr.msrb.gmra.mxu3 %vm717_vm3, %v11985_v27 }
0x183b   : > { %6457 = vmatpush.msrb.mxu0 %v9149_v33  ;;  %6486 = vmatpush.msrb.mxu2 %v9181_v1  ;;  %v9196_v33 = vunpack.c.l.bf16 %v9776_v51  ;;  %v9228_v1 = vunpack.c.l.bf16 %v9784_v41  ;;  %v9819_v51 = vld [vmem:[%s13266_s10 + $0x5f0] sm:$0xff]   ;;  %v9308_v41 = vunpack.c.l.bf16 %v9804_v11 }
0x183c   : > { %6515 = vmatpush.msra.mxu1 %v9213_v61  ;;  %6544 = vmatpush.msrb.mxu3 %v9245_v25  ;;  %v9161_v61 = vunpack.c.h.bf16 %v9767_v15  ;;  %v9193_v25 = vunpack.c.h.bf16 %v9775_v53  ;;  %v9794_v53 = vld [vmem:[%s13266_s10 + $0x528] sm:$0xff]  }
0x183d   : > { %6458 = vmatpush.msrb.mxu0 %v9148_v36  ;;  %6487 = vmatpush.msrb.mxu2 %v9180_v16  ;;  %v9225_v36 = vunpack.c.h.bf16 %v9783_v54  ;;  %v9758_v16 = vld [vmem:[%s13266_s10 + $0x408] sm:$0xff]  }
0x183e   : > { %6516 = vmatpush.msra.mxu1 %v9212_v21  ;;  %6545 = vmatpush.msrb.mxu3 %v9244_v7  ;;  %v9766_v21 = vld [vmem:[%s13266_s10 + $0x448] sm:$0xff]   ;;  %v9128_v7 = vunpack.c.l.bf16 %v9759_v57  ;;  %v9124_v26 = vunpack.c.l.bf16 %v9758_v16  ;;  %v9369_v57 = vunpack.c.h.bf16 %v9819_v51 }
0x183f   : > { %6459 = vmatpush.msrb.mxu0 %v9145_v43  ;;  %6488 = vmatpush.msrb.mxu2 %v9177_v44  ;;  %v9224_v43 = vunpack.c.l.bf16 %v9783_v54  ;;  %v9125_v44 = vunpack.c.h.bf16 %v9758_v16  ;;  %v9810_v54 = vld [vmem:[%s13266_s10 + $0x5a8] sm:$0xff]   ;;  %v9269_v16 = vunpack.c.h.bf16 %v9794_v53 }
0x1840   : > { %6517 = vmatpush.msra.mxu1 %v9209_v52  ;;  %6546 = vmatpush.msrb.mxu3 %v9241_v20  ;;  %v9157_v52 = vunpack.c.h.bf16 %v9766_v21  ;;  %v9189_v20 = vunpack.c.h.bf16 %v9774_v59 }
0x1841   : > { %8534 = vmatmul.msk.f32.gmra.mxu0 %vm717_vm3, %v12000_v23  ;;  %8538 = vmatmul.msk.f32.gmra.mxu2 %vm717_vm3, %v12000_v23 }
0x1842   : > { %8542 = vmatmul.msk.f32.gmra.mxu1 %vm717_vm3, %v12000_v23  ;;  %8546 = vmatmul.msk.f32.gmra.mxu3 %vm717_vm3, %v12000_v23 }
0x1843   : > { %6460 = vmatpush.msrb.mxu0 %v9144_v42  ;;  %6489 = vmatpush.msrb.mxu2 %v9176_v58  ;;  %v9156_v42 = vunpack.c.l.bf16 %v9766_v21  ;;  %v9188_v58 = vunpack.c.l.bf16 %v9774_v59  ;;  %v9333_v21 = vunpack.c.h.bf16 %v9810_v54  ;;  %v5974_v59 = vpop.f32.mrf.mxu2 }
0x1844   : > { %6518 = vmatpush.msra.mxu1 %v9208_v60  ;;  %6547 = vmatpush.msrb.mxu3 %v9240_v30  ;;  %v9765_v60 = vld [vmem:[%s13266_s10 + $0x440] sm:$0xff]  }
0x1845   : > { %6461 = vmatpush.msrb.mxu0 %v9141_v47  ;;  %6490 = vmatpush.msrb.mxu2 %v9173_v8  ;;  %v9773_v30 = vld [vmem:[%s13266_s10 + $0x480] sm:$0xff]   ;;  %v9121_v8 = vunpack.c.h.bf16 %v9757_v18  ;;  %v9152_v38 = vunpack.c.l.bf16 %v9765_v60 }
0x1846   : > { %6519 = vmatpush.msra.mxu1 %v9205_v34  ;;  %6548 = vmatpush.msrb.mxu3 %v9237_v32  ;;  %v9781_v47 = vld [vmem:[%s13266_s10 + $0x4c0] sm:$0xff]   ;;  %v9153_v34 = vunpack.c.h.bf16 %v9765_v60  ;;  %v9185_v32 = vunpack.c.h.bf16 %v9773_v30 }
0x1847   : > { %6462 = vmatpush.msrb.mxu0 %v9140_v3  ;;  %6491 = vmatpush.msrb.mxu2 %v9172_v31  ;;  %v9217_v12 = vunpack.c.h.bf16 %v9781_v47  ;;  %v9812_v3 = vld [vmem:[%s13266_s10 + $0x5b8] sm:$0xff]   ;;  %v9120_v31 = vunpack.c.l.bf16 %v9757_v18 }
0x1848   : > { %6520 = vmatpush.msra.mxu1 %v9204_v5  ;;  %6549 = vmatpush.msrb.mxu3 %v9236_v40  ;;  %v9820_v5 = vld [vmem:[%s13266_s10 + $0x5f8] sm:$0xff]   ;;  %v9184_v40 = vunpack.c.l.bf16 %v9773_v30  ;;  %v9340_v13 = vunpack.c.l.bf16 %v9812_v3 }
0x1849   : > { %8535 = vmatmul.msk.f32.gmra.mxu0 %vm717_vm3, %v12013_v37  ;;  %8539 = vmatmul.msk.f32.gmra.mxu2 %vm717_vm3, %v12013_v37 }
0x184a   : > { %8543 = vmatmul.msk.f32.gmra.mxu1 %vm717_vm3, %v12013_v37  ;;  %8547 = vmatmul.msk.f32.gmra.mxu3 %vm717_vm3, %v12013_v37 }
0x184b   : > { %6463 = vmatpush.msrb.mxu0 %v9137_v55  ;;  %6492 = vmatpush.msrb.mxu2 %v9169_v46  ;;  %v9216_v55 = vunpack.c.l.bf16 %v9781_v47  ;;  %v9277_v46 = vunpack.c.h.bf16 %v9796_v0 }
0x184c   : > { %6521 = vmatpush.msra.mxu1 %v9201_v19  ;;  %6550 = vmatpush.msrb.mxu3 %v9233_v62  ;;  %v9341_v19 = vunpack.c.h.bf16 %v9812_v3  ;;  %v9309_v62 = vunpack.c.h.bf16 %v9804_v11 }
0x184d   : > { %6464 = vmatpush.msrb.mxu0 %v9136_v63  ;;  %6493 = vmatpush.msrb.mxu2 %v9168_v50  ;;  %v9373_v63 = vunpack.c.h.bf16 %v9820_v5  ;;  %v9795_v50 = vld [vmem:[%s13266_s10 + $0x530] sm:$0xff]  }
0x184e   : > { %6522 = vmatpush.msra.mxu1 %v9200_v45  ;;  %6551 = vmatpush.msrb.mxu3 %v9232_v4  ;;  %v9811_v45 = vld [vmem:[%s13266_s10 + $0x5b0] sm:$0xff]   ;;  %v9276_v4 = vunpack.c.l.bf16 %v9796_v0  ;;  %v9272_v15 = vunpack.c.l.bf16 %v9795_v50 }
0x184f   : > { %6465 = vmatpush.msrb.mxu0 %v9133_v29  ;;  %6494 = vmatpush.msrb.mxu2 %v9165_v6  ;;  %v9372_v29 = vunpack.c.l.bf16 %v9820_v5  ;;  %v9273_v6 = vunpack.c.h.bf16 %v9795_v50 }
0x1850   : > { %6523 = vmatpush.msra.mxu1 %v9197_v35  ;;  %6552 = vmatpush.msrb.mxu3 %v9229_v2  ;;  %v9337_v35 = vunpack.c.h.bf16 %v9811_v45  ;;  %v9305_v2 = vunpack.c.h.bf16 %v9803_v24 }
0x1851   : > { %8536 = vmatmul.msk.f32.gmra.mxu0 %vm717_vm3, %v12051_v9  ;;  %8540 = vmatmul.msk.f32.gmra.mxu2 %vm717_vm3, %v12051_v9 }
0x1852   : > { %8544 = vmatmul.msk.f32.gmra.mxu1 %vm717_vm3, %v12051_v9  ;;  %8548 = vmatmul.msk.f32.gmra.mxu3 %vm717_vm3, %v12051_v9 }
0x1853   : > { %6466 = vmatpush.msrb.mxu0 %v9132_v10  ;;  %6495 = vmatpush.msrb.mxu2 %v9164_v48  ;;  %v9336_v10 = vunpack.c.l.bf16 %v9811_v45  ;;  %v12320_v48 = vld [vmem:[%s13265_s9 + $0x10] sm:$0xff]  ;;  %v5977_v45 = vpop.f32.mrf.mxu2 }
0x1854   : > { %6524 = vmatpush.msra.mxu1 %v9196_v33  ;;  %6553 = vmatpush.msrb.mxu3 %v9228_v1  ;;  %v9304_v33 = vunpack.c.l.bf16 %v9803_v24  ;;  %v9368_v1 = vunpack.c.l.bf16 %v9819_v51  ;;  %v12344_v14 = vperm.slane %v12320_v48, 3 }
0x1855   : > { %6467 = vmatpush.msrb.mxu0 %v9129_v22  ;;  %6496 = vmatpush.msrb.mxu2 %v9161_v61  ;;  %v9802_v22 = vld [vmem:[%s13266_s10 + $0x568] sm:$0xff]  }
0x1856   : > { %6525 = vmatpush.msra.mxu1 %v9193_v25  ;;  %6554 = vmatpush.msrb.mxu3 %v9225_v36  ;;  %v9818_v61 = vld [vmem:[%s13266_s10 + $0x5e8] sm:$0xff]   ;;  %v12335_v25 = vperm.slane %v12320_v48, 0  ;;  %v12338_v36 = vperm.slane %v12320_v48, 1  ;;  %v9300_v18 = vunpack.c.l.bf16 %v9802_v22 }
0x1857   : > { %6468 = vmatpush.msrb.mxu0 %v9128_v7  ;;  %6497 = vmatpush.msrb.mxu2 %v9160_v39  ;;  %v5945_v7 = vpop.f32.mrf.mxu0  ;;  %v12341_v39 = vperm.slane %v12320_v48, 2  ;;  %v9364_v60 = vunpack.c.l.bf16 %v9818_v61 }
0x1858   : > { %6526 = vmatpush.msra.mxu1 %v9192_v49  ;;  %6555 = vmatpush.msrb.mxu3 %v9224_v43  ;;  %v12349_v49 = vld [vmem:[%s13266_s10 + $0x520] sm:$0xff]   ;;  %v5946_v30 = vadd.f32 %v5945_v7, %v12335_v25  ;;  %v5975_v47 = vadd.f32 %v5974_v59, %v12338_v36 }
0x1859   : > { %8549 = vmatmul.msk.f32.vlgmr.msra.gmra.mxu0 %vm717_vm3, %v11985_v27  ;;  %8553 = vmatmul.msk.f32.vlgmr.msra.gmra.mxu2 %vm717_vm3, %v11985_v27  ;;  %v12354_v43 = vld [vmem:[%s13266_s10 + $0x5a0] sm:$0xff]  }
0x185a   : > { %8557 = vmatmul.msk.f32.vlgmr.msrb.gmra.mxu1 %vm717_vm3, %v11985_v27  ;;  %8561 = vmatmul.msk.f32.vlgmr.msra.gmra.mxu3 %vm717_vm3, %v11985_v27  ;;  %v6392_v11 = vmax.f32 %v5946_v30, 0.0  ;;  %v6393_v5 = vmax.f32 %v5975_v47, 0.0 }
0x185b   : > { %6469 = vmatpush.msrb.mxu0 %v9125_v44  ;;  %6498 = vmatpush.msrb.mxu2 %v9157_v52  ;;  %v9301_v44 = vunpack.c.h.bf16 %v9802_v22  ;;  %v9365_v52 = vunpack.c.h.bf16 %v9818_v61 }
0x185c   : > { %6527 = vmatpush.msra.mxu1 %v9189_v20  ;;  %6556 = vmatpush.msrb.mxu3 %v9221_v28  ;;  %v6003_v20 = vpop.f32.mrf.mxu1  ;;  %v6032_v28 = vpop.f32.mrf.mxu3 }
0x185d   : > { %6470 = vmatpush.msrb.mxu0 %v9124_v26  ;;  %6499 = vmatpush.msrb.mxu2 %v9156_v42  ;;  %v9268_v26 = vunpack.c.l.bf16 %v9794_v53  ;;  %v9332_v42 = vunpack.c.l.bf16 %v9810_v54 }
0x185e   : > { %6528 = vmatpush.msra.mxu1 %v9188_v58  ;;  %6557 = vmatpush.msrb.mxu3 %v9220_v17  ;;  %v9801_v58 = vld [vmem:[%s13266_s10 + $0x560] sm:$0xff]  }
0x185f   : > { %6471 = vmatpush.msrb.mxu0 %v9121_v8  ;;  %6500 = vmatpush.msrb.mxu2 %v9153_v34  ;;  %v9817_v17 = vld [vmem:[%s13266_s10 + $0x5e0] sm:$0xff]   ;;  %v9265_v8 = vunpack.c.h.bf16 %v12349_v49  ;;  %v9329_v34 = vunpack.c.h.bf16 %v12354_v43  ;;  %v9297_v0 = vunpack.c.h.bf16 %v9801_v58  ;;  %v5948_v50 = vpop.f32.mrf.mxu0 }
0x1860   : > { %6529 = vmatpush.msra.mxu1 %v9185_v32  ;;  %6558 = vmatpush.msrb.mxu3 %v9217_v12  ;;  %v6004_v32 = vadd.f32 %v6003_v20, %v12341_v39  ;;  %v6033_v12 = vadd.f32 %v6032_v28, %v12344_v14  ;;  %v9361_v3 = vunpack.c.h.bf16 %v9817_v17  ;;  %v5980_v28 = vpop.f32.mrf.mxu2 }
0x1861   : > { %8550 = vmatmul.msk.f32.gmra.mxu0 %vm717_vm3, %v12000_v23  ;;  %8554 = vmatmul.msk.f32.gmra.mxu2 %vm717_vm3, %v12000_v23 }
0x1862   : > { %8558 = vmatmul.msk.f32.gmra.mxu1 %vm717_vm3, %v12000_v23  ;;  %8562 = vmatmul.msk.f32.gmra.mxu3 %vm717_vm3, %v12000_v23 }
0x1863   : > { %6472 = vmatpush.msrb.mxu0 %v9120_v31  ;;  %6501 = vmatpush.msrb.mxu2 %v9152_v38  ;;  %v9792_v31 = vld [vmem:[%s13266_s10 + $0x518] sm:$0xff]  }
0x1864   : > { %6530 = vmatpush.msra.mxu1 %v9184_v40  ;;  %6559 = vmatpush.msrb.mxu3 %v9216_v55  ;;  %v9808_v38 = vld [vmem:[%s13266_s10 + $0x598] sm:$0xff]   ;;  %v9264_v40 = vunpack.c.l.bf16 %v12349_v49  ;;  %v9328_v55 = vunpack.c.l.bf16 %v12354_v43  ;;  %v6006_v24 = vpop.f32.mrf.mxu1  ;;  %v6035_v51 = vpop.f32.mrf.mxu3 }
0x1865   : > { %6573 = vmatpush.msra.mxu0 %v9277_v46  ;;  %6602 = vmatpush.msra.mxu2 %v9309_v62  ;;  %v9800_v46 = vld [vmem:[%s13266_s10 + $0x558] sm:$0xff]   ;;  %v6394_v62 = vmax.f32 %v6004_v32, 0.0  ;;  %v6007_v53 = vadd.f32 %v6006_v24, %v12341_v39  ;;  %v6036_v54 = vadd.f32 %v6035_v51, %v12344_v14 }
0x1866   : > { %6631 = vmatpush.msrb.mxu1 %v9341_v19  ;;  %6660 = vmatpush.msra.mxu3 %v9373_v63  ;;  %v9816_v19 = vld [vmem:[%s13266_s10 + $0x5d8] sm:$0xff]   ;;  %v6395_v63 = vmax.f32 %v6033_v12, 0.0  ;;  %v9292_v22 = vunpack.c.l.bf16 %v9800_v46 }
0x1867   : > { %6574 = vmatpush.msra.mxu0 %v9276_v4  ;;  %6603 = vmatpush.msra.mxu2 %v9308_v41  ;;  %v9296_v4 = vunpack.c.l.bf16 %v9801_v58  ;;  %v9261_v41 = vunpack.c.h.bf16 %v9792_v31  ;;  %v9356_v61 = vunpack.c.l.bf16 %v9816_v19  ;;  %v5951_v20 = vpop.f32.mrf.mxu0 }
0x1868   : > { %6632 = vmatpush.msrb.mxu1 %v9340_v13  ;;  %6661 = vmatpush.msra.mxu3 %v9372_v29  ;;  %v9360_v13 = vunpack.c.l.bf16 %v9817_v17  ;;  %v9325_v29 = vunpack.c.h.bf16 %v9808_v38 }
0x1869   : > { %8551 = vmatmul.msk.f32.gmra.mxu0 %vm717_vm3, %v12013_v37  ;;  %8555 = vmatmul.msk.f32.gmra.mxu2 %vm717_vm3, %v12013_v37 }
0x186a   : > { %8559 = vmatmul.msk.f32.gmra.mxu1 %vm717_vm3, %v12013_v37  ;;  %8563 = vmatmul.msk.f32.gmra.mxu3 %vm717_vm3, %v12013_v37 }
0x186b   : > { %6575 = vmatpush.msra.mxu0 %v9273_v6  ;;  %6633 = vmatpush.msrb.mxu1 %v9337_v35  ;;  %v9293_v6 = vunpack.c.h.bf16 %v9800_v46  ;;  %v9357_v35 = vunpack.c.h.bf16 %v9816_v19  ;;  %v9789_v46 = vld [vmem:[%s13266_s10 + $0x500] sm:$0xff]  }
0x186c   : > { %6604 = vmatpush.msra.mxu2 %v9305_v2  ;;  %6662 = vmatpush.msra.mxu3 %v9369_v57  ;;  %v5949_v2 = vadd.f32 %v5948_v50, %v12335_v25  ;;  %v5978_v57 = vadd.f32 %v5977_v45, %v12338_v36  ;;  %v9805_v19 = vld [vmem:[%s13266_s10 + $0x580] sm:$0xff]  }
0x186d   : > { %6576 = vmatpush.msra.mxu0 %v9272_v15  ;;  %6634 = vmatpush.msrb.mxu1 %v9336_v10  ;;  %v9260_v15 = vunpack.c.l.bf16 %v9792_v31  ;;  %v9324_v10 = vunpack.c.l.bf16 %v9808_v38 }
0x186e   : > { %6605 = vmatpush.msra.mxu2 %v9304_v33  ;;  %6663 = vmatpush.msra.mxu3 %v9368_v1  ;;  %v9791_v33 = vld [vmem:[%s13266_s10 + $0x510] sm:$0xff]   ;;  %v6408_v7 = vmax.f32 %v5949_v2, 0.0  ;;  %v6409_v59 = vmax.f32 %v5978_v57, 0.0  ;;  %v9828_v2 = vld [vmem:[%s13266_s10 + $0x638] sm:$0xff]  }
0x186f   : > { %6577 = vmatpush.msra.mxu0 %v9269_v16  ;;  %6635 = vmatpush.msrb.mxu1 %v9333_v21  ;;  %v9807_v1 = vld [vmem:[%s13266_s10 + $0x590] sm:$0xff]   ;;  %v9257_v49 = vunpack.c.h.bf16 %v9791_v33  ;;  %v9256_v30 = vunpack.c.l.bf16 %v9791_v33  ;;  %v9844_v57 = vld [vmem:[%s13266_s10 + $0x6b8] sm:$0xff]   ;;  %v9405_v33 = vunpack.c.h.bf16 %v9828_v2 }
0x1870   : > { %6606 = vmatpush.msra.mxu2 %v9301_v44  ;;  %6664 = vmatpush.msra.mxu3 %v9365_v52  ;;  %v9799_v16 = vld [vmem:[%s13266_s10 + $0x550] sm:$0xff]   ;;  %v9321_v43 = vunpack.c.h.bf16 %v9807_v1  ;;  %v6410_v44 = vmax.f32 %v6007_v53, 0.0  ;;  %v6411_v52 = vmax.f32 %v6036_v54, 0.0  ;;  %v9320_v47 = vunpack.c.l.bf16 %v9807_v1 }
0x1871   : > { %8552 = vmatmul.msk.f32.gmra.mxu0 %vm717_vm3, %v12051_v9  ;;  %8556 = vmatmul.msk.f32.gmra.mxu2 %vm717_vm3, %v12051_v9  ;;  %v9815_v21 = vld [vmem:[%s13266_s10 + $0x5d0] sm:$0xff]   ;;  %v9289_v58 = vunpack.c.h.bf16 %v9799_v16  ;;  %v9288_v32 = vunpack.c.l.bf16 %v9799_v16  ;;  %v9248_v53 = vunpack.c.l.bf16 %v9789_v46  ;;  %v9312_v54 = vunpack.c.l.bf16 %v9805_v19 }
0x1872   : > { %8560 = vmatmul.msk.f32.gmra.mxu1 %vm717_vm3, %v12051_v9  ;;  %8564 = vmatmul.msk.f32.gmra.mxu3 %vm717_vm3, %v12051_v9  ;;  %v9353_v17 = vunpack.c.h.bf16 %v9815_v21  ;;  %v9352_v12 = vunpack.c.l.bf16 %v9815_v21  ;;  %v9469_v1 = vunpack.c.h.bf16 %v9844_v57  ;;  %v9827_v21 = vld [vmem:[%s13266_s10 + $0x630] sm:$0xff]  }
0x1873   : > { %6578 = vmatpush.msra.mxu0 %v9268_v26  ;;  %6636 = vmatpush.msrb.mxu1 %v9332_v42  ;;  %v9790_v26 = vld [vmem:[%s13266_s10 + $0x508] sm:$0xff]  }
0x1874   : > { %6607 = vmatpush.msra.mxu2 %v9300_v18  ;;  %6665 = vmatpush.msra.mxu3 %v9364_v60  ;;  %v9806_v42 = vld [vmem:[%s13266_s10 + $0x588] sm:$0xff]   ;;  %v6009_v18 = vpop.f32.mrf.mxu1  ;;  %v6038_v60 = vpop.f32.mrf.mxu3  ;;  %v9253_v31 = vunpack.c.h.bf16 %v9790_v26  ;;  %v9252_v50 = vunpack.c.l.bf16 %v9790_v26 }
0x1875   : > { %6579 = vmatpush.msra.mxu0 %v9265_v8  ;;  %6637 = vmatpush.msrb.mxu1 %v9329_v34  ;;  %v9798_v8 = vld [vmem:[%s13266_s10 + $0x548] sm:$0xff]   ;;  %v9317_v38 = vunpack.c.h.bf16 %v9806_v42  ;;  %v9316_v45 = vunpack.c.l.bf16 %v9806_v42  ;;  %v9401_v42 = vunpack.c.h.bf16 %v9827_v21 }
0x1876   : > { %6608 = vmatpush.msra.mxu2 %v9297_v0  ;;  %6666 = vmatpush.msra.mxu3 %v9361_v3  ;;  %v9814_v34 = vld [vmem:[%s13266_s10 + $0x5c8] sm:$0xff]   ;;  %v5952_v0 = vadd.f32 %v5951_v20, %v12335_v25  ;;  %v5981_v3 = vadd.f32 %v5980_v28, %v12338_v36 }
0x1877   : > { %6580 = vmatpush.msra.mxu0 %v9264_v40  ;;  %6638 = vmatpush.msrb.mxu1 %v9328_v55  ;;  %v9285_v40 = vunpack.c.h.bf16 %v9798_v8  ;;  %v9349_v55 = vunpack.c.h.bf16 %v9814_v34 }
0x1878   : > { %6609 = vmatpush.msra.mxu2 %v9296_v4  ;;  %6667 = vmatpush.msra.mxu3 %v9360_v13  ;;  %v9797_v4 = vld [vmem:[%s13266_s10 + $0x540] sm:$0xff]  }
0x1879   : > { %6473 = vmatmul.f32.vlgmr.msrb.gmra.mxu0 %v6392_v11  ;;  %6502 = vmatmul.f32.vlgmr.msrb.gmra.mxu2 %v6393_v5  ;;  %v6010_v11 = vadd.f32 %v6009_v18, %v12341_v39  ;;  %v6039_v5 = vadd.f32 %v6038_v60, %v12344_v14  ;;  %v9813_v13 = vld [vmem:[%s13266_s10 + $0x5c0] sm:$0xff]   ;;  %v9826_v60 = vld [vmem:[%s13266_s10 + $0x628] sm:$0xff]  }
0x187a   : > { %6531 = vmatmul.f32.vlgmr.msra.gmra.mxu1 %v6394_v62  ;;  %6560 = vmatmul.f32.vlgmr.msrb.gmra.mxu3 %v6395_v63  ;;  %v6424_v62 = vmax.f32 %v5952_v0, 0.0  ;;  %v6425_v63 = vmax.f32 %v5981_v3, 0.0  ;;  %v9344_v16 = vunpack.c.l.bf16 %v9813_v13  ;;  %v12469_v3 = vperm.slane %v12320_v48, 6 }
0x187b   : > { %6581 = vmatpush.msra.mxu0 %v9261_v41  ;;  %6639 = vmatpush.msrb.mxu1 %v9325_v29  ;;  %v6426_v24 = vmax.f32 %v6010_v11, 0.0  ;;  %v6427_v51 = vmax.f32 %v6039_v5, 0.0  ;;  %v9284_v41 = vunpack.c.l.bf16 %v9798_v8  ;;  %v9348_v29 = vunpack.c.l.bf16 %v9814_v34  ;;  %v9842_v8 = vld [vmem:[%s13266_s10 + $0x6a8] sm:$0xff]  }
0x187c   : > { %6610 = vmatpush.msra.mxu2 %v9293_v6  ;;  %6668 = vmatpush.msra.mxu3 %v9357_v35  ;;  %v9249_v6 = vunpack.c.h.bf16 %v9789_v46  ;;  %v9313_v35 = vunpack.c.h.bf16 %v9805_v19  ;;  %v12466_v34 = vperm.slane %v12320_v48, 4 }
0x187d   : > { %6582 = vmatpush.msra.mxu0 %v9260_v15  ;;  %6640 = vmatpush.msrb.mxu1 %v9324_v10  ;;  %v9281_v15 = vunpack.c.h.bf16 %v9797_v4  ;;  %v9345_v10 = vunpack.c.h.bf16 %v9813_v13  ;;  %v9841_v13 = vld [vmem:[%s13266_s10 + $0x6a0] sm:$0xff]  }
0x187e   : > { %6611 = vmatpush.msra.mxu2 %v9292_v22  ;;  %6669 = vmatpush.msra.mxu3 %v9356_v61  ;;  %v9836_v22 = vld [vmem:[%s13266_s10 + $0x678] sm:$0xff]   ;;  %v9280_v61 = vunpack.c.l.bf16 %v9797_v4  ;;  %v9460_v4 = vunpack.c.l.bf16 %v9842_v8 }
0x187f   : > { %6583 = vmatpush.msra.mxu0 %v9257_v49  ;;  %6641 = vmatpush.msrb.mxu1 %v9321_v43  ;;  %v9468_v49 = vunpack.c.l.bf16 %v9844_v57  ;;  %v9843_v43 = vld [vmem:[%s13266_s10 + $0x6b0] sm:$0xff]   ;;  %v9437_v28 = vunpack.c.h.bf16 %v9836_v22  ;;  %v9850_v57 = vld [vmem:[%s13266_s10 + $0x6e8] sm:$0xff]  }
0x1880   : > { %6612 = vmatpush.msra.mxu2 %v9289_v58  ;;  %6670 = vmatpush.msra.mxu3 %v9353_v17  ;;  %v9465_v17 = vunpack.c.h.bf16 %v9843_v43 }
0x1881   : > { %6476 = vmatmul.f32.gmra.mxu0 %v6408_v7  ;;  %6505 = vmatmul.f32.gmra.mxu2 %v6409_v59  ;;  %v9404_v59 = vunpack.c.l.bf16 %v9828_v2 }
0x1882   : > { %6534 = vmatmul.f32.gmra.mxu1 %v6410_v44  ;;  %6563 = vmatmul.f32.gmra.mxu3 %v6411_v52  ;;  %v9852_v44 = vld [vmem:[%s13266_s10 + $0x6f8] sm:$0xff]  }
0x1883   : > { %6584 = vmatpush.msra.mxu0 %v9256_v30  ;;  %6642 = vmatpush.msrb.mxu1 %v9320_v47  ;;  %v9501_v18 = vunpack.c.h.bf16 %v9852_v44  ;;  %v9436_v47 = vunpack.c.l.bf16 %v9836_v22 }
0x1884   : > { %6613 = vmatpush.msra.mxu2 %v9288_v32  ;;  %6671 = vmatpush.msra.mxu3 %v9352_v12  ;;  %v9464_v32 = vunpack.c.l.bf16 %v9843_v43  ;;  %v9500_v12 = vunpack.c.l.bf16 %v9852_v44 }
0x1885   : > { %6585 = vmatpush.msra.mxu0 %v9253_v31  ;;  %6643 = vmatpush.msrb.mxu1 %v9317_v38  ;;  %v9397_v31 = vunpack.c.h.bf16 %v9826_v60 }
0x1886   : > { %6614 = vmatpush.msra.mxu2 %v9285_v40  ;;  %6672 = vmatpush.msra.mxu3 %v9349_v55  ;;  %v9461_v40 = vunpack.c.h.bf16 %v9842_v8  ;;  %v9851_v55 = vld [vmem:[%s13266_s10 + $0x6f0] sm:$0xff]  }
0x1887   : > { %6586 = vmatpush.msra.mxu0 %v9252_v50  ;;  %6644 = vmatpush.msrb.mxu1 %v9316_v45 }
0x1888   : > { %6615 = vmatpush.msra.mxu2 %v9284_v41  ;;  %6673 = vmatpush.msra.mxu3 %v9348_v29  ;;  %v9834_v41 = vld [vmem:[%s13266_s10 + $0x668] sm:$0xff]  }
0x1889   : > { %6479 = vmatmul.f32.gmra.mxu0 %v6424_v62  ;;  %6508 = vmatmul.f32.gmra.mxu2 %v6425_v63  ;;  %v9396_v62 = vunpack.c.l.bf16 %v9826_v60  ;;  %v9825_v63 = vld [vmem:[%s13266_s10 + $0x620] sm:$0xff]   ;;  %v9429_v22 = vunpack.c.h.bf16 %v9834_v41 }
0x188a   : > { %6537 = vmatmul.f32.gmra.mxu1 %v6426_v24  ;;  %6566 = vmatmul.f32.gmra.mxu3 %v6427_v51  ;;  %v9497_v51 = vunpack.c.h.bf16 %v9851_v55 }
0x188b   : > { %6587 = vmatpush.msra.mxu0 %v9249_v6  ;;  %6645 = vmatpush.msrb.mxu1 %v9313_v35  ;;  %v12489_v6 = vperm.slane %v12320_v48, 5  ;;  %v9393_v35 = vunpack.c.h.bf16 %v9825_v63 }
0x188c   : > { %6616 = vmatpush.msra.mxu2 %v9281_v15  ;;  %6674 = vmatpush.msra.mxu3 %v9345_v10  ;;  %v12496_v10 = vperm.slane %v12320_v48, 7  ;;  %v9840_v48 = vld [vmem:[%s13266_s10 + $0x698] sm:$0xff]  }
0x188d   : > { %6588 = vmatpush.msra.mxu0 %v9248_v53  ;;  %6646 = vmatpush.msrb.mxu1 %v9312_v54  ;;  %v9457_v53 = vunpack.c.h.bf16 %v9841_v13  ;;  %v9496_v54 = vunpack.c.l.bf16 %v9851_v55 }
0x188e   : > { %v5954_v7 = vpop.f32.mrf.mxu0  ;;  %6617 = vmatpush.msra.mxu2 %v9280_v61  ;;  %6675 = vmatpush.msra.mxu3 %v9344_v16  ;;  %v9456_v16 = vunpack.c.l.bf16 %v9841_v13  ;;  %v9822_v13 = vld [vmem:[%s13266_s10 + $0x608] sm:$0xff]  }
0x188f   : > { %v5955_v52 = vadd.f32 %v5954_v7, %v12335_v25  ;;  %v6012_v20 = vpop.f32.mrf.mxu1  ;;  %6689 = vmatpush.msrb.mxu0 %v9405_v33  ;;  %6747 = vmatpush.msra.mxu1 %v9469_v1  ;;  %v12460_v25 = vld [vmem:[%s13266_s10 + $0x670] sm:$0xff]   ;;  %v9824_v33 = vld [vmem:[%s13266_s10 + $0x618] sm:$0xff]   ;;  %v9392_v1 = vunpack.c.l.bf16 %v9825_v63 }
0x1890   : > { %v6013_v26 = vadd.f32 %v6012_v20, %v12341_v39  ;;  %v9400_v39 = vunpack.c.l.bf16 %v9827_v21  ;;  %6718 = vmatpush.msrb.mxu2 %v9437_v28  ;;  %v9433_v38 = vunpack.c.h.bf16 %v12460_v25  ;;  %6776 = vmatpush.msrb.mxu3 %v9501_v18  ;;  %v9432_v2 = vunpack.c.l.bf16 %v12460_v25  ;;  %v9833_v20 = vld [vmem:[%s13266_s10 + $0x660] sm:$0xff]  }
0x1891   : > { %v6440_v58 = vmax.f32 %v5955_v52, 0.0  ;;  %6690 = vmatpush.msrb.mxu0 %v9404_v59  ;;  %6748 = vmatpush.msra.mxu1 %v9468_v49  ;;  %v9493_v21 = vunpack.c.h.bf16 %v9850_v57  ;;  %v9389_v49 = vunpack.c.h.bf16 %v9824_v33  ;;  %v9428_v52 = vunpack.c.l.bf16 %v9834_v41 }
0x1892   : > { %v6442_v30 = vmax.f32 %v6013_v26, 0.0  ;;  %6719 = vmatpush.msrb.mxu2 %v9436_v47  ;;  %6777 = vmatpush.msrb.mxu3 %v9500_v12  ;;  %v9492_v25 = vunpack.c.l.bf16 %v9850_v57  ;;  %v9388_v47 = vunpack.c.l.bf16 %v9824_v33  ;;  %v9425_v8 = vunpack.c.h.bf16 %v9833_v20 }
0x1893   : > { %6482 = vmatmul.f32.gmra.mxu0 %v6440_v58  ;;  %6749 = vmatpush.msra.mxu1 %v9465_v17  ;;  %v9453_v58 = vunpack.c.h.bf16 %v9840_v48  ;;  %v9849_v17 = vld [vmem:[%s13266_s10 + $0x6e0] sm:$0xff]  }
0x1894   : > { %6540 = vmatmul.f32.gmra.mxu1 %v6442_v30  ;;  %v5983_v0 = vpop.f32.mrf.mxu2  ;;  %6691 = vmatpush.msrb.mxu0 %v9401_v42  ;;  %v9823_v30 = vld [vmem:[%s13266_s10 + $0x610] sm:$0xff]  }
0x1895   : > { %v5984_v11 = vadd.f32 %v5983_v0, %v12338_v36  ;;  %v6041_v5 = vpop.f32.mrf.mxu3  ;;  %6750 = vmatpush.msra.mxu1 %v9464_v32  ;;  %6720 = vmatpush.msrb.mxu2 %v9433_v38  ;;  %v9839_v32 = vld [vmem:[%s13266_s10 + $0x690] sm:$0xff]   ;;  %v9452_v0 = vunpack.c.l.bf16 %v9840_v48  ;;  %v9385_v38 = vunpack.c.h.bf16 %v9823_v30  ;;  %v9384_v63 = vunpack.c.l.bf16 %v9823_v30 }
0x1896   : > { %v6042_v46 = vadd.f32 %v6041_v5, %v12344_v14  ;;  %v6061_v19 = vpop.f32.mrf.mxu0  ;;  %6692 = vmatpush.msrb.mxu0 %v9400_v39  ;;  %6778 = vmatpush.msrb.mxu3 %v9497_v51  ;;  %v9832_v5 = vld [vmem:[%s13266_s10 + $0x658] sm:$0xff]   ;;  %v9449_v55 = vunpack.c.h.bf16 %v9839_v32  ;;  %v9448_v41 = vunpack.c.l.bf16 %v9839_v32  ;;  %v9380_v48 = vunpack.c.l.bf16 %v9822_v13 }
0x1897   : > { %v6441_v50 = vmax.f32 %v5984_v11, 0.0  ;;  %v6062_v36 = vadd.f32 %v6061_v19, %v12466_v34  ;;  %v6119_v45 = vpop.f32.mrf.mxu1  ;;  %6751 = vmatpush.msra.mxu1 %v9461_v40  ;;  %6721 = vmatpush.msrb.mxu2 %v9432_v2  ;;  %v9424_v11 = vunpack.c.l.bf16 %v9833_v20  ;;  %v9420_v33 = vunpack.c.l.bf16 %v9832_v5  ;;  %v12561_v32 = vld [vmem:[%s13265_s9 + $0x18] sm:$0xff] }
0x1898   : > { %v6443_v14 = vmax.f32 %v6042_v46, 0.0  ;;  %v6120_v24 = vadd.f32 %v6119_v45, %v12469_v3  ;;  %6693 = vmatpush.msrb.mxu0 %v9397_v31  ;;  %6779 = vmatpush.msrb.mxu3 %v9496_v54  ;;  %v9489_v31 = vunpack.c.h.bf16 %v9849_v17  ;;  %v9488_v46 = vunpack.c.l.bf16 %v9849_v17  ;;  %v9830_v17 = vld [vmem:[%s13266_s10 + $0x648] sm:$0xff]  }
0x1899   : > { %v6396_v29 = vmax.f32 %v6062_v36, 0.0  ;;  %6511 = vmatmul.f32.gmra.mxu2 %v6441_v50  ;;  %6752 = vmatpush.msra.mxu1 %v9460_v4  ;;  %v9848_v50 = vld [vmem:[%s13266_s10 + $0x6d8] sm:$0xff]   ;;  %v9421_v4 = vunpack.c.h.bf16 %v9832_v5  ;;  %v9381_v54 = vunpack.c.h.bf16 %v9822_v13 }
0x189a   : > { %v6398_v15 = vmax.f32 %v6120_v24, 0.0  ;;  %6569 = vmatmul.f32.gmra.mxu3 %v6443_v14  ;;  %6694 = vmatpush.msrb.mxu0 %v9396_v62  ;;  %v9485_v57 = vunpack.c.h.bf16 %v9848_v50 }
0x189b   : > { %6589 = vmatmul.f32.vlgmr.msra.gmra.mxu0 %v6396_v29  ;;  %6753 = vmatpush.msra.mxu1 %v9457_v53  ;;  %v9838_v29 = vld [vmem:[%s13266_s10 + $0x688] sm:$0xff]  }
0x189c   : > { %6647 = vmatmul.f32.vlgmr.msrb.gmra.mxu1 %v6398_v15  ;;  %v6090_v61 = vpop.f32.mrf.mxu2  ;;  %6695 = vmatpush.msrb.mxu0 %v9393_v35  ;;  %v9831_v15 = vld [vmem:[%s13266_s10 + $0x650] sm:$0xff]  }
0x189d   : > { %v6091_v7 = vadd.f32 %v6090_v61, %v12489_v6  ;;  %v6148_v59 = vpop.f32.mrf.mxu3  ;;  %6722 = vmatpush.msrb.mxu2 %v9429_v22  ;;  %6754 = vmatpush.msra.mxu1 %v9456_v16  ;;  %v9445_v61 = vunpack.c.h.bf16 %v9838_v29  ;;  %v9484_v16 = vunpack.c.l.bf16 %v9848_v50  ;;  %v12578_v50 = vperm.slane %v12561_v32, 2 }
0x189e   : > { %v6149_v43 = vadd.f32 %v6148_v59, %v12496_v10  ;;  %v6064_v44 = vpop.f32.mrf.mxu0  ;;  %6696 = vmatpush.msrb.mxu0 %v9392_v1  ;;  %6780 = vmatpush.msrb.mxu3 %v9493_v21  ;;  %v9847_v1 = vld [vmem:[%s13266_s10 + $0x6d0] sm:$0xff]   ;;  %v9821_v21 = vld [vmem:[%s13266_s10 + $0x600] sm:$0xff]  }
0x189f   : > { %v6397_v28 = vmax.f32 %v6091_v7, 0.0  ;;  %v6065_v26 = vadd.f32 %v6064_v44, %v12466_v34  ;;  %v6122_v42 = vpop.f32.mrf.mxu1  ;;  %6723 = vmatpush.msrb.mxu2 %v9428_v52  ;;  %6755 = vmatpush.msra.mxu1 %v9453_v58  ;;  %v9417_v7 = vunpack.c.h.bf16 %v9831_v15  ;;  %v9837_v44 = vld [vmem:[%s13266_s10 + $0x680] sm:$0xff]   ;;  %v9416_v58 = vunpack.c.l.bf16 %v9831_v15 }
0x18a0   : > { %v6399_v18 = vmax.f32 %v6149_v43, 0.0  ;;  %v6123_v60 = vadd.f32 %v6122_v42, %v12469_v3  ;;  %6697 = vmatpush.msrb.mxu0 %v9389_v49  ;;  %6781 = vmatpush.msrb.mxu3 %v9492_v25  ;;  %v9444_v49 = vunpack.c.l.bf16 %v9838_v29  ;;  %v9481_v43 = vunpack.c.h.bf16 %v9847_v1 }
0x18a1   : > { %v6412_v39 = vmax.f32 %v6065_v26, 0.0  ;;  %6618 = vmatmul.f32.vlgmr.msra.gmra.mxu2 %v6397_v28  ;;  %6756 = vmatpush.msra.mxu1 %v9452_v0  ;;  %v9377_v28 = vunpack.c.h.bf16 %v9821_v21  ;;  %v9441_v30 = vunpack.c.h.bf16 %v9837_v44  ;;  %v9440_v5 = vunpack.c.l.bf16 %v9837_v44 }
0x18a2   : > { %v6414_v12 = vmax.f32 %v6123_v60, 0.0  ;;  %6676 = vmatmul.f32.vlgmr.msra.gmra.mxu3 %v6399_v18  ;;  %6698 = vmatpush.msrb.mxu0 %v9388_v47 }
0x18a3   : > { %6592 = vmatmul.f32.gmra.mxu0 %v6412_v39  ;;  %6724 = vmatpush.msrb.mxu2 %v9425_v8  ;;  %v9846_v39 = vld [vmem:[%s13266_s10 + $0x6c8] sm:$0xff]  }
0x18a4   : > { %6650 = vmatmul.f32.gmra.mxu1 %v6414_v12  ;;  %v6093_v40 = vpop.f32.mrf.mxu2  ;;  %6782 = vmatpush.msrb.mxu3 %v9489_v31  ;;  %v9480_v12 = vunpack.c.l.bf16 %v9847_v1  ;;  %v9376_v31 = vunpack.c.l.bf16 %v9821_v21  ;;  %v9875_v1 = vld [vmem:[%s13266_s10 + $0x7b0] sm:$0xff]  }
0x18a5   : > { %v6094_v19 = vadd.f32 %v6093_v40, %v12489_v6  ;;  %v6151_v62 = vpop.f32.mrf.mxu3  ;;  %6699 = vmatpush.msrb.mxu0 %v9385_v38  ;;  %6725 = vmatpush.msrb.mxu2 %v9424_v11  ;;  %v9413_v38 = vunpack.c.h.bf16 %v9830_v17  ;;  %v9477_v40 = vunpack.c.h.bf16 %v9846_v39  ;;  %v9593_v44 = vunpack.c.h.bf16 %v9875_v1 }
0x18a6   : > { %v6152_v36 = vadd.f32 %v6151_v62, %v12496_v10  ;;  %v6067_v45 = vpop.f32.mrf.mxu0  ;;  %6757 = vmatpush.msra.mxu1 %v9449_v55  ;;  %6783 = vmatpush.msrb.mxu3 %v9488_v46  ;;  %v12572_v55 = vperm.slane %v12561_v32, 0  ;;  %v9412_v46 = vunpack.c.l.bf16 %v9830_v17  ;;  %v9829_v62 = vld [vmem:[%s13266_s10 + $0x640] sm:$0xff]  }
0x18a7   : > { %v6413_v14 = vmax.f32 %v6094_v19, 0.0  ;;  %v6068_v24 = vadd.f32 %v6067_v45, %v12466_v34  ;;  %v6125_v51 = vpop.f32.mrf.mxu1  ;;  %6700 = vmatpush.msrb.mxu0 %v9384_v63  ;;  %6726 = vmatpush.msrb.mxu2 %v9421_v4  ;;  %v9845_v4 = vld [vmem:[%s13266_s10 + $0x6c0] sm:$0xff]   ;;  %v9409_v29 = vunpack.c.h.bf16 %v9829_v62 }
0x18a8   : > { %v6415_v35 = vmax.f32 %v6152_v36, 0.0  ;;  %v6126_v2 = vadd.f32 %v6125_v51, %v12469_v3  ;;  %6758 = vmatpush.msra.mxu1 %v9448_v41  ;;  %6784 = vmatpush.msrb.mxu3 %v9485_v57  ;;  %v9476_v36 = vunpack.c.l.bf16 %v9846_v39  ;;  %v9473_v15 = vunpack.c.h.bf16 %v9845_v4 }
0x18a9   : > { %v6428_v53 = vmax.f32 %v6068_v24, 0.0  ;;  %6621 = vmatmul.f32.gmra.mxu2 %v6413_v14  ;;  %6701 = vmatpush.msrb.mxu0 %v9381_v54 }
0x18aa   : > { %v6430_v22 = vmax.f32 %v6126_v2, 0.0  ;;  %6679 = vmatmul.f32.gmra.mxu3 %v6415_v35  ;;  %6727 = vmatpush.msrb.mxu2 %v9420_v33  ;;  %v9408_v33 = vunpack.c.l.bf16 %v9829_v62  ;;  %v9873_v62 = vld [vmem:[%s13266_s10 + $0x7a0] sm:$0xff]  }
0x18ab   : > { %6595 = vmatmul.f32.gmra.mxu0 %v6428_v53  ;;  %6759 = vmatpush.msra.mxu1 %v9445_v61  ;;  %v9868_v53 = vld [vmem:[%s13266_s10 + $0x778] sm:$0xff]  }
0x18ac   : > { %6653 = vmatmul.f32.gmra.mxu1 %v6430_v22  ;;  %v6096_v59 = vpop.f32.mrf.mxu2  ;;  %6785 = vmatpush.msrb.mxu3 %v9484_v16  ;;  %v12600_v22 = vld [vmem:[%s13266_s10 + $0x7f8] sm:$0xff]   ;;  %v12603_v16 = vperm.slane %v12561_v32, 1 }
0x18ad   : > { %v6097_v52 = vadd.f32 %v6096_v59, %v12489_v6  ;;  %v6154_v20 = vpop.f32.mrf.mxu3  ;;  %6702 = vmatpush.msrb.mxu0 %v9380_v48  ;;  %6728 = vmatpush.msrb.mxu2 %v9417_v7  ;;  %v9472_v48 = vunpack.c.l.bf16 %v9845_v4  ;;  %v12607_v59 = vperm.slane %v12561_v32, 3 }
0x18ae   : > { %v6155_v26 = vadd.f32 %v6154_v20, %v12496_v10  ;;  %v6070_v42 = vpop.f32.mrf.mxu0  ;;  %6760 = vmatpush.msra.mxu1 %v9444_v49  ;;  %6786 = vmatpush.msrb.mxu3 %v9481_v43  ;;  %v9565_v43 = vunpack.c.h.bf16 %v9868_v53  ;;  %v9858_v20 = vld [vmem:[%s13266_s10 + $0x728] sm:$0xff]  }
0x18af   : > { %v6429_v18 = vmax.f32 %v6097_v52, 0.0  ;;  %v6071_v60 = vadd.f32 %v6070_v42, %v12466_v34  ;;  %v6128_v25 = vpop.f32.mrf.mxu1  ;;  %v9860_v34 = vld [vmem:[%s13266_s10 + $0x738] sm:$0xff]   ;;  %6703 = vmatpush.msrb.mxu0 %v9377_v28  ;;  %6729 = vmatpush.msrb.mxu2 %v9416_v58  ;;  %v9629_v52 = vunpack.c.h.bf16 %v12600_v22  ;;  %v9564_v42 = vunpack.c.l.bf16 %v9868_v53  ;;  %v9874_v58 = vld [vmem:[%s13266_s10 + $0x7a8] sm:$0xff]  }
0x18b0   : > { %v6431_v47 = vmax.f32 %v6155_v26, 0.0  ;;  %v6129_v8 = vadd.f32 %v6128_v25, %v12469_v3  ;;  %v12569_v3 = vld [vmem:[%s13266_s10 + $0x7b8] sm:$0xff]   ;;  %6761 = vmatpush.msra.mxu1 %v9441_v30  ;;  %v9533_v19 = vunpack.c.h.bf16 %v9860_v34  ;;  %6787 = vmatpush.msrb.mxu3 %v9480_v12  ;;  %v9532_v24 = vunpack.c.l.bf16 %v9860_v34 }
0x18b1   : > { %v6444_v0 = vmax.f32 %v6071_v60, 0.0  ;;  %6624 = vmatmul.f32.gmra.mxu2 %v6429_v18  ;;  %v9597_v45 = vunpack.c.h.bf16 %v12569_v3  ;;  %6704 = vmatpush.msrb.mxu0 %v9376_v31  ;;  %v9596_v21 = vunpack.c.l.bf16 %v12569_v3  ;;  %v9592_v60 = vunpack.c.l.bf16 %v9875_v1  ;;  %v9883_v31 = vld [vmem:[%s13266_s10 + $0x7f0] sm:$0xff]  }
0x18b2   : > { %v6446_v11 = vmax.f32 %v6129_v8, 0.0  ;;  %6682 = vmatmul.f32.gmra.mxu3 %v6431_v47  ;;  %6730 = vmatpush.msrb.mxu2 %v9413_v38  ;;  %v9525_v39 = vunpack.c.h.bf16 %v9858_v20  ;;  %v9867_v47 = vld [vmem:[%s13266_s10 + $0x770] sm:$0xff]  }
0x18b3   : > { %6598 = vmatmul.f32.gmra.mxu0 %v6444_v0  ;;  %6762 = vmatpush.msra.mxu1 %v9440_v5  ;;  %v9589_v0 = vunpack.c.h.bf16 %v9874_v58  ;;  %v9857_v5 = vld [vmem:[%s13266_s10 + $0x720] sm:$0xff]  }
0x18b4   : > { %6656 = vmatmul.f32.gmra.mxu1 %v6446_v11  ;;  %v6099_v63 = vpop.f32.mrf.mxu2  ;;  %6788 = vmatpush.msrb.mxu3 %v9477_v40  ;;  %v9628_v11 = vunpack.c.l.bf16 %v12600_v22  ;;  %v9521_v4 = vunpack.c.h.bf16 %v9857_v5  ;;  %v9584_v22 = vunpack.c.l.bf16 %v9873_v62 }
0x18b5   : > { %v6100_v13 = vadd.f32 %v6099_v63, %v12489_v6  ;;  %v6157_v14 = vpop.f32.mrf.mxu3  ;;  %6731 = vmatpush.msrb.mxu2 %v9412_v46  ;;  %6805 = vmatpush.msra.mxu0 %v9533_v19  ;;  %v9859_v6 = vld [vmem:[%s13266_s10 + $0x730] sm:$0xff]   ;;  %v9524_v46 = vunpack.c.l.bf16 %v9858_v20  ;;  %v9561_v19 = vunpack.c.h.bf16 %v9867_v47  ;;  %v9881_v20 = vld [vmem:[%s13266_s10 + $0x7e0] sm:$0xff]  }
0x18b6   : > { %v6158_v51 = vadd.f32 %v6157_v14, %v12496_v10  ;;  %v6177_v41 = vpop.f32.mrf.mxu0  ;;  %6789 = vmatpush.msrb.mxu3 %v9476_v36  ;;  %6863 = vmatpush.msrb.mxu1 %v9597_v45  ;;  %v9529_v49 = vunpack.c.h.bf16 %v9859_v6  ;;  %v9528_v26 = vunpack.c.l.bf16 %v9859_v6  ;;  %v9588_v36 = vunpack.c.l.bf16 %v9874_v58  ;;  %v9866_v14 = vld [vmem:[%s13266_s10 + $0x768] sm:$0xff]   ;;  %v9855_v58 = vld [vmem:[%s13266_s10 + $0x710] sm:$0xff]  }
0x18b7   : > { %v6445_v35 = vmax.f32 %v6100_v13, 0.0  ;;  %v6178_v2 = vadd.f32 %v6177_v41, %v12572_v55  ;;  %v6235_v57 = vpop.f32.mrf.mxu1  ;;  %6806 = vmatpush.msra.mxu0 %v9532_v24  ;;  %6732 = vmatpush.msrb.mxu2 %v9409_v29  ;;  %v9625_v45 = vunpack.c.h.bf16 %v9883_v31  ;;  %v9560_v13 = vunpack.c.l.bf16 %v9867_v47  ;;  %v9882_v29 = vld [vmem:[%s13266_s10 + $0x7e8] sm:$0xff]  }
0x18b8   : > { %v6447_v10 = vmax.f32 %v6158_v51, 0.0  ;;  %v6236_v54 = vadd.f32 %v6235_v57, %v12578_v50  ;;  %6790 = vmatpush.msrb.mxu3 %v9473_v15  ;;  %6864 = vmatpush.msrb.mxu1 %v9596_v21  ;;  %v9585_v51 = vunpack.c.h.bf16 %v9873_v62  ;;  %v9624_v41 = vunpack.c.l.bf16 %v9883_v31  ;;  %v9872_v21 = vld [vmem:[%s13266_s10 + $0x798] sm:$0xff]  }
0x18b9   : > { %v6400_v61 = vmax.f32 %v6178_v2, 0.0  ;;  %6627 = vmatmul.f32.gmra.mxu2 %v6445_v35  ;;  %6807 = vmatpush.msra.mxu0 %v9529_v49  ;;  %v9520_v57 = vunpack.c.l.bf16 %v9857_v5  ;;  %v9557_v53 = vunpack.c.h.bf16 %v9866_v14  ;;  %v9865_v49 = vld [vmem:[%s13266_s10 + $0x760] sm:$0xff]   ;;  %v9880_v5 = vld [vmem:[%s13266_s10 + $0x7d8] sm:$0xff]  }
0x18ba   : > { %v6402_v7 = vmax.f32 %v6236_v54, 0.0  ;;  %6685 = vmatmul.f32.gmra.mxu3 %v6447_v10  ;;  %6733 = vmatpush.msrb.mxu2 %v9408_v33  ;;  %v9856_v10 = vld [vmem:[%s13266_s10 + $0x718] sm:$0xff]  }
0x18bb   : > { %6705 = vmatmul.f32.vlgmr.msrb.gmra.mxu0 %v6400_v61  ;;  %6791 = vmatpush.msrb.mxu3 %v9472_v48  ;;  %v9621_v61 = vunpack.c.h.bf16 %v9882_v29 }
0x18bc   : > { %6763 = vmatmul.f32.vlgmr.msra.gmra.mxu1 %v6402_v7  ;;  %v6206_v28 = vpop.f32.mrf.mxu2  ;;  %6834 = vmatpush.msra.mxu2 %v9565_v43 }
0x18bd   : > { %v6207_v17 = vadd.f32 %v6206_v28, %v12603_v16  ;;  %v6264_v18 = vpop.f32.mrf.mxu3  ;;  %6865 = vmatpush.msrb.mxu1 %v9593_v44  ;;  %6892 = vmatpush.msra.mxu3 %v9629_v52  ;;  %v9517_v44 = vunpack.c.h.bf16 %v9856_v10  ;;  %v9556_v52 = vunpack.c.l.bf16 %v9866_v14  ;;  %v9613_v14 = vunpack.c.h.bf16 %v9880_v5 }
0x18be   : > { %v6265_v25 = vadd.f32 %v6264_v18, %v12607_v59  ;;  %v6180_v30 = vpop.f32.mrf.mxu0  ;;  %6808 = vmatpush.msra.mxu0 %v9528_v26  ;;  %6835 = vmatpush.msra.mxu2 %v9564_v42  ;;  %v9581_v26 = vunpack.c.h.bf16 %v9872_v21  ;;  %v9620_v42 = vunpack.c.l.bf16 %v9882_v29  ;;  %v9553_v18 = vunpack.c.h.bf16 %v9865_v49 }
0x18bf   : > { %v6401_v8 = vmax.f32 %v6207_v17, 0.0  ;;  %v6181_v12 = vadd.f32 %v6180_v30, %v12572_v55  ;;  %v6238_v34 = vpop.f32.mrf.mxu1  ;;  %6866 = vmatpush.msrb.mxu1 %v9592_v60  ;;  %6893 = vmatpush.msra.mxu3 %v9628_v11  ;;  %v9516_v17 = vunpack.c.l.bf16 %v9856_v10  ;;  %v9871_v60 = vld [vmem:[%s13266_s10 + $0x790] sm:$0xff]   ;;  %v9580_v30 = vunpack.c.l.bf16 %v9872_v21  ;;  %v9853_v10 = vld [vmem:[%s13266_s10 + $0x700] sm:$0xff]  }
0x18c0   : > { %v6403_v38 = vmax.f32 %v6265_v25, 0.0  ;;  %v6239_v3 = vadd.f32 %v6238_v34, %v12578_v50  ;;  %6809 = vmatpush.msra.mxu0 %v9525_v39  ;;  %6836 = vmatpush.msra.mxu2 %v9561_v19  ;;  %v9617_v39 = vunpack.c.h.bf16 %v9881_v20  ;;  %v9552_v34 = vunpack.c.l.bf16 %v9865_v49 }
0x18c1   : > { %v6416_v40 = vmax.f32 %v6181_v12, 0.0  ;;  %6734 = vmatmul.f32.vlgmr.msrb.gmra.mxu2 %v6401_v8  ;;  %6867 = vmatpush.msrb.mxu1 %v9589_v0  ;;  %v9513_v12 = vunpack.c.h.bf16 %v9855_v58  ;;  %v9864_v0 = vld [vmem:[%s13266_s10 + $0x758] sm:$0xff]   ;;  %v9616_v11 = vunpack.c.l.bf16 %v9881_v20 }
0x18c2   : > { %v6418_v63 = vmax.f32 %v6239_v3, 0.0  ;;  %6792 = vmatmul.f32.vlgmr.msrb.gmra.mxu3 %v6403_v38  ;;  %6810 = vmatpush.msra.mxu0 %v9524_v46  ;;  %v9577_v3 = vunpack.c.h.bf16 %v9871_v60  ;;  %v9548_v29 = vunpack.c.l.bf16 %v9864_v0 }
0x18c3   : > { %6708 = vmatmul.f32.gmra.mxu0 %v6416_v40  ;;  %6868 = vmatpush.msrb.mxu1 %v9588_v36  ;;  %v9512_v36 = vunpack.c.l.bf16 %v9855_v58 }
0x18c4   : > { %6766 = vmatmul.f32.gmra.mxu1 %v6418_v63  ;;  %v6209_v24 = vpop.f32.mrf.mxu2  ;;  %6894 = vmatpush.msra.mxu3 %v9625_v45  ;;  %v9549_v45 = vunpack.c.h.bf16 %v9864_v0  ;;  %v9861_v0 = vld [vmem:[%s13266_s10 + $0x740] sm:$0xff]  }
0x18c5   : > { %v6210_v35 = vadd.f32 %v6209_v24, %v12603_v16  ;;  %v6267_v2 = vpop.f32.mrf.mxu3  ;;  %6811 = vmatpush.msra.mxu0 %v9521_v4  ;;  %6837 = vmatpush.msra.mxu2 %v9560_v13  ;;  %v9854_v4 = vld [vmem:[%s13266_s10 + $0x708] sm:$0xff]   ;;  %v9576_v13 = vunpack.c.l.bf16 %v9871_v60 }
0x18c6   : > { %v6268_v15 = vadd.f32 %v6267_v2, %v12607_v59  ;;  %v6183_v6 = vpop.f32.mrf.mxu0  ;;  %6869 = vmatpush.msrb.mxu1 %v9585_v51  ;;  %6895 = vmatpush.msra.mxu3 %v9624_v41  ;;  %v9509_v41 = vunpack.c.h.bf16 %v9854_v4 }
0x18c7   : > { %v6417_v54 = vmax.f32 %v6210_v35, 0.0  ;;  %v6184_v33 = vadd.f32 %v6183_v6, %v12572_v55  ;;  %v6241_v1 = vpop.f32.mrf.mxu1  ;;  %6812 = vmatpush.msra.mxu0 %v9520_v57  ;;  %6838 = vmatpush.msra.mxu2 %v9557_v53  ;;  %v9879_v35 = vld [vmem:[%s13266_s10 + $0x7d0] sm:$0xff]   ;;  %v12684_v6 = vperm.slane %v12561_v32, 4  ;;  %v12687_v53 = vperm.slane %v12561_v32, 6 }
0x18c8   : > { %v6419_v48 = vmax.f32 %v6268_v15, 0.0  ;;  %v6242_v7 = vadd.f32 %v6241_v1, %v12578_v50  ;;  %6870 = vmatpush.msrb.mxu1 %v9584_v22  ;;  %6896 = vmatpush.msra.mxu3 %v9621_v61  ;;  %v9612_v15 = vunpack.c.l.bf16 %v9880_v5  ;;  %v9508_v1 = vunpack.c.l.bf16 %v9854_v4  ;;  %v9869_v61 = vld [vmem:[%s13266_s10 + $0x780] sm:$0xff]  }
0x18c9   : > { %v6432_v43 = vmax.f32 %v6184_v33, 0.0  ;;  %6737 = vmatmul.f32.gmra.mxu2 %v6417_v54  ;;  %6813 = vmatpush.msra.mxu0 %v9517_v44  ;;  %v9609_v49 = vunpack.c.h.bf16 %v9879_v35  ;;  %v9505_v44 = vunpack.c.h.bf16 %v9853_v10 }
0x18ca   : > { %v6434_v28 = vmax.f32 %v6242_v7, 0.0  ;;  %6795 = vmatmul.f32.gmra.mxu3 %v6419_v48  ;;  %6839 = vmatpush.msra.mxu2 %v9556_v52 }
0x18cb   : > { %6711 = vmatmul.f32.gmra.mxu0 %v6432_v43  ;;  %6871 = vmatpush.msrb.mxu1 %v9581_v26  ;;  %v9569_v26 = vunpack.c.h.bf16 %v9869_v61 }
0x18cc   : > { %6769 = vmatmul.f32.gmra.mxu1 %v6434_v28  ;;  %v6212_v25 = vpop.f32.mrf.mxu2  ;;  %6897 = vmatpush.msra.mxu3 %v9620_v42  ;;  %v9878_v42 = vld [vmem:[%s13266_s10 + $0x7c8] sm:$0xff]  }
0x18cd   : > { %v6213_v47 = vadd.f32 %v6212_v25, %v12603_v16  ;;  %v6270_v8 = vpop.f32.mrf.mxu3  ;;  %6814 = vmatpush.msra.mxu0 %v9516_v17  ;;  %6840 = vmatpush.msra.mxu2 %v9553_v18  ;;  %v9504_v18 = vunpack.c.l.bf16 %v9853_v10  ;;  %v12706_v25 = vperm.slane %v12561_v32, 5 }
0x18ce   : > { %v6271_v31 = vadd.f32 %v6270_v8, %v12607_v59  ;;  %v6186_v38 = vpop.f32.mrf.mxu0  ;;  %6872 = vmatpush.msrb.mxu1 %v9580_v30  ;;  %6898 = vmatpush.msra.mxu3 %v9617_v39  ;;  %v12709_v30 = vperm.slane %v12561_v32, 7  ;;  %v9568_v39 = vunpack.c.l.bf16 %v9869_v61 }
0x18cf   : > { %v6433_v40 = vmax.f32 %v6213_v47, 0.0  ;;  %v6187_v46 = vadd.f32 %v6186_v38, %v12572_v55  ;;  %v6244_v19 = vpop.f32.mrf.mxu1  ;;  %6815 = vmatpush.msra.mxu0 %v9513_v12  ;;  %6841 = vmatpush.msra.mxu2 %v9552_v34  ;;  %v9870_v55 = vld [vmem:[%s13266_s10 + $0x788] sm:$0xff]   ;;  %v9605_v47 = vunpack.c.h.bf16 %v9878_v42 }
0x18d0   : > { %v6435_v62 = vmax.f32 %v6271_v31, 0.0  ;;  %v6245_v63 = vadd.f32 %v6244_v19, %v12578_v50  ;;  %6873 = vmatpush.msrb.mxu1 %v9577_v3  ;;  %6899 = vmatpush.msra.mxu3 %v9616_v11  ;;  %v9863_v50 = vld [vmem:[%s13266_s10 + $0x750] sm:$0xff]   ;;  %v9573_v57 = vunpack.c.h.bf16 %v9870_v55  ;;  %v9572_v7 = vunpack.c.l.bf16 %v9870_v55  ;;  %v9877_v31 = vld [vmem:[%s13266_s10 + $0x7c0] sm:$0xff]  }
0x18d1   : > { %v6448_v24 = vmax.f32 %v6187_v46, 0.0  ;;  %6740 = vmatmul.f32.gmra.mxu2 %v6433_v40  ;;  %6816 = vmatpush.msra.mxu0 %v9512_v36  ;;  %v9545_v22 = vunpack.c.h.bf16 %v9863_v50  ;;  %v9544_v52 = vunpack.c.l.bf16 %v9863_v50  ;;  %v9604_v3 = vunpack.c.l.bf16 %v9878_v42 }
0x18d2   : > { %v6450_v51 = vmax.f32 %v6245_v63, 0.0  ;;  %6798 = vmatmul.f32.gmra.mxu3 %v6435_v62  ;;  %6842 = vmatpush.msra.mxu2 %v9549_v45  ;;  %v9537_v19 = vunpack.c.h.bf16 %v9861_v0  ;;  %v9601_v62 = vunpack.c.h.bf16 %v9877_v31  ;;  %v9536_v45 = vunpack.c.l.bf16 %v9861_v0 }
0x18d3   : > { %6874 = vmatpush.msrb.mxu1 %v9576_v13  ;;  %6900 = vmatpush.msra.mxu3 %v9613_v14  ;;  %v9600_v4 = vunpack.c.l.bf16 %v9877_v31 }
0x18d4   : > { %v6215_v2 = vpop.f32.mrf.mxu2  ;;  %6714 = vmatmul.f32.gmra.mxu0 %v6448_v24  ;;  %6772 = vmatmul.f32.gmra.mxu1 %v6450_v51 }
0x18d5   : > { %v6216_v54 = vadd.f32 %v6215_v2, %v12603_v16  ;;  %v6273_v33 = vpop.f32.mrf.mxu3  ;;  %6817 = vmatpush.msra.mxu0 %v9509_v41  ;;  %6843 = vmatpush.msra.mxu2 %v9548_v29  ;;  %v9862_v16 = vld [vmem:[%s13266_s10 + $0x748] sm:$0xff]  }
0x18d6   : > { %v6274_v21 = vadd.f32 %v6273_v33, %v12607_v59  ;;  %v6293_v48 = vpop.f32.mrf.mxu0  ;;  %6875 = vmatpush.msrb.mxu1 %v9573_v57  ;;  %6901 = vmatpush.msra.mxu3 %v9612_v15  ;;  %v9608_v59 = vunpack.c.l.bf16 %v9879_v35  ;;  %v9541_v60 = vunpack.c.h.bf16 %v9862_v16  ;;  %v9540_v38 = vunpack.c.l.bf16 %v9862_v16 }
0x18d7   : > { %v6351_v43 = vpop.f32.mrf.mxu1  ;;  %v6294_v20 = vadd.f32 %v6293_v48, %v12684_v6  ;;  %v6449_v58 = vmax.f32 %v6216_v54, 0.0  ;;  %6818 = vmatpush.msra.mxu0 %v9508_v1  ;;  %6844 = vmatpush.msra.mxu2 %v9545_v22 }
0x18d8   : > { %v6352_v28 = vadd.f32 %v6351_v43, %v12687_v53  ;;  %v6451_v17 = vmax.f32 %v6274_v21, 0.0  ;;  %6876 = vmatpush.msrb.mxu1 %v9572_v7  ;;  %6902 = vmatpush.msra.mxu3 %v9609_v49 }
0x18d9   : > { %6819 = vmatpush.msra.mxu0 %v9505_v44  ;;  %6845 = vmatpush.msra.mxu2 %v9544_v52  ;;  %v6404_v8 = vmax.f32 %v6294_v20, 0.0 }
0x18da   : > { %v6406_v12 = vmax.f32 %v6352_v28, 0.0  ;;  %6877 = vmatpush.msrb.mxu1 %v9569_v26  ;;  %6903 = vmatpush.msra.mxu3 %v9608_v59 }
0x18db   : > { %6743 = vmatmul.f32.gmra.mxu2 %v6449_v58  ;;  %6801 = vmatmul.f32.gmra.mxu3 %v6451_v17 }
0x18dc   : > { %v6322_v34 = vpop.f32.mrf.mxu2  ;;  %6820 = vmatpush.msra.mxu0 %v9504_v18  ;;  %6846 = vmatpush.msra.mxu2 %v9541_v60  ;;  %v12734_v18 = vld [vmem:[%s13263_s7 + $0x8] sm:$0xff] }
0x18dd   : > { %v6380_v32 = vpop.f32.mrf.mxu3  ;;  %v6323_v11 = vadd.f32 %v6322_v34, %v12706_v25  ;;  %6878 = vmatpush.msrb.mxu1 %v9568_v39  ;;  %6904 = vmatpush.msra.mxu3 %v9605_v47 }
0x18de   : > { %v6381_v5 = vadd.f32 %v6380_v32, %v12709_v30  ;;  %v6296_v40 = vpop.f32.mrf.mxu0  ;;  %6821 = vmatmul.f32.vlgmr.msra.gmra.mxu0 %v6404_v8  ;;  %6879 = vmatmul.f32.vlgmr.msrb.gmra.mxu1 %v6406_v12 }
0x18df   : > { %v6354_v46 = vpop.f32.mrf.mxu1  ;;  %v6297_v63 = vadd.f32 %v6296_v40, %v12684_v6  ;;  %6847 = vmatpush.msra.mxu2 %v9540_v38  ;;  %6905 = vmatpush.msra.mxu3 %v9604_v3  ;;  %v6405_v13 = vmax.f32 %v6323_v11, 0.0 }
0x18e0   : > { %v6355_v36 = vadd.f32 %v6354_v46, %v12687_v53  ;;  %v6407_v14 = vmax.f32 %v6381_v5, 0.0 }
0x18e1   : > { %6848 = vmatpush.msra.mxu2 %v9537_v19  ;;  %6906 = vmatpush.msra.mxu3 %v9601_v62  ;;  %v6420_v55 = vmax.f32 %v6297_v63, 0.0 }
0x18e2   : > { %v6422_v24 = vmax.f32 %v6355_v36, 0.0 }
0x18e3   : > { %6849 = vmatpush.msra.mxu2 %v9536_v45  ;;  %6907 = vmatpush.msra.mxu3 %v9600_v4 }
0x18e4   : > { %v6325_v51 = vpop.f32.mrf.mxu2  ;;  %6850 = vmatmul.f32.vlgmr.msra.gmra.mxu2 %v6405_v13  ;;  %6908 = vmatmul.f32.vlgmr.msra.gmra.mxu3 %v6407_v14 }
0x18e5   : > { %v6383_v50 = vpop.f32.mrf.mxu3  ;;  %v6326_v41 = vadd.f32 %v6325_v51, %v12706_v25 }
0x18e6   : > { %v6384_v29 = vadd.f32 %v6383_v50, %v12709_v30  ;;  %v6299_v35 = vpop.f32.mrf.mxu0  ;;  %6824 = vmatmul.f32.gmra.mxu0 %v6420_v55  ;;  %6882 = vmatmul.f32.gmra.mxu1 %v6422_v24 }
0x18e7   : > { %v6357_v2 = vpop.f32.mrf.mxu1  ;;  %v6300_v57 = vadd.f32 %v6299_v35, %v12684_v6  ;;  %v6421_v10 = vmax.f32 %v6326_v41, 0.0 }
0x18e8   : > { %v6358_v15 = vadd.f32 %v6357_v2, %v12687_v53  ;;  %v6423_v54 = vmax.f32 %v6384_v29, 0.0 }
0x18e9   : > { %v6436_v33 = vmax.f32 %v6300_v57, 0.0 }
0x18ea   : > { %v6438_v1 = vmax.f32 %v6358_v15, 0.0 }
0x18ec   : > { %v6328_v22 = vpop.f32.mrf.mxu2  ;;  %6853 = vmatmul.f32.gmra.mxu2 %v6421_v10  ;;  %6911 = vmatmul.f32.gmra.mxu3 %v6423_v54 }
0x18ed   : > { %v6386_v61 = vpop.f32.mrf.mxu3  ;;  %v6329_v21 = vadd.f32 %v6328_v22, %v12706_v25 }
0x18ee   : > { %v6387_v48 = vadd.f32 %v6386_v61, %v12709_v30  ;;  %v6302_v7 = vpop.f32.mrf.mxu0  ;;  %6827 = vmatmul.f32.gmra.mxu0 %v6436_v33  ;;  %6885 = vmatmul.f32.gmra.mxu1 %v6438_v1 }
0x18ef   : > { %v6360_v49 = vpop.f32.mrf.mxu1  ;;  %v6303_v43 = vadd.f32 %v6302_v7, %v12684_v6  ;;  %v6437_v52 = vmax.f32 %v6329_v21, 0.0  ;;  %v6456_v6 = vperm.slane %v12734_v18, 3 }
0x18f0   : > { %v6361_v44 = vadd.f32 %v6360_v49, %v12687_v53  ;;  %v6439_v16 = vmax.f32 %v6387_v48, 0.0 }
0x18f1   : > { %v6452_v20 = vmax.f32 %v6303_v43, 0.0 }
0x18f2   : > { %v6454_v28 = vmax.f32 %v6361_v44, 0.0 }
0x18f4   : > { %v6331_v26 = vpop.f32.mrf.mxu2  ;;  %6856 = vmatmul.f32.gmra.mxu2 %v6437_v52  ;;  %6914 = vmatmul.f32.gmra.mxu3 %v6439_v16 }
0x18f5   : > { %v6389_v59 = vpop.f32.mrf.mxu3  ;;  %v6332_v42 = vadd.f32 %v6331_v26, %v12706_v25 }
0x18f6   : > { %v6390_v58 = vadd.f32 %v6389_v59, %v12709_v30  ;;  %v6474_v17 = vpop.f32.mrf.mxu0  ;;  %6830 = vmatmul.f32.gmra.mxu0 %v6452_v20  ;;  %6888 = vmatmul.f32.gmra.mxu1 %v6454_v28 }
0x18f7   : > { %v6532_v53 = vpop.f32.mrf.mxu1  ;;  %v6453_v60 = vmax.f32 %v6332_v42, 0.0  ;;  %v6475_v47 = vadd.f32 %v6474_v17, %v6456_v6 }
0x18f8   : > { %v6455_v39 = vmax.f32 %v6390_v58, 0.0 }
0x18fc   : > { %v6503_v8 = vpop.f32.mrf.mxu2  ;;  %6859 = vmatmul.f32.gmra.mxu2 %v6453_v60  ;;  %6917 = vmatmul.f32.gmra.mxu3 %v6455_v39 }
0x18fd   : > { %v6504_v12 = vadd.f32 %v6503_v8, %v6475_v47  ;;  %v6561_v34 = vpop.f32.mrf.mxu3 }
0x18fe   : > { %v6477_v25 = vpop.f32.mrf.mxu0 }
0x18ff   : > { %v6533_v30 = vadd.f32 %v6532_v53, %v6504_v12  ;;  %v6535_v0 = vpop.f32.mrf.mxu1  ;;  %v6478_v32 = vadd.f32 %v6477_v25, %v6456_v6 }
0x1901   : > { %v6562_v31 = vadd.f32 %v6561_v34, %v6533_v30 }
0x1904   : > { %v6506_v38 = vpop.f32.mrf.mxu2 }
0x1905   : > { %v6507_v3 = vadd.f32 %v6506_v38, %v6478_v32  ;;  %v6564_v11 = vpop.f32.mrf.mxu3 }
0x1906   : > { %v6480_v40 = vpop.f32.mrf.mxu0 }
0x1907   : > { %v6536_v5 = vadd.f32 %v6535_v0, %v6507_v3  ;;  %v6538_v19 = vpop.f32.mrf.mxu1  ;;  %v6481_v62 = vadd.f32 %v6480_v40, %v6456_v6 }
0x1909   : > { %v6565_v46 = vadd.f32 %v6564_v11, %v6536_v5 }
0x190c   : > { %v6509_v63 = vpop.f32.mrf.mxu2 }
0x190d   : > { %v6510_v36 = vadd.f32 %v6509_v63, %v6481_v62  ;;  %v6567_v4 = vpop.f32.mrf.mxu3 }
0x190f   : > { %v6539_v45 = vadd.f32 %v6538_v19, %v6510_v36 }
0x1910   : > { %v6483_v13 = vpop.f32.mrf.mxu0 }
0x1911   : > { %v6568_v14 = vadd.f32 %v6567_v4, %v6539_v45  ;;  %v6541_v55 = vpop.f32.mrf.mxu1  ;;  %v6484_v50 = vadd.f32 %v6483_v13, %v6456_v6 }
0x1918   : > { %v6590_v24 = vpop.f32.mrf.mxu0 }
0x1919   : > { %v6648_v51 = vpop.f32.mrf.mxu1  ;;  %v6591_v53 = vadd.f32 %v6590_v24, %v6562_v31 }
0x191c   : > { %v6512_v41 = vpop.f32.mrf.mxu2 }
0x191d   : > { %v6513_v29 = vadd.f32 %v6512_v41, %v6484_v50  ;;  %v6570_v35 = vpop.f32.mrf.mxu3 }
0x191f   : > { %v6542_v2 = vadd.f32 %v6541_v55, %v6513_v29 }
0x1920   : > { %v6593_v57 = vpop.f32.mrf.mxu0 }
0x1921   : > { %v6571_v15 = vadd.f32 %v6570_v35, %v6542_v2  ;;  %v6651_v10 = vpop.f32.mrf.mxu1  ;;  %v6594_v25 = vadd.f32 %v6593_v57, %v6565_v46 }
0x1924   : > { %v6619_v54 = vpop.f32.mrf.mxu2 }
0x1925   : > { %v6677_v33 = vpop.f32.mrf.mxu3  ;;  %v6620_v39 = vadd.f32 %v6619_v54, %v6591_v53 }
0x1927   : > { %v6649_v8 = vadd.f32 %v6648_v51, %v6620_v39 }
0x1928   : > { %v6596_v1 = vpop.f32.mrf.mxu0 }
0x1929   : > { %v6654_v22 = vpop.f32.mrf.mxu1  ;;  %v6678_v30 = vadd.f32 %v6677_v33, %v6649_v8  ;;  %v6597_v40 = vadd.f32 %v6596_v1, %v6568_v14 }
0x192c   : > { %v6622_v61 = vpop.f32.mrf.mxu2 }
0x192d   : > { %v6680_v21 = vpop.f32.mrf.mxu3  ;;  %v6623_v0 = vadd.f32 %v6622_v61, %v6594_v25 }
0x192f   : > { %v6652_v3 = vadd.f32 %v6651_v10, %v6623_v0 }
0x1930   : > { %v6599_v48 = vpop.f32.mrf.mxu0 }
0x1931   : > { %v6657_v7 = vpop.f32.mrf.mxu1  ;;  %v6681_v63 = vadd.f32 %v6680_v21, %v6652_v3  ;;  %v6600_v51 = vadd.f32 %v6599_v48, %v6571_v15 }
0x1934   : > { %v6625_v49 = vpop.f32.mrf.mxu2 }
0x1935   : > { %v6683_v43 = vpop.f32.mrf.mxu3  ;;  %v6626_v36 = vadd.f32 %v6625_v49, %v6597_v40 }
0x1937   : > { %v6655_v13 = vadd.f32 %v6654_v22, %v6626_v36 }
0x1938   : > { %v6706_v44 = vpop.f32.mrf.mxu0 }
0x1939   : > { %v6764_v16 = vpop.f32.mrf.mxu1  ;;  %v6707_v38 = vadd.f32 %v6706_v44, %v6678_v30  ;;  %v6684_v35 = vadd.f32 %v6683_v43, %v6655_v13 }
0x193c   : > { %v6628_v52 = vpop.f32.mrf.mxu2 }
0x193d   : > { %v6686_v20 = vpop.f32.mrf.mxu3  ;;  %v6629_v2 = vadd.f32 %v6628_v52, %v6600_v51 }
0x193f   : > { %v6658_v33 = vadd.f32 %v6657_v7, %v6629_v2 }
0x1940   : > { %v6709_v28 = vpop.f32.mrf.mxu0 }
0x1941   : > { %v6767_v42 = vpop.f32.mrf.mxu1  ;;  %v6710_v45 = vadd.f32 %v6709_v28, %v6681_v63  ;;  %v6687_v48 = vadd.f32 %v6686_v20, %v6658_v33  ;;  %v10150_v33 = vld [vmem:[%s13261_s5 + $0x3] ss:$0 sm:$0xff] }
0x1944   : > { %v6735_v26 = vpop.f32.mrf.mxu2 }
0x1945   : > { %v6793_v59 = vpop.f32.mrf.mxu3  ;;  %v6736_v11 = vadd.f32 %v6735_v26, %v6707_v38 }
0x1947   : > { %v6765_v31 = vadd.f32 %v6764_v16, %v6736_v11 }
0x1948   : > { %v6712_v58 = vpop.f32.mrf.mxu0 }
0x1949   : > { %v6770_v60 = vpop.f32.mrf.mxu1  ;;  %v6794_v55 = vadd.f32 %v6793_v59, %v6765_v31  ;;  %v6713_v14 = vadd.f32 %v6712_v58, %v6684_v35 }
0x194c   : > { %v6738_v17 = vpop.f32.mrf.mxu2 }
0x194d   : > { %v6796_v6 = vpop.f32.mrf.mxu3  ;;  %v6739_v24 = vadd.f32 %v6738_v17, %v6710_v45 }
0x194f   : > { %v6768_v57 = vadd.f32 %v6767_v42, %v6739_v24 }
0x1951   : > { %v6715_v47 = vpop.f32.mrf.mxu0  ;;  %v6773_v32 = vpop.f32.mrf.mxu1  ;;  %v6797_v1 = vadd.f32 %v6796_v6, %v6768_v57 }
0x1952   : > { %v6716_v59 = vadd.f32 %v6715_v47, %v6687_v48  ;;  %v13333_v48 = vld [vmem:[#allocation3_spill] sm:$0xff] }
0x1954   : > { %v6741_v12 = vpop.f32.mrf.mxu2 }
0x1955   : > { %v6799_v34 = vpop.f32.mrf.mxu3  ;;  %v6742_v61 = vadd.f32 %v6741_v12, %v6713_v14 }
0x1957   : > { %v6771_v28 = vadd.f32 %v6770_v60, %v6742_v61 }
0x1959   : > { %v6800_v58 = vadd.f32 %v6799_v34, %v6771_v28  ;;  %v806_v28 = vadd.f32 %v10150_v33, %v13333_v48  ;;  %v8569_v48 = vld [vmem:[%s13260_s4 + $0xf0] sm:$0xff] }
0x195b   : > { %v6822_v5 = vpop.f32.mrf.mxu0  ;;  %v6880_v4 = vpop.f32.mrf.mxu1 }
0x195c   : > { %v6823_v46 = vadd.f32 %v6822_v5, %v6794_v55 }
0x195e   : > { %v6744_v19 = vpop.f32.mrf.mxu2  ;;  %v6802_v62 = vpop.f32.mrf.mxu3 }
0x195f   : > { %v6745_v7 = vadd.f32 %v6744_v19, %v6716_v59  ;;  %v8567_v59 = vld [vmem:[%s13260_s4 + $0xd0] sm:$0xff] }
0x1963   : > { %v6825_v50 = vpop.f32.mrf.mxu0  ;;  %v6883_v49 = vpop.f32.mrf.mxu1 }
0x1964   : > { %v6826_v44 = vadd.f32 %v6825_v50, %v6797_v1  ;;  %v13331_v1 = vld [vmem:[#allocation5_spill] sm:$0xff] }
0x1965   : > { %v812_v61 = vadd.f32 %v10150_v33, %v13331_v1 }
0x1967   : > { %v6851_v41 = vpop.f32.mrf.mxu2  ;;  %v6909_v29 = vpop.f32.mrf.mxu3 }
0x1968   : > { %v6852_v10 = vadd.f32 %v6851_v41, %v6823_v46 }
0x196a   : > { %v6881_v54 = vadd.f32 %v6880_v4, %v6852_v10 }
0x196b   : > { %v6828_v52 = vpop.f32.mrf.mxu0  ;;  %v6886_v39 = vpop.f32.mrf.mxu1 }
0x196c   : > { %v6910_v21 = vadd.f32 %v6909_v29, %v6881_v54  ;;  %v6829_v6 = vadd.f32 %v6828_v52, %v6800_v58  ;;  %v8568_v52 = vld [vmem:[%s13260_s4 + $0xd8] sm:$0xff]  ;;  %v8565_v58 = vld [vmem:[%s13260_s4 + $0xc0] sm:$0xff] }
0x196d   : > { %7058 = vmatpush.msrb.mxu0 %v8568_v52 }
0x196e   : > { %v6921_v22 = vadd.f32 %v6910_v21, %v11985_v27  ;;  %v6774_v27 = vadd.f32 %v6773_v32, %v6745_v7  ;;  %v817_v21 = vld [vmem:[%s10399_s30 + $0x18] sm:$0xff] }
0x196f   : > { %v6854_v16 = vpop.f32.mrf.mxu2  ;;  %v6912_v15 = vpop.f32.mrf.mxu3  ;;  %7059 = vmatpush.msrb.mxu0 %v8567_v59 }
0x1970   : > { %v6855_v26 = vadd.f32 %v6854_v16, %v6826_v44  ;;  %v6925_v43 = vsel %vm717_vm3, %v6921_v22, 0.0  ;;  %v6803_v0 = vadd.f32 %v6802_v62, %v6774_v27  ;;  %v821_v16 = vadd.f32 %v817_v21, %v812_v61 }
0x1971   : > { %6926 = vadd.xlane.f32.xlu0 %v6925_v43 }
0x1972   : > { %v6884_v42 = vadd.f32 %v6883_v49, %v6855_v26  ;;  %v13332_v49 = vld [vmem:[#allocation4_spill] sm:$0xff]  ;;  %v815_v26 = vld [vmem:[%s10399_s30 + $0x8] sm:$0xff] }
0x1973   : > { %v6831_v30 = vpop.f32.mrf.mxu0  ;;  %v809_v44 = vadd.f32 %v10150_v33, %v13332_v49  ;;  %v819_v43 = vadd.f32 %v815_v26, %v806_v28  ;;  %v9978_v28 = vld [vmem:[%s13261_s5 + $0x4] ss:$0 sm:$0xff] }
0x1974   : > { %v6913_v17 = vadd.f32 %v6912_v15, %v6884_v42  ;;  %v6832_v47 = vadd.f32 %v6831_v30, %v6803_v0  ;;  %v8566_v42 = vld [vmem:[%s13260_s4 + $0xc8] sm:$0xff] }
0x1975   : > { %7060 = vmatpush.msrb.mxu0 %v8566_v42 }
0x1976   : > { %v6922_v53 = vadd.f32 %v6913_v17, %v12000_v23  ;;  %v6889_v23 = vpop.f32.mrf.mxu1 }
0x1977   : > { %v6857_v8 = vpop.f32.mrf.mxu2  ;;  %v6915_v60 = vpop.f32.mrf.mxu3  ;;  %7061 = vmatpush.msrb.mxu0 %v8565_v58 }
0x1978   : > { %v6858_v12 = vadd.f32 %v6857_v8, %v6829_v6  ;;  %v6928_v20 = vsel %vm717_vm3, %v6922_v53, 0.0 }
0x1979   : > { %6929 = vadd.xlane.f32.xlu2 %v6928_v20 }
0x197a   : > { %v6887_v25 = vadd.f32 %v6886_v39, %v6858_v12 }
0x197c   : > { %v6916_v38 = vadd.f32 %v6915_v60, %v6887_v25 }
0x197e   : > { %v6923_v34 = vadd.f32 %v6916_v38, %v12013_v37 }
0x197f   : > { %v6860_v3 = vpop.f32.mrf.mxu2  ;;  %v6918_v32 = vpop.f32.mrf.mxu3 }
0x1980   : > { %v6861_v11 = vadd.f32 %v6860_v3, %v6832_v47  ;;  %v6931_v5 = vsel %vm717_vm3, %v6923_v34, 0.0 }
0x1981   : > { %6932 = vadd.xlane.f32.xlu1 %v6931_v5 }
0x1982   : > { %v6890_v40 = vadd.f32 %v6889_v23, %v6861_v11  ;;  %v7013_v11 = vperm.slane %v12734_v18, 4 }
0x1984   : > { %v6919_v19 = vadd.f32 %v6918_v32, %v6890_v40  ;;  %v7018_v40 = vperm.slane %v12734_v18, 5 }
0x1986   : > { %v6924_v63 = vadd.f32 %v6919_v19, %v12051_v9 }
0x1988   : > { %v6934_v36 = vsel %vm717_vm3, %v6924_v63, 0.0 }
0x1989   : > { %6935 = vadd.xlane.f32.xlu0 %v6934_v36 }
0x19e4   : > { %v6927_v31 = vpop.xlane.xlu0 %6926 }
0x19e5   : > { %v6937_v62 = vmul.f32 %v6927_v31, %v13316_v56 }
0x19e7   : > { %v12746_v45 = vsub.f32 %v6921_v22, %v6937_v62  ;;  %v816_v22 = vld [vmem:[%s10399_s30 + $0x10] sm:$0xff] }
0x19e8   : > { %v820_v15 = vadd.f32 %v816_v22, %v809_v44 }
0x19e9   : > { %v6945_v37 = vmul.f32 %v12746_v45, %v12746_v45 }
0x19eb   : > { %v6949_v4 = vsel %vm717_vm3, %v6945_v37, 0.0 }
0x19ec   : > { %v6930_v13 = vpop.xlane.xlu2 %6929  ;;  %6950 = vadd.xlane.f32.xlu2 %v6949_v4 }
0x19ed   : > { %v6938_v55 = vmul.f32 %v6930_v13, %v13316_v56 }
0x19ef   : > { %v12752_v24 = vsub.f32 %v6922_v53, %v6938_v55 }
0x19f1   : > { %v6946_v9 = vmul.f32 %v12752_v24, %v12752_v24 }
0x19f3   : > { %v6952_v51 = vsel %vm717_vm3, %v6946_v9, 0.0 }
0x19f4   : > { %6953 = vadd.xlane.f32.xlu1 %v6952_v51  ;;  %v6933_v46 = vpop.xlane.xlu1 %6932 }
0x19f5   : > { %v6939_v50 = vmul.f32 %v6933_v46, %v13316_v56 }
0x19f7   : > { %v12758_v41 = vsub.f32 %v6923_v34, %v6939_v50 }
0x19f9   : > { %v6947_v29 = vmul.f32 %v12758_v41, %v12758_v41 }
0x19fb   : > { %v6955_v35 = vsel %vm717_vm3, %v6947_v29, 0.0 }
0x19fc   : > { %v6936_v2 = vpop.xlane.xlu0 %6935  ;;  %6956 = vadd.xlane.f32.xlu0 %v6955_v35 }
0x19fd   : > { %v6940_v57 = vmul.f32 %v6936_v2, %v13316_v56 }
0x19ff   : > { %v12764_v10 = vsub.f32 %v6924_v63, %v6940_v57 }
0x1a01   : > { %v6948_v14 = vmul.f32 %v12764_v10, %v12764_v10 }
0x1a03   : > { %v6958_v54 = vsel %vm717_vm3, %v6948_v14, 0.0 }
0x1a04   : > { %6959 = vadd.xlane.f32.xlu2 %v6958_v54 }
0x1a0d   : > { %7139 = vrot.lane.b32.xlu1 %v821_v16, %s13329_s28 }
0x1a10   : > { %7137 = vrot.lane.b32.xlu0 %v820_v15, %s13329_s28 }
0x1a1c   : > { %7135 = vrot.lane.b32.xlu2 %v819_v43, %s13329_s28 }
0x1a5f   : > { %v6951_v7 = vpop.xlane.xlu2 %6950 }
0x1a60   : > { %v6961_v17 = vmul.f32 %v6951_v7, %v13316_v56 }
0x1a62   : > { %v6965_v6 = vadd.f32 1e-05, %v6961_v17 }
0x1a64   : > { %10134 = vrsqrt.f32 %v6965_v6  ;;  %vm6975_vm1 = vweird.f32 %v6965_v6 }
0x1a67   : > { %v6954_v53 = vpop.xlane.xlu1 %6953 }
0x1a68   : > { %v6962_v39 = vmul.f32 %v6954_v53, %v13316_v56 }
0x1a6a   : > { %v10135_v8 = vpop.eup %10134  ;;  %v6966_v27 = vadd.f32 1e-05, %v6962_v39 }
0x1a6b   : > { %v6970_v12 = vmul.f32 %v10135_v8, %v6965_v6  ;;  %vm6976_vm15 = vweird.f32 %v10135_v8 }
0x1a6c   : > { %10136 = vrsqrt.f32 %v6966_v27  ;;  %vm6977_vm6 = vmor %vm6975_vm1, %vm6976_vm15  ;;  %vm6985_vm9 = vweird.f32 %v6966_v27 }
0x1a6d   : > { %v6971_v20 = vmul.f32 %v10135_v8, %v6970_v12 }
0x1a6f   : > { %v6972_v60 = vmul.f32 0.5, %v6971_v20  ;;  %v6957_v25 = vpop.xlane.xlu0 %6956 }
0x1a70   : > { %v6963_v30 = vmul.f32 %v6957_v25, %v13316_v56  ;;  %v9979_v25 = vld [vmem:[%s13261_s5 + $0x5] ss:$0 sm:$0xff] }
0x1a71   : > { %v6973_v0 = vsub.f32 1.5, %v6972_v60 }
0x1a72   : > { %v10137_v38 = vpop.eup %10136  ;;  %v6967_v47 = vadd.f32 1e-05, %v6963_v30 }
0x1a73   : > { %v6974_v34 = vmul.f32 %v10135_v8, %v6973_v0  ;;  %v6980_v3 = vmul.f32 %v10137_v38, %v6966_v27  ;;  %vm6986_vm7 = vweird.f32 %v10137_v38 }
0x1a74   : > { %10138 = vrsqrt.f32 %v6967_v47  ;;  %vm6987_vm10 = vmor %vm6985_vm9, %vm6986_vm7  ;;  %vm6995_vm12 = vweird.f32 %v6967_v47 }
0x1a75   : > { %v6978_v5 = vsel %vm6977_vm6, %v10135_v8, %v6974_v34  ;;  %v6981_v23 = vmul.f32 %v10137_v38, %v6980_v3 }
0x1a76   : > { %v7009_v32 = vmul.f32 %v6978_v5, %v12746_v45  ;;  %v13334_v5 = vld [vmem:[#allocation2_spill] sm:$0xff] }
0x1a77   : > { %v6982_v19 = vmul.f32 0.5, %v6981_v23  ;;  %v6960_v63 = vpop.xlane.xlu2 %6959  ;;  %v7174_v23 = vld [vmem:[%s13267_s11 + $0x28] sm:$0xff] }
0x1a78   : > { %v7014_v36 = vmul.f32 %v7013_v11, %v7009_v32  ;;  %v6964_v31 = vmul.f32 %v6960_v63, %v13316_v56  ;;  %v12838_v32 = vld [vmem:[%s13267_s11 + $0x18] sm:$0xff] }
0x1a79   : > { %v6983_v62 = vsub.f32 1.5, %v6982_v19  ;;  %v7227_v19 = vunpack.c.l.bf16 %v7174_v23 }
0x1a7a   : > { %v10139_v37 = vpop.eup %10138  ;;  %v7019_v4 = vadd.f32 %v7018_v40, %v7014_v36  ;;  %v6968_v13 = vadd.f32 1e-05, %v6964_v31  ;;  %v12843_v36 = vld [vmem:[%s13267_s11 + $0x58] sm:$0xff] }
0x1a7b   : > { %v6984_v55 = vmul.f32 %v10137_v38, %v6983_v62  ;;  %v6990_v9 = vmul.f32 %v10139_v37, %v6967_v47  ;;  %vm6996_vm11 = vweird.f32 %v10139_v37  ;;  %v7240_v31 = vunpack.c.h.bf16 %v12843_v36  ;;  %7384 = vmatpush.msra.mxu1 %v7227_v19 }
0x1a7c   : > { %10140 = vrsqrt.f32 %v6968_v13  ;;  %8571 = vmatmul.msk.f32.vlgmr.msrb.gmra.mxu0 %vm717_vm3, %v7019_v4  ;;  %vm6997_vm13 = vmor %vm6995_vm12, %vm6996_vm11  ;;  %vm7005_vm14 = vweird.f32 %v6968_v13  ;;  %v7223_v62 = vunpack.c.l.bf16 %v12838_v32  ;;  %vm7370_vm11 = vcmask 392192  }
0x1a7d   : > { %v6988_v18 = vsel %vm6987_vm10, %v10137_v38, %v6984_v55  ;;  %v6991_v51 = vmul.f32 %v10139_v37, %v6990_v9  ;;  %7447 = vmatpush.msrb.mxu3 %v7240_v31  ;;  %v7186_v55 = vld [vmem:[%s13267_s11 + $0x88] sm:$0xff]  ;;  %vm7314_vm10 = vcmask 1047556   ;;  %vm7782_vm12 = vcmask 326656  }
0x1a7e   : > { %v7010_v45 = vmul.f32 %v6988_v18, %v12752_v24  ;;  %v7251_v18 = vunpack.c.l.bf16 %v7186_v55 }
0x1a7f   : > { %v6992_v46 = vmul.f32 0.5, %v6991_v51  ;;  %v7252_v51 = vunpack.c.h.bf16 %v7186_v55 }
0x1a80   : > { %v7015_v50 = vmul.f32 %v7013_v11, %v7010_v45  ;;  %v12865_v45 = vld [vmem:[%s13267_s11 + $0x8] sm:$0xff]  ;;  %7470 = vmatpush.msra.mxu0 %v7251_v18  ;;  %v7193_v18 = vld [vmem:[%s13267_s11 + $0xc0] sm:$0xff] }
0x1a81   : > { %v6993_v29 = vsub.f32 1.5, %v6992_v46  ;;  %v7219_v46 = vunpack.c.l.bf16 %v12865_v45 }
0x1a82   : > { %v10141_v56 = vpop.eup %10140  ;;  %v7020_v35 = vadd.f32 %v7018_v40, %v7015_v50  ;;  %v12871_v50 = vld [vmem:[%s13267_s11 + $0x48] sm:$0xff] }
0x1a83   : > { %v6994_v2 = vmul.f32 %v10139_v37, %v6993_v29  ;;  %v7000_v57 = vmul.f32 %v10141_v56, %v6968_v13  ;;  %vm7006_vm4 = vweird.f32 %v10141_v56  ;;  %v12856_v13 = vld [vmem:[%s13267_s11 + $0x50] sm:$0xff]  ;;  %v7185_v29 = vld [vmem:[%s13267_s11 + $0x80] sm:$0xff] }
0x1a84   : > { %8572 = vmatmul.msk.f32.gmra.mxu0 %vm717_vm3, %v7020_v35  ;;  %vm7007_vm15 = vmor %vm7005_vm14, %vm7006_vm4  ;;  %v7238_v9 = vunpack.c.h.bf16 %v12856_v13  ;;  %v7249_v35 = vunpack.c.l.bf16 %v7185_v29 }
0x1a85   : > { %v6998_v14 = vsel %vm6997_vm13, %v10139_v37, %v6994_v2  ;;  %v7001_v54 = vmul.f32 %v10141_v56, %v7000_v57  ;;  %v12850_v37 = vld [vmem:[%s13267_s11 + $0x10] sm:$0xff]  ;;  %v7250_v2 = vunpack.c.h.bf16 %v7185_v29  ;;  %v12880_v57 = vld [vmem:[%s13267_s11] sm:$0xff]  ;;  %v7138_v29 = vpop.permute.xlu0 %7137 }
0x1a86   : > { %v7011_v33 = vmul.f32 %v6998_v14, %v12758_v41  ;;  %v8570_v41 = vld [vmem:[%s13260_s4 + $0xf8] sm:$0xff]  ;;  %v7221_v4 = vunpack.c.l.bf16 %v12850_v37  ;;  %7448 = vmatpush.msrb.mxu3 %v7238_v9  ;;  %v7217_v14 = vunpack.c.l.bf16 %v12880_v57  ;;  %7471 = vmatpush.msra.mxu0 %v7249_v35  ;;  %v7136_v35 = vpop.permute.xlu2 %7135 }
0x1a87   : > { %v7002_v1 = vmul.f32 0.5, %v7001_v54  ;;  %7114 = vmatpush.msrb.mxu2 %v8570_v41  ;;  %v12886_v54 = vld [vmem:[%s13267_s11 + $0x40] sm:$0xff] }
0x1a88   : > { %v7016_v61 = vmul.f32 %v7013_v11, %v7011_v33  ;;  %v7184_v33 = vld [vmem:[%s13267_s11 + $0x78] sm:$0xff] }
0x1a89   : > { %v7003_v21 = vsub.f32 1.5, %v7002_v1  ;;  %7115 = vmatpush.msrb.mxu2 %v8569_v48  ;;  %v7228_v1 = vunpack.c.h.bf16 %v7174_v23  ;;  %v12904_v48 = vld [vmem:[%s13267_s11 + $0x30] sm:$0xff] }
0x1a8a   : > { %v7021_v24 = vadd.f32 %v7018_v40, %v7016_v61  ;;  %v7234_v61 = vunpack.c.h.bf16 %v12886_v54 }
0x1a8b   : > { %v7004_v49 = vmul.f32 %v10141_v56, %v7003_v21  ;;  %7490 = vmatpush.msra.mxu2 %v7252_v51  ;;  %v7247_v21 = vunpack.c.l.bf16 %v7184_v33  ;;  %v7265_v51 = vunpack.c.l.bf16 %v7193_v18 }
0x1a8c   : > { %8573 = vmatmul.msk.f32.gmra.mxu0 %vm717_vm3, %v7021_v24  ;;  %v7248_v24 = vunpack.c.h.bf16 %v7184_v33 }
0x1a8d   : > { %v7008_v44 = vsel %vm7007_vm15, %v10141_v56, %v7004_v49  ;;  %v7236_v56 = vunpack.c.h.bf16 %v12871_v50  ;;  %7491 = vmatpush.msra.mxu2 %v7250_v2  ;;  %v12895_v49 = vld [vmem:[%s13267_s11 + $0x38] sm:$0xff]  ;;  %7472 = vmatpush.msra.mxu0 %v7247_v21  ;;  %v13335_v2 = vld [vmem:[#allocation10_spill] sm:$0xff] }
0x1a8e   : > { %v7012_v22 = vmul.f32 %v7008_v44, %v12764_v10  ;;  %v7183_v44 = vld [vmem:[%s13267_s11 + $0x70] sm:$0xff] }
0x1a8f   : > { %7449 = vmatpush.msrb.mxu3 %v7236_v56  ;;  %v7246_v41 = vunpack.c.h.bf16 %v7183_v44  ;;  %7492 = vmatpush.msra.mxu2 %v7248_v24  ;;  %v9976_v56 = vld [vmem:[%s13261_s5 + $0x1] ss:$0 sm:$0xff] }
0x1a90   : > { %v7017_v16 = vmul.f32 %v7013_v11, %v7012_v22 }
0x1a91   : > { %7450 = vmatpush.msrb.mxu3 %v7234_v61  ;;  %7493 = vmatpush.msra.mxu2 %v7246_v41  ;;  %v13336_v61 = vld [vmem:[#allocation7_spill] sm:$0xff] }
0x1a92   : > { %v7022_v15 = vadd.f32 %v7018_v40, %v7017_v16  ;;  %v7173_v40 = vld [vmem:[%s13267_s11 + $0x20] sm:$0xff]  ;;  %v7232_v16 = vunpack.c.h.bf16 %v12895_v49  ;;  %v694_v21 = vadd.f32 %v9976_v56, %v13336_v61 }
0x1a93   : > { %v7225_v63 = vunpack.c.l.bf16 %v7173_v40  ;;  %v7226_v22 = vunpack.c.h.bf16 %v7173_v40  ;;  %v12953_v40 = vld [vmem:[%s13267_s11 + $0x98] sm:$0xff] }
0x1a94   : > { %8574 = vmatmul.msk.f32.gmra.mxu0 %vm717_vm3, %v7022_v15  ;;  %v7245_v15 = vunpack.c.l.bf16 %v7183_v44  ;;  %7451 = vmatpush.msrb.mxu3 %v7232_v16  ;;  %v7256_v19 = vunpack.c.h.bf16 %v12953_v40  ;;  %v10175_v44 = vmov 1983009808  }
0x1a95   : > { %7385 = vmatpush.msra.mxu1 %v7225_v63 }
0x1a96   : > { %7473 = vmatpush.msra.mxu0 %v7245_v15  ;;  %v13337_v15 = vld [vmem:[#allocation8_spill] sm:$0xff] }
0x1a97   : > { %7386 = vmatpush.msra.mxu1 %v7223_v62  ;;  %v12962_v62 = vld [vmem:[%s13267_s11 + $0x90] sm:$0xff]  ;;  %v697_v41 = vadd.f32 %v9976_v56, %v13337_v15  ;;  %v7231_v15 = vunpack.c.l.bf16 %v12895_v49  ;;  %v13055_v49 = vld [vmem:[%s13267_s11 + $0xf8] sm:$0xff] }
0x1a99   : > { %7387 = vmatpush.msra.mxu1 %v7221_v4  ;;  %v7254_v4 = vunpack.c.h.bf16 %v12962_v62 }
0x1a9b   : > { %7388 = vmatpush.msra.mxu1 %v7219_v46  ;;  %v7140_v46 = vpop.permute.xlu1 %7139 }
0x1a9d   : > { %7389 = vmatpush.msra.mxu1 %v7217_v14 }
0x1a9f   : > { %7404 = vmatpush.msrb.mxu1 %v7228_v1 }
0x1aa1   : > { %7405 = vmatpush.msrb.mxu1 %v7226_v22  ;;  %v7319_v22 = vunpack.c.l.s4 %v10175_v44 }
0x1af9   : > { %v7063_v26 = vpop.f32.mrf.mxu0 }
0x1afa   : > { %v7064_v10 = vadd.f32 %v9978_v28, %v7063_v26  ;;  %v7224_v26 = vunpack.c.h.bf16 %v12838_v32  ;;  %v7195_v32 = vld [vmem:[%s13267_s11 + $0xd0] sm:$0xff] }
0x1afb   : > { %v7269_v63 = vunpack.c.l.bf16 %v7195_v32  ;;  %v7270_v31 = vunpack.c.h.bf16 %v7195_v32 }
0x1afc   : > { %vm7075_vm1 = vcmp.ge.f32.partialorder %v7064_v10, 0.0  ;;  %v7079_v43 = vmul.f32 0.01, %v7064_v10  ;;  %7406 = vmatpush.msrb.mxu1 %v7224_v26 }
0x1afe   : > { %v7083_v52 = vsel %vm7075_vm1, %v7064_v10, %v7079_v43  ;;  %v7230_v10 = vunpack.c.h.bf16 %v12904_v48 }
0x1aff   : > { %8575 = vmatmul.msk.f32.vlgmr.msrb.gmra.mxu2 %vm772_vm8, %v7083_v52  ;;  %v12914_v52 = vld [vmem:[%s13267_s11 + $0xb8] sm:$0xff] }
0x1b00   : > { %7452 = vmatpush.msrb.mxu3 %v7230_v10 }
0x1b01   : > { %v7066_v59 = vpop.f32.mrf.mxu0 }
0x1b02   : > { %v7067_v42 = vadd.f32 %v9978_v28, %v7066_v59 }
0x1b04   : > { %vm7076_vm6 = vcmp.ge.f32.partialorder %v7067_v42, 0.0  ;;  %v7080_v58 = vmul.f32 0.01, %v7067_v42 }
0x1b06   : > { %v7084_v7 = vsel %vm7076_vm6, %v7067_v42, %v7080_v58  ;;  %v7264_v42 = vunpack.c.h.bf16 %v12914_v52  ;;  %v7181_v58 = vld [vmem:[%s13267_s11 + $0x60] sm:$0xff] }
0x1b07   : > { %8576 = vmatmul.msk.f32.gmra.mxu2 %vm772_vm8, %v7084_v7  ;;  %v7222_v7 = vunpack.c.h.bf16 %v12850_v37  ;;  %v7194_v37 = vld [vmem:[%s13267_s11 + $0xc8] sm:$0xff] }
0x1b08   : > { %7533 = vmatpush.msra.mxu3 %v7264_v42  ;;  %v7267_v55 = vunpack.c.l.bf16 %v7194_v37  ;;  %v7268_v9 = vunpack.c.h.bf16 %v7194_v37  ;;  %v7210_v37 = vld [vmem:[%s13267_s11 + $0x148] sm:$0xff] }
0x1b09   : > { %v7069_v17 = vpop.f32.mrf.mxu0  ;;  %7407 = vmatpush.msrb.mxu1 %v7222_v7  ;;  %v13338_v7 = vld [vmem:[#allocation6_spill] sm:$0xff] }
0x1b0a   : > { %v7070_v6 = vadd.f32 %v9978_v28, %v7069_v17  ;;  %v7241_v17 = vunpack.c.l.bf16 %v7181_v58 }
0x1b0c   : > { %vm7077_vm7 = vcmp.ge.f32.partialorder %v7070_v6, 0.0  ;;  %v7081_v53 = vmul.f32 0.01, %v7070_v6 }
0x1b0e   : > { %v7085_v39 = vsel %vm7077_vm7, %v7070_v6, %v7081_v53  ;;  %v7242_v6 = vunpack.c.h.bf16 %v7181_v58  ;;  %v12924_v53 = vld [vmem:[%s13267_s11 + $0xb0] sm:$0xff]  ;;  %v7320_v58 = vunpack.c.0.s8 %v7319_v22 }
0x1b0f   : > { %8577 = vmatmul.msk.f32.gmra.mxu2 %vm772_vm8, %v7085_v39  ;;  %v7198_v39 = vld [vmem:[%s13267_s11 + $0xe8] sm:$0xff] }
0x1b11   : > { %v7072_v8 = vpop.f32.mrf.mxu0 }
0x1b12   : > { %v7073_v27 = vadd.f32 %v9978_v28, %v7072_v8  ;;  %v7182_v28 = vld [vmem:[%s13267_s11 + $0x68] sm:$0xff]  ;;  %v7262_v8 = vunpack.c.h.bf16 %v12924_v53 }
0x1b13   : > { %v7243_v43 = vunpack.c.l.bf16 %v7182_v28  ;;  %v7244_v59 = vunpack.c.h.bf16 %v7182_v28  ;;  %v7162_v28 = vsel %vm772_vm8, %v694_v21, %v7136_v35  ;;  %v7299_v35 = vunpack.c.l.bf16 %v7210_v37 }
0x1b14   : > { %vm7078_vm9 = vcmp.ge.f32.partialorder %v7073_v27, 0.0  ;;  %v7082_v12 = vmul.f32 0.01, %v7073_v27  ;;  %7534 = vmatpush.msra.mxu3 %v7262_v8 }
0x1b15   : > { %7474 = vmatpush.msra.mxu0 %v7243_v43  ;;  %7494 = vmatpush.msra.mxu2 %v7244_v59  ;;  %v7163_v43 = vsel %vm772_vm8, %v697_v41, %v7138_v29  ;;  %v13046_v41 = vld [vmem:[%s13267_s11 + $0x100] sm:$0xff] }
0x1b16   : > { %v7086_v20 = vsel %vm7078_vm9, %v7073_v27, %v7082_v12  ;;  %v7275_v27 = vunpack.c.l.bf16 %v7198_v39  ;;  %v7276_v12 = vunpack.c.h.bf16 %v7198_v39 }
0x1b17   : > { %8578 = vmatmul.msk.f32.gmra.mxu2 %vm772_vm8, %v7086_v20  ;;  %v7220_v20 = vunpack.c.h.bf16 %v12865_v45  ;;  %7475 = vmatpush.msra.mxu0 %v7241_v17  ;;  %v7266_v45 = vunpack.c.h.bf16 %v7193_v18  ;;  %v691_v17 = vadd.f32 %v9976_v56, %v13338_v7 }
0x1b18   : > { %7495 = vmatpush.msra.mxu2 %v7242_v6  ;;  %v10176_v6 = vmov 1934713408  }
0x1b19   : > { %7556 = vmatpush.msrb.mxu0 %v7275_v27  ;;  %7408 = vmatpush.msrb.mxu1 %v7220_v20  ;;  %v7343_v39 = vunpack.c.l.s4 %v10176_v6  ;;  %v7261_v6 = vunpack.c.l.bf16 %v12924_v53 }
0x1b1a   : > { %7576 = vmatpush.msrb.mxu2 %v7276_v12 }
0x1b82   : > { %v7117_v60 = vpop.f32.mrf.mxu2 }
0x1b83   : > { %v7118_v47 = vadd.f32 %v9979_v25, %v7117_v60  ;;  %v12934_v60 = vld [vmem:[%s13267_s11 + $0xa8] sm:$0xff] }
0x1b8a   : > { %v7120_v30 = vpop.f32.mrf.mxu2 }
0x1b8b   : > { %v7121_v0 = vadd.f32 %v9979_v25, %v7120_v30  ;;  %v7260_v30 = vunpack.c.h.bf16 %v12934_v60 }
0x1b8d   : > { %7151 = vrot.lane.b32.xlu1 %v7121_v0, %s13327_s27  ;;  %7535 = vmatpush.msra.mxu3 %v7260_v30 }
0x1b92   : > { %v7123_v38 = vpop.f32.mrf.mxu2 }
0x1b93   : > { %v7124_v34 = vadd.f32 %v9979_v25, %v7123_v38 }
0x1b95   : > { %7153 = vrot.lane.b32.xlu2 %v7124_v34, %s13327_s27  ;;  %7149 = vrot.lane.b32.xlu1 %v7118_v47, %s13327_s27  ;;  %v7218_v47 = vunpack.c.h.bf16 %v12880_v57  ;;  %v12944_v34 = vld [vmem:[%s13267_s11 + $0xa0] sm:$0xff]  ;;  %v700_v57 = vadd.f32 %v9976_v56, %v13335_v2 }
0x1b97   : > { %7409 = vmatpush.msrb.mxu1 %v7218_v47  ;;  %v7164_v33 = vsel %vm772_vm8, %v700_v57, %v7140_v46  ;;  %v7300_v57 = vunpack.c.h.bf16 %v7210_v37 }
0x1b9a   : > { %v7126_v3 = vpop.f32.mrf.mxu2 }
0x1b9b   : > { %v7127_v11 = vadd.f32 %v9979_v25, %v7126_v3  ;;  %v7197_v25 = vld [vmem:[%s13267_s11 + $0xe0] sm:$0xff]  ;;  %v7196_v3 = vld [vmem:[%s13267_s11 + $0xd8] sm:$0xff] }
0x1b9c   : > { %v7273_v0 = vunpack.c.l.bf16 %v7197_v25  ;;  %v7274_v38 = vunpack.c.h.bf16 %v7197_v25  ;;  %v7272_v23 = vunpack.c.h.bf16 %v7196_v3 }
0x1b9d   : > { %7155 = vrot.lane.b32.xlu0 %v7127_v11, %s13327_s27  ;;  %v7258_v11 = vunpack.c.h.bf16 %v12944_v34 }
0x1b9e   : > { %7557 = vmatpush.msrb.mxu0 %v7273_v0  ;;  %7577 = vmatpush.msrb.mxu2 %v7274_v38  ;;  %v12987_v38 = vunpack.c.0.s8 %v7343_v39  ;;  %v7280_v39 = vunpack.c.h.bf16 %v13055_v49 }
0x1b9f   : > { %7536 = vmatpush.msra.mxu3 %v7258_v11 }
0x1ba0   : > { %7578 = vmatpush.msrb.mxu2 %v7272_v23 }
0x1ba1   : > { %7537 = vmatpush.msra.mxu3 %v7256_v19 }
0x1ba2   : > { %7579 = vmatpush.msrb.mxu2 %v7270_v31  ;;  %v12996_v31 = vld [vmem:[%s13267_s11 + $0x118] sm:$0xff] }
0x1ba3   : > { %7538 = vmatpush.msra.mxu3 %v7254_v4  ;;  %v7288_v56 = vunpack.c.h.bf16 %v12996_v31 }
0x1ba4   : > { %7580 = vmatpush.msrb.mxu2 %v7268_v9 }
0x1ba5   : > { %7133 = vrot.lane.b32.xlu0 %v13334_v5, %s13329_s28  ;;  %v7271_v5 = vunpack.c.l.bf16 %v7196_v3 }
0x1ba6   : > { %7581 = vmatpush.msrb.mxu2 %v7266_v45  ;;  %v7209_v45 = vld [vmem:[%s13267_s11 + $0x140] sm:$0xff] }
0x1ba7   : > { %7558 = vmatpush.msrb.mxu0 %v7271_v5  ;;  %v7297_v61 = vunpack.c.l.bf16 %v7209_v45  ;;  %v7298_v44 = vunpack.c.h.bf16 %v7209_v45 }
0x1ba9   : > { %7559 = vmatpush.msrb.mxu0 %v7269_v63  ;;  %v7239_v63 = vunpack.c.l.bf16 %v12843_v36  ;;  %v13010_v36 = vld [vmem:[%s13267_s11 + $0x110] sm:$0xff] }
0x1baa   : > { %v7285_v45 = vunpack.c.l.bf16 %v13010_v36 }
0x1bab   : > { %7560 = vmatpush.msrb.mxu0 %v7267_v55 }
0x1bad   : > { %7561 = vmatpush.msrb.mxu0 %v7265_v51  ;;  %v7237_v51 = vunpack.c.l.bf16 %v12856_v13  ;;  %v7235_v13 = vunpack.c.l.bf16 %v12871_v50  ;;  %v7208_v50 = vld [vmem:[%s13267_s11 + $0x138] sm:$0xff] }
0x1bef   : > { %v7154_v26 = vpop.permute.xlu2 %7153 }
0x1bf0   : > { %v7167_v42 = vsel %vm717_vm3, %v7163_v43, %v7154_v26  ;;  %v7207_v26 = vld [vmem:[%s13267_s11 + $0x130] sm:$0xff] }
0x1bf1   : > { %v7313_v12 = vrot.slane %v7167_v42, 4  ;;  %v7293_v7 = vunpack.c.l.bf16 %v7207_v26 }
0x1bff   : > { %v7152_v14 = vpop.permute.xlu1 %7151 }
0x1c00   : > { %v7166_v10 = vsel %vm717_vm3, %v7162_v28, %v7152_v14  ;;  %v13024_v14 = vld [vmem:[%s13267_s11 + $0x108] sm:$0xff]  ;;  %v7295_v28 = vunpack.c.l.bf16 %v7208_v50 }
0x1c01   : > { %v7328_v0 = vrot.slane %v7166_v10, 4  ;;  %v7284_v22 = vunpack.c.h.bf16 %v13024_v14 }
0x1c07   : > { %v7150_v20 = vpop.permute.xlu1 %7149 }
0x1c0f   : > { %v7156_v1 = vpop.permute.xlu0 %7155 }
0x1c10   : > { %v7168_v24 = vsel %vm717_vm3, %v7164_v33, %v7156_v1  ;;  %v7286_v1 = vunpack.c.h.bf16 %v13010_v36  ;;  %v7279_v36 = vunpack.c.l.bf16 %v13055_v49  ;;  %v7778_v49 = vld [vmem:[%s13269_s13 + $0x90] sm:$0xff] }
0x1c11   : > { %v7326_v16 = vrot.slane %v7168_v24, 4  ;;  %v7329_v23 = vsel %vm7314_vm10, %v7168_v24, %v7328_v0  ;;  %v7233_v24 = vunpack.c.l.bf16 %v12886_v54 }
0x1c12   : > { %v13003_v9 = vperm.slane %v7329_v23, %v7320_v58 }
0x1c13   : > { %v7327_v59 = vsel %vm7314_vm10, %v7326_v16, %v7166_v10  ;;  %v7229_v10 = vunpack.c.l.bf16 %v12904_v48  ;;  %v7296_v48 = vunpack.c.h.bf16 %v7208_v50 }
0x1c14   : > { %v7333_v8 = vperm.slane %v7327_v59, %v7320_v58  ;;  %v7350_v21 = vrot.slane %v13003_v9, 4  ;;  %v7263_v59 = vunpack.c.l.bf16 %v12914_v52 }
0x1c16   : > { %v7338_v11 = vrot.slane %v7333_v8, 4 }
0x1c17   : > { %v7134_v27 = vpop.permute.xlu0 %7133 }
0x1c18   : > { %v7161_v25 = vsel %vm772_vm8, %v691_v17, %v7134_v27  ;;  %v13069_v17 = vld [vmem:[%s13267_s11 + $0xf0] sm:$0xff]  ;;  %v7294_v27 = vunpack.c.h.bf16 %v7207_v26  ;;  %v7779_v26 = vld [vmem:[%s13269_s13 + $0x98] sm:$0xff] }
0x1c19   : > { %v7165_v30 = vsel %vm717_vm3, %v7161_v25, %v7150_v20  ;;  %v13083_v20 = vld [vmem:[%s13267_s11 + $0x178] sm:$0xff]  ;;  %v7259_v25 = vunpack.c.l.bf16 %v12934_v60  ;;  %v7278_v53 = vunpack.c.h.bf16 %v13069_v17  ;;  %vm7730_vm3 = vcmask 322560  }
0x1c1a   : > { %v7315_v47 = vsel %vm7314_vm10, %v7313_v12, %v7165_v30  ;;  %v7316_v3 = vrot.slane %v7165_v30, 4  ;;  %v7205_v30 = vld [vmem:[%s13267_s11 + $0x120] sm:$0xff] }
0x1c1b   : > { %v7321_v5 = vperm.slane %v7315_v47, %v7320_v58  ;;  %v7312_v47 = vunpack.c.h.bf16 %v13083_v20  ;;  %v7290_v23 = vunpack.c.h.bf16 %v7205_v30 }
0x1c1c   : > { %v7317_v4 = vsel %vm7314_vm10, %v7167_v42, %v7316_v3  ;;  %v7282_v42 = vunpack.c.h.bf16 %v13046_v41  ;;  %v7257_v3 = vunpack.c.l.bf16 %v12944_v34 }
0x1c1d   : > { %v7339_v32 = vsel %vm7314_vm10, %v7338_v11, %v7321_v5  ;;  %v7340_v19 = vrot.slane %v7321_v5, 4  ;;  %v13018_v2 = vperm.slane %v7317_v4, %v7320_v58  ;;  %v7206_v58 = vld [vmem:[%s13267_s11 + $0x128] sm:$0xff]  ;;  %v7215_v11 = vld [vmem:[%s13267_s11 + $0x170] sm:$0xff]  ;;  %v7289_v5 = vunpack.c.l.bf16 %v7205_v30  ;;  %v7213_v4 = vld [vmem:[%s13267_s11 + $0x160] sm:$0xff] }
0x1c1e   : > { %v7345_v55 = vperm.slane %v7339_v32, %v12987_v38  ;;  %v7291_v12 = vunpack.c.l.bf16 %v7206_v58  ;;  %v7292_v0 = vunpack.c.h.bf16 %v7206_v58  ;;  %v7214_v32 = vld [vmem:[%s13267_s11 + $0x168] sm:$0xff]  ;;  %v7310_v34 = vunpack.c.h.bf16 %v7215_v11 }
0x1c1f   : > { %v7341_v18 = vsel %vm7314_vm10, %v7333_v8, %v7340_v19  ;;  %v7351_v16 = vsel %vm7314_vm10, %v7350_v21, %v13018_v2  ;;  %v7352_v8 = vrot.slane %v13018_v2, 4  ;;  %v7255_v19 = vunpack.c.l.bf16 %v12953_v40  ;;  %v7775_v21 = vld [vmem:[%s13269_s13 + $0x78] sm:$0xff]  ;;  %v7777_v58 = vld [vmem:[%s13269_s13 + $0x88] sm:$0xff] }
0x1c20   : > { %v7349_v46 = vperm.slane %v7341_v18, %v12987_v38  ;;  %8579 = vmatmul.msk.f32.vlgmr.msra.gmra.mxu1 %vm7370_vm11, %v7345_v55  ;;  %v7362_v29 = vrot.slane %v7345_v55, 4  ;;  %v13058_v43 = vperm.slane %v7351_v16, %v12987_v38  ;;  %v7287_v40 = vunpack.c.l.bf16 %v12996_v31  ;;  %v7212_v18 = vld [vmem:[%s13267_s11 + $0x158] sm:$0xff]  ;;  %v7761_v30 = vld [vmem:[%s13269_s13 + $0x8] sm:$0xff] }
0x1c21   : > { %7427 = vmatpush.msra.mxu1 %v7239_v63  ;;  %v7353_v60 = vsel %vm7314_vm10, %v13003_v9, %v7352_v8  ;;  %v7253_v9 = vunpack.c.l.bf16 %v12962_v62  ;;  %v7211_v62 = vld [vmem:[%s13267_s11 + $0x150] sm:$0xff]  ;;  %v7304_v31 = vunpack.c.h.bf16 %v7212_v18  ;;  %v7771_v16 = vld [vmem:[%s13269_s13 + $0x58] sm:$0xff] }
0x1c22   : > { %8583 = vmatmul.msk.f32.vlgmr.msra.gmra.mxu0 %vm7370_vm11, %v7349_v46  ;;  %8584 = vmatmul.msk.f32.vlgmr.msra.gmra.mxu2 %vm7370_vm11, %v7349_v46  ;;  %v13029_v33 = vsel %vm7314_vm10, 0.0, %v7362_v29  ;;  %v7364_v54 = vrot.slane %v7349_v46, 4  ;;  %v7366_v63 = vrot.slane %v13058_v43, 4  ;;  %v7361_v37 = vperm.slane %v7353_v60, %v12987_v38 }
0x1c23   : > { %7428 = vmatpush.msra.mxu1 %v7237_v51  ;;  %8582 = vmatmul.msk.f32.vlgmr.msrb.gmra.mxu3 %vm7370_vm11, %v13029_v33  ;;  %v7306_v51 = vunpack.c.h.bf16 %v7213_v4  ;;  %v7283_v46 = vunpack.c.l.bf16 %v13024_v14  ;;  %v7302_v29 = vunpack.c.h.bf16 %v7211_v62  ;;  %v7309_v14 = vunpack.c.l.bf16 %v7215_v11 }
0x1c24   : > { %7619 = vmatpush.msrb.mxu3 %v7288_v56  ;;  %7642 = vmatpush.msra.mxu0 %v7299_v35  ;;  %v7365_v52 = vsel %vm7314_vm10, 0.0, %v7364_v54  ;;  %v7367_v38 = vsel %vm7314_vm10, 0.0, %v7366_v63  ;;  %v7368_v56 = vrot.slane %v7361_v37, 4  ;;  %v7281_v35 = vunpack.c.l.bf16 %v13046_v41  ;;  %v7770_v41 = vld [vmem:[%s13269_s13 + $0x50] sm:$0xff]  ;;  %v7769_v54 = vld [vmem:[%s13269_s13 + $0x48] sm:$0xff] }
0x1c25   : > { %7429 = vmatpush.msra.mxu1 %v7235_v13  ;;  %7662 = vmatpush.msra.mxu2 %v7300_v57  ;;  %v7277_v13 = vunpack.c.l.bf16 %v13069_v17  ;;  %v7311_v57 = vunpack.c.l.bf16 %v13083_v20  ;;  %v7301_v50 = vunpack.c.l.bf16 %v7211_v62 }
0x1c26   : > { %7620 = vmatpush.msrb.mxu3 %v7286_v1  ;;  %7643 = vmatpush.msra.mxu0 %v7297_v61  ;;  %v7369_v2 = vsel %vm7314_vm10, 0.0, %v7368_v56  ;;  %v7305_v1 = vunpack.c.l.bf16 %v7213_v4  ;;  %v7303_v61 = vunpack.c.l.bf16 %v7212_v18 }
0x1c27   : > { %7430 = vmatpush.msra.mxu1 %v7233_v24  ;;  %7663 = vmatpush.msra.mxu2 %v7298_v44  ;;  %v7774_v24 = vld [vmem:[%s13269_s13 + $0x70] sm:$0xff]  ;;  %v7773_v44 = vld [vmem:[%s13269_s13 + $0x68] sm:$0xff] }
0x1c28   : > { %8580 = vmatmul.msk.f32.vlgmr.msrb.gmra.mxu1 %vm7370_vm11, %v7345_v55  ;;  %7621 = vmatpush.msrb.mxu3 %v7284_v22  ;;  %v7308_v55 = vunpack.c.h.bf16 %v7214_v32  ;;  %v7772_v22 = vld [vmem:[%s13269_s13 + $0x60] sm:$0xff] }
0x1c29   : > { %7431 = vmatpush.msra.mxu1 %v7231_v15  ;;  %7644 = vmatpush.msra.mxu0 %v7295_v28  ;;  %v7780_v28 = vld [vmem:[%s13269_s13 + $0xa0] sm:$0xff] }
0x1c2a   : > { %8587 = vmatmul.msk.f32.vlgmr.msrb.gmra.mxu0 %vm7370_vm11, %v13058_v43  ;;  %8588 = vmatmul.msk.f32.vlgmr.msrb.gmra.mxu2 %vm7370_vm11, %v13058_v43 }
0x1c2b   : > { %7432 = vmatpush.msra.mxu1 %v7229_v10  ;;  %8586 = vmatmul.msk.f32.vlgmr.msra.gmra.mxu3 %vm7370_vm11, %v7365_v52  ;;  %v7768_v10 = vld [vmem:[%s13269_s13 + $0x40] sm:$0xff] }
0x1c2c   : > { %7622 = vmatpush.msrb.mxu3 %v7282_v42  ;;  %7664 = vmatpush.msra.mxu2 %v7296_v48  ;;  %v7766_v48 = vld [vmem:[%s13269_s13 + $0x30] sm:$0xff] }
0x1c2d   : > { %7513 = vmatpush.msrb.mxu1 %v7263_v59  ;;  %7645 = vmatpush.msra.mxu0 %v7293_v7  ;;  %v7767_v59 = vld [vmem:[%s13269_s13 + $0x38] sm:$0xff]  ;;  %v7776_v7 = vld [vmem:[%s13269_s13 + $0x80] sm:$0xff] }
0x1c2e   : > { %7623 = vmatpush.msrb.mxu3 %v7280_v39  ;;  %7665 = vmatpush.msra.mxu2 %v7294_v27  ;;  %v7763_v39 = vld [vmem:[%s13269_s13 + $0x18] sm:$0xff] }
0x1c2f   : > { %7514 = vmatpush.msrb.mxu1 %v7261_v6  ;;  %7646 = vmatpush.msra.mxu0 %v7291_v12  ;;  %v7764_v6 = vld [vmem:[%s13269_s13 + $0x20] sm:$0xff] }
0x1c30   : > { %7624 = vmatpush.msrb.mxu3 %v7278_v53  ;;  %7666 = vmatpush.msra.mxu2 %v7292_v0  ;;  %v7760_v0 = vld [vmem:[%s13269_s13] sm:$0xff] }
0x1c31   : > { %7515 = vmatpush.msrb.mxu1 %v7259_v25  ;;  %7647 = vmatpush.msra.mxu0 %v7289_v5  ;;  %v7762_v25 = vld [vmem:[%s13269_s13 + $0x10] sm:$0xff] }
0x1c32   : > { %8581 = vmatmul.msk.f32.vlgmr.msra.gmra.mxu1 %vm7370_vm11, %v13029_v33  ;;  %7705 = vmatpush.msra.mxu3 %v7312_v47  ;;  %v7307_v33 = vunpack.c.l.bf16 %v7214_v32 }
0x1c33   : > { %7516 = vmatpush.msrb.mxu1 %v7257_v3  ;;  %7667 = vmatpush.msra.mxu2 %v7290_v23 }
0x1c34   : > { %8591 = vmatmul.msk.f32.vlgmr.msra.gmra.mxu0 %vm7370_vm11, %v7361_v37  ;;  %8592 = vmatmul.msk.f32.vlgmr.msra.gmra.mxu2 %vm7370_vm11, %v7361_v37 }
0x1c35   : > { %7706 = vmatpush.msra.mxu3 %v7310_v34  ;;  %7517 = vmatpush.msrb.mxu1 %v7255_v19 }
0x1c36   : > { %8590 = vmatmul.msk.f32.vlgmr.msrb.gmra.mxu3 %vm7370_vm11, %v7367_v38  ;;  %7786 = vmatpush.msrb.mxu0 %v7775_v21 }
0x1c37   : > { %7707 = vmatpush.msra.mxu3 %v7308_v55  ;;  %7518 = vmatpush.msrb.mxu1 %v7253_v9 }
0x1c38   : > { %7787 = vmatpush.msrb.mxu0 %v7774_v24  ;;  %7817 = vmatpush.msrb.mxu2 %v7780_v28 }
0x1c39   : > { %7599 = vmatpush.msra.mxu1 %v7287_v40  ;;  %7708 = vmatpush.msra.mxu3 %v7306_v51  ;;  %v7746_v51 = vld [vmem:[%s13268_s12] ss:$8 sm:$0x3] }
0x1c3a   : > { %8585 = vmatmul.msk.f32.vlgmr.msrb.gmra.mxu1 %vm7370_vm11, %v7365_v52  ;;  %7788 = vmatpush.msrb.mxu0 %v7773_v44  ;;  %v7765_v52 = vld [vmem:[%s13269_s13 + $0x28] sm:$0xff] }
0x1c3b   : > { %7600 = vmatpush.msra.mxu1 %v7285_v45  ;;  %7709 = vmatpush.msra.mxu3 %v7304_v31 }
0x1c3c   : > { %7789 = vmatpush.msrb.mxu0 %v7772_v22  ;;  %7818 = vmatpush.msrb.mxu2 %v7779_v26 }
0x1c3d   : > { %7601 = vmatpush.msra.mxu1 %v7283_v46  ;;  %7710 = vmatpush.msra.mxu3 %v7302_v29 }
0x1c3e   : > { %8594 = vmatmul.msk.f32.vlgmr.msra.gmra.mxu3 %vm7370_vm11, %v7369_v2  ;;  %7790 = vmatpush.msrb.mxu0 %v7771_v16 }
0x1c3f   : > { %7602 = vmatpush.msra.mxu1 %v7281_v35  ;;  %7819 = vmatpush.msrb.mxu2 %v7778_v49  ;;  %v7749_v35 = vperm.slane %v7746_v51, 1 }
0x1c40   : > { %7791 = vmatpush.msrb.mxu0 %v7770_v41  ;;  %v7748_v41 = vperm.slane %v7746_v51, 0 }
0x1c41   : > { %7603 = vmatpush.msra.mxu1 %v7279_v36  ;;  %7820 = vmatpush.msrb.mxu2 %v7777_v58  ;;  %v7831_v58 = vld [vmem:[%s13270_s14 + $0x10] sm:$0xff] }
0x1c42   : > { %7792 = vmatpush.msrb.mxu0 %v7769_v54 }
0x1c43   : > { %7604 = vmatpush.msra.mxu1 %v7277_v13  ;;  %7821 = vmatpush.msrb.mxu2 %v7776_v7  ;;  %v7829_v7 = vld [vmem:[%s13270_s14] sm:$0xff] }
0x1c44   : > { %8589 = vmatmul.msk.f32.vlgmr.msra.gmra.mxu1 %vm7370_vm11, %v7367_v38  ;;  %7793 = vmatpush.msrb.mxu0 %v7768_v10 }
0x1c45   : > { %7685 = vmatpush.msrb.mxu1 %v7311_v57 }
0x1c46   : > { %7794 = vmatpush.msrb.mxu0 %v7767_v59  ;;  %v7833_v59 = vld [vmem:[%s13270_s14 + $0x20] sm:$0xff] }
0x1c47   : > { %7686 = vmatpush.msrb.mxu1 %v7309_v14 }
0x1c48   : > { %7795 = vmatpush.msrb.mxu0 %v7766_v48  ;;  %v7830_v48 = vld [vmem:[%s13270_s14 + $0x8] sm:$0xff] }
0x1c49   : > { %7687 = vmatpush.msrb.mxu1 %v7307_v33 }
0x1c4a   : > { %7796 = vmatpush.msrb.mxu0 %v7765_v52 }
0x1c4b   : > { %7688 = vmatpush.msrb.mxu1 %v7305_v1 }
0x1c4c   : > { %7797 = vmatpush.msrb.mxu0 %v7764_v6 }
0x1c4d   : > { %7689 = vmatpush.msrb.mxu1 %v7303_v61 }
0x1c4e   : > { %7798 = vmatpush.msrb.mxu0 %v7763_v39 }
0x1c4f   : > { %7690 = vmatpush.msrb.mxu1 %v7301_v50 }
0x1c50   : > { %8593 = vmatmul.msk.f32.vlgmr.msrb.gmra.mxu1 %vm7370_vm11, %v7369_v2  ;;  %7799 = vmatpush.msrb.mxu0 %v7762_v25  ;;  %v7865_v25 = vld [vmem:[%s13271_s15] sm:$0xff] }
0x1c52   : > { %7800 = vmatpush.msrb.mxu0 %v7761_v30 }
0x1c54   : > { %7801 = vmatpush.msrb.mxu0 %v7760_v0 }
0x1c9d   : > { %v7391_v15 = vpop.f32.mrf.mxu1 }
0x1c9e   : > { %v7715_v4 = vsel %vm610_vm0, %v7391_v15, 0.0 }
0x1c9f   : > { %v7477_v3 = vpop.f32.mrf.mxu0 }
0x1ca0   : > { %v7718_v45 = vsel %vm610_vm0, %v7477_v3, 0.0 }
0x1ca5   : > { %v7411_v43 = vpop.f32.mrf.mxu1  ;;  %v7497_v17 = vpop.f32.mrf.mxu2 }
0x1ca6   : > { %v7454_v42 = vpop.f32.mrf.mxu3  ;;  %v7731_v8 = vsel %vm7730_vm3, %v7411_v43, 0.0  ;;  %v7734_v11 = vsel %vm7730_vm3, %v7497_v17, 0.0  ;;  %v7834_v43 = vld [vmem:[%s13270_s14 + $0x28] sm:$0x3]  ;;  %v7781_v17 = vld [vmem:[%s13268_s12 + $0x1] ss:$0 sm:$0xff] }
0x1ca7   : > { %v7732_v27 = vsel %vm7730_vm3, %v7454_v42, 0.0  ;;  %v7563_v38 = vpop.f32.mrf.mxu0  ;;  %8596 = vmatpush.msk.msra.mxu1 %vm669_vm2, %v7834_v43  ;;  %v7832_v42 = vld [vmem:[%s13270_s14 + $0x18] sm:$0xff] }
0x1ca8   : > { %v7733_v53 = vadd.f32 %v7732_v27, %v7731_v8  ;;  %v7722_v14 = vsel %vm610_vm0, %v7563_v38, 0.0 }
0x1ca9   : > { %7853 = vmatpush.msra.mxu1 %v7833_v59 }
0x1caa   : > { %v7735_v5 = vadd.f32 %v7734_v11, %v7733_v53  ;;  %v7835_v53 = vld [vmem:[%s13268_s12 + $0x2] ss:$0 sm:$0xff]  ;;  %v7867_v11 = vld [vmem:[%s13268_s12 + $0x3] ss:$0 sm:$0xff] }
0x1cab   : > { %7854 = vmatpush.msra.mxu1 %v7832_v42 }
0x1cad   : > { %v7583_v47 = vpop.f32.mrf.mxu2  ;;  %7855 = vmatpush.msra.mxu1 %v7831_v58 }
0x1cae   : > { %v7540_v20 = vpop.f32.mrf.mxu3  ;;  %v7738_v63 = vsel %vm7730_vm3, %v7583_v47, 0.0 }
0x1caf   : > { %v7434_v12 = vpop.f32.mrf.mxu1  ;;  %v7736_v60 = vsel %vm7730_vm3, %v7540_v20, 0.0  ;;  %7856 = vmatpush.msra.mxu1 %v7830_v48  ;;  %v7866_v20 = vld [vmem:[%s13271_s15 + $0x8] sm:$0x3] }
0x1cb0   : > { %v7737_v23 = vadd.f32 %v7736_v60, %v7735_v5  ;;  %v7716_v34 = vsel %vm610_vm0, %v7434_v12, 0.0  ;;  %8598 = vmatpush.msk.msrb.mxu3 %vm669_vm2, %v7866_v20  ;;  %vm7895_vm2 = vcmask 11264  }
0x1cb1   : > { %v7717_v9 = vadd.f32 %v7716_v34, %v7715_v4  ;;  %v7649_v21 = vpop.f32.mrf.mxu0  ;;  %7857 = vmatpush.msra.mxu1 %v7829_v7 }
0x1cb2   : > { %v7739_v55 = vadd.f32 %v7738_v63, %v7737_v23  ;;  %v7726_v22 = vsel %vm610_vm0, %v7649_v21, 0.0  ;;  %7890 = vmatpush.msrb.mxu3 %v7865_v25 }
0x1cb3   : > { %v7719_v31 = vadd.f32 %v7718_v45, %v7717_v9 }
0x1cb7   : > { %v7520_v32 = vpop.f32.mrf.mxu1  ;;  %v7669_v40 = vpop.f32.mrf.mxu2 }
0x1cb8   : > { %v7720_v62 = vsel %vm610_vm0, %v7520_v32, 0.0  ;;  %v7742_v46 = vsel %vm7730_vm3, %v7669_v40, 0.0 }
0x1cb9   : > { %v7626_v19 = vpop.f32.mrf.mxu3  ;;  %v7721_v36 = vadd.f32 %v7720_v62, %v7719_v31 }
0x1cba   : > { %v7740_v37 = vsel %vm7730_vm3, %v7626_v19, 0.0 }
0x1cbb   : > { %v7741_v18 = vadd.f32 %v7740_v37, %v7739_v55  ;;  %v7723_v61 = vadd.f32 %v7722_v14, %v7721_v36 }
0x1cbd   : > { %v7743_v56 = vadd.f32 %v7742_v46, %v7741_v18 }
0x1cc1   : > { %v7712_v29 = vpop.f32.mrf.mxu3  ;;  %v7606_v2 = vpop.f32.mrf.mxu1 }
0x1cc2   : > { %v7744_v13 = vsel %vm7730_vm3, %v7712_v29, 0.0  ;;  %v7724_v33 = vsel %vm610_vm0, %v7606_v2, 0.0 }
0x1cc3   : > { %v7745_v57 = vadd.f32 %v7744_v13, %v7743_v56  ;;  %v7725_v24 = vadd.f32 %v7724_v33, %v7723_v61 }
0x1cc5   : > { %v7753_v1 = vadd.f32 %v7749_v35, %v7745_v57  ;;  %v7727_v15 = vadd.f32 %v7726_v22, %v7725_v24 }
0x1cc7   : > { %vm7755_vm8 = vcmp.ge.f32.partialorder %v7753_v1, 0.0  ;;  %v7757_v50 = vmul.f32 0.01, %v7753_v1 }
0x1cc9   : > { %v7759_v44 = vsel %vm7755_vm8, %v7753_v1, %v7757_v50 }
0x1cca   : > { %8595 = vmatmul.msk.f32.vlgmr.msrb.gmra.mxu2 %vm7782_vm12, %v7759_v44 }
0x1ccd   : > { %v7692_v16 = vpop.f32.mrf.mxu1 }
0x1cce   : > { %v7728_v28 = vsel %vm610_vm0, %v7692_v16, 0.0 }
0x1ccf   : > { %v7729_v54 = vadd.f32 %v7728_v28, %v7727_v15 }
0x1cd1   : > { %v7752_v26 = vadd.f32 %v7748_v41, %v7729_v54 }
0x1cd3   : > { %v7756_v10 = vmul.f32 0.01, %v7752_v26  ;;  %vm7754_vm13 = vcmp.ge.f32.partialorder %v7752_v26, 0.0 }
0x1cd5   : > { %v7758_v49 = vsel %vm7754_vm13, %v7752_v26, %v7756_v10 }
0x1cd6   : > { %7802 = vmatmul.f32.vlgmr.msrb.gmra.mxu0 %v7758_v49 }
0x1d4d   : > { %v7823_v39 = vpop.f32.mrf.mxu2 }
0x1d53   : > { %v7803_v52 = vpop.f32.mrf.mxu0 }
0x1d54   : > { %v7804_v6 = vadd.f32 %v7803_v52, %v7781_v17 }
0x1d56   : > { %v7824_v8 = vadd.f32 %v7823_v39, %v7804_v6 }
0x1d58   : > { %vm7826_vm0 = vcmp.ge.f32.partialorder %v7824_v8, 0.0  ;;  %v7827_v27 = vmul.f32 0.01, %v7824_v8 }
0x1d5a   : > { %v7828_v12 = vsel %vm7826_vm0, %v7824_v8, %v7827_v27 }
0x1d5b   : > { %8597 = vmatmul.msk.f32.vlgmr.msra.gmra.mxu1 %vm656_vm5, %v7828_v12  ;;  %vm7868_vm5 = vcmask 80896  }
0x1dd8   : > { %v7859_v30 = vpop.f32.mrf.mxu1 }
0x1dd9   : > { %v7860_v0 = vadd.f32 %v7859_v30, %v7835_v53 }
0x1ddb   : > { %vm7862_vm4 = vcmp.ge.f32.partialorder %v7860_v0, 0.0  ;;  %v7863_v47 = vmul.f32 0.01, %v7860_v0 }
0x1ddd   : > { %v7864_v3 = vsel %vm7862_vm4, %v7860_v0, %v7863_v47 }
0x1dde   : > { %8599 = vmatmul.msk.f32.vlgmr.msrb.gmra.mxu3 %vm7868_vm5, %v7864_v3 }
0x1e61   : > { %v7892_v60 = vpop.f32.mrf.mxu3 }
0x1e62   : > { %v7893_v5 = vadd.f32 %v7892_v60, %v7867_v11 }
0x1e64   : > { %7896 = vst.msk [vmem:[%s579_s0] sm:$0xf] %vm7895_vm2, %v7893_v5 }
0x1e65 PF: > { %s26_s21 = sadd.s32 1, %s10157_s21  }
0x1e66   : > { %p23_p4 = scmp.ge.s32.totalorder %s26_s21, 4  }
0x1e68   :  { %25 = sbr.rel (!%p23_p4) target bundleno = 2 (0x2), region = 133 }

</bundles_post_ra>
